<compile_context>
chip_gen: v7x
topology: tpu7x:2x2x1
jax: 0.10.0
libtpu: 0.0.40
codegen_flags: <defaults>
</compile_context>

<pallas_src>
import jax
import jax.numpy as jnp
from jax import lax
from jax.experimental import pallas as pl
from jax.experimental.pallas import tpu as pltpu


# ----------------------------- layer geometry -------------------------------

def _make_layer_dims(h, w, cin, couts):
    """Per-layer (H, W, Cin, Cout); a 2x2 maxpool precedes every layer but the first."""
    dims = []
    for i, cout in enumerate(couts):
        if i > 0:
            assert h % 2 == 0 and w % 2 == 0, "spatial dims must stay even for MaxPool2d(2)"
            h, w = h // 2, w // 2
        dims.append((h, w, cin, cout))
        cin = cout
    return tuple(dims)


def _flat_rows(h, w):
    # (H+2) padded rows + 1 slop row: the (dy=2, dx=2) tap slab starts at 2*(W+2)+2
    # and spans H*(W+2) rows, so it needs 2 extra rows past (H+2)*(W+2).
    return (h + 3) * (w + 2)


# ------------------------------ fused kernel --------------------------------

def _build_fused_encoder_kernel(dims):
    """conv3x3(pad=1, no bias) + BN(inference) + ReLU, x4, with fused MaxPool2d(2)."""
    nl = len(dims)

    def kernel(*refs):
        x_ref = refs[0]                                   # layer-0 padded flat input (bf16)
        layer_refs = refs[1:1 + 3 * nl]                   # (w2, scale, shift) per layer
        o_ref = refs[1 + 3 * nl]
        scratch = refs[2 + 3 * nl:]
        pad_refs = scratch[:nl - 1]                       # padded flat inputs, layers 1..nl-1
        ybuf_refs = scratch[nl - 1:]                      # conv outputs (pool sources), layers 0..nl-2

        def conv_bn_relu(src_ref, h, w, cin, cout, w_ref, s_ref, b_ref):
            p = w + 2                                     # row pitch of the padded buffer
            m = h * p                                     # pitched output rows
            acc = jnp.zeros((m, cout), jnp.float32)
            for t in range(9):                            # 9 taps -> 9 contiguous slabs + matmuls
                dy, dx = divmod(t, 3)
                acc = acc + jnp.dot(
                    src_ref[pl.ds(dy * p + dx, m), :],    # bf16 slab, contiguous rows
                    w_ref[pl.ds(t * cin, cin), :],        # bf16 (Cin, Cout) weight slice
                    preferred_element_type=jnp.float32)   # f32 MXU accumulate
            y = acc * s_ref[...] + b_ref[...]             # folded BN (inference), f32
            return jnp.maximum(y, 0.0)                    # (m, cout); cols W, W+1 of each row invalid

        src = x_ref
        for li, (h, w, cin, cout) in enumerate(dims):
            w_ref, s_ref, b_ref = layer_refs[3 * li:3 * li + 3]
            y = conv_bn_relu(src, h, w, cin, cout, w_ref, s_ref, b_ref)

            if li == nl - 1:
                # Store the pitched block as-is (one contiguous store); the wrapper
                # drops the 2 invalid columns per row.  (hl*wl*cl is tiny here; a
                # 128-lane-dense out layout would need an in-kernel relayout.)
                o_ref[...] = y.astype(o_ref.dtype)
                break

            # ---- fused MaxPool2d(2) into the next layer's padded buffer --------
            hn, wn = h // 2, w // 2
            p_cur, p_nxt = w + 2, wn + 2
            ybuf = ybuf_refs[li]
            ybuf[...] = y.astype(ybuf.dtype)              # one contiguous bf16 store

            dst = pad_refs[li]
            # Zero only the top border row and bottom border + slop rows (2 thin
            # contiguous stores, every grid step -> correct on every core); the
            # side-border zeros are written below as part of each pooled row.
            dst[pl.ds(0, p_nxt), :] = jnp.zeros((p_nxt, cout), dst.dtype)
            dst[pl.ds((hn + 1) * p_nxt, 2 * p_nxt), :] = jnp.zeros((2 * p_nxt, cout), dst.dtype)

            cz = jnp.zeros((1, cout), dst.dtype)
            for i in range(hn):                           # <= 8 pooled rows per layer
                r0 = (2 * i) * p_cur
                r1 = r0 + p_cur
                rowmax = jnp.maximum(ybuf[pl.ds(r0, w), :],          # contiguous reads
                                     ybuf[pl.ds(r1, w), :])          # (w, cout)
                pooled = jnp.max(rowmax.reshape(wn, 2, cout), axis=1)  # column de-interleave
                row = jnp.concatenate([cz, pooled, cz], axis=0)      # padded row incl. side zeros
                dst[pl.ds((1 + i) * p_nxt, p_nxt), :] = row          # one contiguous store
            src = dst

    return kernel


# ------------------------------ JAX wrapper ----------------------------------

def cnn_encoder2(x_nchw, params, layer_names=("inc", "down1", "down2", "down3")):
    """CNNEncoder2.forward: inc -> down1 -> down2 -> down3 (NCHW in / NCHW out)."""
    n, cin, h, w = x_nchw.shape
    couts = tuple(params[name]["w"].shape[-1] for name in layer_names)
    dims = _make_layer_dims(h, w, cin, couts)
    hl, wl, _, cl = dims[-1]
    p_last = wl + 2
    m_last = hl * p_last

    # NCHW -> NHWC, spatial zero-pad (1 top/left/right, 2 bottom incl. slop row),
    # flatten to the pitched layout, bf16 MXU feed.
    x = jnp.transpose(x_nchw, (0, 2, 3, 1)).astype(jnp.float32)
    x = jnp.pad(x, ((0, 0), (1, 2), (1, 1), (0, 0)))
    x_flat = x.reshape(n, _flat_rows(h, w), cin).astype(jnp.bfloat16)

    in_specs = [pl.BlockSpec((pl.Squeezed(), _flat_rows(h, w), cin),
                             lambda i: (i, 0, 0))]
    args = [x_flat]
    for name, (lh, lw, lci, lco) in zip(layer_names, dims):
        prm = params[name]
        # HWIO (3,3,Cin,Cout) -> tap-major (9*Cin, Cout); bf16 feed for the MXU.
        args += [prm["w"].reshape(9 * lci, lco).astype(jnp.bfloat16),
                 prm["scale"].reshape(1, lco).astype(jnp.float32),
                 prm["shift"].reshape(1, lco).astype(jnp.float32)]
        in_specs += [pl.BlockSpec((9 * lci, lco), lambda i: (0, 0)),   # constant maps:
                     pl.BlockSpec((1, lco), lambda i: (0, 0)),         # DMA'd once,
                     pl.BlockSpec((1, lco), lambda i: (0, 0))]         # reused every step

    # Scratch: bf16 padded inputs for layers 1..3 + bf16 conv outputs (pool sources)
    # for layers 0..2.  All activations stay VMEM-resident.
    scratch = [pltpu.VMEM((_flat_rows(lh, lw), lci), jnp.bfloat16)
               for (lh, lw, lci, lco) in dims[1:]]
    scratch += [pltpu.VMEM((lh * (lw + 2), lco), jnp.bfloat16)
                for (lh, lw, lci, lco) in dims[:-1]]

    out = pl.pallas_call(
        _build_fused_encoder_kernel(dims),
        out_shape=jax.ShapeDtypeStruct((n, m_last, cl), jnp.float32),
        grid_spec=pltpu.PrefetchScalarGridSpec(
            num_scalar_prefetch=0,
            grid=(n,),                                                 # one image / step
            in_specs=in_specs,
            out_specs=pl.BlockSpec((pl.Squeezed(), m_last, cl), lambda i: (i, 0, 0)),
            scratch_shapes=scratch),
        compiler_params=pltpu.CompilerParams(
            dimension_semantics=("parallel",)),                        # megacore over batch
    )(*args)

    # Drop the 2 invalid (pitch) columns per row, back to NCHW.
    out = out.reshape(n, hl, p_last, cl)[:, :, :wl, :]
    return jnp.transpose(out, (0, 3, 1, 2))


# --------------------------- deterministic params ---------------------------

def _init_conv_bn(key, cin, cout, eps=1e-5):
    kw, kg, kb, km, kv = jax.random.split(key, 5)
    w = 0.05 * jax.random.normal(kw, (3, 3, cin, cout), jnp.float32)   # HWIO
    gamma = 1.0 + 0.1 * jax.random.normal(kg, (cout,), jnp.float32)
    beta = 0.1 * jax.random.normal(kb, (cout,), jnp.float32)
    running_mean = 0.1 * jax.random.normal(km, (cout,), jnp.float32)
    running_var = 1.0 + 0.1 * jax.random.uniform(kv, (cout,), jnp.float32)
    scale = gamma / jnp.sqrt(running_var + eps)
    shift = beta - running_mean * scale
    return dict(w=w, scale=scale, shift=shift)


# ------------------------------ pure-JAX ref ---------------------------------

def _ref_forward(x_nchw, params, feed_dtype=jnp.float32):
    """Reference.  feed_dtype=bfloat16 mirrors the kernel's MXU feed (bf16
    activations/weights, f32 accumulation, f32 BN+ReLU)."""
    def conv(x, p):
        y = lax.conv_general_dilated(
            x.astype(feed_dtype), p["w"].astype(feed_dtype),
            window_strides=(1, 1), padding="SAME",
            dimension_numbers=("NHWC", "HWIO", "NHWC"),
            preferred_element_type=jnp.float32)
        return jnp.maximum(y * p["scale"] + p["shift"], 0.0)

    def pool(x):
        n, hh, ww, c = x.shape
        return jnp.max(x.reshape(n, hh // 2, 2, ww // 2, 2, c), axis=(2, 4))

    x = jnp.transpose(x_nchw, (0, 2, 3, 1)).astype(jnp.float32)
    x = conv(x, params["inc"])
    for name in ("down1", "down2", "down3"):
        x = conv(pool(x), params[name])
    return jnp.transpose(x, (0, 3, 1, 2))


# ----------------------------------- main ------------------------------------

if __name__ == "__main__":
    n_channels, out_channels = 4, 32    # CNNEncoder2(n_channels=4, out_channels=32, ...)
    key = jax.random.PRNGKey(0)
    kx, k0, k1, k2, k3 = jax.random.split(key, 5)
    params = {
        "inc":   _init_conv_bn(k0, n_channels, 64),
        "down1": _init_conv_bn(k1, 64, 128),
        "down2": _init_conv_bn(k2, 128, 256),
        "down3": _init_conv_bn(k3, 256, out_channels),
    }

    x = jax.random.normal(kx, (2, n_channels, 16, 16), jnp.float32)    # NCHW

    fwd = jax.jit(cnn_encoder2)
    out = jax.block_until_ready(fwd(x, params))
    assert out.shape == (2, out_channels, 2, 2), out.shape

    # Tight check vs a reference using the same bf16 MXU feed (f32 accumulate).
    ref_bf16 = jax.block_until_ready(_ref_forward(x, params, feed_dtype=jnp.bfloat16))
    err_bf16 = float(jnp.max(jnp.abs(out - ref_bf16)))
    assert jnp.allclose(out, ref_bf16, rtol=2e-3, atol=2e-3), err_bf16

    # Loose sanity check vs the pure-f32 reference (only bf16-feed drift remains).
    ref_f32 = jax.block_until_ready(_ref_forward(x, params, feed_dtype=jnp.float32))
    err_f32 = float(jnp.max(jnp.abs(out - ref_f32)))
    assert jnp.allclose(out, ref_f32, rtol=5e-2, atol=5e-2), err_f32

    print("KERNEL_OK")
</pallas_src>

<mosaic_0001>
module attributes {stable_mosaic.version = 11 : i64} {
  func.func @kernel(%arg0: i32, %arg1: memref<1x342x4xbf16, #tpu.memory_space<vmem>>, %arg2: memref<36x64xbf16, #tpu.memory_space<vmem>>, %arg3: memref<1x64xf32, #tpu.memory_space<vmem>>, %arg4: memref<1x64xf32, #tpu.memory_space<vmem>>, %arg5: memref<576x128xbf16, #tpu.memory_space<vmem>>, %arg6: memref<1x128xf32, #tpu.memory_space<vmem>>, %arg7: memref<1x128xf32, #tpu.memory_space<vmem>>, %arg8: memref<1152x256xbf16, #tpu.memory_space<vmem>>, %arg9: memref<1x256xf32, #tpu.memory_space<vmem>>, %arg10: memref<1x256xf32, #tpu.memory_space<vmem>>, %arg11: memref<2304x32xbf16, #tpu.memory_space<vmem>>, %arg12: memref<1x32xf32, #tpu.memory_space<vmem>>, %arg13: memref<1x32xf32, #tpu.memory_space<vmem>>, %arg14: memref<1x8x32xf32, #tpu.memory_space<vmem>>, %arg15: memref<110x64xbf16, #tpu.memory_space<vmem>>, %arg16: memref<42x128xbf16, #tpu.memory_space<vmem>>, %arg17: memref<20x256xbf16, #tpu.memory_space<vmem>>, %arg18: memref<288x64xbf16, #tpu.memory_space<vmem>>, %arg19: memref<80x128xbf16, #tpu.memory_space<vmem>>, %arg20: memref<24x256xbf16, #tpu.memory_space<vmem>>) attributes {dimension_semantics = [#tpu.dimension_semantics<parallel>], iteration_bounds = array<i64: 2>, scalar_prefetch = 0 : i64, scratch_operands = 6 : i64, tpu.core_type = #tpu.core_type<tc>, window_params = [{transform_indices = @transform_0, window_bounds = array<i64: 1, 342, 4>}, {pipeline_mode = #tpu.pipeline_mode<synchronous>, transform_indices = @transform_1, window_bounds = array<i64: 36, 64>}, {pipeline_mode = #tpu.pipeline_mode<synchronous>, transform_indices = @transform_2, window_bounds = array<i64: 1, 64>}, {pipeline_mode = #tpu.pipeline_mode<synchronous>, transform_indices = @transform_3, window_bounds = array<i64: 1, 64>}, {pipeline_mode = #tpu.pipeline_mode<synchronous>, transform_indices = @transform_4, window_bounds = array<i64: 576, 128>}, {pipeline_mode = #tpu.pipeline_mode<synchronous>, transform_indices = @transform_5, window_bounds = array<i64: 1, 128>}, {pipeline_mode = #tpu.pipeline_mode<synchronous>, transform_indices = @transform_6, window_bounds = array<i64: 1, 128>}, {pipeline_mode = #tpu.pipeline_mode<synchronous>, transform_indices = @transform_7, window_bounds = array<i64: 1152, 256>}, {pipeline_mode = #tpu.pipeline_mode<synchronous>, transform_indices = @transform_8, window_bounds = array<i64: 1, 256>}, {pipeline_mode = #tpu.pipeline_mode<synchronous>, transform_indices = @transform_9, window_bounds = array<i64: 1, 256>}, {pipeline_mode = #tpu.pipeline_mode<synchronous>, transform_indices = @transform_10, window_bounds = array<i64: 2304, 32>}, {pipeline_mode = #tpu.pipeline_mode<synchronous>, transform_indices = @transform_11, window_bounds = array<i64: 1, 32>}, {pipeline_mode = #tpu.pipeline_mode<synchronous>, transform_indices = @transform_12, window_bounds = array<i64: 1, 32>}, {transform_indices = @transform_13, window_bounds = array<i64: 1, 8, 32>}]} {
    %cst = arith.constant 0.000000e+00 : f32
    %0 = vector.broadcast %cst : f32 to vector<288x64xf32>
    %c0 = arith.constant 0 : index
    %c0_0 = arith.constant 0 : index
    %c0_1 = arith.constant 0 : index
    %1 = vector.load %arg1[%c0, %c0_0, %c0_1] : memref<1x342x4xbf16, #tpu.memory_space<vmem>>, vector<1x288x4xbf16>
    %2 = vector.shape_cast %1 : vector<1x288x4xbf16> to vector<288x4xbf16>
    %c0_2 = arith.constant 0 : index
    %c0_3 = arith.constant 0 : index
    %3 = vector.load %arg2[%c0_2, %c0_3] : memref<36x64xbf16, #tpu.memory_space<vmem>>, vector<4x64xbf16>
    %cst_4 = arith.constant dense<0.000000e+00> : vector<288x64xf32>
    %4 = tpu.matmul %2, %3, %cst_4 {dimension_numbers = #tpu.dot_dimension_numbers<[1], [0], [0], [1], [0, 0, 1, 1], [], []>} : vector<288x4xbf16>, vector<4x64xbf16>, vector<288x64xf32> -> vector<288x64xf32>
    %5 = arith.addf %0, %4 : vector<288x64xf32>
    %c0_5 = arith.constant 0 : index
    %c1 = arith.constant 1 : index
    %c0_6 = arith.constant 0 : index
    %6 = vector.load %arg1[%c0_5, %c1, %c0_6] : memref<1x342x4xbf16, #tpu.memory_space<vmem>>, vector<1x288x4xbf16>
    %7 = vector.shape_cast %6 : vector<1x288x4xbf16> to vector<288x4xbf16>
    %c4 = arith.constant 4 : index
    %c0_7 = arith.constant 0 : index
    %8 = vector.load %arg2[%c4, %c0_7] : memref<36x64xbf16, #tpu.memory_space<vmem>>, vector<4x64xbf16>
    %cst_8 = arith.constant dense<0.000000e+00> : vector<288x64xf32>
    %9 = tpu.matmul %7, %8, %cst_8 {dimension_numbers = #tpu.dot_dimension_numbers<[1], [0], [0], [1], [0, 0, 1, 1], [], []>} : vector<288x4xbf16>, vector<4x64xbf16>, vector<288x64xf32> -> vector<288x64xf32>
    %10 = arith.addf %5, %9 : vector<288x64xf32>
    %c0_9 = arith.constant 0 : index
    %c2 = arith.constant 2 : index
    %c0_10 = arith.constant 0 : index
    %11 = vector.load %arg1[%c0_9, %c2, %c0_10] : memref<1x342x4xbf16, #tpu.memory_space<vmem>>, vector<1x288x4xbf16>
    %12 = vector.shape_cast %11 : vector<1x288x4xbf16> to vector<288x4xbf16>
    %c8 = arith.constant 8 : index
    %c0_11 = arith.constant 0 : index
    %13 = vector.load %arg2[%c8, %c0_11] : memref<36x64xbf16, #tpu.memory_space<vmem>>, vector<4x64xbf16>
    %cst_12 = arith.constant dense<0.000000e+00> : vector<288x64xf32>
    %14 = tpu.matmul %12, %13, %cst_12 {dimension_numbers = #tpu.dot_dimension_numbers<[1], [0], [0], [1], [0, 0, 1, 1], [], []>} : vector<288x4xbf16>, vector<4x64xbf16>, vector<288x64xf32> -> vector<288x64xf32>
    %15 = arith.addf %10, %14 : vector<288x64xf32>
    %c0_13 = arith.constant 0 : index
    %c18 = arith.constant 18 : index
    %c0_14 = arith.constant 0 : index
    %16 = vector.load %arg1[%c0_13, %c18, %c0_14] : memref<1x342x4xbf16, #tpu.memory_space<vmem>>, vector<1x288x4xbf16>
    %17 = vector.shape_cast %16 : vector<1x288x4xbf16> to vector<288x4xbf16>
    %c12 = arith.constant 12 : index
    %c0_15 = arith.constant 0 : index
    %18 = vector.load %arg2[%c12, %c0_15] : memref<36x64xbf16, #tpu.memory_space<vmem>>, vector<4x64xbf16>
    %cst_16 = arith.constant dense<0.000000e+00> : vector<288x64xf32>
    %19 = tpu.matmul %17, %18, %cst_16 {dimension_numbers = #tpu.dot_dimension_numbers<[1], [0], [0], [1], [0, 0, 1, 1], [], []>} : vector<288x4xbf16>, vector<4x64xbf16>, vector<288x64xf32> -> vector<288x64xf32>
    %20 = arith.addf %15, %19 : vector<288x64xf32>
    %c0_17 = arith.constant 0 : index
    %c19 = arith.constant 19 : index
    %c0_18 = arith.constant 0 : index
    %21 = vector.load %arg1[%c0_17, %c19, %c0_18] : memref<1x342x4xbf16, #tpu.memory_space<vmem>>, vector<1x288x4xbf16>
    %22 = vector.shape_cast %21 : vector<1x288x4xbf16> to vector<288x4xbf16>
    %c16 = arith.constant 16 : index
    %c0_19 = arith.constant 0 : index
    %23 = vector.load %arg2[%c16, %c0_19] : memref<36x64xbf16, #tpu.memory_space<vmem>>, vector<4x64xbf16>
    %cst_20 = arith.constant dense<0.000000e+00> : vector<288x64xf32>
    %24 = tpu.matmul %22, %23, %cst_20 {dimension_numbers = #tpu.dot_dimension_numbers<[1], [0], [0], [1], [0, 0, 1, 1], [], []>} : vector<288x4xbf16>, vector<4x64xbf16>, vector<288x64xf32> -> vector<288x64xf32>
    %25 = arith.addf %20, %24 : vector<288x64xf32>
    %c0_21 = arith.constant 0 : index
    %c20 = arith.constant 20 : index
    %c0_22 = arith.constant 0 : index
    %26 = vector.load %arg1[%c0_21, %c20, %c0_22] : memref<1x342x4xbf16, #tpu.memory_space<vmem>>, vector<1x288x4xbf16>
    %27 = vector.shape_cast %26 : vector<1x288x4xbf16> to vector<288x4xbf16>
    %c20_23 = arith.constant 20 : index
    %c0_24 = arith.constant 0 : index
    %28 = vector.load %arg2[%c20_23, %c0_24] : memref<36x64xbf16, #tpu.memory_space<vmem>>, vector<4x64xbf16>
    %cst_25 = arith.constant dense<0.000000e+00> : vector<288x64xf32>
    %29 = tpu.matmul %27, %28, %cst_25 {dimension_numbers = #tpu.dot_dimension_numbers<[1], [0], [0], [1], [0, 0, 1, 1], [], []>} : vector<288x4xbf16>, vector<4x64xbf16>, vector<288x64xf32> -> vector<288x64xf32>
    %30 = arith.addf %25, %29 : vector<288x64xf32>
    %c0_26 = arith.constant 0 : index
    %c36 = arith.constant 36 : index
    %c0_27 = arith.constant 0 : index
    %31 = vector.load %arg1[%c0_26, %c36, %c0_27] : memref<1x342x4xbf16, #tpu.memory_space<vmem>>, vector<1x288x4xbf16>
    %32 = vector.shape_cast %31 : vector<1x288x4xbf16> to vector<288x4xbf16>
    %c24 = arith.constant 24 : index
    %c0_28 = arith.constant 0 : index
    %33 = vector.load %arg2[%c24, %c0_28] : memref<36x64xbf16, #tpu.memory_space<vmem>>, vector<4x64xbf16>
    %cst_29 = arith.constant dense<0.000000e+00> : vector<288x64xf32>
    %34 = tpu.matmul %32, %33, %cst_29 {dimension_numbers = #tpu.dot_dimension_numbers<[1], [0], [0], [1], [0, 0, 1, 1], [], []>} : vector<288x4xbf16>, vector<4x64xbf16>, vector<288x64xf32> -> vector<288x64xf32>
    %35 = arith.addf %30, %34 : vector<288x64xf32>
    %c0_30 = arith.constant 0 : index
    %c37 = arith.constant 37 : index
    %c0_31 = arith.constant 0 : index
    %36 = vector.load %arg1[%c0_30, %c37, %c0_31] : memref<1x342x4xbf16, #tpu.memory_space<vmem>>, vector<1x288x4xbf16>
    %37 = vector.shape_cast %36 : vector<1x288x4xbf16> to vector<288x4xbf16>
    %c28 = arith.constant 28 : index
    %c0_32 = arith.constant 0 : index
    %38 = vector.load %arg2[%c28, %c0_32] : memref<36x64xbf16, #tpu.memory_space<vmem>>, vector<4x64xbf16>
    %cst_33 = arith.constant dense<0.000000e+00> : vector<288x64xf32>
    %39 = tpu.matmul %37, %38, %cst_33 {dimension_numbers = #tpu.dot_dimension_numbers<[1], [0], [0], [1], [0, 0, 1, 1], [], []>} : vector<288x4xbf16>, vector<4x64xbf16>, vector<288x64xf32> -> vector<288x64xf32>
    %40 = arith.addf %35, %39 : vector<288x64xf32>
    %c0_34 = arith.constant 0 : index
    %c38 = arith.constant 38 : index
    %c0_35 = arith.constant 0 : index
    %41 = vector.load %arg1[%c0_34, %c38, %c0_35] : memref<1x342x4xbf16, #tpu.memory_space<vmem>>, vector<1x288x4xbf16>
    %42 = vector.shape_cast %41 : vector<1x288x4xbf16> to vector<288x4xbf16>
    %c32 = arith.constant 32 : index
    %c0_36 = arith.constant 0 : index
    %43 = vector.load %arg2[%c32, %c0_36] : memref<36x64xbf16, #tpu.memory_space<vmem>>, vector<4x64xbf16>
    %cst_37 = arith.constant dense<0.000000e+00> : vector<288x64xf32>
    %44 = tpu.matmul %42, %43, %cst_37 {dimension_numbers = #tpu.dot_dimension_numbers<[1], [0], [0], [1], [0, 0, 1, 1], [], []>} : vector<288x4xbf16>, vector<4x64xbf16>, vector<288x64xf32> -> vector<288x64xf32>
    %45 = arith.addf %40, %44 : vector<288x64xf32>
    %c0_38 = arith.constant 0 : index
    %c0_39 = arith.constant 0 : index
    %46 = vector.load %arg3[%c0_38, %c0_39] : memref<1x64xf32, #tpu.memory_space<vmem>>, vector<1x64xf32>
    %47 = vector.broadcast %46 : vector<1x64xf32> to vector<288x64xf32>
    %48 = arith.mulf %45, %47 : vector<288x64xf32>
    %c0_40 = arith.constant 0 : index
    %c0_41 = arith.constant 0 : index
    %49 = vector.load %arg4[%c0_40, %c0_41] : memref<1x64xf32, #tpu.memory_space<vmem>>, vector<1x64xf32>
    %50 = vector.broadcast %49 : vector<1x64xf32> to vector<288x64xf32>
    %51 = arith.addf %48, %50 : vector<288x64xf32>
    %cst_42 = arith.constant 0.000000e+00 : f32
    %52 = vector.broadcast %cst_42 : f32 to vector<288x64xf32>
    %53 = arith.maximumf %51, %52 : vector<288x64xf32>
    %54 = arith.truncf %53 : vector<288x64xf32> to vector<288x64xbf16>
    %c0_43 = arith.constant 0 : index
    %c0_44 = arith.constant 0 : index
    %55 = vector.load %arg18[%c0_43, %c0_44] : memref<288x64xbf16, #tpu.memory_space<vmem>>, vector<288x64xbf16>
    tpu.vector_store %arg18[%c0_43, %c0_44], %54 {strides = array<i32>} : memref<288x64xbf16, #tpu.memory_space<vmem>>, vector<288x64xbf16>,
    %cst_45 = arith.constant 0.000000e+00 : bf16
    %56 = vector.broadcast %cst_45 : bf16 to vector<10x64xbf16>
    %c0_46 = arith.constant 0 : index
    %c0_47 = arith.constant 0 : index
    %57 = vector.load %arg15[%c0_46, %c0_47] : memref<110x64xbf16, #tpu.memory_space<vmem>>, vector<10x64xbf16>
    tpu.vector_store %arg15[%c0_46, %c0_47], %56 {strides = array<i32>} : memref<110x64xbf16, #tpu.memory_space<vmem>>, vector<10x64xbf16>,
    %cst_48 = arith.constant 0.000000e+00 : bf16
    %58 = vector.broadcast %cst_48 : bf16 to vector<20x64xbf16>
    %c90 = arith.constant 90 : index
    %c0_49 = arith.constant 0 : index
    %59 = vector.load %arg15[%c90, %c0_49] : memref<110x64xbf16, #tpu.memory_space<vmem>>, vector<20x64xbf16>
    tpu.vector_store %arg15[%c90, %c0_49], %58 {strides = array<i32>} : memref<110x64xbf16, #tpu.memory_space<vmem>>, vector<20x64xbf16>,
    %cst_50 = arith.constant 0.000000e+00 : bf16
    %60 = vector.broadcast %cst_50 : bf16 to vector<1x64xbf16>
    %c0_51 = arith.constant 0 : index
    %c0_52 = arith.constant 0 : index
    %61 = vector.load %arg18[%c0_51, %c0_52] : memref<288x64xbf16, #tpu.memory_space<vmem>>, vector<16x64xbf16>
    %c18_53 = arith.constant 18 : index
    %c0_54 = arith.constant 0 : index
    %62 = vector.load %arg18[%c18_53, %c0_54] : memref<288x64xbf16, #tpu.memory_space<vmem>>, vector<16x64xbf16>
    %63 = arith.maximumf %61, %62 : vector<16x64xbf16>
    %64 = vector.shape_cast %63 : vector<16x64xbf16> to vector<8x2x64xbf16>
    %cst_55 = arith.constant dense<0xFF80> : vector<8x64xbf16>
    %65 = vector.multi_reduction <maximumf>, %64, %cst_55 [1] : vector<8x2x64xbf16> to vector<8x64xbf16>
    %66 = tpu.concatenate %60, %65, %60 in 0 : vector<1x64xbf16>, vector<8x64xbf16>, vector<1x64xbf16> -> vector<10x64xbf16>
    %c10 = arith.constant 10 : index
    %c0_56 = arith.constant 0 : index
    %67 = vector.load %arg15[%c10, %c0_56] : memref<110x64xbf16, #tpu.memory_space<vmem>>, vector<10x64xbf16>
    tpu.vector_store %arg15[%c10, %c0_56], %66 {strides = array<i32>} : memref<110x64xbf16, #tpu.memory_space<vmem>>, vector<10x64xbf16>,
    %c36_57 = arith.constant 36 : index
    %c0_58 = arith.constant 0 : index
    %68 = vector.load %arg18[%c36_57, %c0_58] : memref<288x64xbf16, #tpu.memory_space<vmem>>, vector<16x64xbf16>
    %c54 = arith.constant 54 : index
    %c0_59 = arith.constant 0 : index
    %69 = vector.load %arg18[%c54, %c0_59] : memref<288x64xbf16, #tpu.memory_space<vmem>>, vector<16x64xbf16>
    %70 = arith.maximumf %68, %69 : vector<16x64xbf16>
    %71 = vector.shape_cast %70 : vector<16x64xbf16> to vector<8x2x64xbf16>
    %cst_60 = arith.constant dense<0xFF80> : vector<8x64xbf16>
    %72 = vector.multi_reduction <maximumf>, %71, %cst_60 [1] : vector<8x2x64xbf16> to vector<8x64xbf16>
    %73 = tpu.concatenate %60, %72, %60 in 0 : vector<1x64xbf16>, vector<8x64xbf16>, vector<1x64xbf16> -> vector<10x64xbf16>
    %c20_61 = arith.constant 20 : index
    %c0_62 = arith.constant 0 : index
    %74 = vector.load %arg15[%c20_61, %c0_62] : memref<110x64xbf16, #tpu.memory_space<vmem>>, vector<10x64xbf16>
    tpu.vector_store %arg15[%c20_61, %c0_62], %73 {strides = array<i32>} : memref<110x64xbf16, #tpu.memory_space<vmem>>, vector<10x64xbf16>,
    %c72 = arith.constant 72 : index
    %c0_63 = arith.constant 0 : index
    %75 = vector.load %arg18[%c72, %c0_63] : memref<288x64xbf16, #tpu.memory_space<vmem>>, vector<16x64xbf16>
    %c90_64 = arith.constant 90 : index
    %c0_65 = arith.constant 0 : index
    %76 = vector.load %arg18[%c90_64, %c0_65] : memref<288x64xbf16, #tpu.memory_space<vmem>>, vector<16x64xbf16>
    %77 = arith.maximumf %75, %76 : vector<16x64xbf16>
    %78 = vector.shape_cast %77 : vector<16x64xbf16> to vector<8x2x64xbf16>
    %cst_66 = arith.constant dense<0xFF80> : vector<8x64xbf16>
    %79 = vector.multi_reduction <maximumf>, %78, %cst_66 [1] : vector<8x2x64xbf16> to vector<8x64xbf16>
    %80 = tpu.concatenate %60, %79, %60 in 0 : vector<1x64xbf16>, vector<8x64xbf16>, vector<1x64xbf16> -> vector<10x64xbf16>
    %c30 = arith.constant 30 : index
    %c0_67 = arith.constant 0 : index
    %81 = vector.load %arg15[%c30, %c0_67] : memref<110x64xbf16, #tpu.memory_space<vmem>>, vector<10x64xbf16>
    tpu.vector_store %arg15[%c30, %c0_67], %80 {strides = array<i32>} : memref<110x64xbf16, #tpu.memory_space<vmem>>, vector<10x64xbf16>,
    %c108 = arith.constant 108 : index
    %c0_68 = arith.constant 0 : index
    %82 = vector.load %arg18[%c108, %c0_68] : memref<288x64xbf16, #tpu.memory_space<vmem>>, vector<16x64xbf16>
    %c126 = arith.constant 126 : index
    %c0_69 = arith.constant 0 : index
    %83 = vector.load %arg18[%c126, %c0_69] : memref<288x64xbf16, #tpu.memory_space<vmem>>, vector<16x64xbf16>
    %84 = arith.maximumf %82, %83 : vector<16x64xbf16>
    %85 = vector.shape_cast %84 : vector<16x64xbf16> to vector<8x2x64xbf16>
    %cst_70 = arith.constant dense<0xFF80> : vector<8x64xbf16>
    %86 = vector.multi_reduction <maximumf>, %85, %cst_70 [1] : vector<8x2x64xbf16> to vector<8x64xbf16>
    %87 = tpu.concatenate %60, %86, %60 in 0 : vector<1x64xbf16>, vector<8x64xbf16>, vector<1x64xbf16> -> vector<10x64xbf16>
    %c40 = arith.constant 40 : index
    %c0_71 = arith.constant 0 : index
    %88 = vector.load %arg15[%c40, %c0_71] : memref<110x64xbf16, #tpu.memory_space<vmem>>, vector<10x64xbf16>
    tpu.vector_store %arg15[%c40, %c0_71], %87 {strides = array<i32>} : memref<110x64xbf16, #tpu.memory_space<vmem>>, vector<10x64xbf16>,
    %c144 = arith.constant 144 : index
    %c0_72 = arith.constant 0 : index
    %89 = vector.load %arg18[%c144, %c0_72] : memref<288x64xbf16, #tpu.memory_space<vmem>>, vector<16x64xbf16>
    %c162 = arith.constant 162 : index
    %c0_73 = arith.constant 0 : index
    %90 = vector.load %arg18[%c162, %c0_73] : memref<288x64xbf16, #tpu.memory_space<vmem>>, vector<16x64xbf16>
    %91 = arith.maximumf %89, %90 : vector<16x64xbf16>
    %92 = vector.shape_cast %91 : vector<16x64xbf16> to vector<8x2x64xbf16>
    %cst_74 = arith.constant dense<0xFF80> : vector<8x64xbf16>
    %93 = vector.multi_reduction <maximumf>, %92, %cst_74 [1] : vector<8x2x64xbf16> to vector<8x64xbf16>
    %94 = tpu.concatenate %60, %93, %60 in 0 : vector<1x64xbf16>, vector<8x64xbf16>, vector<1x64xbf16> -> vector<10x64xbf16>
    %c50 = arith.constant 50 : index
    %c0_75 = arith.constant 0 : index
    %95 = vector.load %arg15[%c50, %c0_75] : memref<110x64xbf16, #tpu.memory_space<vmem>>, vector<10x64xbf16>
    tpu.vector_store %arg15[%c50, %c0_75], %94 {strides = array<i32>} : memref<110x64xbf16, #tpu.memory_space<vmem>>, vector<10x64xbf16>,
    %c180 = arith.constant 180 : index
    %c0_76 = arith.constant 0 : index
    %96 = vector.load %arg18[%c180, %c0_76] : memref<288x64xbf16, #tpu.memory_space<vmem>>, vector<16x64xbf16>
    %c198 = arith.constant 198 : index
    %c0_77 = arith.constant 0 : index
    %97 = vector.load %arg18[%c198, %c0_77] : memref<288x64xbf16, #tpu.memory_space<vmem>>, vector<16x64xbf16>
    %98 = arith.maximumf %96, %97 : vector<16x64xbf16>
    %99 = vector.shape_cast %98 : vector<16x64xbf16> to vector<8x2x64xbf16>
    %cst_78 = arith.constant dense<0xFF80> : vector<8x64xbf16>
    %100 = vector.multi_reduction <maximumf>, %99, %cst_78 [1] : vector<8x2x64xbf16> to vector<8x64xbf16>
    %101 = tpu.concatenate %60, %100, %60 in 0 : vector<1x64xbf16>, vector<8x64xbf16>, vector<1x64xbf16> -> vector<10x64xbf16>
    %c60 = arith.constant 60 : index
    %c0_79 = arith.constant 0 : index
    %102 = vector.load %arg15[%c60, %c0_79] : memref<110x64xbf16, #tpu.memory_space<vmem>>, vector<10x64xbf16>
    tpu.vector_store %arg15[%c60, %c0_79], %101 {strides = array<i32>} : memref<110x64xbf16, #tpu.memory_space<vmem>>, vector<10x64xbf16>,
    %c216 = arith.constant 216 : index
    %c0_80 = arith.constant 0 : index
    %103 = vector.load %arg18[%c216, %c0_80] : memref<288x64xbf16, #tpu.memory_space<vmem>>, vector<16x64xbf16>
    %c234 = arith.constant 234 : index
    %c0_81 = arith.constant 0 : index
    %104 = vector.load %arg18[%c234, %c0_81] : memref<288x64xbf16, #tpu.memory_space<vmem>>, vector<16x64xbf16>
    %105 = arith.maximumf %103, %104 : vector<16x64xbf16>
    %106 = vector.shape_cast %105 : vector<16x64xbf16> to vector<8x2x64xbf16>
    %cst_82 = arith.constant dense<0xFF80> : vector<8x64xbf16>
    %107 = vector.multi_reduction <maximumf>, %106, %cst_82 [1] : vector<8x2x64xbf16> to vector<8x64xbf16>
    %108 = tpu.concatenate %60, %107, %60 in 0 : vector<1x64xbf16>, vector<8x64xbf16>, vector<1x64xbf16> -> vector<10x64xbf16>
    %c70 = arith.constant 70 : index
    %c0_83 = arith.constant 0 : index
    %109 = vector.load %arg15[%c70, %c0_83] : memref<110x64xbf16, #tpu.memory_space<vmem>>, vector<10x64xbf16>
    tpu.vector_store %arg15[%c70, %c0_83], %108 {strides = array<i32>} : memref<110x64xbf16, #tpu.memory_space<vmem>>, vector<10x64xbf16>,
    %c252 = arith.constant 252 : index
    %c0_84 = arith.constant 0 : index
    %110 = vector.load %arg18[%c252, %c0_84] : memref<288x64xbf16, #tpu.memory_space<vmem>>, vector<16x64xbf16>
    %c270 = arith.constant 270 : index
    %c0_85 = arith.constant 0 : index
    %111 = vector.load %arg18[%c270, %c0_85] : memref<288x64xbf16, #tpu.memory_space<vmem>>, vector<16x64xbf16>
    %112 = arith.maximumf %110, %111 : vector<16x64xbf16>
    %113 = vector.shape_cast %112 : vector<16x64xbf16> to vector<8x2x64xbf16>
    %cst_86 = arith.constant dense<0xFF80> : vector<8x64xbf16>
    %114 = vector.multi_reduction <maximumf>, %113, %cst_86 [1] : vector<8x2x64xbf16> to vector<8x64xbf16>
    %115 = tpu.concatenate %60, %114, %60 in 0 : vector<1x64xbf16>, vector<8x64xbf16>, vector<1x64xbf16> -> vector<10x64xbf16>
    %c80 = arith.constant 80 : index
    %c0_87 = arith.constant 0 : index
    %116 = vector.load %arg15[%c80, %c0_87] : memref<110x64xbf16, #tpu.memory_space<vmem>>, vector<10x64xbf16>
    tpu.vector_store %arg15[%c80, %c0_87], %115 {strides = array<i32>} : memref<110x64xbf16, #tpu.memory_space<vmem>>, vector<10x64xbf16>,
    %cst_88 = arith.constant 0.000000e+00 : f32
    %117 = vector.broadcast %cst_88 : f32 to vector<80x128xf32>
    %c0_89 = arith.constant 0 : index
    %c0_90 = arith.constant 0 : index
    %118 = vector.load %arg15[%c0_89, %c0_90] : memref<110x64xbf16, #tpu.memory_space<vmem>>, vector<80x64xbf16>
    %c0_91 = arith.constant 0 : index
    %c0_92 = arith.constant 0 : index
    %119 = vector.load %arg5[%c0_91, %c0_92] : memref<576x128xbf16, #tpu.memory_space<vmem>>, vector<64x128xbf16>
    %cst_93 = arith.constant dense<0.000000e+00> : vector<80x128xf32>
    %120 = tpu.matmul %118, %119, %cst_93 {dimension_numbers = #tpu.dot_dimension_numbers<[1], [0], [0], [1], [0, 0, 1, 1], [], []>} : vector<80x64xbf16>, vector<64x128xbf16>, vector<80x128xf32> -> vector<80x128xf32>
    %121 = arith.addf %117, %120 : vector<80x128xf32>
    %c1_94 = arith.constant 1 : index
    %c0_95 = arith.constant 0 : index
    %122 = vector.load %arg15[%c1_94, %c0_95] : memref<110x64xbf16, #tpu.memory_space<vmem>>, vector<80x64xbf16>
    %c64 = arith.constant 64 : index
    %c0_96 = arith.constant 0 : index
    %123 = vector.load %arg5[%c64, %c0_96] : memref<576x128xbf16, #tpu.memory_space<vmem>>, vector<64x128xbf16>
    %cst_97 = arith.constant dense<0.000000e+00> : vector<80x128xf32>
    %124 = tpu.matmul %122, %123, %cst_97 {dimension_numbers = #tpu.dot_dimension_numbers<[1], [0], [0], [1], [0, 0, 1, 1], [], []>} : vector<80x64xbf16>, vector<64x128xbf16>, vector<80x128xf32> -> vector<80x128xf32>
    %125 = arith.addf %121, %124 : vector<80x128xf32>
    %c2_98 = arith.constant 2 : index
    %c0_99 = arith.constant 0 : index
    %126 = vector.load %arg15[%c2_98, %c0_99] : memref<110x64xbf16, #tpu.memory_space<vmem>>, vector<80x64xbf16>
    %c128 = arith.constant 128 : index
    %c0_100 = arith.constant 0 : index
    %127 = vector.load %arg5[%c128, %c0_100] : memref<576x128xbf16, #tpu.memory_space<vmem>>, vector<64x128xbf16>
    %cst_101 = arith.constant dense<0.000000e+00> : vector<80x128xf32>
    %128 = tpu.matmul %126, %127, %cst_101 {dimension_numbers = #tpu.dot_dimension_numbers<[1], [0], [0], [1], [0, 0, 1, 1], [], []>} : vector<80x64xbf16>, vector<64x128xbf16>, vector<80x128xf32> -> vector<80x128xf32>
    %129 = arith.addf %125, %128 : vector<80x128xf32>
    %c10_102 = arith.constant 10 : index
    %c0_103 = arith.constant 0 : index
    %130 = vector.load %arg15[%c10_102, %c0_103] : memref<110x64xbf16, #tpu.memory_space<vmem>>, vector<80x64xbf16>
    %c192 = arith.constant 192 : index
    %c0_104 = arith.constant 0 : index
    %131 = vector.load %arg5[%c192, %c0_104] : memref<576x128xbf16, #tpu.memory_space<vmem>>, vector<64x128xbf16>
    %cst_105 = arith.constant dense<0.000000e+00> : vector<80x128xf32>
    %132 = tpu.matmul %130, %131, %cst_105 {dimension_numbers = #tpu.dot_dimension_numbers<[1], [0], [0], [1], [0, 0, 1, 1], [], []>} : vector<80x64xbf16>, vector<64x128xbf16>, vector<80x128xf32> -> vector<80x128xf32>
    %133 = arith.addf %129, %132 : vector<80x128xf32>
    %c11 = arith.constant 11 : index
    %c0_106 = arith.constant 0 : index
    %134 = vector.load %arg15[%c11, %c0_106] : memref<110x64xbf16, #tpu.memory_space<vmem>>, vector<80x64xbf16>
    %c256 = arith.constant 256 : index
    %c0_107 = arith.constant 0 : index
    %135 = vector.load %arg5[%c256, %c0_107] : memref<576x128xbf16, #tpu.memory_space<vmem>>, vector<64x128xbf16>
    %cst_108 = arith.constant dense<0.000000e+00> : vector<80x128xf32>
    %136 = tpu.matmul %134, %135, %cst_108 {dimension_numbers = #tpu.dot_dimension_numbers<[1], [0], [0], [1], [0, 0, 1, 1], [], []>} : vector<80x64xbf16>, vector<64x128xbf16>, vector<80x128xf32> -> vector<80x128xf32>
    %137 = arith.addf %133, %136 : vector<80x128xf32>
    %c12_109 = arith.constant 12 : index
    %c0_110 = arith.constant 0 : index
    %138 = vector.load %arg15[%c12_109, %c0_110] : memref<110x64xbf16, #tpu.memory_space<vmem>>, vector<80x64xbf16>
    %c320 = arith.constant 320 : index
    %c0_111 = arith.constant 0 : index
    %139 = vector.load %arg5[%c320, %c0_111] : memref<576x128xbf16, #tpu.memory_space<vmem>>, vector<64x128xbf16>
    %cst_112 = arith.constant dense<0.000000e+00> : vector<80x128xf32>
    %140 = tpu.matmul %138, %139, %cst_112 {dimension_numbers = #tpu.dot_dimension_numbers<[1], [0], [0], [1], [0, 0, 1, 1], [], []>} : vector<80x64xbf16>, vector<64x128xbf16>, vector<80x128xf32> -> vector<80x128xf32>
    %141 = arith.addf %137, %140 : vector<80x128xf32>
    %c20_113 = arith.constant 20 : index
    %c0_114 = arith.constant 0 : index
    %142 = vector.load %arg15[%c20_113, %c0_114] : memref<110x64xbf16, #tpu.memory_space<vmem>>, vector<80x64xbf16>
    %c384 = arith.constant 384 : index
    %c0_115 = arith.constant 0 : index
    %143 = vector.load %arg5[%c384, %c0_115] : memref<576x128xbf16, #tpu.memory_space<vmem>>, vector<64x128xbf16>
    %cst_116 = arith.constant dense<0.000000e+00> : vector<80x128xf32>
    %144 = tpu.matmul %142, %143, %cst_116 {dimension_numbers = #tpu.dot_dimension_numbers<[1], [0], [0], [1], [0, 0, 1, 1], [], []>} : vector<80x64xbf16>, vector<64x128xbf16>, vector<80x128xf32> -> vector<80x128xf32>
    %145 = arith.addf %141, %144 : vector<80x128xf32>
    %c21 = arith.constant 21 : index
    %c0_117 = arith.constant 0 : index
    %146 = vector.load %arg15[%c21, %c0_117] : memref<110x64xbf16, #tpu.memory_space<vmem>>, vector<80x64xbf16>
    %c448 = arith.constant 448 : index
    %c0_118 = arith.constant 0 : index
    %147 = vector.load %arg5[%c448, %c0_118] : memref<576x128xbf16, #tpu.memory_space<vmem>>, vector<64x128xbf16>
    %cst_119 = arith.constant dense<0.000000e+00> : vector<80x128xf32>
    %148 = tpu.matmul %146, %147, %cst_119 {dimension_numbers = #tpu.dot_dimension_numbers<[1], [0], [0], [1], [0, 0, 1, 1], [], []>} : vector<80x64xbf16>, vector<64x128xbf16>, vector<80x128xf32> -> vector<80x128xf32>
    %149 = arith.addf %145, %148 : vector<80x128xf32>
    %c22 = arith.constant 22 : index
    %c0_120 = arith.constant 0 : index
    %150 = vector.load %arg15[%c22, %c0_120] : memref<110x64xbf16, #tpu.memory_space<vmem>>, vector<80x64xbf16>
    %c512 = arith.constant 512 : index
    %c0_121 = arith.constant 0 : index
    %151 = vector.load %arg5[%c512, %c0_121] : memref<576x128xbf16, #tpu.memory_space<vmem>>, vector<64x128xbf16>
    %cst_122 = arith.constant dense<0.000000e+00> : vector<80x128xf32>
    %152 = tpu.matmul %150, %151, %cst_122 {dimension_numbers = #tpu.dot_dimension_numbers<[1], [0], [0], [1], [0, 0, 1, 1], [], []>} : vector<80x64xbf16>, vector<64x128xbf16>, vector<80x128xf32> -> vector<80x128xf32>
    %153 = arith.addf %149, %152 : vector<80x128xf32>
    %c0_123 = arith.constant 0 : index
    %c0_124 = arith.constant 0 : index
    %154 = vector.load %arg6[%c0_123, %c0_124] : memref<1x128xf32, #tpu.memory_space<vmem>>, vector<1x128xf32>
    %155 = vector.broadcast %154 : vector<1x128xf32> to vector<80x128xf32>
    %156 = arith.mulf %153, %155 : vector<80x128xf32>
    %c0_125 = arith.constant 0 : index
    %c0_126 = arith.constant 0 : index
    %157 = vector.load %arg7[%c0_125, %c0_126] : memref<1x128xf32, #tpu.memory_space<vmem>>, vector<1x128xf32>
    %158 = vector.broadcast %157 : vector<1x128xf32> to vector<80x128xf32>
    %159 = arith.addf %156, %158 : vector<80x128xf32>
    %cst_127 = arith.constant 0.000000e+00 : f32
    %160 = vector.broadcast %cst_127 : f32 to vector<80x128xf32>
    %161 = arith.maximumf %159, %160 : vector<80x128xf32>
    %162 = arith.truncf %161 : vector<80x128xf32> to vector<80x128xbf16>
    %c0_128 = arith.constant 0 : index
    %c0_129 = arith.constant 0 : index
    %163 = vector.load %arg19[%c0_128, %c0_129] : memref<80x128xbf16, #tpu.memory_space<vmem>>, vector<80x128xbf16>
    tpu.vector_store %arg19[%c0_128, %c0_129], %162 {strides = array<i32>} : memref<80x128xbf16, #tpu.memory_space<vmem>>, vector<80x128xbf16>,
    %cst_130 = arith.constant 0.000000e+00 : bf16
    %164 = vector.broadcast %cst_130 : bf16 to vector<6x128xbf16>
    %c0_131 = arith.constant 0 : index
    %c0_132 = arith.constant 0 : index
    %165 = vector.load %arg16[%c0_131, %c0_132] : memref<42x128xbf16, #tpu.memory_space<vmem>>, vector<6x128xbf16>
    tpu.vector_store %arg16[%c0_131, %c0_132], %164 {strides = array<i32>} : memref<42x128xbf16, #tpu.memory_space<vmem>>, vector<6x128xbf16>,
    %cst_133 = arith.constant 0.000000e+00 : bf16
    %166 = vector.broadcast %cst_133 : bf16 to vector<12x128xbf16>
    %c30_134 = arith.constant 30 : index
    %c0_135 = arith.constant 0 : index
    %167 = vector.load %arg16[%c30_134, %c0_135] : memref<42x128xbf16, #tpu.memory_space<vmem>>, vector<12x128xbf16>
    tpu.vector_store %arg16[%c30_134, %c0_135], %166 {strides = array<i32>} : memref<42x128xbf16, #tpu.memory_space<vmem>>, vector<12x128xbf16>,
    %cst_136 = arith.constant 0.000000e+00 : bf16
    %168 = vector.broadcast %cst_136 : bf16 to vector<1x128xbf16>
    %c0_137 = arith.constant 0 : index
    %c0_138 = arith.constant 0 : index
    %169 = vector.load %arg19[%c0_137, %c0_138] : memref<80x128xbf16, #tpu.memory_space<vmem>>, vector<8x128xbf16>
    %c10_139 = arith.constant 10 : index
    %c0_140 = arith.constant 0 : index
    %170 = vector.load %arg19[%c10_139, %c0_140] : memref<80x128xbf16, #tpu.memory_space<vmem>>, vector<8x128xbf16>
    %171 = arith.maximumf %169, %170 : vector<8x128xbf16>
    %172 = vector.shape_cast %171 : vector<8x128xbf16> to vector<4x2x128xbf16>
    %cst_141 = arith.constant dense<0xFF80> : vector<4x128xbf16>
    %173 = vector.multi_reduction <maximumf>, %172, %cst_141 [1] : vector<4x2x128xbf16> to vector<4x128xbf16>
    %174 = tpu.concatenate %168, %173, %168 in 0 : vector<1x128xbf16>, vector<4x128xbf16>, vector<1x128xbf16> -> vector<6x128xbf16>
    %c6 = arith.constant 6 : index
    %c0_142 = arith.constant 0 : index
    %175 = vector.load %arg16[%c6, %c0_142] : memref<42x128xbf16, #tpu.memory_space<vmem>>, vector<6x128xbf16>
    tpu.vector_store %arg16[%c6, %c0_142], %174 {strides = array<i32>} : memref<42x128xbf16, #tpu.memory_space<vmem>>, vector<6x128xbf16>,
    %c20_143 = arith.constant 20 : index
    %c0_144 = arith.constant 0 : index
    %176 = vector.load %arg19[%c20_143, %c0_144] : memref<80x128xbf16, #tpu.memory_space<vmem>>, vector<8x128xbf16>
    %c30_145 = arith.constant 30 : index
    %c0_146 = arith.constant 0 : index
    %177 = vector.load %arg19[%c30_145, %c0_146] : memref<80x128xbf16, #tpu.memory_space<vmem>>, vector<8x128xbf16>
    %178 = arith.maximumf %176, %177 : vector<8x128xbf16>
    %179 = vector.shape_cast %178 : vector<8x128xbf16> to vector<4x2x128xbf16>
    %cst_147 = arith.constant dense<0xFF80> : vector<4x128xbf16>
    %180 = vector.multi_reduction <maximumf>, %179, %cst_147 [1] : vector<4x2x128xbf16> to vector<4x128xbf16>
    %181 = tpu.concatenate %168, %180, %168 in 0 : vector<1x128xbf16>, vector<4x128xbf16>, vector<1x128xbf16> -> vector<6x128xbf16>
    %c12_148 = arith.constant 12 : index
    %c0_149 = arith.constant 0 : index
    %182 = vector.load %arg16[%c12_148, %c0_149] : memref<42x128xbf16, #tpu.memory_space<vmem>>, vector<6x128xbf16>
    tpu.vector_store %arg16[%c12_148, %c0_149], %181 {strides = array<i32>} : memref<42x128xbf16, #tpu.memory_space<vmem>>, vector<6x128xbf16>,
    %c40_150 = arith.constant 40 : index
    %c0_151 = arith.constant 0 : index
    %183 = vector.load %arg19[%c40_150, %c0_151] : memref<80x128xbf16, #tpu.memory_space<vmem>>, vector<8x128xbf16>
    %c50_152 = arith.constant 50 : index
    %c0_153 = arith.constant 0 : index
    %184 = vector.load %arg19[%c50_152, %c0_153] : memref<80x128xbf16, #tpu.memory_space<vmem>>, vector<8x128xbf16>
    %185 = arith.maximumf %183, %184 : vector<8x128xbf16>
    %186 = vector.shape_cast %185 : vector<8x128xbf16> to vector<4x2x128xbf16>
    %cst_154 = arith.constant dense<0xFF80> : vector<4x128xbf16>
    %187 = vector.multi_reduction <maximumf>, %186, %cst_154 [1] : vector<4x2x128xbf16> to vector<4x128xbf16>
    %188 = tpu.concatenate %168, %187, %168 in 0 : vector<1x128xbf16>, vector<4x128xbf16>, vector<1x128xbf16> -> vector<6x128xbf16>
    %c18_155 = arith.constant 18 : index
    %c0_156 = arith.constant 0 : index
    %189 = vector.load %arg16[%c18_155, %c0_156] : memref<42x128xbf16, #tpu.memory_space<vmem>>, vector<6x128xbf16>
    tpu.vector_store %arg16[%c18_155, %c0_156], %188 {strides = array<i32>} : memref<42x128xbf16, #tpu.memory_space<vmem>>, vector<6x128xbf16>,
    %c60_157 = arith.constant 60 : index
    %c0_158 = arith.constant 0 : index
    %190 = vector.load %arg19[%c60_157, %c0_158] : memref<80x128xbf16, #tpu.memory_space<vmem>>, vector<8x128xbf16>
    %c70_159 = arith.constant 70 : index
    %c0_160 = arith.constant 0 : index
    %191 = vector.load %arg19[%c70_159, %c0_160] : memref<80x128xbf16, #tpu.memory_space<vmem>>, vector<8x128xbf16>
    %192 = arith.maximumf %190, %191 : vector<8x128xbf16>
    %193 = vector.shape_cast %192 : vector<8x128xbf16> to vector<4x2x128xbf16>
    %cst_161 = arith.constant dense<0xFF80> : vector<4x128xbf16>
    %194 = vector.multi_reduction <maximumf>, %193, %cst_161 [1] : vector<4x2x128xbf16> to vector<4x128xbf16>
    %195 = tpu.concatenate %168, %194, %168 in 0 : vector<1x128xbf16>, vector<4x128xbf16>, vector<1x128xbf16> -> vector<6x128xbf16>
    %c24_162 = arith.constant 24 : index
    %c0_163 = arith.constant 0 : index
    %196 = vector.load %arg16[%c24_162, %c0_163] : memref<42x128xbf16, #tpu.memory_space<vmem>>, vector<6x128xbf16>
    tpu.vector_store %arg16[%c24_162, %c0_163], %195 {strides = array<i32>} : memref<42x128xbf16, #tpu.memory_space<vmem>>, vector<6x128xbf16>,
    %cst_164 = arith.constant 0.000000e+00 : f32
    %197 = vector.broadcast %cst_164 : f32 to vector<24x256xf32>
    %c0_165 = arith.constant 0 : index
    %c0_166 = arith.constant 0 : index
    %198 = vector.load %arg16[%c0_165, %c0_166] : memref<42x128xbf16, #tpu.memory_space<vmem>>, vector<24x128xbf16>
    %c0_167 = arith.constant 0 : index
    %c0_168 = arith.constant 0 : index
    %199 = vector.load %arg8[%c0_167, %c0_168] : memref<1152x256xbf16, #tpu.memory_space<vmem>>, vector<128x256xbf16>
    %cst_169 = arith.constant dense<0.000000e+00> : vector<24x256xf32>
    %200 = tpu.matmul %198, %199, %cst_169 {dimension_numbers = #tpu.dot_dimension_numbers<[1], [0], [0], [1], [0, 0, 1, 1], [], []>} : vector<24x128xbf16>, vector<128x256xbf16>, vector<24x256xf32> -> vector<24x256xf32>
    %201 = arith.addf %197, %200 : vector<24x256xf32>
    %c1_170 = arith.constant 1 : index
    %c0_171 = arith.constant 0 : index
    %202 = vector.load %arg16[%c1_170, %c0_171] : memref<42x128xbf16, #tpu.memory_space<vmem>>, vector<24x128xbf16>
    %c128_172 = arith.constant 128 : index
    %c0_173 = arith.constant 0 : index
    %203 = vector.load %arg8[%c128_172, %c0_173] : memref<1152x256xbf16, #tpu.memory_space<vmem>>, vector<128x256xbf16>
    %cst_174 = arith.constant dense<0.000000e+00> : vector<24x256xf32>
    %204 = tpu.matmul %202, %203, %cst_174 {dimension_numbers = #tpu.dot_dimension_numbers<[1], [0], [0], [1], [0, 0, 1, 1], [], []>} : vector<24x128xbf16>, vector<128x256xbf16>, vector<24x256xf32> -> vector<24x256xf32>
    %205 = arith.addf %201, %204 : vector<24x256xf32>
    %c2_175 = arith.constant 2 : index
    %c0_176 = arith.constant 0 : index
    %206 = vector.load %arg16[%c2_175, %c0_176] : memref<42x128xbf16, #tpu.memory_space<vmem>>, vector<24x128xbf16>
    %c256_177 = arith.constant 256 : index
    %c0_178 = arith.constant 0 : index
    %207 = vector.load %arg8[%c256_177, %c0_178] : memref<1152x256xbf16, #tpu.memory_space<vmem>>, vector<128x256xbf16>
    %cst_179 = arith.constant dense<0.000000e+00> : vector<24x256xf32>
    %208 = tpu.matmul %206, %207, %cst_179 {dimension_numbers = #tpu.dot_dimension_numbers<[1], [0], [0], [1], [0, 0, 1, 1], [], []>} : vector<24x128xbf16>, vector<128x256xbf16>, vector<24x256xf32> -> vector<24x256xf32>
    %209 = arith.addf %205, %208 : vector<24x256xf32>
    %c6_180 = arith.constant 6 : index
    %c0_181 = arith.constant 0 : index
    %210 = vector.load %arg16[%c6_180, %c0_181] : memref<42x128xbf16, #tpu.memory_space<vmem>>, vector<24x128xbf16>
    %c384_182 = arith.constant 384 : index
    %c0_183 = arith.constant 0 : index
    %211 = vector.load %arg8[%c384_182, %c0_183] : memref<1152x256xbf16, #tpu.memory_space<vmem>>, vector<128x256xbf16>
    %cst_184 = arith.constant dense<0.000000e+00> : vector<24x256xf32>
    %212 = tpu.matmul %210, %211, %cst_184 {dimension_numbers = #tpu.dot_dimension_numbers<[1], [0], [0], [1], [0, 0, 1, 1], [], []>} : vector<24x128xbf16>, vector<128x256xbf16>, vector<24x256xf32> -> vector<24x256xf32>
    %213 = arith.addf %209, %212 : vector<24x256xf32>
    %c7 = arith.constant 7 : index
    %c0_185 = arith.constant 0 : index
    %214 = vector.load %arg16[%c7, %c0_185] : memref<42x128xbf16, #tpu.memory_space<vmem>>, vector<24x128xbf16>
    %c512_186 = arith.constant 512 : index
    %c0_187 = arith.constant 0 : index
    %215 = vector.load %arg8[%c512_186, %c0_187] : memref<1152x256xbf16, #tpu.memory_space<vmem>>, vector<128x256xbf16>
    %cst_188 = arith.constant dense<0.000000e+00> : vector<24x256xf32>
    %216 = tpu.matmul %214, %215, %cst_188 {dimension_numbers = #tpu.dot_dimension_numbers<[1], [0], [0], [1], [0, 0, 1, 1], [], []>} : vector<24x128xbf16>, vector<128x256xbf16>, vector<24x256xf32> -> vector<24x256xf32>
    %217 = arith.addf %213, %216 : vector<24x256xf32>
    %c8_189 = arith.constant 8 : index
    %c0_190 = arith.constant 0 : index
    %218 = vector.load %arg16[%c8_189, %c0_190] : memref<42x128xbf16, #tpu.memory_space<vmem>>, vector<24x128xbf16>
    %c640 = arith.constant 640 : index
    %c0_191 = arith.constant 0 : index
    %219 = vector.load %arg8[%c640, %c0_191] : memref<1152x256xbf16, #tpu.memory_space<vmem>>, vector<128x256xbf16>
    %cst_192 = arith.constant dense<0.000000e+00> : vector<24x256xf32>
    %220 = tpu.matmul %218, %219, %cst_192 {dimension_numbers = #tpu.dot_dimension_numbers<[1], [0], [0], [1], [0, 0, 1, 1], [], []>} : vector<24x128xbf16>, vector<128x256xbf16>, vector<24x256xf32> -> vector<24x256xf32>
    %221 = arith.addf %217, %220 : vector<24x256xf32>
    %c12_193 = arith.constant 12 : index
    %c0_194 = arith.constant 0 : index
    %222 = vector.load %arg16[%c12_193, %c0_194] : memref<42x128xbf16, #tpu.memory_space<vmem>>, vector<24x128xbf16>
    %c768 = arith.constant 768 : index
    %c0_195 = arith.constant 0 : index
    %223 = vector.load %arg8[%c768, %c0_195] : memref<1152x256xbf16, #tpu.memory_space<vmem>>, vector<128x256xbf16>
    %cst_196 = arith.constant dense<0.000000e+00> : vector<24x256xf32>
    %224 = tpu.matmul %222, %223, %cst_196 {dimension_numbers = #tpu.dot_dimension_numbers<[1], [0], [0], [1], [0, 0, 1, 1], [], []>} : vector<24x128xbf16>, vector<128x256xbf16>, vector<24x256xf32> -> vector<24x256xf32>
    %225 = arith.addf %221, %224 : vector<24x256xf32>
    %c13 = arith.constant 13 : index
    %c0_197 = arith.constant 0 : index
    %226 = vector.load %arg16[%c13, %c0_197] : memref<42x128xbf16, #tpu.memory_space<vmem>>, vector<24x128xbf16>
    %c896 = arith.constant 896 : index
    %c0_198 = arith.constant 0 : index
    %227 = vector.load %arg8[%c896, %c0_198] : memref<1152x256xbf16, #tpu.memory_space<vmem>>, vector<128x256xbf16>
    %cst_199 = arith.constant dense<0.000000e+00> : vector<24x256xf32>
    %228 = tpu.matmul %226, %227, %cst_199 {dimension_numbers = #tpu.dot_dimension_numbers<[1], [0], [0], [1], [0, 0, 1, 1], [], []>} : vector<24x128xbf16>, vector<128x256xbf16>, vector<24x256xf32> -> vector<24x256xf32>
    %229 = arith.addf %225, %228 : vector<24x256xf32>
    %c14 = arith.constant 14 : index
    %c0_200 = arith.constant 0 : index
    %230 = vector.load %arg16[%c14, %c0_200] : memref<42x128xbf16, #tpu.memory_space<vmem>>, vector<24x128xbf16>
    %c1024 = arith.constant 1024 : index
    %c0_201 = arith.constant 0 : index
    %231 = vector.load %arg8[%c1024, %c0_201] : memref<1152x256xbf16, #tpu.memory_space<vmem>>, vector<128x256xbf16>
    %cst_202 = arith.constant dense<0.000000e+00> : vector<24x256xf32>
    %232 = tpu.matmul %230, %231, %cst_202 {dimension_numbers = #tpu.dot_dimension_numbers<[1], [0], [0], [1], [0, 0, 1, 1], [], []>} : vector<24x128xbf16>, vector<128x256xbf16>, vector<24x256xf32> -> vector<24x256xf32>
    %233 = arith.addf %229, %232 : vector<24x256xf32>
    %c0_203 = arith.constant 0 : index
    %c0_204 = arith.constant 0 : index
    %234 = vector.load %arg9[%c0_203, %c0_204] : memref<1x256xf32, #tpu.memory_space<vmem>>, vector<1x256xf32>
    %235 = vector.broadcast %234 : vector<1x256xf32> to vector<24x256xf32>
    %236 = arith.mulf %233, %235 : vector<24x256xf32>
    %c0_205 = arith.constant 0 : index
    %c0_206 = arith.constant 0 : index
    %237 = vector.load %arg10[%c0_205, %c0_206] : memref<1x256xf32, #tpu.memory_space<vmem>>, vector<1x256xf32>
    %238 = vector.broadcast %237 : vector<1x256xf32> to vector<24x256xf32>
    %239 = arith.addf %236, %238 : vector<24x256xf32>
    %cst_207 = arith.constant 0.000000e+00 : f32
    %240 = vector.broadcast %cst_207 : f32 to vector<24x256xf32>
    %241 = arith.maximumf %239, %240 : vector<24x256xf32>
    %242 = arith.truncf %241 : vector<24x256xf32> to vector<24x256xbf16>
    %c0_208 = arith.constant 0 : index
    %c0_209 = arith.constant 0 : index
    %243 = vector.load %arg20[%c0_208, %c0_209] : memref<24x256xbf16, #tpu.memory_space<vmem>>, vector<24x256xbf16>
    tpu.vector_store %arg20[%c0_208, %c0_209], %242 {strides = array<i32>} : memref<24x256xbf16, #tpu.memory_space<vmem>>, vector<24x256xbf16>,
    %cst_210 = arith.constant 0.000000e+00 : bf16
    %244 = vector.broadcast %cst_210 : bf16 to vector<4x256xbf16>
    %c0_211 = arith.constant 0 : index
    %c0_212 = arith.constant 0 : index
    %245 = vector.load %arg17[%c0_211, %c0_212] : memref<20x256xbf16, #tpu.memory_space<vmem>>, vector<4x256xbf16>
    tpu.vector_store %arg17[%c0_211, %c0_212], %244 {strides = array<i32>} : memref<20x256xbf16, #tpu.memory_space<vmem>>, vector<4x256xbf16>,
    %cst_213 = arith.constant 0.000000e+00 : bf16
    %246 = vector.broadcast %cst_213 : bf16 to vector<8x256xbf16>
    %c12_214 = arith.constant 12 : index
    %c0_215 = arith.constant 0 : index
    %247 = vector.load %arg17[%c12_214, %c0_215] : memref<20x256xbf16, #tpu.memory_space<vmem>>, vector<8x256xbf16>
    tpu.vector_store %arg17[%c12_214, %c0_215], %246 {strides = array<i32>} : memref<20x256xbf16, #tpu.memory_space<vmem>>, vector<8x256xbf16>,
    %cst_216 = arith.constant 0.000000e+00 : bf16
    %248 = vector.broadcast %cst_216 : bf16 to vector<1x256xbf16>
    %c0_217 = arith.constant 0 : index
    %c0_218 = arith.constant 0 : index
    %249 = vector.load %arg20[%c0_217, %c0_218] : memref<24x256xbf16, #tpu.memory_space<vmem>>, vector<4x256xbf16>
    %c6_219 = arith.constant 6 : index
    %c0_220 = arith.constant 0 : index
    %250 = vector.load %arg20[%c6_219, %c0_220] : memref<24x256xbf16, #tpu.memory_space<vmem>>, vector<4x256xbf16>
    %251 = arith.maximumf %249, %250 : vector<4x256xbf16>
    %252 = vector.shape_cast %251 : vector<4x256xbf16> to vector<2x2x256xbf16>
    %cst_221 = arith.constant dense<0xFF80> : vector<2x256xbf16>
    %253 = vector.multi_reduction <maximumf>, %252, %cst_221 [1] : vector<2x2x256xbf16> to vector<2x256xbf16>
    %254 = tpu.concatenate %248, %253, %248 in 0 : vector<1x256xbf16>, vector<2x256xbf16>, vector<1x256xbf16> -> vector<4x256xbf16>
    %c4_222 = arith.constant 4 : index
    %c0_223 = arith.constant 0 : index
    %255 = vector.load %arg17[%c4_222, %c0_223] : memref<20x256xbf16, #tpu.memory_space<vmem>>, vector<4x256xbf16>
    tpu.vector_store %arg17[%c4_222, %c0_223], %254 {strides = array<i32>} : memref<20x256xbf16, #tpu.memory_space<vmem>>, vector<4x256xbf16>,
    %c12_224 = arith.constant 12 : index
    %c0_225 = arith.constant 0 : index
    %256 = vector.load %arg20[%c12_224, %c0_225] : memref<24x256xbf16, #tpu.memory_space<vmem>>, vector<4x256xbf16>
    %c18_226 = arith.constant 18 : index
    %c0_227 = arith.constant 0 : index
    %257 = vector.load %arg20[%c18_226, %c0_227] : memref<24x256xbf16, #tpu.memory_space<vmem>>, vector<4x256xbf16>
    %258 = arith.maximumf %256, %257 : vector<4x256xbf16>
    %259 = vector.shape_cast %258 : vector<4x256xbf16> to vector<2x2x256xbf16>
    %cst_228 = arith.constant dense<0xFF80> : vector<2x256xbf16>
    %260 = vector.multi_reduction <maximumf>, %259, %cst_228 [1] : vector<2x2x256xbf16> to vector<2x256xbf16>
    %261 = tpu.concatenate %248, %260, %248 in 0 : vector<1x256xbf16>, vector<2x256xbf16>, vector<1x256xbf16> -> vector<4x256xbf16>
    %c8_229 = arith.constant 8 : index
    %c0_230 = arith.constant 0 : index
    %262 = vector.load %arg17[%c8_229, %c0_230] : memref<20x256xbf16, #tpu.memory_space<vmem>>, vector<4x256xbf16>
    tpu.vector_store %arg17[%c8_229, %c0_230], %261 {strides = array<i32>} : memref<20x256xbf16, #tpu.memory_space<vmem>>, vector<4x256xbf16>,
    %cst_231 = arith.constant 0.000000e+00 : f32
    %263 = vector.broadcast %cst_231 : f32 to vector<8x32xf32>
    %c0_232 = arith.constant 0 : index
    %c0_233 = arith.constant 0 : index
    %264 = vector.load %arg17[%c0_232, %c0_233] : memref<20x256xbf16, #tpu.memory_space<vmem>>, vector<8x256xbf16>
    %c0_234 = arith.constant 0 : index
    %c0_235 = arith.constant 0 : index
    %265 = vector.load %arg11[%c0_234, %c0_235] : memref<2304x32xbf16, #tpu.memory_space<vmem>>, vector<256x32xbf16>
    %cst_236 = arith.constant dense<0.000000e+00> : vector<8x32xf32>
    %266 = tpu.matmul %264, %265, %cst_236 {dimension_numbers = #tpu.dot_dimension_numbers<[1], [0], [0], [1], [0, 0, 1, 1], [], []>} : vector<8x256xbf16>, vector<256x32xbf16>, vector<8x32xf32> -> vector<8x32xf32>
    %267 = arith.addf %263, %266 : vector<8x32xf32>
    %c1_237 = arith.constant 1 : index
    %c0_238 = arith.constant 0 : index
    %268 = vector.load %arg17[%c1_237, %c0_238] : memref<20x256xbf16, #tpu.memory_space<vmem>>, vector<8x256xbf16>
    %c256_239 = arith.constant 256 : index
    %c0_240 = arith.constant 0 : index
    %269 = vector.load %arg11[%c256_239, %c0_240] : memref<2304x32xbf16, #tpu.memory_space<vmem>>, vector<256x32xbf16>
    %cst_241 = arith.constant dense<0.000000e+00> : vector<8x32xf32>
    %270 = tpu.matmul %268, %269, %cst_241 {dimension_numbers = #tpu.dot_dimension_numbers<[1], [0], [0], [1], [0, 0, 1, 1], [], []>} : vector<8x256xbf16>, vector<256x32xbf16>, vector<8x32xf32> -> vector<8x32xf32>
    %271 = arith.addf %267, %270 : vector<8x32xf32>
    %c2_242 = arith.constant 2 : index
    %c0_243 = arith.constant 0 : index
    %272 = vector.load %arg17[%c2_242, %c0_243] : memref<20x256xbf16, #tpu.memory_space<vmem>>, vector<8x256xbf16>
    %c512_244 = arith.constant 512 : index
    %c0_245 = arith.constant 0 : index
    %273 = vector.load %arg11[%c512_244, %c0_245] : memref<2304x32xbf16, #tpu.memory_space<vmem>>, vector<256x32xbf16>
    %cst_246 = arith.constant dense<0.000000e+00> : vector<8x32xf32>
    %274 = tpu.matmul %272, %273, %cst_246 {dimension_numbers = #tpu.dot_dimension_numbers<[1], [0], [0], [1], [0, 0, 1, 1], [], []>} : vector<8x256xbf16>, vector<256x32xbf16>, vector<8x32xf32> -> vector<8x32xf32>
    %275 = arith.addf %271, %274 : vector<8x32xf32>
    %c4_247 = arith.constant 4 : index
    %c0_248 = arith.constant 0 : index
    %276 = vector.load %arg17[%c4_247, %c0_248] : memref<20x256xbf16, #tpu.memory_space<vmem>>, vector<8x256xbf16>
    %c768_249 = arith.constant 768 : index
    %c0_250 = arith.constant 0 : index
    %277 = vector.load %arg11[%c768_249, %c0_250] : memref<2304x32xbf16, #tpu.memory_space<vmem>>, vector<256x32xbf16>
    %cst_251 = arith.constant dense<0.000000e+00> : vector<8x32xf32>
    %278 = tpu.matmul %276, %277, %cst_251 {dimension_numbers = #tpu.dot_dimension_numbers<[1], [0], [0], [1], [0, 0, 1, 1], [], []>} : vector<8x256xbf16>, vector<256x32xbf16>, vector<8x32xf32> -> vector<8x32xf32>
    %279 = arith.addf %275, %278 : vector<8x32xf32>
    %c5 = arith.constant 5 : index
    %c0_252 = arith.constant 0 : index
    %280 = vector.load %arg17[%c5, %c0_252] : memref<20x256xbf16, #tpu.memory_space<vmem>>, vector<8x256xbf16>
    %c1024_253 = arith.constant 1024 : index
    %c0_254 = arith.constant 0 : index
    %281 = vector.load %arg11[%c1024_253, %c0_254] : memref<2304x32xbf16, #tpu.memory_space<vmem>>, vector<256x32xbf16>
    %cst_255 = arith.constant dense<0.000000e+00> : vector<8x32xf32>
    %282 = tpu.matmul %280, %281, %cst_255 {dimension_numbers = #tpu.dot_dimension_numbers<[1], [0], [0], [1], [0, 0, 1, 1], [], []>} : vector<8x256xbf16>, vector<256x32xbf16>, vector<8x32xf32> -> vector<8x32xf32>
    %283 = arith.addf %279, %282 : vector<8x32xf32>
    %c6_256 = arith.constant 6 : index
    %c0_257 = arith.constant 0 : index
    %284 = vector.load %arg17[%c6_256, %c0_257] : memref<20x256xbf16, #tpu.memory_space<vmem>>, vector<8x256xbf16>
    %c1280 = arith.constant 1280 : index
    %c0_258 = arith.constant 0 : index
    %285 = vector.load %arg11[%c1280, %c0_258] : memref<2304x32xbf16, #tpu.memory_space<vmem>>, vector<256x32xbf16>
    %cst_259 = arith.constant dense<0.000000e+00> : vector<8x32xf32>
    %286 = tpu.matmul %284, %285, %cst_259 {dimension_numbers = #tpu.dot_dimension_numbers<[1], [0], [0], [1], [0, 0, 1, 1], [], []>} : vector<8x256xbf16>, vector<256x32xbf16>, vector<8x32xf32> -> vector<8x32xf32>
    %287 = arith.addf %283, %286 : vector<8x32xf32>
    %c8_260 = arith.constant 8 : index
    %c0_261 = arith.constant 0 : index
    %288 = vector.load %arg17[%c8_260, %c0_261] : memref<20x256xbf16, #tpu.memory_space<vmem>>, vector<8x256xbf16>
    %c1536 = arith.constant 1536 : index
    %c0_262 = arith.constant 0 : index
    %289 = vector.load %arg11[%c1536, %c0_262] : memref<2304x32xbf16, #tpu.memory_space<vmem>>, vector<256x32xbf16>
    %cst_263 = arith.constant dense<0.000000e+00> : vector<8x32xf32>
    %290 = tpu.matmul %288, %289, %cst_263 {dimension_numbers = #tpu.dot_dimension_numbers<[1], [0], [0], [1], [0, 0, 1, 1], [], []>} : vector<8x256xbf16>, vector<256x32xbf16>, vector<8x32xf32> -> vector<8x32xf32>
    %291 = arith.addf %287, %290 : vector<8x32xf32>
    %c9 = arith.constant 9 : index
    %c0_264 = arith.constant 0 : index
    %292 = vector.load %arg17[%c9, %c0_264] : memref<20x256xbf16, #tpu.memory_space<vmem>>, vector<8x256xbf16>
    %c1792 = arith.constant 1792 : index
    %c0_265 = arith.constant 0 : index
    %293 = vector.load %arg11[%c1792, %c0_265] : memref<2304x32xbf16, #tpu.memory_space<vmem>>, vector<256x32xbf16>
    %cst_266 = arith.constant dense<0.000000e+00> : vector<8x32xf32>
    %294 = tpu.matmul %292, %293, %cst_266 {dimension_numbers = #tpu.dot_dimension_numbers<[1], [0], [0], [1], [0, 0, 1, 1], [], []>} : vector<8x256xbf16>, vector<256x32xbf16>, vector<8x32xf32> -> vector<8x32xf32>
    %295 = arith.addf %291, %294 : vector<8x32xf32>
    %c10_267 = arith.constant 10 : index
    %c0_268 = arith.constant 0 : index
    %296 = vector.load %arg17[%c10_267, %c0_268] : memref<20x256xbf16, #tpu.memory_space<vmem>>, vector<8x256xbf16>
    %c2048 = arith.constant 2048 : index
    %c0_269 = arith.constant 0 : index
    %297 = vector.load %arg11[%c2048, %c0_269] : memref<2304x32xbf16, #tpu.memory_space<vmem>>, vector<256x32xbf16>
    %cst_270 = arith.constant dense<0.000000e+00> : vector<8x32xf32>
    %298 = tpu.matmul %296, %297, %cst_270 {dimension_numbers = #tpu.dot_dimension_numbers<[1], [0], [0], [1], [0, 0, 1, 1], [], []>} : vector<8x256xbf16>, vector<256x32xbf16>, vector<8x32xf32> -> vector<8x32xf32>
    %299 = arith.addf %295, %298 : vector<8x32xf32>
    %c0_271 = arith.constant 0 : index
    %c0_272 = arith.constant 0 : index
    %300 = vector.load %arg12[%c0_271, %c0_272] : memref<1x32xf32, #tpu.memory_space<vmem>>, vector<1x32xf32>
    %301 = vector.broadcast %300 : vector<1x32xf32> to vector<8x32xf32>
    %302 = arith.mulf %299, %301 : vector<8x32xf32>
    %c0_273 = arith.constant 0 : index
    %c0_274 = arith.constant 0 : index
    %303 = vector.load %arg13[%c0_273, %c0_274] : memref<1x32xf32, #tpu.memory_space<vmem>>, vector<1x32xf32>
    %304 = vector.broadcast %303 : vector<1x32xf32> to vector<8x32xf32>
    %305 = arith.addf %302, %304 : vector<8x32xf32>
    %cst_275 = arith.constant 0.000000e+00 : f32
    %306 = vector.broadcast %cst_275 : f32 to vector<8x32xf32>
    %307 = arith.maximumf %305, %306 : vector<8x32xf32>
    %c0_276 = arith.constant 0 : index
    %c0_277 = arith.constant 0 : index
    %c0_278 = arith.constant 0 : index
    %308 = vector.load %arg14[%c0_276, %c0_277, %c0_278] : memref<1x8x32xf32, #tpu.memory_space<vmem>>, vector<1x8x32xf32>
    %309 = vector.shape_cast %308 : vector<1x8x32xf32> to vector<8x32xf32>
    %310 = vector.shape_cast %307 : vector<8x32xf32> to vector<1x8x32xf32>
    tpu.vector_store %arg14[%c0_276, %c0_277, %c0_278], %310 {strides = array<i32>} : memref<1x8x32xf32, #tpu.memory_space<vmem>>, vector<1x8x32xf32>,
    return
  }
  func.func @transform_0(%arg0: i32) -> (i32, i32, i32) {
    %c0_i32 = arith.constant 0 : i32
    %c0_i32_0 = arith.constant 0 : i32
    %c0_i32_1 = arith.constant 0 : i32
    return %arg0, %c0_i32, %c0_i32_0 : i32, i32, i32
  }
  func.func @transform_1(%arg0: i32) -> (i32, i32) {
    %c0_i32 = arith.constant 0 : i32
    %c0_i32_0 = arith.constant 0 : i32
    %c0_i32_1 = arith.constant 0 : i32
    return %c0_i32, %c0_i32_0 : i32, i32
  }
  func.func @transform_2(%arg0: i32) -> (i32, i32) {
    %c0_i32 = arith.constant 0 : i32
    %c0_i32_0 = arith.constant 0 : i32
    %c0_i32_1 = arith.constant 0 : i32
    return %c0_i32, %c0_i32_0 : i32, i32
  }
  func.func @transform_3(%arg0: i32) -> (i32, i32) {
    %c0_i32 = arith.constant 0 : i32
    %c0_i32_0 = arith.constant 0 : i32
    %c0_i32_1 = arith.constant 0 : i32
    return %c0_i32, %c0_i32_0 : i32, i32
  }
  func.func @transform_4(%arg0: i32) -> (i32, i32) {
    %c0_i32 = arith.constant 0 : i32
    %c0_i32_0 = arith.constant 0 : i32
    %c0_i32_1 = arith.constant 0 : i32
    return %c0_i32, %c0_i32_0 : i32, i32
  }
  func.func @transform_5(%arg0: i32) -> (i32, i32) {
    %c0_i32 = arith.constant 0 : i32
    %c0_i32_0 = arith.constant 0 : i32
    %c0_i32_1 = arith.constant 0 : i32
    return %c0_i32, %c0_i32_0 : i32, i32
  }
  func.func @transform_6(%arg0: i32) -> (i32, i32) {
    %c0_i32 = arith.constant 0 : i32
    %c0_i32_0 = arith.constant 0 : i32
    %c0_i32_1 = arith.constant 0 : i32
    return %c0_i32, %c0_i32_0 : i32, i32
  }
  func.func @transform_7(%arg0: i32) -> (i32, i32) {
    %c0_i32 = arith.constant 0 : i32
    %c0_i32_0 = arith.constant 0 : i32
    %c0_i32_1 = arith.constant 0 : i32
    return %c0_i32, %c0_i32_0 : i32, i32
  }
  func.func @transform_8(%arg0: i32) -> (i32, i32) {
    %c0_i32 = arith.constant 0 : i32
    %c0_i32_0 = arith.constant 0 : i32
    %c0_i32_1 = arith.constant 0 : i32
    return %c0_i32, %c0_i32_0 : i32, i32
  }
  func.func @transform_9(%arg0: i32) -> (i32, i32) {
    %c0_i32 = arith.constant 0 : i32
    %c0_i32_0 = arith.constant 0 : i32
    %c0_i32_1 = arith.constant 0 : i32
    return %c0_i32, %c0_i32_0 : i32, i32
  }
  func.func @transform_10(%arg0: i32) -> (i32, i32) {
    %c0_i32 = arith.constant 0 : i32
    %c0_i32_0 = arith.constant 0 : i32
    %c0_i32_1 = arith.constant 0 : i32
    return %c0_i32, %c0_i32_0 : i32, i32
  }
  func.func @transform_11(%arg0: i32) -> (i32, i32) {
    %c0_i32 = arith.constant 0 : i32
    %c0_i32_0 = arith.constant 0 : i32
    %c0_i32_1 = arith.constant 0 : i32
    return %c0_i32, %c0_i32_0 : i32, i32
  }
  func.func @transform_12(%arg0: i32) -> (i32, i32) {
    %c0_i32 = arith.constant 0 : i32
    %c0_i32_0 = arith.constant 0 : i32
    %c0_i32_1 = arith.constant 0 : i32
    return %c0_i32, %c0_i32_0 : i32, i32
  }
  func.func @transform_13(%arg0: i32) -> (i32, i32, i32) {
    %c0_i32 = arith.constant 0 : i32
    %c0_i32_0 = arith.constant 0 : i32
    %c0_i32_1 = arith.constant 0 : i32
    return %arg0, %c0_i32, %c0_i32_0 : i32, i32, i32
  }
}

</mosaic_0001>

<bundles_post_ra>
// kernel: cnn_encoder2.1
= control target key start
LH: loop header
LB: loop body
LE: loop exit
PB: predicated region body
PF: predicated region fallthrough
CT: control target
= control target key end

     0   :  { %s14319_s25 = smov 0   ;;  %s17709_s0 = inlined_call_operand.vmem [shape: bf16[2,342,4], index: 0, kind: input, shape index: {}]   ;;  %s17710_s1 = inlined_call_operand.vmem [shape: bf16[36,64], index: 1, kind: input, shape index: {}]   ;;  %s17711_s2 = inlined_call_operand.vmem [shape: f32[1,64], index: 2, kind: input, shape index: {}]   ;;  %s17712_s3 = inlined_call_operand.vmem [shape: f32[1,64], index: 3, kind: input, shape index: {}]   ;;  %s17713_s4 = inlined_call_operand.vmem [shape: bf16[576,128], index: 4, kind: input, shape index: {}]   ;;  %s17714_s5 = inlined_call_operand.vmem [shape: f32[1,128], index: 5, kind: input, shape index: {}]   ;;  %s17715_s6 = inlined_call_operand.vmem [shape: f32[1,128], index: 6, kind: input, shape index: {}]   ;;  %s17716_s7 = inlined_call_operand.vmem [shape: bf16[1152,256], index: 7, kind: input, shape index: {}]   ;;  %s17717_s8 = inlined_call_operand.vmem [shape: f32[1,256], index: 8, kind: input, shape index: {}]   ;;  %s17718_s9 = inlined_call_operand.vmem [shape: f32[1,256], index: 9, kind: input, shape index: {}]   ;;  %s17719_s10 = inlined_call_operand.vmem [shape: bf16[2304,32], index: 10, kind: input, shape index: {}]   ;;  %s17720_s11 = inlined_call_operand.vmem [shape: f32[1,32], index: 11, kind: input, shape index: {}]   ;;  %s17721_s12 = inlined_call_operand.vmem [shape: f32[1,32], index: 12, kind: input, shape index: {}]   ;;  %s17722_s13 = inlined_call_operand.vmem [shape: f32[2,8,32], index: 13, kind: output, shape index: {}]  }
   0x1 LB: > { %s11441_s26 = sadd.s32 4294967295, %s14243_s25   ;;  %p11445_p0 = scmp.ge.s32.totalorder %s14243_s25, 1  ;;  %s14243_s25 = sphi %s14319_s25, %s23_s25  }
   0x2   : > { %p387_p1 = scmp.lt.s32.totalorder %s14243_s25, 3 }
   0x4   : > { %p388_p2 = pnand %p11445_p0, %p387_p1 }
   0x6   : > { %391 = sbr.rel (%p388_p2) target bundleno = 2691 (0xa83), region = 72 }
   0xd   : > { %v13716_v0 = vld [vmem:[%s17710_s1] ss:$0 sps:$4 sm:$0xcc]   ;;  %vm17750_vm0 = vcmask 1041408   ;;  %p430_p3 = scmp.lt.s32.totalorder %s11441_s26, 1  ;;  %vm726_vm2 = vcmask 31744  }
   0xe   : > { %v725_v1 = vrot.slane %v13716_v0, 2  ;;  %v477_v2 = vld [vmem:[%s17710_s1] sm:$0x3]  ;;  %vm17737_vm1 = vsmask.f32 7424  ;;  %vm17746_vm3 = vcmask 1046528  }
   0xf   : > { %s17950_s26 = smov (!%p430_p3, %s11441_s26), 1  ;;  %v999_v25 = vsel %vm17750_vm0, %v477_v2, 0  ;;  %v14386_v34 = vld [vmem:[%s17710_s1 + $0x4] sm:$0x3]  ;;  %vm17732_vm4 = vsmask.f32 6400 }
  0x10   : > { %13693 = vmatprep.subr.msk.bf16.mxu0 %vm17750_vm0, %v725_v1  ;;  %v783_v3 = vsel %vm17750_vm0, %v725_v1, 0  ;;  %13694 = vmatprep.subr.msk.bf16.mxu1 %vm17750_vm0, %v725_v1  ;;  %s13703_s14 = smul.u32 172, %s17950_s26  ;;  %vm17733_vm5 = vcmask 1045504   ;;  %vm17731_vm6 = vsmask.f32 5376  ;;  %vm17745_vm7 = vcmask 1044480  }
  0x11   : > { %12586 = vmatpush3.bf16.msra.mxu0 %v783_v3  ;;  %13180 = vmatpush3.bf16.msra.mxu1 %v783_v3  ;;  %vm17736_vm8 = vcmask 523264   ;;  %vm17749_vm9 = vcmask 516096   ;;  %vm17747_vm10 = vcmask 1042434   ;;  %vm17738_vm11 = vcmask 1043459   ;;  %s11447_s27 = sshll.u32 %s17950_s26, 3 }
  0x12   : > { %13695 = vmatprep.subr.msk.bf16.mxu0 %vm17750_vm0, %v477_v2  ;;  %s14343_s17 = scalar_lea.vmem %s17709_s0, %s13703_s14  ;;  %vm4250_vm12 = vcmask 1044484   ;;  %vm4252_vm13 = vcmask 1045509   ;;  %vm4254_vm14 = vcmask 1046534   ;;  %vm4256_vm15 = vcmask 1047559   ;;  %s438_s30 = scalar_lea.vmem %s17722_s13, %s11447_s27 }
  0x13   : > { %v441_v4 = vld [vmem:[%s14343_s17] sm:$0xf]  ;;  %v14347_v5 = vld [vmem:[%s14343_s17 + $0x4] sm:$0xf]  ;;  %v14353_v7 = vld [vmem:[%s14343_s17 + $0x8] sm:$0xff]  }
  0x14   : > { %v14350_v6 = vcombine.low %v441_v4, %v14347_v5  ;;  %v14356_v8 = vld [vmem:[%s14343_s17 + $0x10] sm:$0xff]   ;;  %v582_v11 = vshll.u32 %v14353_v7, 16  ;;  %v586_v12 = vshrl.u32 %v14353_v7, 16  ;;  %v14364_v14 = vld [vmem:[%s14343_s17 + $0x18] sm:$0xff]   ;;  %v14368_v16 = vld [vmem:[%s14343_s17 + $0x20] sm:$0xff]   ;;  %v1185_v3 = vrot.slane %v14353_v7, 1 }
  0x15   : > { %v590_v13 = vshll.u32 %v14356_v8, 16  ;;  %v594_v15 = vshrl.u32 %v14356_v8, 16  ;;  %v598_v20 = vshll.u32 %v14364_v14, 16  ;;  %v606_v23 = vshll.u32 %v14368_v16, 16  ;;  %v14373_v24 = vld [vmem:[%s14343_s17 + $0x28] sm:$0xff]   ;;  %v14390_v36 = vld [vmem:[%s14343_s17 + $0x30] sm:$0xff]  }
  0x16   : > { %v575_v9 = vshrl.u32 %v14350_v6, 16  ;;  %v577_v10 = vshll.u32 %v14350_v6, 16  ;;  %v584_v18 = vrot.slane %v582_v11, 1  ;;  %v602_v28 = vshrl.u32 %v14364_v14, 16  ;;  %v14393_v37 = vld [vmem:[%s14343_s17 + $0x38] sm:$0xff]   ;;  %v14397_v41 = vld [vmem:[%s14343_s17 + $0x40] sm:$0xff]  }
  0x17   : > { %v592_v19 = vrot.slane %v590_v13, 1  ;;  %v600_v27 = vrot.slane %v598_v20, 1  ;;  %v610_v31 = vshrl.u32 %v14368_v16, 16  ;;  %v614_v32 = vshll.u32 %v14373_v24, 16  ;;  %v14406_v46 = vld [vmem:[%s14343_s17 + $0x48] sm:$0xff]   ;;  %v14409_v47 = vld [vmem:[%s14343_s17 + $0x50] sm:$0xff]  }
  0x18   : > { %v579_v17 = vrot.slane %v577_v10, 1  ;;  %v588_v22 = vor.u32 %v586_v12, %v584_v18  ;;  %v608_v35 = vrot.slane %v606_v23, 1  ;;  %v622_v42 = vshll.u32 %v14390_v36, 16  ;;  %v14415_v51 = vld [vmem:[%s14343_s17 + $0x58] sm:$0xff]   ;;  %v1178_v63 = vld [vmem:[%s14343_s17] sm:$0xe] }
  0x19   : > { %v596_v26 = vor.u32 %v594_v15, %v592_v19  ;;  %v604_v38 = vor.u32 %v602_v28, %v600_v27  ;;  %v616_v40 = vrot.slane %v614_v32, 1  ;;  %v630_v43 = vshll.u32 %v14393_v37, 16  ;;  %v14428_v1 = vld [vmem:[%s14343_s17 + $0x60] sm:$0xff]   ;;  %v14435_v12 = vld [vmem:[%s14343_s17 + $0x68] sm:$0xff]   ;;  %v14456_v32 = vld [vmem:[%s14343_s17 + $0x70] sm:$0xff]  }
  0x1a   : > { %v580_v21 = vor.u32 %v579_v17, %v575_v9  ;;  %v593_v30 = vsel %vm17737_vm1, %v588_v22, %v592_v19  ;;  %v612_v39 = vor.u32 %v610_v31, %v608_v35  ;;  %v618_v45 = vshrl.u32 %v14373_v24, 16 }
  0x1b   : > { %v601_v33 = vsel %vm17737_vm1, %v596_v26, %v600_v27  ;;  %v609_v44 = vsel %vm17737_vm1, %v604_v38, %v608_v35  ;;  %v626_v49 = vshrl.u32 %v14390_v36, 16  ;;  %v638_v50 = vshll.u32 %v14397_v41, 16 }
  0x1c   : > { %v585_v29 = vsel %vm17737_vm1, %v580_v21, %v584_v18  ;;  %v617_v48 = vsel %vm17737_vm1, %v612_v39, %v616_v40  ;;  %v624_v52 = vrot.slane %v622_v42, 1  ;;  %v632_v53 = vrot.slane %v630_v43, 1 }
  0x1d   : > { %12587 = vmatprep.mubr.msk.bf16.mxu0 %vm726_vm2, %v585_v29  ;;  %v634_v54 = vshrl.u32 %v14393_v37, 16  ;;  %v642_v55 = vshrl.u32 %v14397_v41, 16  ;;  %v620_v56 = vor.u32 %v618_v45, %v616_v40  ;;  %v646_v57 = vshll.u32 %v14406_v46, 16 }
  0x1e   : > { %12588 = vmatmul.mubr.msk.bf16.vlgmr.msra.gmra.mrb[0].mxu0 %vm726_vm2, %v593_v30  ;;  %v654_v58 = vshll.u32 %v14409_v47, 16  ;;  %v628_v59 = vor.u32 %v626_v49, %v624_v52  ;;  %v640_v60 = vrot.slane %v638_v50, 1  ;;  %v650_v61 = vshrl.u32 %v14406_v46, 16  ;;  %v13736_v49 = vld [vmem:[%s17710_s1 + $0x4] ss:$0 sps:$4 sm:$0xcc]  }
  0x1f   : > { %12624 = vmatpush3.bf16.msra.mxu0 %v999_v25  ;;  %12591 = vmatprep.mubr.msk.bf16.mxu0 %vm726_vm2, %v601_v33  ;;  %v662_v62 = vshll.u32 %v14415_v51, 16  ;;  %v658_v0 = vshrl.u32 %v14409_v47, 16  ;;  %v11504_v2 = vcombine.low %v1178_v63, %v14347_v5  ;;  %v1187_v4 = vrot.slane %v14356_v8, 1 }
  0x20   : > { %13696 = vmatprep.subr.msk.bf16.mxu0 %vm17750_vm0, %v14386_v34  ;;  %v625_v9 = vsel %vm17737_vm1, %v620_v56, %v624_v52  ;;  %v648_v10 = vrot.slane %v646_v57, 1  ;;  %v656_v11 = vrot.slane %v654_v58, 1  ;;  %v633_v13 = vsel %vm17737_vm1, %v628_v59, %v632_v53  ;;  %v14523_v56 = vld [vmem:[%s17710_s1 + $0x8] sm:$0x3] }
  0x21   : > { %v666_v15 = vshrl.u32 %v14415_v51, 16  ;;  %v1184_v17 = vrot.slane %v11504_v2, 1  ;;  %v14442_v18 = vsel %vm17746_vm3, %v1185_v3, %v1187_v4  ;;  %v664_v5 = vrot.slane %v662_v62, 1 }
  0x22   : > { %v670_v19 = vshll.u32 %v14428_v1, 16  ;;  %v674_v20 = vshrl.u32 %v14428_v1, 16  ;;  %v636_v22 = vor.u32 %v634_v54, %v632_v53  ;;  %v678_v23 = vshll.u32 %v14435_v12, 16 }
  0x23   : > { %v1186_v21 = vsel %vm17746_vm3, %v1184_v17, %v1185_v3  ;;  %v644_v25 = vor.u32 %v642_v55, %v640_v60  ;;  %v682_v28 = vshrl.u32 %v14435_v12, 16  ;;  %v652_v29 = vor.u32 %v650_v61, %v648_v10  ;;  %v13737_v17 = vld [vmem:[%s14343_s17 + $0x90] ss:$0 sps:$4 sm:$0x11]  }
  0x24   : > { %v641_v26 = vsel %vm17737_vm1, %v636_v22, %v640_v60  ;;  %v672_v30 = vrot.slane %v670_v19, 1  ;;  %v660_v31 = vor.u32 %v658_v0, %v656_v11  ;;  %v686_v38 = vshll.u32 %v14456_v32, 16 }
  0x25   : > { %v649_v27 = vsel %vm17737_vm1, %v644_v25, %v648_v10  ;;  %v657_v33 = vsel %vm17737_vm1, %v652_v29, %v656_v11  ;;  %v668_v39 = vor.u32 %v666_v15, %v664_v5  ;;  %v680_v40 = vrot.slane %v678_v23, 1  ;;  %v1491_v15 = vld [vmem:[%s14343_s17 + $0x8] sm:$0xe]  ;;  %v14596_v29 = vld [vmem:[%s17710_s1 + $0x8] ss:$0 sps:$4 sm:$0xcc]  }
  0x26   : > { %12592 = vmatmul.mubr.msk.bf16.gmra.mrb[4].mxu0 %vm726_vm2, %v609_v44  ;;  %v665_v35 = vsel %vm17737_vm1, %v660_v31, %v664_v5  ;;  %v676_v42 = vor.u32 %v674_v20, %v672_v30  ;;  %v1276_v52 = vsel %vm17750_vm0, %v14386_v34, 0  ;;  %v1662_v53 = vrot.slane %v13736_v49, 2  ;;  %v14513_v34 = vld [vmem:[%s14343_s17 + $0x88] sm:$0xff]   ;;  %v14575_v5 = vld [vmem:[%s14343_s17 + $0x10] sm:$0xff]   ;;  %v14625_v49 = vld [vmem:[%s14343_s17 + $0x40] sm:$0xff]  }
  0x27   : > { %12595 = vmatprep.mubr.msk.bf16.mxu0 %vm726_vm2, %v617_v48  ;;  %v673_v43 = vsel %vm17737_vm1, %v668_v39, %v672_v30  ;;  %v684_v45 = vor.u32 %v682_v28, %v680_v40  ;;  %v14467_v48 = vrot.slane %v686_v38, 1  ;;  %v1189_v54 = vrot.slane %v14364_v14, 1  ;;  %v14610_v39 = vld [vmem:[%s14343_s17 + $0x30] sm:$0xff]  }
  0x28   : > { %v681_v44 = vsel %vm17737_vm1, %v676_v42, %v680_v40  ;;  %v1718_v55 = vsel %vm17750_vm0, %v1662_v53, 0  ;;  %v1191_v58 = vrot.slane %v14368_v16, 1  ;;  %v1197_v61 = vrot.slane %v14393_v37, 1 }
  0x29   : > { %v689_v50 = vsel %vm17737_vm1, %v684_v45, %v14467_v48  ;;  %v1190_v57 = vsel %vm17746_vm3, %v1187_v4, %v1189_v54  ;;  %v1201_v63 = vrot.slane %v14406_v46, 1  ;;  %v1219_v22 = vrot.slane %v13737_v17, 1  ;;  %v14622_v45 = vld [vmem:[%s14343_s17 + $0x38] sm:$0xff]  }
  0x2a   : > { %v1192_v59 = vsel %vm17746_vm3, %v1189_v54, %v1191_v58  ;;  %v1623_v25 = vrot.slane %v14575_v5, 1  ;;  %v2425_v38 = vrot.slane %v14596_v29, 2  ;;  %v1951_v17 = vshll.u32 %v14575_v5, 16 }
  0x2b   : > { %v1996_v29 = vshll.u32 %v14622_v45, 16 }
  0x2e   : > { %12596 = vmatmul.mubr.msk.bf16.gmra.mrb[8].mxu0 %vm726_vm2, %v625_v9  ;;  %v1211_v9 = vrot.slane %v14456_v32, 1 }
  0x2f   : > { %12599 = vmatprep.mubr.msk.bf16.mxu0 %vm726_vm2, %v633_v13 }
  0x36   : > { %12600 = vmatmul.mubr.msk.bf16.gmra.mrb[12].mxu0 %vm726_vm2, %v641_v26  ;;  %v14587_v26 = vld [vmem:[%s14343_s17 + $0x18] sm:$0xff]  }
  0x37   : > { %12603 = vmatprep.mubr.msk.bf16.mxu0 %vm726_vm2, %v649_v27  ;;  %v14590_v27 = vld [vmem:[%s14343_s17 + $0x20] sm:$0xff]   ;;  %v1625_v31 = vrot.slane %v14587_v26, 1 }
  0x39   : > { %v1626_v40 = vsel %vm17746_vm3, %v1623_v25, %v1625_v31 }
  0x3e   : > { %12604 = vmatmul.mubr.msk.bf16.gmra.mrb[16].mxu0 %vm726_vm2, %v657_v33  ;;  %v1627_v33 = vrot.slane %v14590_v27, 1 }
  0x3f   : > { %12607 = vmatprep.mubr.msk.bf16.mxu0 %vm726_vm2, %v665_v35  ;;  %v14606_v35 = vld [vmem:[%s14343_s17 + $0x28] sm:$0xff]  }
  0x40   : > { %v1628_v42 = vsel %vm17746_vm3, %v1625_v31, %v1627_v33 }
  0x46   : > { %12608 = vmatmul.mubr.msk.bf16.gmra.mrb[20].mxu0 %vm726_vm2, %v673_v43  ;;  %v1629_v43 = vrot.slane %v14606_v35, 1 }
  0x47   : > { %12611 = vmatprep.mubr.msk.bf16.mxu0 %vm726_vm2, %v681_v44  ;;  %v1631_v44 = vrot.slane %v14610_v39, 1 }
  0x4e   : > { %12612 = vmatmul.mubr.msk.bf16.gmra.mrb[24].mxu0 %vm726_vm2, %v689_v50  ;;  %v1630_v50 = vsel %vm17746_vm3, %v1627_v33, %v1629_v43 }
  0x4f   : > { %12625 = vmatprep.mubr.msk.bf16.mxu0 %vm726_vm2, %v14350_v6  ;;  %v13732_v6 = vld [vmem:[%s14343_s17 + $0x78] sm:$0xff]  }
  0x50   : > { %v1213_v10 = vrot.slane %v13732_v6, 1 }
  0x52   : > { %v1214_v13 = vsel %vm17746_vm3, %v1211_v9, %v1213_v10 }
  0x56   : > { %12626 = vmatmul.mubr.msk.bf16.vlgmr.msra.gmra.mrb[0].mxu0 %vm726_vm2, %v14353_v7  ;;  %v13733_v7 = vld [vmem:[%s14343_s17 + $0x80] sm:$0xff]  }
  0x57   : > { %12662 = vmatpush3.bf16.msra.mxu0 %v1276_v52  ;;  %12629 = vmatprep.mubr.msk.bf16.mxu0 %vm726_vm2, %v14356_v8  ;;  %v1195_v8 = vrot.slane %v14390_v36, 1  ;;  %v1632_v52 = vsel %vm17746_vm3, %v1629_v43, %v1631_v44  ;;  %v1969_v43 = vshll.u32 %v14590_v27, 16 }
  0x58   : > { %13697 = vmatprep.subr.msk.bf16.mxu0 %vm17750_vm0, %v1662_v53  ;;  %v1633_v53 = vrot.slane %v14622_v45, 1 }
  0x5a   : > { %v1634_v54 = vsel %vm17746_vm3, %v1631_v44, %v1633_v53 }
  0x5e   : > { %12630 = vmatmul.mubr.msk.bf16.gmra.mrb[4].mxu0 %vm726_vm2, %v14364_v14  ;;  %v1193_v14 = vrot.slane %v14373_v24, 1 }
  0x5f   : > { %12633 = vmatprep.mubr.msk.bf16.mxu0 %vm726_vm2, %v14368_v16  ;;  %v1198_v16 = vsel %vm17746_vm3, %v1195_v8, %v1197_v61 }
  0x60   : > { %v1194_v60 = vsel %vm17746_vm3, %v1191_v58, %v1193_v14  ;;  %v1196_v62 = vsel %vm17746_vm3, %v1193_v14, %v1195_v8  ;;  %v14646_v58 = vld [vmem:[%s14343_s17 + $0x58] sm:$0xff]   ;;  %v14649_v14 = vld [vmem:[%s14343_s17 + $0x60] sm:$0xff]  }
  0x61   : > { %v1641_v8 = vrot.slane %v14646_v58, 1 }
  0x66   : > { %12634 = vmatmul.mubr.msk.bf16.gmra.mrb[8].mxu0 %vm726_vm2, %v14373_v24  ;;  %v1199_v24 = vrot.slane %v14397_v41, 1 }
  0x67   : > { %12637 = vmatprep.mubr.msk.bf16.mxu0 %vm726_vm2, %v14390_v36  ;;  %v1203_v36 = vrot.slane %v14409_v47, 1 }
  0x68   : > { %v1200_v0 = vsel %vm17746_vm3, %v1197_v61, %v1199_v24  ;;  %v1202_v2 = vsel %vm17746_vm3, %v1199_v24, %v1201_v63  ;;  %v1643_v61 = vrot.slane %v14649_v14, 1 }
  0x69   : > { %v1204_v3 = vsel %vm17746_vm3, %v1201_v63, %v1203_v36  ;;  %v14663_v63 = vld [vmem:[%s14343_s17 + $0x70] sm:$0xff]  }
  0x6a   : > { %v1644_v24 = vsel %vm17746_vm3, %v1641_v8, %v1643_v61 }
  0x6e   : > { %12638 = vmatmul.mubr.msk.bf16.gmra.mrb[12].mxu0 %vm726_vm2, %v14393_v37  ;;  %v1205_v37 = vrot.slane %v14415_v51, 1 }
  0x6f   : > { %12641 = vmatprep.mubr.msk.bf16.mxu0 %vm726_vm2, %v14397_v41  ;;  %v1207_v41 = vrot.slane %v14428_v1, 1 }
  0x70   : > { %v1206_v4 = vsel %vm17746_vm3, %v1203_v36, %v1205_v37 }
  0x76   : > { %12642 = vmatmul.mubr.msk.bf16.gmra.mrb[16].mxu0 %vm726_vm2, %v14406_v46  ;;  %v1209_v46 = vrot.slane %v14435_v12, 1 }
  0x77   : > { %12645 = vmatprep.mubr.msk.bf16.mxu0 %vm726_vm2, %v14409_v47  ;;  %v1208_v47 = vsel %vm17746_vm3, %v1205_v37, %v1207_v41  ;;  %v14671_v37 = vld [vmem:[%s14343_s17 + $0x78] sm:$0xff]  }
  0x78   : > { %v1212_v11 = vsel %vm17746_vm3, %v1209_v46, %v1211_v9  ;;  %v14686_v9 = vld [vmem:[%s14343_s17 + $0x90] sm:$0xff]  }
  0x7e   : > { %12646 = vmatmul.mubr.msk.bf16.gmra.mrb[20].mxu0 %vm726_vm2, %v14415_v51  ;;  %v1210_v51 = vsel %vm17746_vm3, %v1207_v41, %v1209_v46  ;;  %v1649_v41 = vrot.slane %v14671_v37, 1 }
  0x7f   : > { %12649 = vmatprep.mubr.msk.bf16.mxu0 %vm726_vm2, %v14428_v1  ;;  %v1215_v1 = vrot.slane %v13733_v7, 1 }
  0x81   : > { %v1216_v19 = vsel %vm17746_vm3, %v1213_v10, %v1215_v1 }
  0x86   : > { %12650 = vmatmul.mubr.msk.bf16.gmra.mrb[24].mxu0 %vm726_vm2, %v14435_v12  ;;  %v1217_v12 = vrot.slane %v14513_v34, 1 }
  0x87   : > { %12653 = vmatprep.mubr.msk.bf16.mxu0 %vm726_vm2, %v14456_v32  ;;  %v2164_v32 = vsel %vm17750_vm0, %v14523_v56, 0 }
  0x88   : > { %v1218_v20 = vsel %vm17746_vm3, %v1215_v1, %v1217_v12  ;;  %v1220_v28 = vsel %vm17746_vm3, %v1217_v12, %v1219_v22  ;;  %v13756_v22 = vld [vmem:[%s14343_s17 + $0x98] ss:$0 sps:$4 sm:$0x11]  }
  0x89   : > { %v1657_v31 = vrot.slane %v13756_v22, 1 }
  0x8e   : > { %12654 = vmatmul.mubr.msk.bf16.gmra.mrb[28].mxu0 %vm726_vm2, %v13732_v6  ;;  %v1635_v6 = vrot.slane %v14625_v49, 1 }
  0x8f   : > { %12657 = vmatprep.mubr.msk.bf16.mxu0 %vm726_vm2, %v13733_v7  ;;  %v14634_v7 = vld [vmem:[%s14343_s17 + $0x48] sm:$0xff]  }
  0x90   : > { %v2011_v22 = vshrl.u32 %v14634_v7, 16 }
  0x96   : > { %12658 = vmatmul.mubr.msk.bf16.gmra.mrb[32].mxu0 %vm726_vm2, %v14513_v34  ;;  %v14637_v34 = vld [vmem:[%s14343_s17 + $0x50] sm:$0xff]  }
  0x97   : > { %12663 = vmatprep.mubr.msk.bf16.mxu0 %vm726_vm2, %v1186_v21 }
  0x9e   : > { %12664 = vmatmul.mubr.msk.bf16.vlgmr.msra.gmra.mrb[0].mxu0 %vm726_vm2, %v14442_v18  ;;  %v14572_v18 = vld [vmem:[%s14343_s17 + $0xc] sm:$0xf] }
  0x9f   : > { %12700 = vmatpush3.bf16.msra.mxu0 %v1718_v55  ;;  %12667 = vmatprep.mubr.msk.bf16.mxu0 %vm726_vm2, %v1190_v57  ;;  %v14580_v21 = vcombine.low %v1491_v15, %v14572_v18  ;;  %v1636_v55 = vsel %vm17746_vm3, %v1633_v53, %v1635_v6  ;;  %v1639_v57 = vrot.slane %v14637_v34, 1  ;;  %v1948_v15 = vshrl.u32 %v14575_v5, 16 }
  0xa0   : > { %13698 = vmatprep.subr.msk.bf16.mxu0 %vm17750_vm0, %v14523_v56  ;;  %v1637_v56 = vrot.slane %v14634_v7, 1 }
  0xa1   : > { %v1622_v23 = vrot.slane %v14580_v21, 1  ;;  %v1940_v1 = vshrl.u32 %v14580_v21, 16  ;;  %v1943_v12 = vshll.u32 %v14580_v21, 16  ;;  %v1957_v21 = vshrl.u32 %v14587_v26, 16 }
  0xa3   : > { %v1624_v30 = vsel %vm17746_vm3, %v1622_v23, %v1623_v25  ;;  %v1942_v23 = vrot.slane %v1940_v1, 1  ;;  %v1945_v25 = vrot.slane %v1943_v12, 2  ;;  %v1998_v12 = vrot.slane %v1996_v29, 2 }
  0xa5   : > { %v1946_v33 = vor.u32 %v1945_v25, %v1942_v23  ;;  %v2014_v23 = vshll.u32 %v14634_v7, 16 }
  0xa6   : > { %12668 = vmatmul.mubr.msk.bf16.gmra.mrb[4].mxu0 %vm726_vm2, %v1192_v59  ;;  %v1638_v59 = vsel %vm17746_vm3, %v1635_v6, %v1637_v56 }
  0xa7   : > { %12671 = vmatprep.mubr.msk.bf16.mxu0 %vm726_vm2, %v1194_v60  ;;  %v1640_v60 = vsel %vm17746_vm3, %v1637_v56, %v1639_v57  ;;  %v1975_v56 = vshrl.u32 %v14606_v35, 16 }
  0xae   : > { %12672 = vmatmul.mubr.msk.bf16.gmra.mrb[8].mxu0 %vm726_vm2, %v1196_v62  ;;  %v1642_v62 = vsel %vm17746_vm3, %v1639_v57, %v1641_v8  ;;  %v1978_v57 = vshll.u32 %v14606_v35, 16  ;;  %v1987_v8 = vshll.u32 %v14610_v39, 16 }
  0xaf   : > { %12675 = vmatprep.mubr.msk.bf16.mxu0 %vm726_vm2, %v1198_v16  ;;  %v14659_v16 = vld [vmem:[%s14343_s17 + $0x68] sm:$0xff]  }
  0xb6   : > { %12676 = vmatmul.mubr.msk.bf16.gmra.mrb[12].mxu0 %vm726_vm2, %v1200_v0  ;;  %v1645_v0 = vrot.slane %v14659_v16, 1 }
  0xb7   : > { %12679 = vmatprep.mubr.msk.bf16.mxu0 %vm726_vm2, %v1202_v2  ;;  %v1647_v2 = vrot.slane %v14663_v63, 1 }
  0xb8   : > { %v1646_v36 = vsel %vm17746_vm3, %v1643_v61, %v1645_v0 }
  0xbe   : > { %12680 = vmatmul.mubr.msk.bf16.gmra.mrb[16].mxu0 %vm726_vm2, %v1204_v3  ;;  %v1648_v3 = vsel %vm17746_vm3, %v1645_v0, %v1647_v2  ;;  %v2481_v0 = vsel %vm17750_vm0, %v2425_v38, 0 }
  0xbf   : > { %12683 = vmatprep.mubr.msk.bf16.mxu0 %vm726_vm2, %v1206_v4  ;;  %v14675_v4 = vld [vmem:[%s14343_s17 + $0x80] sm:$0xff]  }
  0xc0   : > { %v1651_v46 = vrot.slane %v14675_v4, 1 }
  0xc2   : > { %v1652_v10 = vsel %vm17746_vm3, %v1649_v41, %v1651_v46 }
  0xc6   : > { %12684 = vmatmul.mubr.msk.bf16.gmra.mrb[20].mxu0 %vm726_vm2, %v1208_v47  ;;  %v1650_v47 = vsel %vm17746_vm3, %v1647_v2, %v1649_v41  ;;  %v14722_v41 = vld [vmem:[%s17710_s1 + $0xc] sm:$0x3] }
  0xc7   : > { %12687 = vmatprep.mubr.msk.bf16.mxu0 %vm726_vm2, %v1210_v51  ;;  %v14683_v51 = vld [vmem:[%s14343_s17 + $0x88] sm:$0xff]  }
  0xce   : > { %12688 = vmatmul.mubr.msk.bf16.gmra.mrb[24].mxu0 %vm726_vm2, %v1212_v11  ;;  %v1653_v11 = vrot.slane %v14683_v51, 1 }
  0xcf   : > { %12691 = vmatprep.mubr.msk.bf16.mxu0 %vm726_vm2, %v1214_v13  ;;  %v1655_v13 = vrot.slane %v14686_v9, 1 }
  0xd1   : > { %v1658_v44 = vsel %vm17746_vm3, %v1655_v13, %v1657_v31 }
  0xd6   : > { %12692 = vmatmul.mubr.msk.bf16.gmra.mrb[28].mxu0 %vm726_vm2, %v1216_v19  ;;  %v1654_v19 = vsel %vm17746_vm3, %v1651_v46, %v1653_v11 }
  0xd7   : > { %12695 = vmatprep.mubr.msk.bf16.mxu0 %vm726_vm2, %v1218_v20  ;;  %v1656_v20 = vsel %vm17746_vm3, %v1653_v11, %v1655_v13  ;;  %v2005_v11 = vshll.u32 %v14625_v49, 16 }
  0xde   : > { %12696 = vmatmul.mubr.msk.bf16.gmra.mrb[32].mxu0 %vm726_vm2, %v1220_v28  ;;  %v1950_v28 = vrot.slane %v1948_v15, 1 }
  0xdf   : > { %12701 = vmatprep.mubr.msk.bf16.mxu0 %vm726_vm2, %v1624_v30  ;;  %v1953_v30 = vrot.slane %v1951_v17, 2 }
  0xe6   : > { %12702 = vmatmul.mubr.msk.bf16.vlgmr.msra.gmra.mrb[0].mxu0 %vm726_vm2, %v1626_v40  ;;  %v1954_v40 = vor.u32 %v1953_v30, %v1950_v28  ;;  %v2020_v28 = vshrl.u32 %v14637_v34, 16  ;;  %v2023_v30 = vshll.u32 %v14637_v34, 16 }
  0xe7   : > { %12738 = vmatpush3.bf16.msra.mxu0 %v2164_v32  ;;  %12705 = vmatprep.mubr.msk.bf16.mxu0 %vm726_vm2, %v1628_v42  ;;  %v1960_v32 = vshll.u32 %v14587_v26, 16  ;;  %v1966_v42 = vshrl.u32 %v14590_v27, 16 }
  0xe8   : > { %13699 = vmatprep.subr.msk.bf16.mxu0 %vm17750_vm0, %v2425_v38  ;;  %v1955_v53 = vsel %vm17732_vm4, %v1946_v33, %v1954_v40 }
  0xe9   : > { %v1968_v6 = vrot.slane %v1966_v42, 1  ;;  %v2025_v42 = vrot.slane %v2023_v30, 2  ;;  %v2083_v30 = vshrl.u32 %v14683_v51, 16 }
  0xee   : > { %12706 = vmatmul.mubr.msk.bf16.gmra.mrb[4].mxu0 %vm726_vm2, %v1630_v50  ;;  %v1959_v50 = vrot.slane %v1957_v21, 1  ;;  %v2013_v21 = vrot.slane %v2011_v22, 1 }
  0xef   : > { %12709 = vmatprep.mubr.msk.bf16.mxu0 %vm726_vm2, %v1632_v52  ;;  %v1962_v52 = vrot.slane %v1960_v32, 2  ;;  %v2016_v32 = vrot.slane %v2014_v23, 2 }
  0xf6   : > { %12710 = vmatmul.mubr.msk.bf16.gmra.mrb[8].mxu0 %vm726_vm2, %v1634_v54  ;;  %v1971_v54 = vrot.slane %v1969_v43, 2  ;;  %v2017_v43 = vor.u32 %v2016_v32, %v2013_v21  ;;  %v2092_v32 = vshrl.u32 %v14686_v9, 16 }
  0xf7   : > { %12713 = vmatprep.mubr.msk.bf16.mxu0 %vm726_vm2, %v1636_v55  ;;  %v1963_v55 = vor.u32 %v1962_v52, %v1959_v50  ;;  %v2032_v50 = vshll.u32 %v14646_v58, 16 }
  0xf9   : > { %v1964_v61 = vsel %vm17732_vm4, %v1954_v40, %v1963_v55  ;;  %v2022_v40 = vrot.slane %v2020_v28, 1 }
  0xfb   : > { %v2026_v52 = vor.u32 %v2025_v42, %v2022_v40  ;;  %v2085_v42 = vrot.slane %v2083_v30, 1 }
  0xfe   : > { %12714 = vmatmul.mubr.msk.bf16.gmra.mrb[12].mxu0 %vm726_vm2, %v1638_v59  ;;  %v1972_v59 = vor.u32 %v1971_v54, %v1968_v6  ;;  %v2041_v6 = vshll.u32 %v14649_v14, 16 }
  0xff   : > { %12717 = vmatprep.mubr.msk.bf16.mxu0 %vm726_vm2, %v1640_v60  ;;  %v1984_v60 = vshrl.u32 %v14610_v39, 16 }
 0x100   : > { %v1973_v2 = vsel %vm17732_vm4, %v1963_v55, %v1972_v59 }
 0x106   : > { %12718 = vmatmul.mubr.msk.bf16.gmra.mrb[16].mxu0 %vm726_vm2, %v1642_v62  ;;  %v1977_v62 = vrot.slane %v1975_v56, 1  ;;  %v2034_v56 = vrot.slane %v2032_v50, 2 }
 0x107   : > { %12721 = vmatprep.mubr.msk.bf16.mxu0 %vm726_vm2, %v1644_v24  ;;  %v1980_v24 = vrot.slane %v1978_v57, 2  ;;  %v2027_v57 = vsel %vm17732_vm4, %v2017_v43, %v2026_v52 }
 0x109   : > { %v1981_v46 = vor.u32 %v1980_v24, %v1977_v62  ;;  %v2050_v62 = vshll.u32 %v14659_v16, 16 }
 0x10b   : > { %v1982_v13 = vsel %vm17732_vm4, %v1972_v59, %v1981_v46 }
 0x10e   : > { %12722 = vmatmul.mubr.msk.bf16.gmra.mrb[20].mxu0 %vm726_vm2, %v1646_v36  ;;  %v1986_v36 = vrot.slane %v1984_v60, 1  ;;  %v2043_v60 = vrot.slane %v2041_v6, 2 }
 0x10f   : > { %12725 = vmatprep.mubr.msk.bf16.mxu0 %vm726_vm2, %v1648_v3  ;;  %v1989_v3 = vrot.slane %v1987_v8, 2 }
 0x111   : > { %v1990_v38 = vor.u32 %v1989_v3, %v1986_v36 }
 0x113   : > { %v1991_v15 = vsel %vm17732_vm4, %v1981_v46, %v1990_v38  ;;  %v2052_v46 = vrot.slane %v2050_v62, 2 }
 0x116   : > { %12726 = vmatmul.mubr.msk.bf16.gmra.mrb[24].mxu0 %vm726_vm2, %v1650_v47  ;;  %v1993_v47 = vshrl.u32 %v14622_v45, 16 }
 0x117   : > { %12729 = vmatprep.mubr.msk.bf16.mxu0 %vm726_vm2, %v1652_v10  ;;  %v2002_v10 = vshrl.u32 %v14625_v49, 16 }
 0x118   : > { %v1995_v1 = vrot.slane %v1993_v47, 1 }
 0x119   : > { %v2004_v17 = vrot.slane %v2002_v10, 1 }
 0x11e   : > { %12730 = vmatmul.mubr.msk.bf16.gmra.mrb[28].mxu0 %vm726_vm2, %v1654_v19  ;;  %v2007_v19 = vrot.slane %v2005_v11, 2  ;;  %v2065_v11 = vshrl.u32 %v14671_v37, 16 }
 0x11f   : > { %12733 = vmatprep.mubr.msk.bf16.mxu0 %vm726_vm2, %v1656_v20  ;;  %v1999_v20 = vor.u32 %v1998_v12, %v1995_v1  ;;  %v2074_v12 = vshrl.u32 %v14675_v4, 16 }
 0x120   : > { %v2008_v25 = vor.u32 %v2007_v19, %v2004_v17  ;;  %v2067_v19 = vrot.slane %v2065_v11, 1 }
 0x121   : > { %v2000_v31 = vsel %vm17732_vm4, %v1990_v38, %v1999_v20  ;;  %v2076_v23 = vrot.slane %v2074_v12, 1  ;;  %v2400_v12 = vrot.slane %v14634_v7, 2  ;;  %v2408_v7 = vrot.slane %v14659_v16, 2 }
 0x122   : > { %v2009_v33 = vsel %vm17732_vm4, %v1999_v20, %v2008_v25  ;;  %v2018_v54 = vsel %vm17732_vm4, %v2008_v25, %v2017_v43 }
 0x126   : > { %12734 = vmatmul.mubr.msk.bf16.gmra.mrb[32].mxu0 %vm726_vm2, %v1658_v44  ;;  %v2029_v44 = vshrl.u32 %v14646_v58, 16 }
 0x127   : > { %12739 = vmatprep.mubr.msk.bf16.mxu0 %vm726_vm2, %v1955_v53  ;;  %v2038_v53 = vshrl.u32 %v14649_v14, 16 }
 0x128   : > { %v2031_v55 = vrot.slane %v2029_v44, 1  ;;  %v14774_v44 = vld [vmem:[%s14343_s17 + $0x98] ss:$0 sps:$4 sm:$0x33]  }
 0x129   : > { %v2040_v59 = vrot.slane %v2038_v53, 1 }
 0x12a   : > { %v2035_v8 = vor.u32 %v2034_v56, %v2031_v55  ;;  %v2104_v55 = vshll.u32 %v14774_v44, 16 }
 0x12b   : > { %v2044_v24 = vor.u32 %v2043_v60, %v2040_v59 }
 0x12c   : > { %v2036_v36 = vsel %vm17732_vm4, %v2026_v52, %v2035_v8  ;;  %v2094_v52 = vrot.slane %v2092_v32, 1 }
 0x12d   : > { %v2045_v47 = vsel %vm17732_vm4, %v2035_v8, %v2044_v24  ;;  %v2106_v8 = vrot.slane %v2104_v55, 2 }
 0x12e   : > { %12740 = vmatmul.mubr.msk.bf16.vlgmr.msra.gmra.mrb[0].mxu0 %vm726_vm2, %v1964_v61  ;;  %v2047_v61 = vshrl.u32 %v14659_v16, 16  ;;  %v2416_v16 = vrot.slane %v14683_v51, 2 }
 0x12f   : > { %12776 = vmatpush3.bf16.msra.mxu0 %v2481_v0  ;;  %12743 = vmatprep.mubr.msk.bf16.mxu0 %vm726_vm2, %v1973_v2  ;;  %v2056_v0 = vshrl.u32 %v14663_v63, 16  ;;  %v2059_v2 = vshll.u32 %v14663_v63, 16 }
 0x130   : > { %13700 = vmatprep.subr.msk.bf16.mxu0 %vm17750_vm0, %v14722_v41  ;;  %v2049_v3 = vrot.slane %v2047_v61, 1 }
 0x131   : > { %v2058_v29 = vrot.slane %v2056_v0, 1  ;;  %v2061_v38 = vrot.slane %v2059_v2, 2  ;;  %v2386_v2 = vrot.slane %v14575_v5, 2 }
 0x132   : > { %v2053_v10 = vor.u32 %v2052_v46, %v2049_v3  ;;  %v2388_v46 = vrot.slane %v14587_v26, 2  ;;  %v2392_v26 = vrot.slane %v14606_v35, 2 }
 0x133   : > { %v2062_v1 = vor.u32 %v2061_v38, %v2058_v29  ;;  %v2919_v29 = vsel %vm17750_vm0, %v14722_v41, 0 }
 0x134   : > { %v2054_v17 = vsel %vm17732_vm4, %v2044_v24, %v2053_v10  ;;  %v2389_v5 = vsel %vm17733_vm5, %v2386_v2, %v2388_v46 }
 0x135   : > { %v2063_v22 = vsel %vm17732_vm4, %v2053_v10, %v2062_v1 }
 0x136   : > { %12744 = vmatmul.mubr.msk.bf16.gmra.mrb[4].mxu0 %vm726_vm2, %v1982_v13  ;;  %v2068_v13 = vshll.u32 %v14671_v37, 16 }
 0x137   : > { %12747 = vmatprep.mubr.msk.bf16.mxu0 %vm726_vm2, %v1991_v15  ;;  %v2077_v15 = vshll.u32 %v14675_v4, 16 }
 0x138   : > { %v2070_v20 = vrot.slane %v2068_v13, 2  ;;  %v2396_v13 = vrot.slane %v14622_v45, 2  ;;  %v2404_v45 = vrot.slane %v14646_v58, 2 }
 0x139   : > { %v2079_v25 = vrot.slane %v2077_v15, 2  ;;  %v2402_v15 = vrot.slane %v14637_v34, 2  ;;  %v2410_v34 = vrot.slane %v14663_v63, 2  ;;  %v2418_v63 = vrot.slane %v14686_v9, 2 }
 0x13a   : > { %v2071_v28 = vor.u32 %v2070_v20, %v2067_v19 }
 0x13b   : > { %v2080_v21 = vor.u32 %v2079_v25, %v2076_v23  ;;  %v2403_v19 = vsel %vm17733_vm5, %v2400_v12, %v2402_v15  ;;  %v2405_v20 = vsel %vm17733_vm5, %v2402_v15, %v2404_v45  ;;  %v2411_v58 = vsel %vm17733_vm5, %v2408_v7, %v2410_v34 }
 0x13c   : > { %v2072_v40 = vsel %vm17732_vm4, %v2062_v1, %v2071_v28  ;;  %v2398_v1 = vrot.slane %v14625_v49, 2  ;;  %v2406_v49 = vrot.slane %v14649_v14, 2  ;;  %v2412_v14 = vrot.slane %v14671_v37, 2 }
 0x13d   : > { %v2081_v50 = vsel %vm17732_vm4, %v2071_v28, %v2080_v21  ;;  %v2414_v25 = vrot.slane %v14675_v4, 2  ;;  %v2419_v4 = vsel %vm17733_vm5, %v2416_v16, %v2418_v63 }
 0x13e   : > { %12748 = vmatmul.mubr.msk.bf16.gmra.mrb[8].mxu0 %vm726_vm2, %v2000_v31  ;;  %v2086_v31 = vshll.u32 %v14683_v51, 16  ;;  %v2409_v23 = vsel %vm17733_vm5, %v2406_v49, %v2408_v7  ;;  %v2413_v28 = vsel %vm17733_vm5, %v2410_v34, %v2412_v14  ;;  %v2420_v51 = vrot.slane %v14774_v44, 2  ;;  %v14960_v34 = vld [vmem:[%s14343_s17 + $0x90] sm:$0xff]  }
 0x13f   : > { %12751 = vmatprep.mubr.msk.bf16.mxu0 %vm726_vm2, %v2009_v33  ;;  %v2095_v33 = vshll.u32 %v14686_v9, 16  ;;  %v2415_v30 = vsel %vm17733_vm5, %v2412_v14, %v2414_v25  ;;  %v2417_v37 = vsel %vm17733_vm5, %v2414_v25, %v2416_v16  ;;  %v2858_v14 = vrot.slane %v14960_v34, 2 }
 0x140   : > { %v2088_v43 = vrot.slane %v2086_v31, 2  ;;  %v2696_v31 = vld [vmem:[%s14343_s17 + $0x10] sm:$0xc] }
 0x141   : > { %v2097_v53 = vrot.slane %v2095_v33, 2  ;;  %v14857_v33 = vld [vmem:[%s14343_s17 + $0x18] sm:$0xff]  }
 0x142   : > { %v2089_v6 = vor.u32 %v2088_v43, %v2085_v42  ;;  %v2421_v42 = vsel %vm17733_vm5, %v2418_v63, %v2420_v51  ;;  %v14866_v43 = vld [vmem:[%s14343_s17 + $0x20] sm:$0xff]   ;;  %v3149_v16 = vshrl.u32 %v14857_v33, 16  ;;  %v3152_v63 = vshll.u32 %v14857_v33, 16 }
 0x143   : > { %v2098_v56 = vor.u32 %v2097_v53, %v2094_v52  ;;  %v14870_v52 = vld [vmem:[%s14343_s17 + $0x28] sm:$0xff]   ;;  %v2830_v53 = vrot.slane %v14866_v43, 2 }
 0x144   : > { %v2090_v59 = vsel %vm17732_vm4, %v2080_v21, %v2089_v6  ;;  %v14849_v21 = vld [vmem:[%s14343_s17 + $0x14] sm:$0xf] }
 0x145   : > { %v2099_v61 = vsel %vm17732_vm4, %v2089_v6, %v2098_v56  ;;  %v14854_v32 = vcombine.low %v2696_v31, %v14849_v21 }
 0x146   : > { %12752 = vmatmul.mubr.msk.bf16.gmra.mrb[12].mxu0 %vm726_vm2, %v2018_v54  ;;  %v2101_v54 = vshrl.u32 %v14774_v44, 16  ;;  %v2832_v44 = vrot.slane %v14870_v52, 2 }
 0x147   : > { %12755 = vmatprep.mubr.msk.bf16.mxu0 %vm726_vm2, %v2027_v57  ;;  %v2379_v57 = vld [vmem:[%s14343_s17 + $0x8] sm:$0xc]  ;;  %v2827_v9 = vrot.slane %v14854_v32, 2 }
 0x148   : > { %v2103_v60 = vrot.slane %v2101_v54, 1  ;;  %v11580_v62 = vcombine.low %v2379_v57, %v14572_v18  ;;  %v2390_v18 = vrot.slane %v14590_v27, 2  ;;  %v2394_v27 = vrot.slane %v14610_v39, 2  ;;  %v14878_v54 = vld [vmem:[%s14343_s17 + $0x30] sm:$0xff]   ;;  %v14885_v57 = vld [vmem:[%s14343_s17 + $0x38] sm:$0xff]  }
 0x149   : > { %v2399_v39 = vsel %vm17733_vm5, %v2396_v13, %v2398_v1 }
 0x14a   : > { %v2107_v24 = vor.u32 %v2106_v8, %v2103_v60  ;;  %v2385_v0 = vrot.slane %v11580_v62, 2  ;;  %v2391_v38 = vsel %vm17733_vm5, %v2388_v46, %v2390_v18  ;;  %v2393_v11 = vsel %vm17733_vm5, %v2390_v18, %v2392_v26  ;;  %v14900_v62 = vld [vmem:[%s14343_s17 + $0x40] sm:$0xff]   ;;  %v14912_v46 = vld [vmem:[%s14343_s17 + $0x50] sm:$0xff]  }
 0x14b   : > { %v2395_v41 = vsel %vm17733_vm5, %v2392_v26, %v2394_v27  ;;  %v2397_v35 = vsel %vm17733_vm5, %v2394_v27, %v2396_v13  ;;  %v2834_v60 = vrot.slane %v14878_v54, 2  ;;  %v2836_v8 = vrot.slane %v14885_v57, 2  ;;  %v14928_v27 = vld [vmem:[%s14343_s17 + $0x68] sm:$0xff]  }
 0x14c   : > { %v2387_v3 = vsel %vm17733_vm5, %v2385_v0, %v2386_v2  ;;  %v14904_v0 = vld [vmem:[%s14343_s17 + $0x48] sm:$0xff]   ;;  %v2838_v2 = vrot.slane %v14900_v62, 2 }
 0x14e   : > { %12756 = vmatmul.mubr.msk.bf16.gmra.mrb[16].mxu0 %vm726_vm2, %v2036_v36  ;;  %v2108_v36 = vsel %vm17732_vm4, %v2098_v56, %v2107_v24  ;;  %v2833_v56 = vsel %vm17733_vm5, %v2830_v53, %v2832_v44  ;;  %v2837_v24 = vsel %vm17733_vm5, %v2834_v60, %v2836_v8  ;;  %vm4060_vm4 = vcmask 519169  }
 0x14f   : > { %12759 = vmatprep.mubr.msk.bf16.mxu0 %vm726_vm2, %v2045_v47  ;;  %v14797_v47 = vld [vmem:[%s17710_s1 + $0xc] ss:$0 sps:$4 sm:$0xcc]  }
 0x150   : > { %v3313_v10 = vrot.slane %v14797_v47, 2  ;;  %v14916_v47 = vld [vmem:[%s14343_s17 + $0x58] sm:$0xff]  }
 0x152   : > { %v3369_v55 = vsel %vm17750_vm0, %v3313_v10, 0 }
 0x156   : > { %12760 = vmatmul.mubr.msk.bf16.gmra.mrb[20].mxu0 %vm726_vm2, %v2054_v17  ;;  %v2401_v17 = vsel %vm17733_vm5, %v2398_v1, %v2400_v12  ;;  %v14936_v1 = vld [vmem:[%s14343_s17 + $0x70] sm:$0xff]  }
 0x157   : > { %12763 = vmatprep.mubr.msk.bf16.mxu0 %vm726_vm2, %v2063_v22  ;;  %v2407_v22 = vsel %vm17733_vm5, %v2404_v45, %v2406_v49  ;;  %v2850_v12 = vrot.slane %v14936_v1, 2  ;;  %v14952_v49 = vld [vmem:[%s14343_s17 + $0x88] sm:$0xff]  }
 0x15e   : > { %12764 = vmatmul.mubr.msk.bf16.gmra.mrb[24].mxu0 %vm726_vm2, %v2072_v40  ;;  %v2828_v40 = vrot.slane %v14857_v33, 2 }
 0x15f   : > { %12767 = vmatprep.mubr.msk.bf16.mxu0 %vm726_vm2, %v2081_v50 }
 0x160   : > { %v2829_v50 = vsel %vm17733_vm5, %v2827_v9, %v2828_v40  ;;  %v2831_v6 = vsel %vm17733_vm5, %v2828_v40, %v2830_v53  ;;  %v3151_v40 = vrot.slane %v3149_v16, 2  ;;  %v3161_v53 = vshll.u32 %v14866_v43, 16 }
 0x166   : > { %12768 = vmatmul.mubr.msk.bf16.gmra.mrb[28].mxu0 %vm726_vm2, %v2090_v59  ;;  %v14890_v59 = vld [vmem:[%s17710_s1 + $0x10] sm:$0x3] }
 0x167   : > { %12771 = vmatprep.mubr.msk.bf16.mxu0 %vm726_vm2, %v2099_v61  ;;  %v2835_v61 = vsel %vm17733_vm5, %v2832_v44, %v2834_v60 }
 0x16e   : > { %12772 = vmatmul.mubr.msk.bf16.gmra.mrb[32].mxu0 %vm726_vm2, %v2108_v36  ;;  %v2840_v36 = vrot.slane %v14904_v0, 2 }
 0x16f   : > { %12777 = vmatprep.mubr.msk.bf16.mxu0 %vm726_vm2, %v2387_v3  ;;  %v2839_v3 = vsel %vm17733_vm5, %v2836_v8, %v2838_v2 }
 0x170   : > { %v2841_v18 = vsel %vm17733_vm5, %v2838_v2, %v2840_v36 }
 0x176   : > { %12778 = vmatmul.mubr.msk.bf16.vlgmr.msra.gmra.mrb[0].mxu0 %vm726_vm2, %v2389_v5  ;;  %v2842_v5 = vrot.slane %v14912_v46, 2 }
 0x177   : > { %12814 = vmatpush3.bf16.msra.mxu0 %v2919_v29  ;;  %12781 = vmatprep.mubr.msk.bf16.mxu0 %vm726_vm2, %v2391_v38  ;;  %v2844_v29 = vrot.slane %v14916_v47, 2 }
 0x178   : > { %13701 = vmatprep.subr.msk.bf16.mxu0 %vm17750_vm0, %v3313_v10  ;;  %v2843_v38 = vsel %vm17733_vm5, %v2840_v36, %v2842_v5  ;;  %v14924_v10 = vld [vmem:[%s14343_s17 + $0x60] sm:$0xff]  }
 0x179   : > { %v2845_v26 = vsel %vm17733_vm5, %v2842_v5, %v2844_v29  ;;  %v3176_v5 = vshrl.u32 %v14878_v54, 16 }
 0x17e   : > { %12782 = vmatmul.mubr.msk.bf16.gmra.mrb[4].mxu0 %vm726_vm2, %v2393_v11  ;;  %v2846_v11 = vrot.slane %v14924_v10, 2 }
 0x17f   : > { %12785 = vmatprep.mubr.msk.bf16.mxu0 %vm726_vm2, %v2395_v41  ;;  %v2848_v41 = vrot.slane %v14928_v27, 2 }
 0x180   : > { %v2847_v13 = vsel %vm17733_vm5, %v2844_v29, %v2846_v11  ;;  %v14231_v29 = vld [vmem:[%s14343_s17 + $0x70] sm:$0xff]  }
 0x186   : > { %12786 = vmatmul.mubr.msk.bf16.gmra.mrb[8].mxu0 %vm726_vm2, %v2397_v35  ;;  %v2849_v35 = vsel %vm17733_vm5, %v2846_v11, %v2848_v41 }
 0x187   : > { %12789 = vmatprep.mubr.msk.bf16.mxu0 %vm726_vm2, %v2399_v39  ;;  %v14940_v39 = vld [vmem:[%s14343_s17 + $0x78] sm:$0xff]  }
 0x188   : > { %v2852_v15 = vrot.slane %v14940_v39, 2 }
 0x18a   : > { %v2853_v45 = vsel %vm17733_vm5, %v2850_v12, %v2852_v15 }
 0x18e   : > { %12790 = vmatmul.mubr.msk.bf16.gmra.mrb[12].mxu0 %vm726_vm2, %v2401_v17  ;;  %v2851_v17 = vsel %vm17733_vm5, %v2848_v41, %v2850_v12 }
 0x18f   : > { %12793 = vmatprep.mubr.msk.bf16.mxu0 %vm726_vm2, %v2403_v19  ;;  %v14948_v19 = vld [vmem:[%s14343_s17 + $0x80] sm:$0xff]  }
 0x196   : > { %12794 = vmatmul.mubr.msk.bf16.gmra.mrb[16].mxu0 %vm726_vm2, %v2405_v20  ;;  %v2854_v20 = vrot.slane %v14948_v19, 2 }
 0x197   : > { %12797 = vmatprep.mubr.msk.bf16.mxu0 %vm726_vm2, %v2407_v22  ;;  %v2856_v22 = vrot.slane %v14952_v49, 2 }
 0x198   : > { %v2855_v7 = vsel %vm17733_vm5, %v2852_v15, %v2854_v20  ;;  %v3185_v15 = vshrl.u32 %v14885_v57, 16 }
 0x199   : > { %v2859_v31 = vsel %vm17733_vm5, %v2856_v22, %v2858_v14 }
 0x19a   : > { %v3187_v16 = vrot.slane %v3185_v15, 2 }
 0x19e   : > { %12798 = vmatmul.mubr.msk.bf16.gmra.mrb[20].mxu0 %vm726_vm2, %v2409_v23  ;;  %v14963_v23 = vld [vmem:[%s14343_s17 + $0x98] sm:$0xff]  }
 0x19f   : > { %12801 = vmatprep.mubr.msk.bf16.mxu0 %vm726_vm2, %v2411_v58  ;;  %v2857_v58 = vsel %vm17733_vm5, %v2854_v20, %v2856_v22  ;;  %v2860_v25 = vrot.slane %v14963_v23, 2 }
 0x1a6   : > { %12802 = vmatmul.mubr.msk.bf16.gmra.mrb[24].mxu0 %vm726_vm2, %v2413_v28  ;;  %v3141_v28 = vshrl.u32 %v14854_v32, 16 }
 0x1a7   : > { %12805 = vmatprep.mubr.msk.bf16.mxu0 %vm726_vm2, %v2415_v30  ;;  %v3144_v30 = vshll.u32 %v14854_v32, 16  ;;  %v3158_v32 = vshrl.u32 %v14866_v43, 16 }
 0x1a8   : > { %v3143_v51 = vrot.slane %v3141_v28, 2 }
 0x1a9   : > { %v3146_v9 = vrot.slane %v3144_v30, 3  ;;  %v3160_v8 = vrot.slane %v3158_v32, 2 }
 0x1ab   : > { %v3147_v44 = vor.u32 %v3146_v9, %v3143_v51  ;;  %v14233_v9 = vld [vmem:[%s14343_s17 + $0x88] sm:$0xff]  }
 0x1ac   : > { %v714_v32 = vshrl.u32 %v14233_v9, 16 }
 0x1ae   : > { %12806 = vmatmul.mubr.msk.bf16.gmra.mrb[28].mxu0 %vm726_vm2, %v2417_v37  ;;  %v2861_v37 = vsel %vm17733_vm5, %v2858_v14, %v2860_v25  ;;  %v3178_v14 = vrot.slane %v3176_v5, 2 }
 0x1af   : > { %12809 = vmatprep.mubr.msk.bf16.mxu0 %vm726_vm2, %v2419_v4  ;;  %v13779_v4 = vld [vmem:[%s14343_s17 + $0xa0] ss:$0 sps:$4 sm:$0x33]  }
 0x1b6   : > { %12810 = vmatmul.mubr.msk.bf16.gmra.mrb[32].mxu0 %vm726_vm2, %v2421_v42  ;;  %v3154_v42 = vrot.slane %v3152_v63, 3 }
 0x1b7   : > { %12815 = vmatprep.mubr.msk.bf16.mxu0 %vm726_vm2, %v2829_v50  ;;  %v2862_v50 = vrot.slane %v13779_v4, 2  ;;  %v3194_v4 = vshrl.u32 %v14900_v62, 16 }
 0x1b9   : > { %v2863_v60 = vsel %vm17733_vm5, %v2860_v25, %v2862_v50  ;;  %v3197_v50 = vshll.u32 %v14900_v62, 16  ;;  %vm4063_vm5 = vcmask 518144  }
 0x1be   : > { %12816 = vmatmul.mubr.msk.bf16.vlgmr.msra.gmra.mrb[0].mxu0 %vm726_vm2, %v2831_v6  ;;  %v3155_v6 = vor.u32 %v3154_v42, %v3151_v40  ;;  %v710_v40 = vshll.u32 %v14233_v9, 16  ;;  %v3248_v9 = vshrl.u32 %v14936_v1, 16 }
 0x1bf   : > { %12852 = vmatpush3.bf16.msra.mxu0 %v3369_v55  ;;  %12819 = vmatprep.mubr.msk.bf16.mxu0 %vm726_vm2, %v2833_v56  ;;  %v3167_v55 = vshrl.u32 %v14870_v52, 16  ;;  %v3170_v56 = vshll.u32 %v14870_v52, 16 }
 0x1c0   : > { %13702 = vmatprep.subr.msk.bf16.mxu0 %vm17750_vm0, %v14890_v59 }
 0x1c1   : > { %v3169_v2 = vrot.slane %v3167_v55, 2  ;;  %v3172_v36 = vrot.slane %v3170_v56, 3  ;;  %v712_v56 = vrot.slane %v710_v40, 1  ;;  %v3251_v40 = vshll.u32 %v14936_v1, 16 }
 0x1c3   : > { %v3173_v20 = vor.u32 %v3172_v36, %v3169_v2  ;;  %v3196_v2 = vrot.slane %v3194_v4, 2  ;;  %v3199_v36 = vrot.slane %v3197_v50, 3  ;;  %v3257_v50 = vshrl.u32 %v14940_v39, 16 }
 0x1c6   : > { %12820 = vmatmul.mubr.msk.bf16.gmra.mrb[4].mxu0 %vm726_vm2, %v2835_v61  ;;  %v3163_v61 = vrot.slane %v3161_v53, 3  ;;  %v14234_v53 = vld [vmem:[%s14343_s17 + $0x90] ss:$0 sps:$4 sm:$0x11]  }
 0x1c7   : > { %12823 = vmatprep.mubr.msk.bf16.mxu0 %vm726_vm2, %v2837_v24  ;;  %v3156_v24 = vsel %vm17731_vm6, %v3147_v44, %v3155_v6  ;;  %v718_v44 = vshll.u32 %v14234_v53, 16 }
 0x1c8   : > { %v3164_v12 = vor.u32 %v3163_v61, %v3160_v8  ;;  %v716_v61 = vor.u32 %v714_v32, %v712_v56  ;;  %v3260_v32 = vshll.u32 %v14940_v39, 16 }
 0x1ca   : > { %v3165_v30 = vsel %vm17731_vm6, %v3155_v6, %v3164_v12  ;;  %v3206_v6 = vshll.u32 %v14904_v0, 16 }
 0x1cc   : > { %v3208_v5 = vrot.slane %v3206_v6, 3 }
 0x1ce   : > { %12824 = vmatmul.mubr.msk.bf16.gmra.mrb[8].mxu0 %vm726_vm2, %v2839_v3  ;;  %v14230_v3 = vld [vmem:[%s14343_s17 + $0x78] sm:$0xff]  }
 0x1cf   : > { %12827 = vmatprep.mubr.msk.bf16.mxu0 %vm726_vm2, %v2841_v18  ;;  %v694_v18 = vshll.u32 %v14230_v3, 16  ;;  %v698_v41 = vshrl.u32 %v14230_v3, 16 }
 0x1d1   : > { %v696_v11 = vrot.slane %v694_v18, 1 }
 0x1d3   : > { %v700_v22 = vor.u32 %v698_v41, %v696_v11 }
 0x1d6   : > { %12828 = vmatmul.mubr.msk.bf16.gmra.mrb[12].mxu0 %vm726_vm2, %v2843_v38  ;;  %v690_v38 = vshrl.u32 %v14231_v29, 16 }
 0x1d7   : > { %12831 = vmatprep.mubr.msk.bf16.mxu0 %vm726_vm2, %v2845_v26  ;;  %v3179_v26 = vshll.u32 %v14878_v54, 16 }
 0x1d9   : > { %v3181_v25 = vrot.slane %v3179_v26, 3  ;;  %v3212_v26 = vshrl.u32 %v14912_v46, 16 }
 0x1db   : > { %v3214_v15 = vrot.slane %v3212_v26, 2 }
 0x1de   : > { %12832 = vmatmul.mubr.msk.bf16.gmra.mrb[16].mxu0 %vm726_vm2, %v2847_v13  ;;  %v14232_v13 = vld [vmem:[%s14343_s17 + $0x80] sm:$0xff]  }
 0x1df   : > { %12835 = vmatprep.mubr.msk.bf16.mxu0 %vm726_vm2, %v2849_v35  ;;  %v702_v35 = vshll.u32 %v14232_v13, 16  ;;  %v706_v51 = vshrl.u32 %v14232_v13, 16  ;;  %v3221_v13 = vshrl.u32 %v14916_v47, 16 }
 0x1e6   : > { %12836 = vmatmul.mubr.msk.bf16.gmra.mrb[20].mxu0 %vm726_vm2, %v2851_v17  ;;  %v3188_v17 = vshll.u32 %v14885_v57, 16 }
 0x1e7   : > { %12839 = vmatprep.mubr.msk.bf16.mxu0 %vm726_vm2, %v2853_v45  ;;  %v692_v45 = vor.u32 %v690_v38, %v14467_v48  ;;  %v3682_v48 = vsel %vm17750_vm0, %v14890_v59, 0  ;;  %v3203_v59 = vshrl.u32 %v14904_v0, 16  ;;  %v3200_v38 = vor.u32 %v3199_v36, %v3196_v2 }
 0x1e8   : > { %v3190_v63 = vrot.slane %v3188_v17, 3  ;;  %v3275_v2 = vshrl.u32 %v14952_v49, 16  ;;  %v3278_v36 = vshll.u32 %v14952_v49, 16 }
 0x1e9   : > { %v3205_v18 = vrot.slane %v3203_v59, 2  ;;  %v3253_v59 = vrot.slane %v3251_v40, 3 }
 0x1ea   : > { %v3191_v42 = vor.u32 %v3190_v63, %v3187_v16  ;;  %v3280_v26 = vrot.slane %v3278_v36, 3 }
 0x1eb   : > { %v3209_v41 = vor.u32 %v3208_v5, %v3205_v18 }
 0x1ee   : > { %12840 = vmatmul.mubr.msk.bf16.gmra.mrb[24].mxu0 %vm726_vm2, %v2855_v7  ;;  %v704_v7 = vrot.slane %v702_v35, 1  ;;  %v3224_v35 = vshll.u32 %v14916_v47, 16 }
 0x1ef   : > { %12843 = vmatprep.mubr.msk.bf16.mxu0 %vm726_vm2, %v2857_v58  ;;  %v697_v58 = vsel %vm17737_vm1, %v692_v45, %v696_v11  ;;  %v3215_v11 = vshll.u32 %v14912_v46, 16  ;;  %v3210_v45 = vsel %vm17731_vm6, %v3200_v38, %v3209_v41 }
 0x1f0   : > { %12615 = vmatprep.mubr.msk.bf16.mxu1 %vm726_vm2, %v697_v58  ;;  %v705_v28 = vsel %vm17737_vm1, %v700_v22, %v704_v7  ;;  %v708_v55 = vor.u32 %v706_v51, %v704_v7  ;;  %v3226_v22 = vrot.slane %v3224_v35, 3  ;;  %v3230_v58 = vshrl.u32 %v14924_v10, 16 }
 0x1f1   : > { %12616 = vmatmul.mubr.msk.bf16.vlgmr.msra.gmra.mrb[0].mxu1 %vm726_vm2, %v705_v28  ;;  %v3217_v17 = vrot.slane %v3215_v11, 3  ;;  %v3239_v28 = vshrl.u32 %v14928_v27, 16 }
 0x1f2   : > { %v713_v8 = vsel %vm17737_vm1, %v708_v55, %v712_v56  ;;  %v3232_v63 = vrot.slane %v3230_v58, 2  ;;  %v3259_v55 = vrot.slane %v3257_v50, 2  ;;  %v3262_v56 = vrot.slane %v3260_v32, 3 }
 0x1f3   : > { %12619 = vmatprep.mubr.msk.bf16.mxu1 %vm726_vm2, %v713_v8  ;;  %v3218_v7 = vor.u32 %v3217_v17, %v3214_v15  ;;  %v3266_v8 = vshrl.u32 %v14948_v19, 16  ;;  %v3296_v15 = vshll.u32 %v14963_v23, 16 }
 0x1f5   : > { %v3219_v16 = vsel %vm17731_vm6, %v3209_v41, %v3218_v7  ;;  %v3268_v18 = vrot.slane %v3266_v8, 2  ;;  %v3284_v41 = vshrl.u32 %v14960_v34, 16 }
 0x1f6   : > { %12844 = vmatmul.mubr.msk.bf16.gmra.mrb[28].mxu0 %vm726_vm2, %v2859_v31  ;;  %v3174_v31 = vsel %vm17731_vm6, %v3164_v12, %v3173_v20  ;;  %v3201_v12 = vsel %vm17731_vm6, %v3191_v42, %v3200_v38  ;;  %v3277_v38 = vrot.slane %v3275_v2, 2 }
 0x1f7   : > { %12847 = vmatprep.mubr.msk.bf16.mxu0 %vm726_vm2, %v2861_v37  ;;  %v3182_v37 = vor.u32 %v3181_v25, %v3178_v14  ;;  %v3233_v14 = vshll.u32 %v14924_v10, 16 }
 0x1f8   : > { %v3281_v35 = vor.u32 %v3280_v26, %v3277_v38 }
 0x1f9   : > { %v3192_v3 = vsel %vm17731_vm6, %v3182_v37, %v3191_v42 }
 0x1fe   : > { %12848 = vmatmul.mubr.msk.bf16.gmra.mrb[32].mxu0 %vm726_vm2, %v2863_v60  ;;  %v720_v60 = vrot.slane %v718_v44, 1  ;;  %v3250_v44 = vrot.slane %v3248_v9, 2 }
 0x1ff   : > { %12853 = vmatprep.mubr.msk.bf16.mxu0 %vm726_vm2, %v3156_v24  ;;  %v3183_v24 = vsel %vm17731_vm6, %v3173_v20, %v3182_v37  ;;  %v3223_v20 = vrot.slane %v3221_v13, 2  ;;  %v3241_v37 = vrot.slane %v3239_v28, 2  ;;  %v3287_v13 = vshll.u32 %v14960_v34, 16 }
 0x200   : > { %v721_v29 = vsel %vm17737_vm1, %v716_v61, %v720_v60  ;;  %v3254_v60 = vor.u32 %v3253_v59, %v3250_v44  ;;  %v3269_v61 = vshll.u32 %v14948_v19, 16  ;;  %vm17744_vm1 = vsmask.f32 4352 }
 0x201   : > { %12620 = vmatmul.mubr.msk.bf16.gmra.mrb[4].mxu1 %vm726_vm2, %v721_v29  ;;  %v3227_v25 = vor.u32 %v3226_v22, %v3223_v20  ;;  %v3289_v20 = vrot.slane %v3287_v13, 3  ;;  %v15057_v22 = vld [vmem:[%s14343_s17 + $0xa0] ss:$0 sps:$4 sm:$0x77]  }
 0x202   : > { %v3271_v5 = vrot.slane %v3269_v61, 3  ;;  %v3302_v28 = vshrl.u32 %v15057_v22, 16 }
 0x204   : > { %v3272_v11 = vor.u32 %v3271_v5, %v3268_v18 }
 0x206   : > { %12854 = vmatmul.mubr.msk.bf16.vlgmr.msra.gmra.mrb[0].mxu0 %vm726_vm2, %v3165_v30  ;;  %v3242_v30 = vshll.u32 %v14928_v27, 16 }
 0x207   : > { %12890 = vmatpush3.bf16.msra.mxu0 %v3682_v48  ;;  %12857 = vmatprep.mubr.msk.bf16.mxu0 %vm726_vm2, %v3174_v31  ;;  %v3235_v48 = vrot.slane %v3233_v14, 3  ;;  %v3228_v31 = vsel %vm17731_vm6, %v3218_v7, %v3227_v25  ;;  %v3282_v7 = vsel %vm17731_vm6, %v3272_v11, %v3281_v35  ;;  %v3298_v14 = vrot.slane %v3296_v15, 3 }
 0x208   : > { %v3244_v4 = vrot.slane %v3242_v30, 3  ;;  %v3305_v30 = vshll.u32 %v15057_v22, 16 }
 0x209   : > { %v3236_v51 = vor.u32 %v3235_v48, %v3232_v63  ;;  %v3584_v63 = vld [vmem:[%s14343_s17 + $0x10] sm:$0x8] }
 0x20a   : > { %v3245_v42 = vor.u32 %v3244_v4, %v3241_v37  ;;  %v3307_v37 = vrot.slane %v3305_v30, 3 }
 0x20b   : > { %v3237_v53 = vsel %vm17731_vm6, %v3227_v25, %v3236_v51 }
 0x20c   : > { %v3246_v6 = vsel %vm17731_vm6, %v3236_v51, %v3245_v42  ;;  %v11657_v51 = vcombine.low %v3584_v63, %v14849_v21  ;;  %v3595_v21 = vrot.slane %v14870_v52, 3  ;;  %v3603_v52 = vrot.slane %v14904_v0, 3 }
 0x20d   : > { %v3611_v0 = vrot.slane %v14928_v27, 3  ;;  %v3619_v27 = vrot.slane %v14952_v49, 3 }
 0x20e   : > { %12858 = vmatmul.mubr.msk.bf16.gmra.mrb[4].mxu0 %vm726_vm2, %v3183_v24  ;;  %v3263_v24 = vor.u32 %v3262_v56, %v3259_v55  ;;  %v3590_v40 = vrot.slane %v11657_v51, 3 }
 0x20f   : > { %12861 = vmatprep.mubr.msk.bf16.mxu0 %vm726_vm2, %v3192_v3  ;;  %v3255_v3 = vsel %vm17731_vm6, %v3245_v42, %v3254_v60  ;;  %v3591_v42 = vrot.slane %v14857_v33, 3  ;;  %v3597_v33 = vrot.slane %v14878_v54, 3  ;;  %v3605_v54 = vrot.slane %v14912_v46, 3 }
 0x210   : > { %v3264_v29 = vsel %vm17731_vm6, %v3254_v60, %v3263_v24  ;;  %v3273_v17 = vsel %vm17731_vm6, %v3263_v24, %v3272_v11  ;;  %v3613_v46 = vrot.slane %v14936_v1, 3  ;;  %v3621_v1 = vrot.slane %v14960_v34, 3  ;;  %v15129_v34 = vld [vmem:[%s17711_s2] ss:$0 sm:$0xff] }
 0x211   : > { %v3592_v32 = vsel %vm17745_vm7, %v3590_v40, %v3591_v42  ;;  %v3598_v55 = vsel %vm17745_vm7, %v3595_v21, %v3597_v33  ;;  %v3606_v61 = vsel %vm17745_vm7, %v3603_v52, %v3605_v54  ;;  %v15134_v11 = vld [vmem:[%s17712_s3] ss:$0 sm:$0xff] }
 0x212   : > { %v3622_v38 = vsel %vm17745_vm7, %v3619_v27, %v3621_v1 }
 0x216   : > { %12862 = vmatmul.mubr.msk.bf16.gmra.mrb[8].mxu0 %vm726_vm2, %v3201_v12  ;;  %v3293_v12 = vshrl.u32 %v14963_v23, 16 }
 0x217   : > { %12865 = vmatprep.mubr.msk.bf16.mxu0 %vm726_vm2, %v3210_v45  ;;  %v3286_v45 = vrot.slane %v3284_v41, 2 }
 0x218   : > { %v3295_v58 = vrot.slane %v3293_v12, 2 }
 0x219   : > { %v3290_v25 = vor.u32 %v3289_v20, %v3286_v45 }
 0x21b   : > { %v3291_v48 = vsel %vm17731_vm6, %v3281_v35, %v3290_v25 }
 0x21e   : > { %12866 = vmatmul.mubr.msk.bf16.gmra.mrb[12].mxu0 %vm726_vm2, %v3219_v16  ;;  %v3299_v16 = vor.u32 %v3298_v14, %v3295_v58 }
 0x21f   : > { %12869 = vmatprep.mubr.msk.bf16.mxu0 %vm726_vm2, %v3228_v31  ;;  %v3304_v31 = vrot.slane %v3302_v28, 2 }
 0x220   : > { %v3300_v4 = vsel %vm17731_vm6, %v3290_v25, %v3299_v16 }
 0x221   : > { %v3308_v9 = vor.u32 %v3307_v37, %v3304_v31 }
 0x223   : > { %v3309_v50 = vsel %vm17731_vm6, %v3299_v16, %v3308_v9  ;;  %vm17734_vm6 = vmmov 0  }
 0x226   : > { %12870 = vmatmul.mubr.msk.bf16.gmra.mrb[16].mxu0 %vm726_vm2, %v3237_v53  ;;  %v3593_v53 = vrot.slane %v14866_v43, 3  ;;  %v3601_v43 = vrot.slane %v14900_v62, 3  ;;  %v3609_v62 = vrot.slane %v14924_v10, 3  ;;  %v3617_v10 = vrot.slane %v14948_v19, 3 }
 0x227   : > { %12873 = vmatprep.mubr.msk.bf16.mxu0 %vm726_vm2, %v3246_v6  ;;  %v3599_v6 = vrot.slane %v14885_v57, 3  ;;  %v3607_v57 = vrot.slane %v14916_v47, 3  ;;  %v3615_v47 = vrot.slane %v14940_v39, 3  ;;  %v3623_v39 = vrot.slane %v14963_v23, 3 }
 0x228   : > { %v3594_v44 = vsel %vm17745_vm7, %v3591_v42, %v3593_v53  ;;  %v3596_v59 = vsel %vm17745_vm7, %v3593_v53, %v3595_v21  ;;  %v3604_v8 = vsel %vm17745_vm7, %v3601_v43, %v3603_v52  ;;  %v3612_v36 = vsel %vm17745_vm7, %v3609_v62, %v3611_v0 }
 0x229   : > { %v3600_v56 = vsel %vm17745_vm7, %v3597_v33, %v3599_v6  ;;  %v3602_v60 = vsel %vm17745_vm7, %v3599_v6, %v3601_v43  ;;  %v3608_v24 = vsel %vm17745_vm7, %v3605_v54, %v3607_v57  ;;  %v3610_v2 = vsel %vm17745_vm7, %v3607_v57, %v3609_v62 }
 0x22a   : > { %v3616_v18 = vsel %vm17745_vm7, %v3613_v46, %v3615_v47  ;;  %v3618_v5 = vsel %vm17745_vm7, %v3615_v47, %v3617_v10  ;;  %v3624_v26 = vsel %vm17745_vm7, %v3621_v1, %v3623_v39  ;;  %v3625_v19 = vrot.slane %v15057_v22, 3 }
 0x22c   : > { %v3626_v49 = vsel %vm17745_vm7, %v3623_v39, %v3625_v19 }
 0x22e   : > { %12874 = vmatmul.mubr.msk.bf16.gmra.mrb[20].mxu0 %vm726_vm2, %v3255_v3  ;;  %v3614_v3 = vsel %vm17745_vm7, %v3611_v0, %v3613_v46  ;;  %v4080_v46 = vlaneseq }
 0x22f   : > { %12877 = vmatprep.mubr.msk.bf16.mxu0 %vm726_vm2, %v3264_v29  ;;  %v3620_v29 = vsel %vm17745_vm7, %v3617_v10, %v3619_v27 }
 0x236   : > { %12878 = vmatmul.mubr.msk.bf16.gmra.mrb[24].mxu0 %vm726_vm2, %v3273_v17 }
 0x237   : > { %12881 = vmatprep.mubr.msk.bf16.mxu0 %vm726_vm2, %v3282_v7 }
 0x23e   : > { %12882 = vmatmul.mubr.msk.bf16.gmra.mrb[28].mxu0 %vm726_vm2, %v3291_v48 }
 0x23f   : > { %12885 = vmatprep.mubr.msk.bf16.mxu0 %vm726_vm2, %v3300_v4 }
 0x246   : > { %12886 = vmatmul.mubr.msk.bf16.gmra.mrb[32].mxu0 %vm726_vm2, %v3309_v50 }
 0x247   : > { %12891 = vmatprep.mubr.msk.bf16.mxu0 %vm726_vm2, %v3592_v32 }
 0x24e   : > { %12892 = vmatmul.mubr.msk.bf16.vlgmr.msra.gmra.mrb[0].mxu0 %vm726_vm2, %v3594_v44 }
 0x24f   : > { %12895 = vmatprep.mubr.msk.bf16.mxu0 %vm726_vm2, %v3596_v59 }
 0x256   : > { %12896 = vmatmul.mubr.msk.bf16.gmra.mrb[4].mxu0 %vm726_vm2, %v3598_v55 }
 0x257   : > { %12899 = vmatprep.mubr.msk.bf16.mxu0 %vm726_vm2, %v3600_v56 }
 0x25e   : > { %12900 = vmatmul.mubr.msk.bf16.gmra.mrb[8].mxu0 %vm726_vm2, %v3602_v60 }
 0x25f   : > { %12903 = vmatprep.mubr.msk.bf16.mxu0 %vm726_vm2, %v3604_v8 }
 0x266   : > { %12904 = vmatmul.mubr.msk.bf16.gmra.mrb[12].mxu0 %vm726_vm2, %v3606_v61 }
 0x267   : > { %12907 = vmatprep.mubr.msk.bf16.mxu0 %vm726_vm2, %v3608_v24 }
 0x26e   : > { %12908 = vmatmul.mubr.msk.bf16.gmra.mrb[16].mxu0 %vm726_vm2, %v3610_v2  ;;  %v14245_v2 = vmov 1966171168  }
 0x26f   : > { %12911 = vmatprep.mubr.msk.bf16.mxu0 %vm726_vm2, %v3612_v36  ;;  %v4078_v36 = vunpack.c.l.s4 %v14245_v2 }
 0x271   : > { %v4079_v39 = vunpack.c.0.s8 %v4078_v36 }
 0x276   : > { %12912 = vmatmul.mubr.msk.bf16.gmra.mrb[20].mxu0 %vm726_vm2, %v3614_v3 }
 0x277   : > { %12915 = vmatprep.mubr.msk.bf16.mxu0 %vm726_vm2, %v3616_v18 }
 0x27e   : > { %12916 = vmatmul.mubr.msk.bf16.gmra.mrb[24].mxu0 %vm726_vm2, %v3618_v5 }
 0x27f   : > { %12919 = vmatprep.mubr.msk.bf16.mxu0 %vm726_vm2, %v3620_v29 }
 0x286   : > { %12920 = vmatmul.mubr.msk.bf16.gmra.mrb[28].mxu0 %vm726_vm2, %v3622_v38  ;;  %v15164_v38 = vshrl.u32 %v4080_v46, 7 }
 0x287   : > { %12923 = vmatprep.mubr.msk.bf16.mxu0 %vm726_vm2, %v3624_v26 }
 0x288   : > { %17753 = vst [vmem:[#allocation8_spill] sm:$0xff] %v15164_v38 }
 0x28e   : > { %12924 = vmatmul.mubr.msk.bf16.gmra.mrb[32].mxu0 %vm726_vm2, %v3626_v49  ;;  %vm17739_vm2 = vcmask 519168  }
 0x321   : > { %v12893_v23 = vpop.f32.mrb[0].mxu0 }
 0x322   : > { %v3906_v41 = vmul.f32 %v12893_v23, %v15129_v34  ;;  %v3718_v13 = vpop.f32.mrb[1].mxu0 }
 0x323   : > { %v3904_v35 = vmul.f32 %v15129_v34, %v3718_v13  ;;  %v12894_v12 = vpop.f32.mrb[2].mxu0 }
 0x324   : > { %v3949_v15 = vadd.f32 %v15134_v11, %v3906_v41  ;;  %v3907_v17 = vmul.f32 %v12894_v12, %v15129_v34  ;;  %v3721_v45 = vpop.f32.mrb[3].mxu0 }
 0x325   : > { %v3947_v20 = vadd.f32 %v15134_v11, %v3904_v35  ;;  %v3905_v22 = vmul.f32 %v15129_v34, %v3721_v45 }
 0x326   : > { %v3950_v7 = vadd.f32 %v15134_v11, %v3907_v17  ;;  %v3985_v14 = vmax.f32 %v3949_v15, 0.0 }
 0x327   : > { %v3948_v58 = vadd.f32 %v15134_v11, %v3905_v22  ;;  %v3983_v28 = vmax.f32 %v3947_v20, 0.0 }
 0x328   : > { %v3986_v25 = vmax.f32 %v3950_v7, 0.0 }
 0x329   : > { %v3984_v30 = vmax.f32 %v3948_v58, 0.0  ;;  %v12897_v16 = vpop.f32.mrb[4].mxu0  ;;  %v15175_v58 = vsub.s32 %v4079_v39, %v15164_v38 }
 0x32a   : > { %v4020_v63 = vpack.c.bf16 %v3986_v25, %v3985_v14  ;;  %v3910_v48 = vmul.f32 %v12897_v16, %v15129_v34  ;;  %v3734_v31 = vpop.f32.mrb[5].mxu0 }
 0x32b   : > { %v4019_v37 = vpack.c.bf16 %v3984_v30, %v3983_v28  ;;  %v3908_v4 = vmul.f32 %v15129_v34, %v3734_v31  ;;  %v12898_v51 = vpop.f32.mrb[6].mxu0  ;;  %17754 = vst [vmem:[#allocation9_spill] sm:$0xff] %v15175_v58 }
 0x32c   : > { %4039 = vst.msk [vmem:[#allocation5 + $0x8] sm:$0xff] %vm17736_vm8, %v4020_v63  ;;  %v3953_v9 = vadd.f32 %v15134_v11, %v3910_v48  ;;  %v3911_v40 = vmul.f32 %v12898_v51, %v15129_v34  ;;  %v3737_v42 = vpop.f32.mrb[7].mxu0 }
 0x32d   : > { %4038 = vst.msk [vmem:[#allocation5] sm:$0xff] %vm17736_vm8, %v4019_v37  ;;  %v3951_v50 = vadd.f32 %v15134_v11, %v3908_v4  ;;  %v3909_v32 = vmul.f32 %v15129_v34, %v3737_v42 }
 0x32e   : > { %v3954_v53 = vadd.f32 %v15134_v11, %v3911_v40  ;;  %v3989_v44 = vmax.f32 %v3953_v9, 0.0 }
 0x32f   : > { %v3952_v21 = vadd.f32 %v15134_v11, %v3909_v32  ;;  %v3987_v33 = vmax.f32 %v3951_v50, 0.0 }
 0x330   : > { %v3990_v59 = vmax.f32 %v3954_v53, 0.0 }
 0x331   : > { %v3988_v6 = vmax.f32 %v3952_v21, 0.0  ;;  %v12901_v55 = vpop.f32.mrb[8].mxu0 }
 0x332   : > { %v4022_v56 = vpack.c.bf16 %v3990_v59, %v3989_v44  ;;  %v3914_v43 = vmul.f32 %v12901_v55, %v15129_v34  ;;  %v3750_v52 = vpop.f32.mrb[9].mxu0 }
 0x333   : > { %v4021_v60 = vpack.c.bf16 %v3988_v6, %v3987_v33  ;;  %v3912_v8 = vmul.f32 %v15129_v34, %v3750_v52  ;;  %v12902_v54 = vpop.f32.mrb[10].mxu0  ;;  %v4066_v1 = vld [vmem:[#allocation5 + $0x8] sm:$0xfe] }
 0x334   : > { %4041 = vst.msk [vmem:[#allocation5 + $0x18] sm:$0xff] %vm17736_vm8, %v4022_v56  ;;  %v3957_v57 = vadd.f32 %v15134_v11, %v3914_v43  ;;  %v3915_v61 = vmul.f32 %v12902_v54, %v15129_v34  ;;  %v3753_v24 = vpop.f32.mrb[11].mxu0  ;;  %v4070_v45 = vrot.slane %v4066_v1, 1  ;;  %v4065_v25 = vld [vmem:[#allocation5] sm:$0xff] }
 0x335   : > { %4040 = vst.msk [vmem:[#allocation5 + $0x10] sm:$0xff] %vm17736_vm8, %v4021_v60  ;;  %v3955_v62 = vadd.f32 %v15134_v11, %v3912_v8  ;;  %v3913_v0 = vmul.f32 %v15129_v34, %v3753_v24 }
 0x336   : > { %v3958_v47 = vadd.f32 %v15134_v11, %v3915_v61  ;;  %v3993_v18 = vmax.f32 %v3957_v57, 0.0 }
 0x337   : > { %v3956_v3 = vadd.f32 %v15134_v11, %v3913_v0  ;;  %v3991_v27 = vmax.f32 %v3955_v62, 0.0 }
 0x338   : > { %v3994_v10 = vmax.f32 %v3958_v47, 0.0 }
 0x339   : > { %v3992_v5 = vmax.f32 %v3956_v3, 0.0  ;;  %v12905_v29 = vpop.f32.mrb[12].mxu0 }
 0x33a   : > { %v4024_v26 = vpack.c.bf16 %v3994_v10, %v3993_v18  ;;  %v3918_v19 = vmul.f32 %v12905_v29, %v15129_v34  ;;  %v3766_v49 = vpop.f32.mrb[13].mxu0 }
 0x33b   : > { %v4023_v23 = vpack.c.bf16 %v3992_v5, %v3991_v27  ;;  %v3916_v41 = vmul.f32 %v15129_v34, %v3766_v49  ;;  %v12906_v13 = vpop.f32.mrb[14].mxu0  ;;  %v15180_v51 = vld [vmem:[#allocation5 + $0x18] sm:$0xf8] }
 0x33c   : > { %v4067_v35 = vld [vmem:[#allocation5 + $0x10] sm:$0x1]  ;;  %4043 = vst.msk [vmem:[#allocation5 + $0x28] sm:$0xff] %vm17736_vm8, %v4024_v26  ;;  %v3961_v12 = vadd.f32 %v15134_v11, %v3918_v19  ;;  %v3919_v15 = vmul.f32 %v12906_v13, %v15129_v34  ;;  %v3769_v17 = vpop.f32.mrb[15].mxu0  ;;  %v4289_v55 = vrot.slane %v15180_v51, 1 }
 0x33d   : > { %v4071_v20 = vrot.slane %v4067_v35, 1  ;;  %4042 = vst.msk [vmem:[#allocation5 + $0x20] sm:$0xff] %vm17736_vm8, %v4023_v23  ;;  %v3959_v22 = vadd.f32 %v15134_v11, %v3916_v41  ;;  %v3917_v7 = vmul.f32 %v15129_v34, %v3769_v17 }
 0x33e   : > { %v3962_v14 = vadd.f32 %v15134_v11, %v3919_v15  ;;  %v3997_v63 = vmax.f32 %v3961_v12, 0.0 }
 0x33f   : > { %v4072_v28 = vsel %vm17746_vm3, %v4070_v45, %v4071_v20  ;;  %v3960_v30 = vadd.f32 %v15134_v11, %v3917_v7  ;;  %v3995_v31 = vmax.f32 %v3959_v22, 0.0 }
 0x340   : > { %v4074_v16 = vmax.bf16 %v4072_v28, %v4065_v25  ;;  %v3998_v48 = vmax.f32 %v3962_v14, 0.0 }
 0x341   : > { %v3996_v37 = vmax.f32 %v3960_v30, 0.0  ;;  %v12909_v4 = vpop.f32.mrb[16].mxu0 }
 0x342   : > { %v4076_v9 = vcombine.high %v4074_v16, %v4074_v16  ;;  %v4083_v40 = vrot.slane %v4074_v16, %v15175_v58  ;;  %v4026_v42 = vpack.c.bf16 %v3998_v48, %v3997_v63  ;;  %v3782_v50 = vpop.f32.mrb[17].mxu0  ;;  %v15199_v57 = vmul.f32 %v12909_v4, %v15129_v34 }
 0x343   : > { %v4025_v32 = vpack.c.bf16 %v3996_v37, %v3995_v31  ;;  %v15183_v53 = vpop.f32.mrb[18].mxu0  ;;  %v15202_v61 = vmul.f32 %v15129_v34, %v3782_v50 }
 0x344   : > { %v4090_v21 = vrot.slane %v4076_v9, %v15175_v58  ;;  %v4091_v44 = vcombine.high %v4083_v40, %v4083_v40  ;;  %v4099_v59 = vrot.slane %v4083_v40, %v15175_v58  ;;  %v15187_v33 = vld [vmem:[#allocation5 + $0x20] sm:$0x7]  ;;  %4045 = vst.msk [vmem:[#allocation5 + $0x38] sm:$0xff] %vm17736_vm8, %v4026_v42  ;;  %v15190_v6 = vpop.f32.mrb[19].mxu0 }
 0x345   : > { %4044 = vst.msk [vmem:[#allocation5 + $0x30] sm:$0xff] %vm17736_vm8, %v4025_v32  ;;  %v4290_v54 = vrot.slane %v15187_v33, 1 }
 0x346   : > { %v4092_v56 = vcombine.high %v4090_v21, %v4090_v21  ;;  %v4106_v43 = vrot.slane %v4090_v21, %v15175_v58  ;;  %v4113_v52 = vrot.slane %v4091_v44, %v15175_v58  ;;  %v4121_v60 = vcombine.high %v4099_v59, %v4099_v59 }
 0x347   : > { %v4127_v8 = vsel %vm17749_vm9, %v4099_v59, 4286644096 }
 0x348   : > { %v4120_v24 = vrot.slane %v4092_v56, %v15175_v58  ;;  %v4122_v62 = vcombine.high %v4106_v43, %v4106_v43  ;;  %v4123_v0 = vcombine.high %v4113_v52, %v4113_v52  ;;  %v4129_v2 = vunpack.i.l.bf16 %v4127_v8 }
 0x349   : > { %v4130_v36 = vunpack.i.h.bf16 %v4127_v8  ;;  %v4140_v46 = vsel %vm17749_vm9, %v4113_v52, 4286644096  ;;  %v4153_v47 = vsel %vm17749_vm9, %v4121_v60, 4286644096  ;;  %v4179_v3 = vsel %vm17749_vm9, %v4106_v43, 4286644096 }
 0x34a   : > { %v4124_v18 = vcombine.high %v4120_v24, %v4120_v24  ;;  %v4142_v10 = vunpack.i.l.bf16 %v4140_v46  ;;  %v4143_v27 = vunpack.i.h.bf16 %v4140_v46  ;;  %v4155_v5 = vunpack.i.l.bf16 %v4153_v47  ;;  %v15208_v29 = vpop.f32.mrb[20].mxu0 }
 0x34b   : > { %v4131_v1 = vmax.f32 %v4129_v2, %v4130_v36  ;;  %v4156_v39 = vunpack.i.h.bf16 %v4153_v47  ;;  %v4166_v26 = vsel %vm17749_vm9, %v4123_v0, 4286644096  ;;  %v4181_v19 = vunpack.i.l.bf16 %v4179_v3  ;;  %v15211_v35 = vpop.f32.mrb[21].mxu0 }
 0x34c   : > { %v4144_v49 = vmax.f32 %v4142_v10, %v4143_v27  ;;  %v4168_v23 = vunpack.i.l.bf16 %v4166_v26  ;;  %v4169_v41 = vunpack.i.h.bf16 %v4166_v26  ;;  %v4182_v13 = vunpack.i.h.bf16 %v4179_v3  ;;  %v15215_v20 = vpop.f32.mrb[22].mxu0 }
 0x34d   : > { %v4132_v12 = vrot.slane %v4131_v1, 4  ;;  %v4157_v15 = vmax.f32 %v4155_v5, %v4156_v39  ;;  %v4192_v17 = vsel %vm17749_vm9, %v4120_v24, 4286644096  ;;  %v4205_v45 = vsel %vm17749_vm9, %v4122_v62, 4286644096  ;;  %v15217_v28 = vpop.f32.mrb[23].mxu0 }
 0x34e   : > { %v4145_v22 = vrot.slane %v4144_v49, 4  ;;  %v4170_v7 = vmax.f32 %v4168_v23, %v4169_v41  ;;  %v4183_v14 = vmax.f32 %v4181_v19, %v4182_v13  ;;  %v4194_v25 = vunpack.i.l.bf16 %v4192_v17 }
 0x34f   : > { %v4133_v30 = vmax.f32 %v4131_v1, %v4132_v12  ;;  %v4158_v16 = vrot.slane %v4157_v15, 4  ;;  %v4195_v63 = vunpack.i.h.bf16 %v4192_v17  ;;  %v4207_v48 = vunpack.i.l.bf16 %v4205_v45 }
 0x350   : > { %v4146_v31 = vmax.f32 %v4144_v49, %v4145_v22  ;;  %v4171_v37 = vrot.slane %v4170_v7, 4  ;;  %v4184_v4 = vrot.slane %v4183_v14, 4  ;;  %v4208_v9 = vunpack.i.h.bf16 %v4205_v45 }
 0x351   : > { %v4134_v40 = vrot.slane %v4133_v30, 2  ;;  %v4159_v42 = vmax.f32 %v4157_v15, %v4158_v16  ;;  %v4196_v50 = vmax.f32 %v4194_v25, %v4195_v63  ;;  %v4218_v32 = vsel %vm17749_vm9, %v4124_v18, 4286644096  ;;  %v15220_v21 = vpop.f32.mrb[24].mxu0 }
 0x352   : > { %v4147_v44 = vrot.slane %v4146_v31, 2  ;;  %v4172_v59 = vmax.f32 %v4170_v7, %v4171_v37  ;;  %v4185_v56 = vmax.f32 %v4183_v14, %v4184_v4  ;;  %v4209_v43 = vmax.f32 %v4207_v48, %v4208_v9  ;;  %v15222_v52 = vpop.f32.mrb[25].mxu0 }
 0x353   : > { %v4135_v60 = vmax.f32 %v4133_v30, %v4134_v40  ;;  %v4160_v8 = vrot.slane %v4159_v42, 2  ;;  %v4197_v24 = vrot.slane %v4196_v50, 4  ;;  %v4220_v62 = vunpack.i.l.bf16 %v4218_v32  ;;  %v15224_v0 = vpop.f32.mrb[26].mxu0  ;;  %v15237_v40 = vld [vmem:[#allocation5 + $0x28] sm:$0xe0] }
 0x354   : > { %v4148_v2 = vmax.f32 %v4146_v31, %v4147_v44  ;;  %v4173_v36 = vrot.slane %v4172_v59, 2  ;;  %v4186_v46 = vrot.slane %v4185_v56, 2  ;;  %v4210_v47 = vrot.slane %v4209_v43, 4  ;;  %v15226_v3 = vpop.f32.mrb[27].mxu0  ;;  %v4284_v31 = vld [vmem:[#allocation5 + $0x18] sm:$0x3] }
 0x355   : > { %v4136_v18 = vrot.slane %v4135_v60, 1  ;;  %v4161_v10 = vmax.f32 %v4159_v42, %v4160_v8  ;;  %v4198_v27 = vmax.f32 %v4196_v50, %v4197_v24  ;;  %v4221_v5 = vunpack.i.h.bf16 %v4218_v32  ;;  %v15253_v24 = vpop.f32.mrb[0].mxu1 }
 0x356   : > { %v4149_v1 = vrot.slane %v4148_v2, 1  ;;  %v4174_v39 = vmax.f32 %v4172_v59, %v4173_v36  ;;  %v4187_v26 = vmax.f32 %v4185_v56, %v4186_v46  ;;  %v4211_v19 = vmax.f32 %v4209_v43, %v4210_v47  ;;  %v15257_v36 = vpop.f32.mrb[1].mxu1 }
 0x357   : > { %v4137_v49 = vmax.f32 %v4135_v60, %v4136_v18  ;;  %v4162_v23 = vrot.slane %v4161_v10, 1  ;;  %v4199_v41 = vrot.slane %v4198_v27, 2  ;;  %v4222_v13 = vmax.f32 %v4220_v62, %v4221_v5 }
 0x358   : > { %v4150_v12 = vmax.f32 %v4148_v2, %v4149_v1  ;;  %v4175_v15 = vrot.slane %v4174_v39, 1  ;;  %v4188_v17 = vrot.slane %v4187_v26, 1  ;;  %v4212_v45 = vrot.slane %v4211_v19, 2 }
 0x359   : > { %v4163_v22 = vmax.f32 %v4161_v10, %v4162_v23  ;;  %v4200_v7 = vmax.f32 %v4198_v27, %v4199_v41  ;;  %v4223_v14 = vrot.slane %v4222_v13, 4  ;;  %v15230_v25 = vadd.f32 %v15134_v11, %v15199_v57  ;;  %v4283_v57 = vld [vmem:[#allocation5 + $0x10] sm:$0xfc] }
 0x35a   : > { %v4176_v30 = vmax.f32 %v4174_v39, %v4175_v15  ;;  %v4189_v16 = vmax.f32 %v4187_v26, %v4188_v17  ;;  %v4213_v63 = vmax.f32 %v4211_v19, %v4212_v45  ;;  %v4291_v48 = vsel %vm17746_vm3, %v4289_v55, %v4290_v54  ;;  %v15264_v10 = vld [vmem:[#allocation5 + $0x30] sm:$0x1f]  ;;  %v15277_v19 = vpop.f32.mrb[28].mxu0 }
 0x35b   : > { %v4138_v37 = vpack.i.bf16 %v4137_v49, %v4137_v49  ;;  %v4151_v4 = vpack.i.bf16 %v4150_v12, %v4150_v12  ;;  %v4201_v9 = vrot.slane %v4200_v7, 1  ;;  %v4164_v42 = vpack.i.bf16 %v4163_v22, %v4163_v22  ;;  %v15281_v12 = vpop.f32.mrb[29].mxu0 }
 0x35c   : > { %v15239_v50 = vmax.f32 %v4222_v13, %v4223_v14  ;;  %v4295_v32 = vmax.bf16 %v4290_v54, %v4284_v31  ;;  %v4177_v44 = vpack.i.bf16 %v4176_v30, %v4176_v30  ;;  %v4190_v59 = vpack.i.bf16 %v4189_v16, %v4189_v16 }
 0x35d   : > { %v4214_v56 = vrot.slane %v4213_v63, 1  ;;  %v4294_v51 = vmax.bf16 %v4291_v48, %v4283_v57  ;;  %v15247_v60 = vadd.f32 %v15134_v11, %v15202_v61  ;;  %v15251_v8 = vmul.f32 %v15183_v53, %v15129_v34  ;;  %v15266_v53 = vpop.f32.mrb[2].mxu1 }
 0x35e   : > { %v15255_v33 = vmax.f32 %v4200_v7, %v4201_v9  ;;  %v4238_v54 = vunpack.c.l.b16 %v4138_v37  ;;  %v4239_v62 = vunpack.c.l.b16 %v4151_v4  ;;  %v15260_v47 = vunpack.c.l.b16 %v4164_v42  ;;  %v15275_v26 = vpop.f32.mrb[3].mxu1  ;;  %v15288_v7 = vpop.f32.mrb[30].mxu0 }
 0x35f   : > { %v4298_v2 = vcombine.high %v4294_v51, %v4294_v51  ;;  %v4305_v61 = vrot.slane %v4294_v51, %v15175_v58  ;;  %v4353_v18 = vrot.slane %v4295_v32, %v15175_v58  ;;  %v15268_v27 = vmax.f32 %v4213_v63, %v4214_v56  ;;  %v15293_v48 = vpop.f32.mrb[31].mxu0 }
 0x360   : > { %v15270_v5 = vunpack.c.l.b16 %v4177_v44  ;;  %v15272_v1 = vunpack.c.l.b16 %v4190_v59  ;;  %v15284_v15 = vsel %vm17747_vm10, %v4239_v62, %v4238_v54 }
 0x361   : > { %17755 = vst [vmem:[#allocation10_spill] sm:$0xff] %v15268_v27  ;;  %v4312_v39 = vrot.slane %v4298_v2, %v15175_v58  ;;  %v4313_v49 = vcombine.high %v4305_v61, %v4305_v61  ;;  %v4321_v23 = vrot.slane %v4305_v61, %v15175_v58  ;;  %v4354_v41 = vcombine.high %v4353_v18, %v4353_v18 }
 0x362   : > { %17756 = vst [vmem:[#allocation11_spill] sm:$0xff] %v15270_v5  ;;  %17757 = vst [vmem:[#allocation12_spill] sm:$0xff] %v15272_v1  ;;  %v4361_v13 = vrot.slane %v4353_v18, %v15175_v58 }
 0x363   : > { %v4314_v17 = vcombine.high %v4312_v39, %v4312_v39  ;;  %v4328_v45 = vrot.slane %v4312_v39, %v15175_v58  ;;  %v4335_v14 = vrot.slane %v4313_v49, %v15175_v58  ;;  %v4343_v30 = vcombine.high %v4321_v23, %v4321_v23 }
 0x364   : > { %v4368_v16 = vrot.slane %v4354_v41, %v15175_v58  ;;  %v4448_v63 = vsel %vm17749_vm9, %v4361_v13, 4286644096 }
 0x365   : > { %v4342_v31 = vrot.slane %v4314_v17, %v15175_v58  ;;  %v4344_v37 = vcombine.high %v4328_v45, %v4328_v45  ;;  %v4396_v4 = vsel %vm17749_vm9, %v4328_v45, 4286644096  ;;  %v4450_v9 = vunpack.i.l.bf16 %v4448_v63 }
 0x366   : > { %v4345_v42 = vcombine.high %v4335_v14, %v4335_v14  ;;  %v4370_v57 = vsel %vm17749_vm9, %v4343_v30, 4286644096  ;;  %v4398_v32 = vunpack.i.l.bf16 %v4396_v4  ;;  %v4399_v44 = vunpack.i.h.bf16 %v4396_v4 }
 0x367   : > { %v4346_v59 = vcombine.high %v4342_v31, %v4342_v31  ;;  %v4372_v56 = vunpack.i.l.bf16 %v4370_v57  ;;  %v4373_v51 = vunpack.i.h.bf16 %v4370_v57  ;;  %v4409_v54 = vsel %vm17749_vm9, %v4342_v31, 4286644096 }
 0x368   : > { %v4383_v62 = vsel %vm17749_vm9, %v4345_v42, 4286644096  ;;  %v4400_v2 = vmax.f32 %v4398_v32, %v4399_v44  ;;  %v4411_v61 = vunpack.i.l.bf16 %v4409_v54  ;;  %v4412_v18 = vunpack.i.h.bf16 %v4409_v54 }
 0x369   : > { %v4374_v39 = vmax.f32 %v4372_v56, %v4373_v51  ;;  %v4385_v49 = vunpack.i.l.bf16 %v4383_v62  ;;  %v4386_v23 = vunpack.i.h.bf16 %v4383_v62  ;;  %v4422_v41 = vsel %vm17749_vm9, %v4344_v37, 4286644096 }
 0x36a   : > { %v4401_v13 = vrot.slane %v4400_v2, 4  ;;  %v4413_v17 = vmax.f32 %v4411_v61, %v4412_v18  ;;  %v4424_v45 = vunpack.i.l.bf16 %v4422_v41  ;;  %v4425_v14 = vunpack.i.h.bf16 %v4422_v41 }
 0x36b   : > { %v4375_v30 = vrot.slane %v4374_v39, 4  ;;  %v4387_v4 = vmax.f32 %v4385_v49, %v4386_v23  ;;  %v4435_v57 = vsel %vm17749_vm9, %v4346_v59, 4286644096  ;;  %v4451_v43 = vunpack.i.h.bf16 %v4448_v63 }
 0x36c   : > { %v4402_v31 = vmax.f32 %v4400_v2, %v4401_v13  ;;  %v4414_v46 = vrot.slane %v4413_v17, 4  ;;  %v4426_v42 = vmax.f32 %v4424_v45, %v4425_v14  ;;  %v4437_v32 = vunpack.i.l.bf16 %v4435_v57 }
 0x36d   : > { %v4376_v44 = vmax.f32 %v4374_v39, %v4375_v30  ;;  %v4388_v54 = vrot.slane %v4387_v4, 4  ;;  %v4438_v56 = vunpack.i.h.bf16 %v4435_v57  ;;  %v4452_v51 = vmax.f32 %v4450_v9, %v4451_v43 }
 0x36e   : > { %v4403_v62 = vrot.slane %v4402_v31, 2  ;;  %v4415_v37 = vmax.f32 %v4413_v17, %v4414_v46  ;;  %v4427_v55 = vrot.slane %v4426_v42, 4  ;;  %v4461_v61 = vsel %vm17749_vm9, %v4368_v16, 4286644096 }
 0x36f   : > { %v4377_v18 = vrot.slane %v4376_v44, 2  ;;  %v4389_v41 = vmax.f32 %v4387_v4, %v4388_v54  ;;  %v4439_v49 = vmax.f32 %v4437_v32, %v4438_v56  ;;  %v4453_v23 = vrot.slane %v4452_v51, 4 }
 0x370   : > { %v4404_v59 = vmax.f32 %v4402_v31, %v4403_v62  ;;  %v4416_v63 = vrot.slane %v4415_v37, 2  ;;  %v4428_v2 = vmax.f32 %v4426_v42, %v4427_v55  ;;  %v4463_v13 = vunpack.i.l.bf16 %v4461_v61  ;;  %v4517_v62 = vld [vmem:[#allocation5 + $0x28] sm:$0xf] }
 0x371   : > { %v4378_v45 = vmax.f32 %v4376_v44, %v4377_v18  ;;  %v4390_v14 = vrot.slane %v4389_v41, 2  ;;  %v4440_v39 = vrot.slane %v4439_v49, 4  ;;  %v4454_v30 = vmax.f32 %v4452_v51, %v4453_v23 }
 0x372   : > { %v4405_v57 = vrot.slane %v4404_v59, 1  ;;  %v4417_v43 = vmax.f32 %v4415_v37, %v4416_v63  ;;  %v4429_v9 = vrot.slane %v4428_v2, 2  ;;  %v4464_v22 = vunpack.i.h.bf16 %v4461_v61 }
 0x373   : > { %v4379_v46 = vrot.slane %v4378_v45, 1  ;;  %v4391_v17 = vmax.f32 %v4389_v41, %v4390_v14  ;;  %v4441_v38 = vmax.f32 %v4439_v49, %v4440_v39  ;;  %v4455_v16 = vrot.slane %v4454_v30, 2 }
 0x374   : > { %v4203_v4 = vpack.i.bf16 %v15255_v33, %v15255_v33  ;;  %v4418_v32 = vrot.slane %v4417_v43, 1  ;;  %v4430_v31 = vmax.f32 %v4428_v2, %v4429_v9  ;;  %v4465_v54 = vmax.f32 %v4463_v13, %v4464_v22  ;;  %v15322_v9 = vpop.f32.mrb[4].mxu1 }
 0x375   : > { %v4380_v55 = vmax.f32 %v4378_v45, %v4379_v46  ;;  %v4392_v42 = vrot.slane %v4391_v17, 1  ;;  %v4442_v44 = vrot.slane %v4441_v38, 2  ;;  %v4456_v56 = vmax.f32 %v4454_v30, %v4455_v16 }
 0x376   : > { %v4406_v51 = vmax.f32 %v4404_v59, %v4405_v57  ;;  %v4431_v18 = vrot.slane %v4430_v31, 1  ;;  %v4466_v37 = vrot.slane %v4465_v54, 4  ;;  %v17758_v61 = vrot.slane %v15264_v10, 1  ;;  %v15324_v10 = vpop.f32.mrb[32].mxu0 }
 0x377   : > { %v17759_v41 = vrot.slane %v15237_v40, 1  ;;  %v4393_v23 = vmax.f32 %v4391_v17, %v4392_v42  ;;  %v4419_v63 = vmax.f32 %v4417_v43, %v4418_v32  ;;  %v4443_v33 = vmax.f32 %v4441_v38, %v4442_v44  ;;  %v4516_v38 = vld [vmem:[#allocation5 + $0x20] sm:$0xf0]  ;;  %v15328_v32 = vld [vmem:[#allocation5 + $0x38] sm:$0x80] }
 0x378   : > { %v17760_v2 = vmov %v17758_v61  ;;  %v4381_v13 = vpack.i.bf16 %v4380_v55, %v4380_v55  ;;  %v4432_v45 = vmax.f32 %v4430_v31, %v4431_v18  ;;  %v4457_v14 = vrot.slane %v4456_v56, 1  ;;  %17764 = vst [vmem:[#allocation15_spill] sm:$0xff] %v15328_v32  ;;  %v15330_v31 = vpop.f32.mrb[5].mxu1 }
 0x379   : > { %v4524_v49 = vsel %vm17746_vm3, %v17759_v41, %v17758_v61  ;;  %v4528_v22 = vmax.bf16 %v17760_v2, %v4517_v62  ;;  %v4467_v39 = vmax.f32 %v4465_v54, %v4466_v37  ;;  %v17761_v59 = vrot.slane %v15239_v50, 2  ;;  %v15332_v54 = vpop.f32.mrb[33].mxu0  ;;  %v15335_v44 = vpop.f32.mrb[6].mxu1 }
 0x37a   : > { %v15320_v40 = vsel %vm17738_vm11, %v15260_v47, %v15284_v15  ;;  %v4394_v57 = vpack.i.bf16 %v4393_v23, %v4393_v23  ;;  %v4444_v43 = vrot.slane %v4443_v33, 1  ;;  %v4407_v17 = vpack.i.bf16 %v4406_v51, %v4406_v51  ;;  %17765 = vst [vmem:[#allocation16_spill] sm:$0xff] %v15335_v44  ;;  %v15337_v62 = vpop.f32.mrb[34].mxu0  ;;  %v15341_v41 = vpop.f32.mrb[7].mxu1 }
 0x37b   : > { %v15315_v30 = vmax.f32 %v15239_v50, %v17761_v59  ;;  %17763 = vst [vmem:[#allocation14_spill] sm:$0xff] %v15320_v40  ;;  %v4468_v16 = vrot.slane %v4467_v39, 2  ;;  %v4527_v50 = vmax.bf16 %v4524_v49, %v4516_v38  ;;  %v4420_v47 = vpack.i.bf16 %v4419_v63, %v4419_v63  ;;  %17766 = vst [vmem:[#allocation17_spill] sm:$0xff] %v15337_v62  ;;  %v15343_v49 = vpop.f32.mrb[35].mxu0 }
 0x37c   : > { %v4445_v15 = vmax.f32 %v4443_v33, %v4444_v43  ;;  %v4482_v55 = vunpack.c.l.b16 %v4394_v57  ;;  %v4562_v42 = vrot.slane %v4528_v22, %v15175_v58  ;;  %v4433_v18 = vpack.i.bf16 %v4432_v45, %v4432_v45  ;;  %17767 = vst [vmem:[#allocation18_spill] sm:$0xff] %v15341_v41  ;;  %17768 = vst [vmem:[#allocation19_spill] sm:$0xff] %v15343_v49 }
 0x37d   : > { %17762 = vst [vmem:[#allocation13_spill] sm:$0xff] %v15315_v30  ;;  %v15339_v37 = vmax.f32 %v4456_v56, %v4457_v14  ;;  %v4481_v51 = vunpack.c.l.b16 %v4381_v13  ;;  %v4531_v61 = vcombine.high %v4527_v50, %v4527_v50  ;;  %v15345_v23 = vunpack.c.l.b16 %v4203_v4 }
 0x37e   : > { %v15347_v63 = vmax.f32 %v4467_v39, %v4468_v16  ;;  %v4563_v2 = vcombine.high %v4562_v42, %v4562_v42  ;;  %v4446_v22 = vpack.i.bf16 %v4445_v15, %v4445_v15  ;;  %v4570_v56 = vrot.slane %v4562_v42, %v15175_v58 }
 0x37f   : > { %17769 = vst [vmem:[#allocation20_spill] sm:$0xff] %v15345_v23  ;;  %v4489_v59 = vsel %vm17747_vm10, %v4482_v55, %v4481_v51  ;;  %v4538_v45 = vrot.slane %v4531_v61, %v15175_v58  ;;  %v4483_v13 = vunpack.c.l.b16 %v4407_v17  ;;  %v15353_v14 = vunpack.c.l.b16 %v4420_v47 }
 0x380   : > { %v4577_v57 = vrot.slane %v4563_v2, %v15175_v58  ;;  %v15359_v43 = vunpack.c.l.b16 %v4433_v18  ;;  %v4633_v17 = vsel %vm17749_vm9, %v4570_v56, 4286644096  ;;  %v15367_v47 = vadd.f32 %v15134_v11, %v15251_v8 }
 0x381   : > { %v4539_v38 = vcombine.high %v4538_v45, %v4538_v45  ;;  %v4546_v16 = vrot.slane %v4538_v45, %v15175_v58  ;;  %v4490_v15 = vsel %vm17738_vm11, %v4483_v13, %v4489_v59  ;;  %v15369_v55 = vunpack.c.l.b16 %v4446_v22 }
 0x382   : > { %v4578_v18 = vcombine.high %v4570_v56, %v4570_v56  ;;  %v4635_v2 = vunpack.i.l.bf16 %v4633_v17  ;;  %v4636_v45 = vunpack.i.h.bf16 %v4633_v17  ;;  %v4646_v46 = vsel %vm17749_vm9, %v4577_v57, 4286644096 }
 0x383   : > { %v4553_v42 = vrot.slane %v4539_v38, %v15175_v58  ;;  %v4554_v51 = vcombine.high %v4546_v16, %v4546_v16  ;;  %v4581_v61 = vsel %vm17749_vm9, %v4546_v16, 4286644096  ;;  %v4579_v59 = vcombine.high %v4577_v57, %v4577_v57 }
 0x384   : > { %v4583_v13 = vunpack.i.l.bf16 %v4581_v61  ;;  %v4584_v4 = vunpack.i.h.bf16 %v4581_v61  ;;  %v4637_v22 = vmax.f32 %v4635_v2, %v4636_v45  ;;  %v4648_v50 = vunpack.i.l.bf16 %v4646_v46 }
 0x385   : > { %v4555_v33 = vcombine.high %v4553_v42, %v4553_v42  ;;  %v4594_v39 = vsel %vm17749_vm9, %v4553_v42, 4286644096  ;;  %v4607_v8 = vsel %vm17749_vm9, %v4554_v51, 4286644096  ;;  %v4649_v5 = vunpack.i.h.bf16 %v4646_v46 }
 0x386   : > { %v4585_v38 = vmax.f32 %v4583_v13, %v4584_v4  ;;  %v4596_v23 = vunpack.i.l.bf16 %v4594_v39  ;;  %v4597_v56 = vunpack.i.h.bf16 %v4594_v39  ;;  %v4609_v27 = vunpack.i.l.bf16 %v4607_v8 }
 0x387   : > { %v4610_v16 = vunpack.i.h.bf16 %v4607_v8  ;;  %v4620_v17 = vsel %vm17749_vm9, %v4555_v33, 4286644096  ;;  %v4638_v1 = vrot.slane %v4637_v22, 4  ;;  %v4650_v32 = vmax.f32 %v4648_v50, %v4649_v5 }
 0x388   : > { %v4586_v40 = vrot.slane %v4585_v38, 4  ;;  %v4598_v57 = vmax.f32 %v4596_v23, %v4597_v56  ;;  %v4622_v30 = vunpack.i.l.bf16 %v4620_v17  ;;  %v4623_v61 = vunpack.i.h.bf16 %v4620_v17 }
 0x389   : > { %v4611_v58 = vmax.f32 %v4609_v27, %v4610_v16  ;;  %v4639_v42 = vmax.f32 %v4637_v22, %v4638_v1  ;;  %v4659_v51 = vsel %vm17749_vm9, %v4578_v18, 4286644096  ;;  %v4651_v49 = vrot.slane %v4650_v32, 4 }
 0x38a   : > { %v4587_v2 = vmax.f32 %v4585_v38, %v4586_v40  ;;  %v4599_v4 = vrot.slane %v4598_v57, 4  ;;  %v4624_v45 = vmax.f32 %v4622_v30, %v4623_v61  ;;  %v4661_v39 = vunpack.i.l.bf16 %v4659_v51 }
 0x38b   : > { %v4612_v13 = vrot.slane %v4611_v58, 4  ;;  %v4640_v8 = vrot.slane %v4639_v42, 2  ;;  %v4662_v33 = vunpack.i.h.bf16 %v4659_v51  ;;  %v4672_v23 = vsel %vm17749_vm9, %v4579_v59, 4286644096 }
 0x38c   : > { %v4588_v41 = vrot.slane %v4587_v2, 2  ;;  %v4600_v46 = vmax.f32 %v4598_v57, %v4599_v4  ;;  %v4625_v62 = vrot.slane %v4624_v45, 4  ;;  %v4652_v5 = vmax.f32 %v4650_v32, %v4651_v49 }
 0x38d   : > { %v4613_v27 = vmax.f32 %v4611_v58, %v4612_v13  ;;  %v4641_v1 = vmax.f32 %v4639_v42, %v4640_v8  ;;  %v4663_v50 = vmax.f32 %v4661_v39, %v4662_v33  ;;  %v4674_v38 = vunpack.i.l.bf16 %v4672_v23 }
 0x38e   : > { %v4589_v18 = vmax.f32 %v4587_v2, %v4588_v41  ;;  %v4601_v22 = vrot.slane %v4600_v46, 2  ;;  %v4626_v40 = vmax.f32 %v4624_v45, %v4625_v62  ;;  %v4491_v30 = vsel %vm4250_vm12, %v15353_v14, %v4490_v15 }
 0x38f   : > { %v4614_v56 = vrot.slane %v4613_v27, 2  ;;  %v4642_v16 = vrot.slane %v4641_v1, 1  ;;  %v4664_v17 = vrot.slane %v4663_v50, 4  ;;  %v4675_v4 = vunpack.i.h.bf16 %v4672_v23 }
 0x390   : > { %v4590_v61 = vrot.slane %v4589_v18, 1  ;;  %v4602_v57 = vmax.f32 %v4600_v46, %v4601_v22  ;;  %v4627_v51 = vrot.slane %v4626_v40, 2  ;;  %v4653_v44 = vrot.slane %v4652_v5, 2 }
 0x391   : > { %v4615_v59 = vmax.f32 %v4613_v27, %v4614_v56  ;;  %v4665_v58 = vmax.f32 %v4663_v50, %v4664_v17  ;;  %v4002_v32 = vmax.f32 %v15367_v47, 0.0  ;;  %v4676_v62 = vmax.f32 %v4674_v38, %v4675_v4 }
 0x392   : > { %v4591_v49 = vmax.f32 %v4589_v18, %v4590_v61  ;;  %v4603_v41 = vrot.slane %v4602_v57, 1  ;;  %v4628_v42 = vmax.f32 %v4626_v40, %v4627_v51  ;;  %v4492_v2 = vsel %vm4252_vm13, %v15359_v43, %v4491_v30 }
 0x393   : > { %v4616_v14 = vrot.slane %v4615_v59, 1  ;;  %v4643_v15 = vmax.f32 %v4641_v1, %v4642_v16  ;;  %v4666_v45 = vrot.slane %v4665_v58, 2  ;;  %v4677_v33 = vrot.slane %v4676_v62, 4 }
 0x394   : > { %v4592_v39 = vpack.i.bf16 %v4591_v49, %v4591_v49  ;;  %v4604_v13 = vmax.f32 %v4602_v57, %v4603_v41  ;;  %v4629_v8 = vrot.slane %v4628_v42, 1  ;;  %v17770_v46 = vrot.slane %v15347_v63, 1 }
 0x395   : > { %v4617_v47 = vmax.f32 %v4615_v59, %v4616_v14  ;;  %v4654_v27 = vmax.f32 %v4652_v5, %v4653_v44  ;;  %v4667_v50 = vmax.f32 %v4665_v58, %v4666_v45  ;;  %v4493_v18 = vsel %vm4254_vm14, %v15369_v55, %v4492_v2 }
 0x396   : > { %v15387_v23 = vmax.f32 %v15347_v63, %v17770_v46  ;;  %v4605_v43 = vpack.i.bf16 %v4604_v13, %v4604_v13  ;;  %v4630_v22 = vmax.f32 %v4628_v42, %v4629_v8  ;;  %v4678_v1 = vmax.f32 %v4676_v62, %v4677_v33 }
 0x397   : > { %v4618_v40 = vpack.i.bf16 %v4617_v47, %v4617_v47  ;;  %v4644_v38 = vpack.i.bf16 %v4643_v15, %v4643_v15  ;;  %v4692_v30 = vunpack.c.l.b16 %v4592_v39  ;;  %v17771_v56 = vmax.f32 %v15230_v25, 0.0 }
 0x398   : > { %v4631_v17 = vpack.i.bf16 %v4630_v22, %v4630_v22  ;;  %v4679_v61 = vrot.slane %v4678_v1, 2  ;;  %v4693_v57 = vunpack.c.l.b16 %v4605_v43  ;;  %v3921_v63 = vmul.f32 %v15129_v34, %v15190_v6 }
 0x399   : > { %v4028_v16 = vpack.c.bf16 %v4002_v32, %v17771_v56  ;;  %v4655_v44 = vrot.slane %v4654_v27, 1  ;;  %v4668_v5 = vrot.slane %v4667_v50, 1  ;;  %v4694_v51 = vunpack.c.l.b16 %v4618_v40 }
 0x39a   : > { %v3926_v55 = vmul.f32 %v15208_v29, %v15129_v34  ;;  %v4680_v4 = vmax.f32 %v4678_v1, %v4679_v61  ;;  %v4695_v59 = vunpack.c.l.b16 %v4631_v17  ;;  %v4700_v58 = vsel %vm17747_vm10, %v4693_v57, %v4692_v30  ;;  %v15444_v30 = vld [vmem:[%s17712_s3] ss:$0 sm:$0xff] }
 0x39b   : > { %4047 = vst.msk [vmem:[#allocation5 + $0x48] sm:$0xff] %vm17736_vm8, %v4028_v16  ;;  %v3964_v25 = vadd.f32 %v15134_v11, %v3921_v63  ;;  %v17772_v32 = vpack.i.bf16 %v15339_v37, %v15339_v37  ;;  %v4701_v6 = vsel %vm17738_vm11, %v4694_v51, %v4700_v58  ;;  %v3924_v42 = vmul.f32 %v15129_v34, %v15211_v35 }
 0x39c   : > { %v3969_v41 = vadd.f32 %v15134_v11, %v3926_v55  ;;  %v4472_v29 = vpack.i.bf16 %v15387_v23, %v15387_v23  ;;  %v4681_v62 = vrot.slane %v4680_v4, 1  ;;  %v3927_v14 = vmul.f32 %v15215_v20, %v15129_v34 }
 0x39d   : > { %v4487_v49 = vunpack.c.l.b16 %v17772_v32  ;;  %v4000_v2 = vmax.f32 %v3964_v25, 0.0  ;;  %v15414_v37 = vmax.f32 %v4654_v27, %v4655_v44  ;;  %v15416_v45 = vmax.f32 %v4667_v50, %v4668_v5  ;;  %v17774_v25 = vld [vmem:[#allocation16_spill] sm:$0xff]  ;;  %v17775_v32 = vld [vmem:[#allocation17_spill] sm:$0xff] }
 0x39e   : > { %v4696_v39 = vunpack.c.l.b16 %v4644_v38  ;;  %v4702_v13 = vsel %vm4250_vm12, %v4695_v59, %v4701_v6  ;;  %v17773_v35 = vmax.f32 %v15247_v60, 0.0  ;;  %v3967_v33 = vadd.f32 %v15134_v11, %v3924_v42  ;;  %v4728_v6 = vld [vmem:[#allocation5 + $0x38] sm:$0x3f] }
 0x39f   : > { %v15412_v15 = vsel %vm4256_vm15, %v4487_v49, %v4493_v18  ;;  %v3970_v46 = vadd.f32 %v15134_v11, %v3927_v14  ;;  %v4005_v47 = vmax.f32 %v3969_v41, 0.0  ;;  %v3925_v20 = vmul.f32 %v15129_v34, %v15217_v28  ;;  %v4727_v14 = vld [vmem:[#allocation5 + $0x30] sm:$0xc0] }
 0x3a0   : > { %v4027_v8 = vpack.c.bf16 %v4000_v2, %v17773_v35  ;;  %v3930_v27 = vmul.f32 %v15220_v21, %v15129_v34  ;;  %v3928_v50 = vmul.f32 %v15129_v34, %v15222_v52  ;;  %v15429_v18 = vmax.f32 %v4680_v4, %v4681_v62  ;;  %v17777_v62 = vld [vmem:[#allocation19_spill] sm:$0xff] }
 0x3a1   : > { %v4006_v60 = vmax.f32 %v3970_v46, 0.0  ;;  %v3931_v43 = vmul.f32 %v15224_v0, %v15129_v34  ;;  %v3929_v22 = vmul.f32 %v15129_v34, %v15226_v3  ;;  %v3968_v1 = vadd.f32 %v15134_v11, %v3925_v20 }
 0x3a2   : > { %4046 = vst.msk [vmem:[#allocation5 + $0x40] sm:$0xff] %vm17736_vm8, %v4027_v8  ;;  %v3973_v28 = vadd.f32 %v15134_v11, %v3930_v27  ;;  %v3971_v21 = vadd.f32 %v15134_v11, %v3928_v50  ;;  %v13181_v52 = vadd.f32 %v15277_v19, %v15253_v24  ;;  %v4003_v40 = vmax.f32 %v3967_v33, 0.0  ;;  %v15451_v11 = vld [vmem:[%s17711_s2] ss:$0 sm:$0xff] }
 0x3a3   : > { %v4030_v38 = vpack.c.bf16 %v4006_v60, %v4005_v47  ;;  %v3974_v0 = vadd.f32 %v15444_v30, %v3931_v43  ;;  %v3972_v34 = vadd.f32 %v15444_v30, %v3929_v22  ;;  %v4004_v3 = vmax.f32 %v3968_v1, 0.0 }
 0x3a4   : > { %v4009_v56 = vmax.f32 %v3973_v28, 0.0  ;;  %v4007_v16 = vmax.f32 %v3971_v21, 0.0  ;;  %v3934_v24 = vmul.f32 %v15451_v11, %v13181_v52  ;;  %v13182_v61 = vadd.f32 %v15281_v12, %v15257_v36 }
 0x3a5   : > { %4049 = vst.msk [vmem:[#allocation5 + $0x58] sm:$0xff] %vm17736_vm8, %v4030_v38  ;;  %v4010_v19 = vmax.f32 %v3974_v0, 0.0  ;;  %v4008_v17 = vmax.f32 %v3972_v34, 0.0  ;;  %v13183_v57 = vadd.f32 %v15288_v7, %v15266_v53  ;;  %v4029_v63 = vpack.c.bf16 %v4004_v3, %v4003_v40 }
 0x3a6   : > { %v3977_v44 = vadd.f32 %v15444_v30, %v3934_v24  ;;  %v13184_v5 = vadd.f32 %v15293_v48, %v15275_v26  ;;  %v13185_v51 = vadd.f32 %v15324_v10, %v15322_v9  ;;  %v3932_v59 = vmul.f32 %v15451_v11, %v13182_v61 }
 0x3a7   : > { %v4032_v55 = vpack.c.bf16 %v4010_v19, %v4009_v56  ;;  %v4031_v4 = vpack.c.bf16 %v4008_v17, %v4007_v16  ;;  %v3935_v58 = vmul.f32 %v15451_v11, %v13183_v57  ;;  %v4657_v36 = vpack.i.bf16 %v15414_v37, %v15414_v37  ;;  %4048 = vst.msk [vmem:[#allocation5 + $0x50] sm:$0xff] %vm17736_vm8, %v4029_v63  ;;  %v17778_v37 = vld [vmem:[#allocation15_spill] sm:$0xff] }
 0x3a8   : > { %v4670_v53 = vpack.i.bf16 %v15416_v45, %v15416_v45  ;;  %v3933_v26 = vmul.f32 %v15451_v11, %v13184_v5  ;;  %v13186_v7 = vadd.f32 %v15332_v54, %v15330_v31  ;;  %v3975_v9 = vadd.f32 %v15444_v30, %v3932_v59  ;;  %v17776_v54 = vld [vmem:[#allocation18_spill] sm:$0xff] }
 0x3a9   : > { %v4730_v12 = vld [vmem:[#allocation5 + $0x40] sm:$0x7f]  ;;  %4051 = vst.msk [vmem:[#allocation5 + $0x68] sm:$0xff] %vm17736_vm8, %v4032_v55  ;;  %4050 = vst.msk [vmem:[#allocation5 + $0x60] sm:$0xff] %vm17736_vm8, %v4031_v4  ;;  %v3978_v10 = vadd.f32 %v15444_v30, %v3935_v58  ;;  %v15480_v49 = vadd.f32 %v17775_v32, %v17774_v25  ;;  %v4683_v41 = vpack.i.bf16 %v15429_v18, %v15429_v18  ;;  %v17779_v45 = vrot.slane %v17778_v37, 1  ;;  %v17780_v18 = vld [vmem:[#allocation9_spill] sm:$0xff] }
 0x3aa   : > { %v4734_v48 = vrot.slane %v4730_v12, 1  ;;  %v4703_v42 = vsel %vm4252_vm13, %v4696_v39, %v4702_v13  ;;  %v3976_v31 = vadd.f32 %v15444_v30, %v3933_v26  ;;  %v15488_v2 = vadd.f32 %v17777_v62, %v17776_v54 }
 0x3ab   : > { %v4013_v33 = vmax.f32 %v3977_v44, 0.0  ;;  %v4014_v46 = vmax.f32 %v3978_v10, 0.0  ;;  %v4697_v47 = vunpack.c.l.b16 %v4657_v36  ;;  %v4011_v27 = vmax.f32 %v3975_v9, 0.0 }
 0x3ac   : > { %v4735_v35 = vsel %vm17746_vm3, %v17779_v45, %v4734_v48  ;;  %v4739_v8 = vmax.bf16 %v4734_v48, %v4728_v6  ;;  %v4012_v50 = vmax.f32 %v3976_v31, 0.0  ;;  %v15496_v39 = vunpack.c.l.b16 %v4472_v29  ;;  %v15499_v43 = vld [vmem:[#allocation5 + $0x58] sm:$0x1] }
 0x3ad   : > { %v4738_v20 = vmax.bf16 %v4735_v35, %v4727_v14  ;;  %v4034_v22 = vpack.c.bf16 %v4014_v46, %v4013_v33  ;;  %v15501_v1 = vunpack.c.l.b16 %v4670_v53  ;;  %v15504_v28 = vsel %vm4254_vm14, %v4697_v47, %v4703_v42 }
 0x3ae   : > { %v4767_v13 = vcombine.high %v4739_v8, %v4739_v8  ;;  %v4774_v60 = vrot.slane %v4739_v8, %v17780_v18  ;;  %v4033_v52 = vpack.c.bf16 %v4012_v50, %v4011_v27  ;;  %v15506_v40 = vunpack.c.l.b16 %v4683_v41  ;;  %v15510_v0 = vld [vmem:[#allocation5 + $0x50] sm:$0xfe] }
 0x3af   : > { %v4742_v21 = vcombine.high %v4738_v20, %v4738_v20  ;;  %4053 = vst.msk [vmem:[#allocation5 + $0x78] sm:$0xff] %vm17736_vm8, %v4034_v22  ;;  %v4959_v3 = vrot.slane %v15499_v43, 1  ;;  %v15517_v56 = vmul.f32 %v15451_v11, %v13185_v51  ;;  %v15520_v16 = vmul.f32 %v15451_v11, %v13186_v7 }
 0x3b0   : > { %v4781_v38 = vrot.slane %v4767_v13, %v17780_v18  ;;  %v4782_v23 = vcombine.high %v4774_v60, %v4774_v60  ;;  %v4790_v29 = vrot.slane %v4774_v60, %v17780_v18  ;;  %4052 = vst.msk [vmem:[#allocation5 + $0x70] sm:$0xff] %vm17736_vm8, %v4033_v52  ;;  %v4958_v61 = vrot.slane %v15510_v0, 1 }
 0x3b1   : > { %v4749_v34 = vrot.slane %v4742_v21, %v17780_v18 }
 0x3b2   : > { %v4783_v24 = vcombine.high %v4781_v38, %v4781_v38  ;;  %v4804_v19 = vrot.slane %v4782_v23, %v17780_v18  ;;  %v4812_v17 = vcombine.high %v4790_v29, %v4790_v29  ;;  %v4797_v44 = vrot.slane %v4781_v38, %v17780_v18 }
 0x3b3   : > { %v4750_v57 = vcombine.high %v4749_v34, %v4749_v34  ;;  %v4757_v63 = vrot.slane %v4749_v34, %v17780_v18  ;;  %v4841_v5 = vsel %vm17749_vm9, %v4790_v29, 4286644096 }
 0x3b4   : > { %v4811_v55 = vrot.slane %v4783_v24, %v17780_v18  ;;  %v4813_v51 = vcombine.high %v4804_v19, %v4804_v19  ;;  %v4843_v4 = vunpack.i.l.bf16 %v4841_v5  ;;  %v4844_v59 = vunpack.i.h.bf16 %v4841_v5 }
 0x3b5   : > { %v4764_v58 = vrot.slane %v4750_v57, %v17780_v18  ;;  %v4765_v36 = vcombine.high %v4757_v63, %v4757_v63  ;;  %v4854_v53 = vsel %vm17749_vm9, %v4804_v19, 4286644096  ;;  %v4867_v12 = vsel %vm17749_vm9, %v4812_v17, 4286644096 }
 0x3b6   : > { %v4845_v26 = vmax.f32 %v4843_v4, %v4844_v59  ;;  %v4856_v7 = vunpack.i.l.bf16 %v4854_v53  ;;  %v4857_v48 = vunpack.i.h.bf16 %v4854_v53  ;;  %v4869_v9 = vunpack.i.l.bf16 %v4867_v12 }
 0x3b7   : > { %v4766_v10 = vcombine.high %v4764_v58, %v4764_v58  ;;  %v4815_v25 = vsel %vm17749_vm9, %v4765_v36, 4286644096  ;;  %v4870_v32 = vunpack.i.h.bf16 %v4867_v12  ;;  %v4880_v6 = vsel %vm17749_vm9, %v4813_v51, 4286644096 }
 0x3b8   : > { %v4817_v41 = vunpack.i.l.bf16 %v4815_v25  ;;  %v4818_v42 = vunpack.i.h.bf16 %v4815_v25  ;;  %v4846_v31 = vrot.slane %v4845_v26, 4  ;;  %v4858_v54 = vmax.f32 %v4856_v7, %v4857_v48 }
 0x3b9   : > { %v4828_v62 = vsel %vm17749_vm9, %v4766_v10, 4286644096  ;;  %v4871_v14 = vmax.f32 %v4869_v9, %v4870_v32  ;;  %v4882_v37 = vunpack.i.l.bf16 %v4880_v6  ;;  %v4883_v45 = vunpack.i.h.bf16 %v4880_v6 }
 0x3ba   : > { %v4819_v35 = vmax.f32 %v4817_v41, %v4818_v42  ;;  %v4830_v8 = vunpack.i.l.bf16 %v4828_v62  ;;  %v4831_v33 = vunpack.i.h.bf16 %v4828_v62  ;;  %v4847_v46 = vmax.f32 %v4845_v26, %v4846_v31 }
 0x3bb   : > { %v4859_v47 = vrot.slane %v4858_v54, 4  ;;  %v4872_v20 = vrot.slane %v4871_v14, 4  ;;  %v4884_v27 = vmax.f32 %v4882_v37, %v4883_v45  ;;  %v4893_v50 = vsel %vm17749_vm9, %v4797_v44, 4286644096 }
 0x3bc   : > { %v4820_v13 = vrot.slane %v4819_v35, 4  ;;  %v4832_v60 = vmax.f32 %v4830_v8, %v4831_v33  ;;  %v4848_v22 = vrot.slane %v4847_v46, 2  ;;  %v4895_v21 = vunpack.i.l.bf16 %v4893_v50 }
 0x3bd   : > { %v4860_v52 = vmax.f32 %v4858_v54, %v4859_v47  ;;  %v4873_v38 = vmax.f32 %v4871_v14, %v4872_v20  ;;  %v4885_v23 = vrot.slane %v4884_v27, 4  ;;  %v4896_v29 = vunpack.i.h.bf16 %v4893_v50 }
 0x3be   : > { %v4821_v34 = vmax.f32 %v4819_v35, %v4820_v13  ;;  %v4833_v24 = vrot.slane %v4832_v60, 4  ;;  %v4849_v19 = vmax.f32 %v4847_v46, %v4848_v22  ;;  %v4906_v17 = vsel %vm17749_vm9, %v4811_v55, 4286644096 }
 0x3bf   : > { %v4861_v57 = vrot.slane %v4860_v52, 2  ;;  %v4874_v63 = vrot.slane %v4873_v38, 2  ;;  %v4886_v5 = vmax.f32 %v4884_v27, %v4885_v23  ;;  %v4897_v51 = vmax.f32 %v4895_v21, %v4896_v29 }
 0x3c0   : > { %v4822_v4 = vrot.slane %v4821_v34, 2  ;;  %v4834_v59 = vmax.f32 %v4832_v60, %v4833_v24  ;;  %v4850_v44 = vrot.slane %v4849_v19, 1  ;;  %v4908_v58 = vunpack.i.l.bf16 %v4906_v17 }
 0x3c1   : > { %v4862_v36 = vmax.f32 %v4860_v52, %v4861_v57  ;;  %v4875_v53 = vmax.f32 %v4873_v38, %v4874_v63  ;;  %v4887_v12 = vrot.slane %v4886_v5, 2  ;;  %v4898_v26 = vrot.slane %v4897_v51, 4  ;;  %v15559_v38 = vld [vmem:[#allocation5 + $0x68] sm:$0x7] }
 0x3c2   : > { %v4823_v7 = vmax.f32 %v4821_v34, %v4822_v4  ;;  %v4835_v48 = vrot.slane %v4834_v59, 2  ;;  %v4851_v9 = vmax.f32 %v4849_v19, %v4850_v44  ;;  %v4909_v10 = vunpack.i.h.bf16 %v4906_v17 }
 0x3c3   : > { %v4863_v25 = vrot.slane %v4862_v36, 1  ;;  %v4876_v32 = vrot.slane %v4875_v53, 1  ;;  %v4888_v6 = vmax.f32 %v4886_v5, %v4887_v12  ;;  %v4899_v55 = vmax.f32 %v4897_v51, %v4898_v26 }
 0x3c4   : > { %v4824_v41 = vrot.slane %v4823_v7, 1  ;;  %v4836_v42 = vmax.f32 %v4834_v59, %v4835_v48  ;;  %v4910_v31 = vmax.f32 %v4908_v58, %v4909_v10  ;;  %v15538_v54 = vadd.f32 %v15444_v30, %v15517_v56  ;;  %v4953_v56 = vld [vmem:[#allocation5 + $0x48] sm:$0xff] }
 0x3c5   : > { %v4889_v62 = vrot.slane %v4888_v6, 1  ;;  %v4900_v14 = vrot.slane %v4899_v55, 2  ;;  %v4960_v37 = vsel %vm17746_vm3, %v4958_v61, %v4959_v3  ;;  %v15547_v45 = vadd.f32 %v15444_v30, %v15520_v16 }
 0x3c6   : > { %v4825_v35 = vmax.f32 %v4823_v7, %v4824_v41  ;;  %v4837_v8 = vrot.slane %v4836_v42, 1  ;;  %v4911_v33 = vrot.slane %v4910_v31, 4  ;;  %v3939_v46 = vmul.f32 %v15451_v11, %v15480_v49 }
 0x3c7   : > { %v4852_v47 = vpack.i.bf16 %v4851_v9, %v4851_v9  ;;  %v15551_v20 = vmax.f32 %v4862_v36, %v4863_v25  ;;  %v15553_v27 = vmax.f32 %v4875_v53, %v4876_v32  ;;  %v4901_v43 = vmax.f32 %v4899_v55, %v4900_v14 }
 0x3c8   : > { %v4838_v0 = vmax.f32 %v4836_v42, %v4837_v8  ;;  %v15555_v50 = vmax.f32 %v4888_v6, %v4889_v62  ;;  %v4912_v3 = vmax.f32 %v4910_v31, %v4911_v33  ;;  %v4962_v61 = vmax.bf16 %v4960_v37, %v4953_v56 }
 0x3c9   : > { %v4826_v16 = vpack.i.bf16 %v4825_v35, %v4825_v35  ;;  %v4902_v13 = vrot.slane %v4901_v43, 1  ;;  %v4017_v60 = vmax.f32 %v15538_v54, 0.0  ;;  %v15563_v23 = vmul.f32 %v15451_v11, %v15488_v2  ;;  %v15580_v2 = vld [vmem:[#allocation5 + $0x60] sm:$0xf8]  ;;  %v5385_v54 = vld [vmem:[#allocation5 + $0x68] sm:$0xf0] }
 0x3ca   : > { %v4839_v21 = vpack.i.bf16 %v4838_v0, %v4838_v0  ;;  %v4913_v49 = vrot.slane %v4912_v3, 2  ;;  %v4964_v52 = vcombine.high %v4962_v61, %v4962_v61  ;;  %v15567_v34 = vunpack.c.l.b16 %v4852_v47 }
 0x3cb   : > { %v15565_v29 = vmax.f32 %v4901_v43, %v4902_v13  ;;  %v4971_v24 = vrot.slane %v4962_v61, %v17780_v18  ;;  %v15571_v19 = vadd.f32 %v15444_v30, %v3939_v46  ;;  %v4865_v17 = vpack.i.bf16 %v15551_v20, %v15551_v20 }
 0x3cc   : > { %v4878_v57 = vpack.i.bf16 %v15553_v27, %v15553_v27  ;;  %v4891_v63 = vpack.i.bf16 %v15555_v50, %v15555_v50  ;;  %v4978_v11 = vrot.slane %v4964_v52, %v17780_v18  ;;  %v15582_v5 = vunpack.c.l.b16 %v4826_v16  ;;  %v5388_v27 = vld [vmem:[#allocation5 + $0x78] sm:$0x1f] }
 0x3cd   : > { %v4979_v51 = vcombine.high %v4971_v24, %v4971_v24  ;;  %v4987_v4 = vrot.slane %v4971_v24, %v17780_v18  ;;  %v5163_v59 = vrot.slane %v15559_v38, 1  ;;  %v15586_v44 = vmax.f32 %v4912_v3, %v4913_v49 }
 0x3ce   : > { %v15588_v58 = vunpack.c.l.b16 %v4839_v21  ;;  %v4980_v36 = vcombine.high %v4978_v11, %v4978_v11  ;;  %v4994_v53 = vrot.slane %v4978_v11, %v17780_v18  ;;  %v4904_v12 = vpack.i.bf16 %v15565_v29, %v15565_v29 }
 0x3cf   : > { %v5001_v26 = vrot.slane %v4979_v51, %v17780_v18  ;;  %v5009_v7 = vcombine.high %v4987_v4, %v4987_v4  ;;  %v5162_v48 = vrot.slane %v15580_v2, 1  ;;  %v5014_v25 = vsel %vm17749_vm9, %v4987_v4, 4286644096 }
 0x3d0   : > { %v5008_v9 = vrot.slane %v4980_v36, %v17780_v18  ;;  %v5010_v10 = vcombine.high %v4994_v53, %v4994_v53  ;;  %v5066_v32 = vsel %vm17749_vm9, %v4994_v53, 4286644096  ;;  %v5016_v55 = vunpack.i.l.bf16 %v5014_v25 }
 0x3d1   : > { %v5011_v6 = vcombine.high %v5001_v26, %v5001_v26  ;;  %v5017_v41 = vunpack.i.h.bf16 %v5014_v25  ;;  %v5027_v42 = vsel %vm17749_vm9, %v5001_v26, 4286644096  ;;  %v5040_v37 = vsel %vm17749_vm9, %v5009_v7, 4286644096 }
 0x3d2   : > { %v5012_v31 = vcombine.high %v5008_v9, %v5008_v9  ;;  %v5029_v62 = vunpack.i.l.bf16 %v5027_v42  ;;  %v5030_v14 = vunpack.i.h.bf16 %v5027_v42  ;;  %v5042_v8 = vunpack.i.l.bf16 %v5040_v37 }
 0x3d3   : > { %v5018_v35 = vmax.f32 %v5016_v55, %v5017_v41  ;;  %v5043_v33 = vunpack.i.h.bf16 %v5040_v37  ;;  %v5053_v46 = vsel %vm17749_vm9, %v5011_v6, 4286644096  ;;  %v5068_v0 = vunpack.i.l.bf16 %v5066_v32 }
 0x3d4   : > { %v5031_v56 = vmax.f32 %v5029_v62, %v5030_v14  ;;  %v5055_v47 = vunpack.i.l.bf16 %v5053_v46  ;;  %v5056_v43 = vunpack.i.h.bf16 %v5053_v46  ;;  %v5069_v16 = vunpack.i.h.bf16 %v5066_v32 }
 0x3d5   : > { %v5019_v3 = vrot.slane %v5018_v35, 4  ;;  %v5044_v61 = vmax.f32 %v5042_v8, %v5043_v33  ;;  %v5079_v13 = vsel %vm17749_vm9, %v5008_v9, 4286644096  ;;  %v5092_v36 = vsel %vm17749_vm9, %v5010_v10, 4286644096 }
 0x3d6   : > { %v5032_v21 = vrot.slane %v5031_v56, 4  ;;  %v5057_v49 = vmax.f32 %v5055_v47, %v5056_v43  ;;  %v5081_v52 = vunpack.i.l.bf16 %v5079_v13  ;;  %v5082_v24 = vunpack.i.h.bf16 %v5079_v13 }
 0x3d7   : > { %v5020_v11 = vmax.f32 %v5018_v35, %v5019_v3  ;;  %v5045_v51 = vrot.slane %v5044_v61, 4  ;;  %v5070_v4 = vmax.f32 %v5068_v0, %v5069_v16  ;;  %v5094_v25 = vunpack.i.l.bf16 %v5092_v36 }
 0x3d8   : > { %v5033_v53 = vmax.f32 %v5031_v56, %v5032_v21  ;;  %v5058_v26 = vrot.slane %v5057_v49, 4  ;;  %v5083_v7 = vmax.f32 %v5081_v52, %v5082_v24  ;;  %v5095_v42 = vunpack.i.h.bf16 %v5092_v36 }
 0x3d9   : > { %v5021_v6 = vrot.slane %v5020_v11, 2  ;;  %v5046_v55 = vmax.f32 %v5044_v61, %v5045_v51  ;;  %v5071_v41 = vrot.slane %v5070_v4, 4  ;;  %v5105_v14 = vsel %vm17749_vm9, %v5012_v31, 4286644096 }
 0x3da   : > { %v5034_v32 = vrot.slane %v5033_v53, 2  ;;  %v5059_v62 = vmax.f32 %v5057_v49, %v5058_v26  ;;  %v5084_v9 = vrot.slane %v5083_v7, 4  ;;  %v5096_v33 = vmax.f32 %v5094_v25, %v5095_v42 }
 0x3db   : > { %v5022_v37 = vmax.f32 %v5020_v11, %v5021_v6  ;;  %v5047_v8 = vrot.slane %v5046_v55, 2  ;;  %v5072_v35 = vmax.f32 %v5070_v4, %v5071_v41  ;;  %v5107_v56 = vunpack.i.l.bf16 %v5105_v14  ;;  %v5157_v11 = vld [vmem:[#allocation5 + $0x60] sm:$0x3] }
 0x3dc   : > { %v5035_v46 = vmax.f32 %v5033_v53, %v5034_v32  ;;  %v5060_v47 = vrot.slane %v5059_v62, 2  ;;  %v5085_v10 = vmax.f32 %v5083_v7, %v5084_v9  ;;  %v5097_v16 = vrot.slane %v5096_v33, 4 }
 0x3dd   : > { %v5023_v43 = vrot.slane %v5022_v37, 1  ;;  %v5048_v0 = vmax.f32 %v5046_v55, %v5047_v8  ;;  %v5073_v3 = vrot.slane %v5072_v35, 2  ;;  %v5108_v52 = vunpack.i.h.bf16 %v5105_v14 }
 0x3de   : > { %v5036_v61 = vrot.slane %v5035_v46, 1  ;;  %v5061_v13 = vmax.f32 %v5059_v62, %v5060_v47  ;;  %v5086_v21 = vrot.slane %v5085_v10, 2  ;;  %v5098_v31 = vmax.f32 %v5096_v33, %v5097_v16 }
 0x3df   : > { %v5024_v49 = vmax.f32 %v5022_v37, %v5023_v43  ;;  %v5049_v24 = vrot.slane %v5048_v0, 1  ;;  %v5074_v51 = vmax.f32 %v5072_v35, %v5073_v3  ;;  %v5109_v53 = vmax.f32 %v5107_v56, %v5108_v52  ;;  %v5156_v35 = vld [vmem:[#allocation5 + $0x58] sm:$0xfc] }
 0x3e0   : > { %v5037_v36 = vmax.f32 %v5035_v46, %v5036_v61  ;;  %v5062_v4 = vrot.slane %v5061_v13, 1  ;;  %v5087_v26 = vmax.f32 %v5085_v10, %v5086_v21  ;;  %v4934_v7 = vsel %vm17747_vm10, %v15588_v58, %v15582_v5 }
 0x3e1   : > { %v15607_v25 = vmax.f32 %v5048_v0, %v5049_v24  ;;  %v5075_v6 = vrot.slane %v5074_v51, 1  ;;  %v5099_v55 = vrot.slane %v5098_v31, 2  ;;  %v15612_v41 = vunpack.c.l.b16 %v4865_v17 }
 0x3e2   : > { %v5025_v42 = vpack.i.bf16 %v5024_v49, %v5024_v49  ;;  %v15614_v32 = vmax.f32 %v5061_v13, %v5062_v4  ;;  %v5168_v62 = vmax.bf16 %v5163_v59, %v5157_v11  ;;  %v15622_v5 = vunpack.c.l.b16 %v4878_v57  ;;  %v5387_v57 = vld [vmem:[#allocation5 + $0x70] sm:$0xe0] }
 0x3e3   : > { %v15627_v58 = vunpack.c.l.b16 %v4891_v63  ;;  %v5088_v20 = vrot.slane %v5087_v26, 1  ;;  %v15632_v17 = vunpack.c.l.b16 %v4904_v12  ;;  %v15636_v14 = vsel %vm17738_vm11, %v15567_v34, %v4934_v7 }
 0x3e4   : > { %v5038_v37 = vpack.i.bf16 %v5037_v36, %v5037_v36  ;;  %v5110_v8 = vrot.slane %v5109_v53, 4  ;;  %v5051_v50 = vpack.i.bf16 %v15607_v25, %v15607_v25  ;;  %v15640_v63 = vmax.f32 %v5074_v51, %v5075_v6 }
 0x3e5   : > { %v15642_v33 = vmax.f32 %v5098_v31, %v5099_v55  ;;  %v5164_v29 = vsel %vm17746_vm3, %v5162_v48, %v5163_v59  ;;  %v5064_v34 = vpack.i.bf16 %v15614_v32, %v15614_v32  ;;  %v15651_v12 = vunpack.c.l.b16 %v5025_v42  ;;  %v5386_v48 = vld [vmem:[#allocation5 + $0x70] sm:$0xf] }
 0x3e6   : > { %v5167_v46 = vmax.bf16 %v5164_v29, %v5156_v35  ;;  %v5226_v47 = vrot.slane %v5168_v62, %v17780_v18  ;;  %v15654_v10 = vmax.f32 %v5087_v26, %v5088_v20  ;;  %v5392_v56 = vrot.slane %v5388_v27, 1 }
 0x3e7   : > { %v5391_v43 = vrot.slane %v5387_v57, 1  ;;  %v4018_v0 = vmax.f32 %v15571_v19, 0.0  ;;  %v15659_v16 = vmax.f32 %v5109_v53, %v5110_v8  ;;  %v15661_v61 = vunpack.c.l.b16 %v5038_v37 }
 0x3e8   : > { %v5171_v3 = vcombine.high %v5167_v46, %v5167_v46  ;;  %v5178_v38 = vrot.slane %v5167_v46, %v17780_v18  ;;  %v5227_v2 = vcombine.high %v5226_v47, %v5226_v47  ;;  %v5234_v59 = vrot.slane %v5226_v47, %v17780_v18 }
 0x3e9   : > { %v5393_v13 = vsel %vm17746_vm3, %v5391_v43, %v5392_v56  ;;  %v4036_v21 = vpack.c.bf16 %v4018_v0, %v4017_v60  ;;  %v5077_v51 = vpack.i.bf16 %v15640_v63, %v15640_v63  ;;  %v15673_v36 = vmax.bf16 %v5392_v56, %v5386_v48 }
 0x3ea   : > { %v5185_v52 = vrot.slane %v5171_v3, %v17780_v18  ;;  %v5186_v49 = vcombine.high %v5178_v38, %v5178_v38  ;;  %v5194_v19 = vrot.slane %v5178_v38, %v17780_v18  ;;  %v5241_v24 = vrot.slane %v5227_v2, %v17780_v18 }
 0x3eb   : > { %v5321_v11 = vsel %vm17749_vm9, %v5234_v59, 4286644096  ;;  %4055 = vst.msk [vmem:[#allocation5 + $0x88] sm:$0xff] %vm17736_vm8, %v4036_v21  ;;  %v15679_v42 = vmax.bf16 %v5393_v13, %v5385_v54  ;;  %v15720_v25 = vsel %vm17747_vm10, %v15661_v61, %v15651_v12 }
 0x3ec   : > { %v5187_v60 = vcombine.high %v5185_v52, %v5185_v52  ;;  %v5201_v4 = vrot.slane %v5185_v52, %v17780_v18  ;;  %v5208_v26 = vrot.slane %v5186_v49, %v17780_v18  ;;  %v5216_v53 = vcombine.high %v5194_v19, %v5194_v19 }
 0x3ed   : > { %v5323_v7 = vunpack.i.l.bf16 %v5321_v11  ;;  %v5324_v6 = vunpack.i.h.bf16 %v5321_v11  ;;  %v5334_v55 = vsel %vm17749_vm9, %v5241_v24, 4286644096 }
 0x3ee   : > { %v5215_v62 = vrot.slane %v5187_v60, %v17780_v18  ;;  %v5217_v20 = vcombine.high %v5201_v4, %v5201_v4  ;;  %v5218_v37 = vcombine.high %v5208_v26, %v5208_v26  ;;  %v5243_v8 = vsel %vm17749_vm9, %v5216_v53, 4286644096 }
 0x3ef   : > { %v5245_v27 = vunpack.i.l.bf16 %v5243_v8  ;;  %v5246_v57 = vunpack.i.h.bf16 %v5243_v8  ;;  %v5269_v35 = vsel %vm17749_vm9, %v5201_v4, 4286644096  ;;  %v5325_v29 = vmax.f32 %v5323_v7, %v5324_v6 }
 0x3f0   : > { %v5219_v46 = vcombine.high %v5215_v62, %v5215_v62  ;;  %v5256_v47 = vsel %vm17749_vm9, %v5218_v37, 4286644096  ;;  %v5271_v56 = vunpack.i.l.bf16 %v5269_v35  ;;  %v5272_v43 = vunpack.i.h.bf16 %v5269_v35 }
 0x3f1   : > { %v5247_v0 = vmax.f32 %v5245_v27, %v5246_v57  ;;  %v5258_v3 = vunpack.i.l.bf16 %v5256_v47  ;;  %v5259_v38 = vunpack.i.h.bf16 %v5256_v47  ;;  %v5282_v2 = vsel %vm17749_vm9, %v5215_v62, 4286644096 }
 0x3f2   : > { %v5273_v59 = vmax.f32 %v5271_v56, %v5272_v43  ;;  %v5284_v48 = vunpack.i.l.bf16 %v5282_v2  ;;  %v5285_v13 = vunpack.i.h.bf16 %v5282_v2  ;;  %v5295_v21 = vsel %vm17749_vm9, %v5217_v20, 4286644096 }
 0x3f3   : > { %v5248_v52 = vrot.slane %v5247_v0, 4  ;;  %v5260_v49 = vmax.f32 %v5258_v3, %v5259_v38  ;;  %v5297_v19 = vunpack.i.l.bf16 %v5295_v21  ;;  %v5298_v24 = vunpack.i.h.bf16 %v5295_v21 }
 0x3f4   : > { %v5274_v11 = vrot.slane %v5273_v59, 4  ;;  %v5286_v54 = vmax.f32 %v5284_v48, %v5285_v13  ;;  %v5308_v60 = vsel %vm17749_vm9, %v5219_v46, 4286644096  ;;  %v5326_v4 = vrot.slane %v5325_v29, 4 }
 0x3f5   : > { %v5249_v26 = vmax.f32 %v5247_v0, %v5248_v52  ;;  %v5261_v53 = vrot.slane %v5260_v49, 4  ;;  %v5299_v7 = vmax.f32 %v5297_v19, %v5298_v24  ;;  %v5310_v6 = vunpack.i.l.bf16 %v5308_v60 }
 0x3f6   : > { %v5275_v37 = vmax.f32 %v5273_v59, %v5274_v11  ;;  %v5287_v62 = vrot.slane %v5286_v54, 4  ;;  %v5311_v8 = vunpack.i.h.bf16 %v5308_v60  ;;  %v5327_v27 = vmax.f32 %v5325_v29, %v5326_v4 }
 0x3f7   : > { %v5250_v57 = vrot.slane %v5249_v26, 2  ;;  %v5262_v35 = vmax.f32 %v5260_v49, %v5261_v53  ;;  %v5300_v20 = vrot.slane %v5299_v7, 4  ;;  %v5336_v47 = vunpack.i.l.bf16 %v5334_v55 }
 0x3f8   : > { %v5276_v56 = vrot.slane %v5275_v37, 2  ;;  %v5288_v43 = vmax.f32 %v5286_v54, %v5287_v62  ;;  %v5312_v3 = vmax.f32 %v5310_v6, %v5311_v8  ;;  %v5328_v38 = vrot.slane %v5327_v27, 2 }
 0x3f9   : > { %v5251_v2 = vmax.f32 %v5249_v26, %v5250_v57  ;;  %v5263_v48 = vrot.slane %v5262_v35, 2  ;;  %v5301_v46 = vmax.f32 %v5299_v7, %v5300_v20  ;;  %v5337_v13 = vunpack.i.h.bf16 %v5334_v55 }
 0x3fa   : > { %v5277_v0 = vmax.f32 %v5275_v37, %v5276_v56  ;;  %v5289_v21 = vrot.slane %v5288_v43, 2  ;;  %v5313_v52 = vrot.slane %v5312_v3, 4  ;;  %v5329_v19 = vmax.f32 %v5327_v27, %v5328_v38 }
 0x3fb   : > { %v5252_v59 = vrot.slane %v5251_v2, 1  ;;  %v5264_v24 = vmax.f32 %v5262_v35, %v5263_v48  ;;  %v5302_v11 = vrot.slane %v5301_v46, 2  ;;  %v5338_v29 = vmax.f32 %v5336_v47, %v5337_v13 }
 0x3fc   : > { %v5278_v60 = vrot.slane %v5277_v0, 1  ;;  %v5290_v49 = vmax.f32 %v5288_v43, %v5289_v21  ;;  %v5314_v4 = vmax.f32 %v5312_v3, %v5313_v52  ;;  %v5330_v53 = vrot.slane %v5329_v19, 1 }
 0x3fd   : > { %v5253_v31 = vmax.f32 %v5251_v2, %v5252_v59  ;;  %v5265_v54 = vrot.slane %v5264_v24, 1  ;;  %v5303_v6 = vmax.f32 %v5301_v46, %v5302_v11  ;;  %v5339_v62 = vrot.slane %v5338_v29, 4 }
 0x3fe   : > { %v5279_v26 = vmax.f32 %v5277_v0, %v5278_v60  ;;  %v5291_v8 = vrot.slane %v5290_v49, 1  ;;  %v5315_v7 = vrot.slane %v5314_v4, 2  ;;  %v5331_v55 = vmax.f32 %v5329_v19, %v5330_v53 }
 0x3ff   : > { %v15688_v37 = vmax.f32 %v5264_v24, %v5265_v54  ;;  %v5340_v57 = vmax.f32 %v5338_v29, %v5339_v62  ;;  %v5400_v27 = vcombine.high %v15679_v42, %v15679_v42  ;;  %v15694_v35 = vadd.f32 %v15444_v30, %v15563_v23 }
 0x400   : > { %v15699_v20 = vunpack.c.l.b16 %v5051_v50  ;;  %v5254_v47 = vpack.i.bf16 %v5253_v31, %v5253_v31  ;;  %v5304_v56 = vrot.slane %v5303_v6, 1  ;;  %v5431_v43 = vrot.slane %v15673_v36, %v17780_v18 }
 0x401   : > { %v5280_v3 = vpack.i.bf16 %v5279_v26, %v5279_v26  ;;  %v15703_v38 = vmax.f32 %v5290_v49, %v5291_v8  ;;  %v15705_v2 = vmax.f32 %v5314_v4, %v5315_v7  ;;  %v5341_v42 = vrot.slane %v5340_v57, 2 }
 0x402   : > { %v15710_v30 = vunpack.c.l.b16 %v5064_v34  ;;  %v15715_v23 = vunpack.c.l.b16 %v5077_v51  ;;  %v5332_v50 = vpack.i.bf16 %v5331_v55, %v5331_v55  ;;  %v5267_v31 = vpack.i.bf16 %v15688_v37, %v15688_v37  ;;  %v13782_v37 = vld [vmem:[%s17713_s4 + $0x20] sm:$0xff]  }
 0x403   : > { %v15724_v36 = vmax.f32 %v5340_v57, %v5341_v42  ;;  %v5407_v32 = vrot.slane %v5400_v27, %v17780_v18  ;;  %v15728_v48 = vmax.f32 %v5303_v6, %v5304_v56  ;;  %v15730_v63 = vunpack.c.l.b16 %v5254_v47 }
 0x404   : > { %v5432_v51 = vcombine.high %v5431_v43, %v5431_v43  ;;  %v5439_v46 = vrot.slane %v5431_v43, %v17780_v18  ;;  %v15736_v13 = vunpack.c.l.b16 %v5280_v3  ;;  %v15738_v21 = vunpack.c.l.b16 %v5332_v50 }
 0x405   : > { %v5408_v0 = vcombine.high %v5407_v32, %v5407_v32  ;;  %v5415_v52 = vrot.slane %v5407_v32, %v17780_v18  ;;  %v5343_v24 = vrot.slane %v15724_v36, 1 }
 0x406   : > { %v5446_v19 = vrot.slane %v5432_v51, %v17780_v18  ;;  %v5502_v59 = vsel %vm17749_vm9, %v5439_v46, 4286644096  ;;  %v5447_v4 = vcombine.high %v5439_v46, %v5439_v46 }
 0x407   : > { %v5422_v11 = vrot.slane %v5408_v0, %v17780_v18  ;;  %v5504_v29 = vunpack.i.l.bf16 %v5502_v59  ;;  %v5505_v60 = vunpack.i.h.bf16 %v5502_v59  ;;  %v5423_v49 = vcombine.high %v5415_v52, %v5415_v52 }
 0x408   : > { %v5450_v53 = vsel %vm17749_vm9, %v5415_v52, 4286644096  ;;  %v5515_v54 = vsel %vm17749_vm9, %v5446_v19, 4286644096  ;;  %v5448_v62 = vcombine.high %v5446_v19, %v5446_v19 }
 0x409   : > { %v5424_v6 = vcombine.high %v5422_v11, %v5422_v11  ;;  %v5452_v26 = vunpack.i.l.bf16 %v5450_v53  ;;  %v5453_v8 = vunpack.i.h.bf16 %v5450_v53  ;;  %v5463_v7 = vsel %vm17749_vm9, %v5422_v11, 4286644096 }
 0x40a   : > { %v5476_v55 = vsel %vm17749_vm9, %v5423_v49, 4286644096  ;;  %v5506_v57 = vmax.f32 %v5504_v29, %v5505_v60  ;;  %v5517_v27 = vunpack.i.l.bf16 %v5515_v54  ;;  %v5465_v56 = vunpack.i.l.bf16 %v5463_v7 }
 0x40b   : > { %v5454_v47 = vmax.f32 %v5452_v26, %v5453_v8  ;;  %v5466_v43 = vunpack.i.h.bf16 %v5463_v7  ;;  %v5478_v3 = vunpack.i.l.bf16 %v5476_v55  ;;  %v5479_v42 = vunpack.i.h.bf16 %v5476_v55 }
 0x40c   : > { %v5489_v50 = vsel %vm17749_vm9, %v5424_v6, 4286644096  ;;  %v5507_v32 = vrot.slane %v5506_v57, 4  ;;  %v5518_v51 = vunpack.i.h.bf16 %v5515_v54  ;;  %v5528_v49 = vsel %vm17749_vm9, %v5447_v4, 4286644096 }
 0x40d   : > { %v5455_v46 = vrot.slane %v5454_v47, 4  ;;  %v5467_v0 = vmax.f32 %v5465_v56, %v5466_v43  ;;  %v5491_v52 = vunpack.i.l.bf16 %v5489_v50  ;;  %v5492_v19 = vunpack.i.h.bf16 %v5489_v50 }
 0x40e   : > { %v5480_v59 = vmax.f32 %v5478_v3, %v5479_v42  ;;  %v5508_v53 = vmax.f32 %v5506_v57, %v5507_v32  ;;  %v5519_v11 = vmax.f32 %v5517_v27, %v5518_v51  ;;  %v5530_v8 = vunpack.i.l.bf16 %v5528_v49 }
 0x40f   : > { %v5456_v29 = vmax.f32 %v5454_v47, %v5455_v46  ;;  %v5468_v60 = vrot.slane %v5467_v0, 4  ;;  %v5493_v26 = vmax.f32 %v5491_v52, %v5492_v19  ;;  %v5531_v9 = vunpack.i.h.bf16 %v5528_v49 }
 0x410   : > { %v5481_v7 = vrot.slane %v5480_v59, 4  ;;  %v5509_v61 = vrot.slane %v5508_v53, 2  ;;  %v5520_v55 = vrot.slane %v5519_v11, 4  ;;  %v5541_v56 = vsel %vm17749_vm9, %v5448_v62, 4286644096 }
 0x411   : > { %v5457_v6 = vrot.slane %v5456_v29, 2  ;;  %v5469_v34 = vmax.f32 %v5467_v0, %v5468_v60  ;;  %v5494_v54 = vrot.slane %v5493_v26, 4  ;;  %v5532_v57 = vmax.f32 %v5530_v8, %v5531_v9 }
 0x412   : > { %v5482_v43 = vmax.f32 %v5480_v59, %v5481_v7  ;;  %v5510_v50 = vmax.f32 %v5508_v53, %v5509_v61  ;;  %v5521_v3 = vmax.f32 %v5519_v11, %v5520_v55  ;;  %v5543_v47 = vunpack.i.l.bf16 %v5541_v56 }
 0x413   : > { %v5458_v27 = vmax.f32 %v5456_v29, %v5457_v6  ;;  %v5470_v42 = vrot.slane %v5469_v34, 2  ;;  %v5495_v4 = vmax.f32 %v5493_v26, %v5494_v54  ;;  %v5533_v52 = vrot.slane %v5532_v57, 4 }
 0x414   : > { %v5483_v32 = vrot.slane %v5482_v43, 2  ;;  %v5511_v51 = vrot.slane %v5510_v50, 1  ;;  %v5522_v46 = vrot.slane %v5521_v3, 2  ;;  %v5544_v12 = vunpack.i.h.bf16 %v5541_v56  ;;  %v15762_v56 = vld [vmem:[#allocation5 + $0x88] sm:$0x7f] }
 0x415   : > { %v5459_v19 = vrot.slane %v5458_v27, 1  ;;  %v5471_v22 = vmax.f32 %v5469_v34, %v5470_v42  ;;  %v5496_v49 = vrot.slane %v5495_v4, 2  ;;  %v5534_v59 = vmax.f32 %v5532_v57, %v5533_v52 }
 0x416   : > { %v5484_v0 = vmax.f32 %v5482_v43, %v5483_v32  ;;  %v5512_v60 = vmax.f32 %v5510_v50, %v5511_v51  ;;  %v5523_v62 = vmax.f32 %v5521_v3, %v5522_v46  ;;  %v5545_v11 = vmax.f32 %v5543_v47, %v5544_v12 }
 0x417   : > { %v5460_v61 = vmax.f32 %v5458_v27, %v5459_v19  ;;  %v5472_v53 = vrot.slane %v5471_v22, 1  ;;  %v5497_v9 = vmax.f32 %v5495_v4, %v5496_v49  ;;  %v5306_v29 = vpack.i.bf16 %v15728_v48, %v15728_v48 }
 0x418   : > { %v5485_v26 = vrot.slane %v5484_v0, 1  ;;  %v5524_v8 = vrot.slane %v5523_v62, 1  ;;  %v5535_v7 = vrot.slane %v5534_v59, 2  ;;  %v15757_v34 = vmax.f32 %v15724_v36, %v5343_v24 }
 0x419   : > { %v5355_v55 = vunpack.c.l.b16 %v5267_v31  ;;  %v5498_v6 = vrot.slane %v5497_v9, 1  ;;  %v5546_v54 = vrot.slane %v5545_v11, 4  ;;  %v5461_v12 = vpack.i.bf16 %v5460_v61, %v5460_v61  ;;  %v17784_v61 = vld [vmem:[#allocation13_spill] sm:$0xff] }
 0x41a   : > { %v5473_v43 = vmax.f32 %v5471_v22, %v5472_v53  ;;  %v5513_v50 = vpack.i.bf16 %v5512_v60, %v5512_v60  ;;  %v5536_v48 = vmax.f32 %v5534_v59, %v5535_v7  ;;  %v17781_v3 = vpack.i.bf16 %v15703_v38, %v15703_v38 }
 0x41b   : > { %v5486_v27 = vmax.f32 %v5484_v0, %v5485_v26  ;;  %v15769_v36 = vmax.f32 %v5497_v9, %v5498_v6  ;;  %v5525_v24 = vmax.f32 %v5523_v62, %v5524_v8  ;;  %v15774_v31 = vunpack.c.l.b16 %v5306_v29  ;;  %v17786_v29 = vld [vmem:[#allocation11_spill] sm:$0xff] }
 0x41c   : > { %v15767_v57 = vunpack.c.l.b16 %v17781_v3  ;;  %v5547_v42 = vmax.f32 %v5545_v11, %v5546_v54  ;;  %v5599_v22 = vrot.slane %v15762_v56, 1  ;;  %v17782_v4 = vmax.f32 %v15547_v45, 0.0  ;;  %v17785_v11 = vld [vmem:[#allocation14_spill] sm:$0xff]  ;;  %v17790_v3 = vld [vmem:[#allocation20_spill] sm:$0xff] }
 0x41d   : > { %v17783_v47 = vmax.f32 %v15694_v35, 0.0  ;;  %v15785_v51 = vsel %vm17747_vm10, %v5355_v55, %v15730_v63  ;;  %v5537_v46 = vrot.slane %v5536_v48, 1  ;;  %v5474_v52 = vpack.i.bf16 %v5473_v43, %v5473_v43  ;;  %v13783_v63 = vld [vmem:[%s17713_s4 + $0x28] sm:$0xff]   ;;  %v17787_v55 = vld [vmem:[#allocation12_spill] sm:$0xff] }
 0x41e   : > { %v15787_v19 = vunpack.c.l.b16 %v5461_v12  ;;  %v15789_v49 = vunpack.c.l.b16 %v5513_v50  ;;  %v17742_v0 = vmov 0.0   ;;  %v5487_v45 = vpack.i.bf16 %v5486_v27, %v5486_v27  ;;  %v13784_v12 = vld [vmem:[%s17713_s4 + $0x30] sm:$0xff]   ;;  %v17788_v43 = vld [vmem:[#allocation10_spill] sm:$0xff] }
 0x41f   : > { %v4035_v38 = vpack.c.bf16 %v17783_v47, %v17782_v4  ;;  %12927 = vmatprep.subr.bf16.mxu1 %v17742_v0  ;;  %v5500_v35 = vpack.i.bf16 %v15769_v36, %v15769_v36  ;;  %v5526_v60 = vpack.i.bf16 %v5525_v24, %v5525_v24  ;;  %12935 = vmatprep.mubr.msk.bf16.mxu1 %vm17734_vm6, %v17742_v0  ;;  %v5548_v62 = vrot.slane %v5547_v42, 2 }
 0x420   : > { %12928 = vmatpush3.bf16.msra.mxu1 %v13782_v37  ;;  %v17740_v59 = vmov 0   ;;  %v4227_v53 = vrot.slane %v17784_v61, 1  ;;  %v5538_v9 = vmax.f32 %v5536_v48, %v5537_v46  ;;  %v4251_v26 = vsel %vm4250_vm12, %v17786_v29, %v17785_v11  ;;  %v5592_v11 = vld [vmem:[#allocation5 + $0x78] sm:$0xc0] }
 0x421   : > { %4054 = vst.msk [vmem:[#allocation5 + $0x80] sm:$0xff] %vm17736_vm8, %v4035_v38  ;;  %12929 = vmatprep.subr.bf16.mxu1 %v17742_v0  ;;  %7359 = vst [vmem:[#allocation3] sm:$0x7] %v17740_v59  ;;  %vm17751_vm6 = vcmask 1040384   ;;  %vm4261_vm8 = vsmask.f32 256  ;;  %v5562_v8 = vunpack.c.l.b16 %v5474_v52  ;;  %v4253_v6 = vsel %vm4252_vm13, %v17787_v55, %v4251_v26 }
 0x422   : > { %4057 = vst.msk [vmem:[#allocation2] sm:$0xf] %vm17739_vm2, %v17740_v59  ;;  %4062 = vst.msk [vmem:[#allocation2 + $0x30] sm:$0xf] %vm17739_vm2, %v17740_v59  ;;  %v4228_v7 = vmax.f32 %v17784_v61, %v4227_v53  ;;  %v15822_v54 = vunpack.c.l.b16 %v5487_v45  ;;  %v17789_v50 = vpack.i.bf16 %v17788_v43, %v17788_v43  ;;  %v4255_v27 = vsel %vm4254_vm14, %v17790_v3, %v4253_v6  ;;  %v13785_v53 = vld [vmem:[%s17713_s4 + $0x38] sm:$0xff]  }
 0x423   : > { %4059 = vst.msk [vmem:[#allocation2 + $0x4] sm:$0x1] %vm17749_vm9, %v17740_v59  ;;  %7360 = vst [vmem:[#allocation3 + $0xc] sm:$0x8] %v17740_v59  ;;  %v4495_v36 = vpack.c.b16 %v15496_v39, %v15412_v15  ;;  %v15834_v24 = vmax.f32 %v5547_v42, %v5548_v62  ;;  %v15836_v37 = vunpack.c.l.b16 %v5526_v60  ;;  %v4705_v38 = vsel %vm4256_vm15, %v15501_v1, %v15504_v28 }
 0x424   : > { %7361 = vst [vmem:[#allocation3 + $0x10] sm:$0xf] %v17740_v59  ;;  %9405 = vst [vmem:[#allocation4] sm:$0x33] %v17740_v59  ;;  %12930 = vmatpush3.bf16.msra.mxu1 %v13783_v63  ;;  %v4244_v48 = vunpack.c.l.b16 %v17789_v50  ;;  %v4229_v4 = vpack.i.bf16 %v4228_v7, %v4228_v7  ;;  %v5539_v46 = vpack.i.bf16 %v5538_v9, %v5538_v9  ;;  %v15864_v61 = vunpack.c.l.b16 %v5500_v35 }
 0x425   : > { %9406 = vst [vmem:[#allocation4 + $0x8] sm:$0xcc] %v17740_v59  ;;  %9407 = vst [vmem:[#allocation4 + $0x10] sm:$0x33] %v17740_v59  ;;  %12931 = vmatprep.subr.bf16.mxu1 %v17742_v0  ;;  %v4706_v60 = vpack.c.b16 %v15506_v40, %v4705_v38  ;;  %v15882_v6 = vsel %vm17747_vm10, %v5562_v8, %v15787_v19 }
 0x426   : > { %4061 = vst.msk [vmem:[#allocation2 + $0x2c] sm:$0xe] %vm4060_vm4, %v17740_v59  ;;  %vm15841_vm11 = vmand %vm17751_vm6, %vm4261_vm8  ;;  %v4257_v39 = vsel %vm4256_vm15, %v4244_v48, %v4255_v27  ;;  %v4245_v28 = vunpack.c.l.b16 %v4229_v4  ;;  %vm17748_vm8 = vcmask 519170   ;;  %v15878_v55 = vunpack.c.l.b16 %v5539_v46 }
 0x427   : > { %vm15851_vm2 = vmand %vm17745_vm7, %vm17744_vm1  ;;  %v4497_v45 = vsel %vm15841_vm11, 0, %v4495_v36  ;;  %v4708_v40 = vsel %vm15841_vm11, 0, %v4706_v60  ;;  %vm4505_vm1 = vcmask 1045508   ;;  %vm4281_vm7 = vcmask 517120  }
 0x428   : > { %v5593_v52 = vld [vmem:[#allocation5 + $0x80] sm:$0x3f]  ;;  %v5594_v15 = vld [vmem:[#allocation5 + $0x80] sm:$0x80]  ;;  %v15862_v62 = vsel %vm15851_vm2, %v4497_v45, 0  ;;  %12932 = vmatpush3.bf16.msra.mxu1 %v13784_v12  ;;  %v4258_v7 = vpack.c.b16 %v4245_v28, %v4257_v39  ;;  %v15900_v8 = vsel %vm15851_vm2, %v4708_v40, 0  ;;  %vm15931_vm10 = vmor %vm17750_vm0, %vm4505_vm1 }
 0x429   : > { %v5598_v63 = vrot.slane %v5594_v15, 1  ;;  %v5604_v1 = vmax.bf16 %v5599_v22, %v5593_v52  ;;  %v11680_v9 = vcombine.low %v15862_v62, %v15862_v62  ;;  %12933 = vmatprep.subr.bf16.mxu1 %v17742_v0  ;;  %vm4716_vm1 = vcmask 1046532  }
 0x42a   : > { %v4263_v48 = vsel %vm15841_vm11, 0, %v4258_v7 }
 0x42b   : > { %v5600_v29 = vsel %vm17746_vm3, %v5598_v63, %v5599_v22  ;;  %v5632_v26 = vcombine.high %v5604_v1, %v5604_v1  ;;  %v5639_v35 = vrot.slane %v5604_v1, %v17780_v18  ;;  %v15884_v43 = vrot.slane %v11680_v9, 6 }
 0x42c   : > { %v5603_v12 = vmax.bf16 %v5600_v29, %v5592_v11  ;;  %12934 = vmatpush3.bf16.msra.mxu1 %v13785_v53  ;;  %v15892_v27 = vsel %vm15851_vm2, %v4263_v48, 0  ;;  %vm4724_vm3 = vcmask 519171  }
 0x42d   : > { %v5646_v50 = vrot.slane %v5632_v26, %v17780_v18  ;;  %v5647_v56 = vcombine.high %v5639_v35, %v5639_v35  ;;  %v5655_v22 = vrot.slane %v5639_v35, %v17780_v18  ;;  %4514 = vst.msk [vmem:[#allocation2 + $0x8] sm:$0xc] %vm17748_vm8, %v15884_v43  ;;  %12955 = vmatprep.subr.bf16.mxu1 %v17742_v0  ;;  %vm17752_vm8 = vcmask 1042432  }
 0x42e   : > { %v5607_v3 = vcombine.high %v5603_v12, %v5603_v12  ;;  %vm15969_vm0 = vmor %vm17752_vm8, %vm4716_vm1  ;;  %vm17806_vm1 = vcmask 519168   ;;  %vm17811_vm8 = vcmask 516096  }
 0x42f   : > { %v5648_v36 = vcombine.high %v5646_v50, %v5646_v50  ;;  %v5669_v4 = vrot.slane %v5647_v56, %v17780_v18  ;;  %v5677_v38 = vcombine.high %v5655_v22, %v5655_v22  ;;  %v5662_v15 = vrot.slane %v5646_v50, %v17780_v18 }
 0x430   : > { %v5614_v52 = vrot.slane %v5607_v3, %v17780_v18  ;;  %v5706_v39 = vsel %vm17749_vm9, %v5655_v22, 4286644096 }
 0x431   : > { %v5676_v60 = vrot.slane %v5648_v36, %v17780_v18  ;;  %v5678_v63 = vcombine.high %v5669_v4, %v5669_v4  ;;  %v5708_v1 = vunpack.i.l.bf16 %v5706_v39  ;;  %v5709_v28 = vunpack.i.h.bf16 %v5706_v39 }
 0x432   : > { %v5615_v53 = vcombine.high %v5614_v52, %v5614_v52  ;;  %v5622_v9 = vrot.slane %v5614_v52, %v17780_v18  ;;  %v5719_v40 = vsel %vm17749_vm9, %v5669_v4, 4286644096  ;;  %v5732_v11 = vsel %vm17749_vm9, %v5677_v38, 4286644096 }
 0x433   : > { %v5710_v29 = vmax.f32 %v5708_v1, %v5709_v28  ;;  %v5721_v26 = vunpack.i.l.bf16 %v5719_v40  ;;  %v5722_v35 = vunpack.i.h.bf16 %v5719_v40  ;;  %v5734_v7 = vunpack.i.l.bf16 %v5732_v11 }
 0x434   : > { %v5629_v12 = vrot.slane %v5615_v53, %v17780_v18  ;;  %v5630_v50 = vcombine.high %v5622_v9, %v5622_v9  ;;  %v5735_v56 = vunpack.i.h.bf16 %v5732_v11  ;;  %v5745_v22 = vsel %vm17749_vm9, %v5678_v63, 4286644096 }
 0x435   : > { %v5711_v48 = vrot.slane %v5710_v29, 4  ;;  %v5723_v3 = vmax.f32 %v5721_v26, %v5722_v35  ;;  %v5747_v36 = vunpack.i.l.bf16 %v5745_v22  ;;  %v5748_v39 = vunpack.i.h.bf16 %v5745_v22 }
 0x436   : > { %v5631_v59 = vcombine.high %v5629_v12, %v5629_v12  ;;  %v5680_v52 = vsel %vm17749_vm9, %v5630_v50, 4286644096  ;;  %v5736_v4 = vmax.f32 %v5734_v7, %v5735_v56  ;;  %v5758_v38 = vsel %vm17749_vm9, %v5662_v15, 4286644096 }
 0x437   : > { %v5682_v1 = vunpack.i.l.bf16 %v5680_v52  ;;  %v5683_v28 = vunpack.i.h.bf16 %v5680_v52  ;;  %v5712_v40 = vmax.f32 %v5710_v29, %v5711_v48  ;;  %v5724_v0 = vrot.slane %v5723_v3, 4 }
 0x438   : > { %v5693_v53 = vsel %vm17749_vm9, %v5631_v59, 4286644096  ;;  %v5737_v9 = vrot.slane %v5736_v4, 4  ;;  %v5749_v11 = vmax.f32 %v5747_v36, %v5748_v39  ;;  %v5760_v63 = vunpack.i.l.bf16 %v5758_v38 }
 0x439   : > { %v5684_v32 = vmax.f32 %v5682_v1, %v5683_v28  ;;  %v5695_v26 = vunpack.i.l.bf16 %v5693_v53  ;;  %v5696_v35 = vunpack.i.h.bf16 %v5693_v53  ;;  %v5713_v22 = vrot.slane %v5712_v40, 2 }
 0x43a   : > { %v5725_v12 = vmax.f32 %v5723_v3, %v5724_v0  ;;  %v5738_v46 = vmax.f32 %v5736_v4, %v5737_v9  ;;  %v5750_v50 = vrot.slane %v5749_v11, 4  ;;  %v5761_v7 = vunpack.i.h.bf16 %v5758_v38 }
 0x43b   : > { %v5685_v56 = vrot.slane %v5684_v32, 4  ;;  %v5697_v15 = vmax.f32 %v5695_v26, %v5696_v35  ;;  %v5714_v19 = vmax.f32 %v5712_v40, %v5713_v22  ;;  %v5771_v29 = vsel %vm17749_vm9, %v5676_v60, 4286644096  ;;  %vm15942_vm9 = vmor %vm17751_vm6, %vm4250_vm12 }
 0x43c   : > { %v5726_v48 = vrot.slane %v5725_v12, 2  ;;  %v5739_v52 = vrot.slane %v5738_v46, 2  ;;  %v5751_v45 = vmax.f32 %v5749_v11, %v5750_v50  ;;  %v5762_v59 = vmax.f32 %v5760_v63, %v5761_v7 }
 0x43d   : > { %v5686_v36 = vmax.f32 %v5684_v32, %v5685_v56  ;;  %v5698_v39 = vrot.slane %v5697_v15, 4  ;;  %v5715_v1 = vrot.slane %v5714_v19, 1  ;;  %v5773_v28 = vunpack.i.l.bf16 %v5771_v29 }
 0x43e   : > { %v5727_v53 = vmax.f32 %v5725_v12, %v5726_v48  ;;  %v5740_v0 = vmax.f32 %v5738_v46, %v5739_v52  ;;  %v5752_v3 = vrot.slane %v5751_v45, 2  ;;  %v5763_v4 = vrot.slane %v5762_v59, 4 }
 0x43f   : > { %v5687_v38 = vrot.slane %v5686_v36, 2  ;;  %v5699_v9 = vmax.f32 %v5697_v15, %v5698_v39  ;;  %v5716_v26 = vmax.f32 %v5714_v19, %v5715_v1  ;;  %v5774_v40 = vunpack.i.h.bf16 %v5771_v29 }
 0x440   : > { %v5728_v35 = vrot.slane %v5727_v53, 1  ;;  %v5741_v60 = vrot.slane %v5740_v0, 1  ;;  %v5764_v22 = vmax.f32 %v5762_v59, %v5763_v4  ;;  %v11679_v11 = vcombine.high %v15892_v27, %v15892_v27 }
 0x441   : > { %v5688_v63 = vmax.f32 %v5686_v36, %v5687_v38  ;;  %v5700_v50 = vrot.slane %v5699_v9, 2  ;;  %v15922_v32 = vmax.f32 %v5773_v28, %v5774_v40  ;;  %v11682_v12 = vcombine.low %v15900_v8, %v15900_v8 }
 0x442   : > { %v5717_v46 = vpack.i.bf16 %v5716_v26, %v5716_v26  ;;  %v17795_v7 = vcombine.low %v15892_v27, %v15892_v27  ;;  %v17798_v15 = vrot.slane %v15586_v44, 1  ;;  %v5729_v48 = vmax.f32 %v5727_v53, %v5728_v35 }
 0x443   : > { %v15938_v52 = vmax.f32 %v5751_v45, %v5752_v3  ;;  %v5765_v59 = vrot.slane %v5764_v22, 2  ;;  %v17801_v36 = vcombine.high %v15862_v62, %v15862_v62  ;;  %v5689_v1 = vrot.slane %v5688_v63, 1 }
 0x444   : > { %v4274_v56 = vrot.slane %v17795_v7, 7  ;;  %v4916_v29 = vmax.f32 %v15586_v44, %v17798_v15  ;;  %v15949_v28 = vmax.f32 %v5740_v0, %v5741_v60  ;;  %v4276_v38 = vrot.slane %v11679_v11, 7 }
 0x445   : > { %v4509_v39 = vrot.slane %v17801_v36, 6  ;;  %v5701_v44 = vmax.f32 %v5699_v9, %v5700_v50  ;;  %v5776_v45 = vrot.slane %v15922_v32, 4  ;;  %v17802_v53 = vrot.slane %v15884_v43, 4 }
 0x446   : > { %v4275_v4 = vrot.slane %v4274_v56, 4  ;;  %4280 = vst.msk [vmem:[#allocation2 + $0x4] sm:$0xe] %vm4060_vm4, %v4274_v56  ;;  %v4718_v26 = vrot.slane %v11682_v12, 5  ;;  %v15957_v40 = vunpack.c.l.b16 %v5717_v46  ;;  %v11683_v0 = vcombine.high %v15900_v8, %v15900_v8  ;;  %v5818_v56 = vld [vmem:[#allocation2] sm:$0xf] }
 0x447   : > { %v4510_v3 = vsel %vm15931_vm10, %v17802_v53, %v4509_v39  ;;  %v5730_v9 = vpack.i.bf16 %v5729_v48, %v5729_v48  ;;  %v15964_v35 = vmax.f32 %v5764_v22, %v5765_v59  ;;  %v4917_v11 = vpack.i.bf16 %v4916_v29, %v4916_v29 }
 0x448   : > { %v4277_v62 = vsel %vm15942_vm9, %v4275_v4, %v4276_v38  ;;  %4515 = vst.msk [vmem:[#allocation2 + $0xc] sm:$0x7] %vm4063_vm5, %v4510_v3  ;;  %v4719_v60 = vrot.slane %v4718_v26, 4  ;;  %v15973_v50 = vmax.f32 %v5688_v63, %v5689_v1  ;;  %v4720_v12 = vrot.slane %v11683_v0, 5 }
 0x449   : > { %4282 = vst.msk [vmem:[#allocation2 + $0x8] sm:$0x3] %vm4281_vm7, %v4277_v62  ;;  %v4936_v8 = vsel %vm4250_vm12, %v15612_v41, %v15636_v14  ;;  %v17805_v22 = vrot.slane %v15642_v33, 1  ;;  %v5702_v7 = vrot.slane %v5701_v44, 1  ;;  %v4933_v15 = vunpack.c.l.b16 %v4917_v11 }
 0x44a   : > { %4725 = vst.msk [vmem:[#allocation2 + $0xc] sm:$0x8] %vm4724_vm3, %v4718_v26  ;;  %v4937_v48 = vsel %vm4252_vm13, %v15622_v5, %v4936_v8  ;;  %v5090_v29 = vpack.i.bf16 %v15654_v10, %v15654_v10  ;;  %v4721_v63 = vsel %vm15969_vm0, %v4719_v60, %v4720_v12  ;;  %v5112_v14 = vrot.slane %v15659_v16, 2 }
 0x44b   : > { %v5102_v46 = vmax.f32 %v15642_v33, %v17805_v22  ;;  %v4938_v59 = vsel %vm4254_vm14, %v15627_v58, %v4937_v48  ;;  %v15990_v36 = vunpack.c.l.b16 %v5730_v9  ;;  %4726 = vst.msk [vmem:[#allocation2 + $0x10] sm:$0xf] %vm17806_vm1, %v4721_v63  ;;  %vm17807_vm6 = vcmask 1043459   ;;  %v13789_v48 = vld [vmem:[%s17713_s4] sm:$0xff]  }
 0x44c   : > { %v4939_v5 = vsel %vm4256_vm15, %v15632_v17, %v4938_v59  ;;  %v5134_v10 = vsel %vm17807_vm6, %v15699_v20, %v15720_v25  ;;  %v17808_v39 = vrot.slane %v15705_v2, 1  ;;  %v5691_v1 = vpack.i.bf16 %v15973_v50, %v15973_v50  ;;  %vm17809_vm1 = vmmov %vm17807_vm6 }
 0x44d   : > { %v5103_v41 = vpack.i.bf16 %v5102_v46, %v5102_v46  ;;  %v15992_v33 = vld [vmem:[#allocation2 + $0x4] sm:$0xf]  ;;  %v4940_v38 = vpack.c.b16 %v4933_v15, %v4939_v5  ;;  %v5113_v53 = vmax.f32 %v15659_v16, %v5112_v14  ;;  %v16009_v3 = vmax.f32 %v5701_v44, %v5702_v7 }
 0x44e   : > { %v5318_v58 = vmax.f32 %v15705_v2, %v17808_v39  ;;  %v16006_v4 = vcombine.low %v5818_v56, %v15992_v33  ;;  %v5130_v17 = vunpack.c.l.b16 %v5090_v29  ;;  %v5135_v26 = vsel %vm4250_vm12, %v15710_v30, %v5134_v10 }
 0x44f   : > { %v5363_v20 = vsel %vm17807_vm6, %v15736_v13, %v15785_v51  ;;  %v5131_v62 = vunpack.c.l.b16 %v5103_v41  ;;  %v5136_v0 = vsel %vm4252_vm13, %v15715_v23, %v5135_v26  ;;  %v4942_v44 = vsel %vm15841_vm11, 0, %v4940_v38 }
 0x450   : > { %v5874_v25 = vshrl.u32 %v16006_v4, 16  ;;  %v5319_v9 = vpack.i.bf16 %v5318_v58, %v5318_v58  ;;  %v5876_v16 = vshll.u32 %v16006_v4, 16  ;;  %v5114_v60 = vrot.slane %v5113_v53, 1 }
 0x451   : > { %v16016_v2 = vld [vmem:[#allocation2 + $0x8] sm:$0xff]   ;;  %v5364_v30 = vsel %vm4250_vm12, %v15767_v57, %v5363_v20  ;;  %v4943_v51 = vsel %vm15851_vm2, %v4942_v44, 0  ;;  %v5137_v11 = vsel %vm4254_vm14, %v5130_v17, %v5136_v0  ;;  %v5570_v23 = vsel %vm17809_vm1, %v15822_v54, %v15882_v6 }
 0x452   : > { %v5881_v13 = vshll.u32 %v16016_v2, 16  ;;  %v5878_v50 = vrot.slane %v5876_v16, 1  ;;  %v11684_v12 = vcombine.low %v4943_v51, %v4943_v51  ;;  %v11685_v8 = vcombine.high %v4943_v51, %v4943_v51 }
 0x453   : > { %v5115_v22 = vmax.f32 %v5113_v53, %v5114_v60  ;;  %v5359_v7 = vunpack.c.l.b16 %v5319_v9  ;;  %v5365_v57 = vsel %vm4252_vm13, %v15774_v31, %v5364_v30  ;;  %v5550_v56 = vrot.slane %v15834_v24, 1 }
 0x454   : > { %v5883_v46 = vrot.slane %v5881_v13, 1  ;;  %v5879_v15 = vor.u32 %v5878_v50, %v5874_v25  ;;  %vm17810_vm6 = vcmask 519168   ;;  %4952 = vst.msk [vmem:[#allocation2 + $0x18] sm:$0x1] %vm17811_vm8, %v11685_v8  ;;  %v17812_v6 = vpack.i.bf16 %v15757_v34, %v15757_v34 }
 0x455   : > { %4951 = vst.msk [vmem:[#allocation2 + $0x14] sm:$0xf] %vm17810_vm6, %v11684_v12  ;;  %v5116_v54 = vpack.i.bf16 %v5115_v22, %v5115_v22  ;;  %v5571_v63 = vsel %vm4250_vm12, %v15864_v61, %v5570_v23  ;;  %v5138_v31 = vsel %vm4256_vm15, %v5131_v62, %v5137_v11  ;;  %v5366_v59 = vsel %vm4254_vm14, %v5359_v7, %v5365_v57  ;;  %v13792_v11 = vld [vmem:[%s17713_s4 + $0x10] sm:$0xff]  }
 0x456   : > { %v5361_v29 = vunpack.c.l.b16 %v17812_v6  ;;  %v5551_v41 = vmax.f32 %v15834_v24, %v5550_v56  ;;  %v5572_v14 = vsel %vm4252_vm13, %v15789_v49, %v5571_v63  ;;  %vm17813_vm1 = vsmask.f32 7424 }
 0x457   : > { %v5884_v5 = vsel %vm17813_vm1, %v5879_v15, %v5883_v46  ;;  %v5132_v10 = vunpack.c.l.b16 %v5116_v54  ;;  %v5367_v39 = vsel %vm4256_vm15, %v15738_v21, %v5366_v59  ;;  %v5573_v34 = vsel %vm4254_vm14, %v15836_v37, %v5572_v14  ;;  %v13790_v21 = vld [vmem:[%s17713_s4 + $0x8] sm:$0xff]  }
 0x458   : > { %v5704_v61 = vpack.i.bf16 %v16009_v3, %v16009_v3  ;;  %v16058_v58 = vunpack.c.l.b16 %v5691_v1  ;;  %vm17814_vm8 = vcmask 523264   ;;  %v5368_v24 = vpack.c.b16 %v5361_v29, %v5367_v39  ;;  %v13794_v29 = vld [vmem:[%s17713_s4 + $0x18] sm:$0xff]  }
 0x459   : > { %12936 = vmatmul.mubr.msk.bf16.vlgmr.msra.gmra.mrb[8].mxu1 %vm17814_vm8, %v5884_v5  ;;  %v5552_v38 = vpack.i.bf16 %v5551_v41, %v5551_v41  ;;  %v17815_v53 = vmov 0.0   ;;  %vm17816_vm6 = vmmov 0   ;;  %v5885_v49 = vshrl.u32 %v16016_v2, 16 }
 0x45a   : > { %12939 = vmatprep.mubr.msk.bf16.mxu1 %vm17816_vm6, %v17815_v53  ;;  %12956 = vmatpush3.bf16.msra.mxu1 %v13789_v48  ;;  %v5139_v37 = vpack.c.b16 %v5132_v10, %v5138_v31  ;;  %v5574_v3 = vsel %vm4256_vm15, %v15878_v55, %v5573_v34  ;;  %v5777_v1 = vmax.f32 %v15922_v32, %v5776_v45  ;;  %v5370_v17 = vsel %vm15841_vm11, 0, %v5368_v24  ;;  %v6136_v31 = vld [vmem:[#allocation2] sm:$0xe] }
 0x45b   : > { %12957 = vmatprep.subr.bf16.mxu1 %v17815_v53  ;;  %v5568_v26 = vunpack.c.l.b16 %v5552_v38  ;;  %v5754_v20 = vrot.slane %v15938_v52, 1  ;;  %v5767_v25 = vrot.slane %v15964_v35, 1  ;;  %v5371_v55 = vsel %vm15851_vm2, %v5370_v17, 0 }
 0x45c   : > { %v5141_v62 = vsel %vm15841_vm11, 0, %v5139_v37  ;;  %v5743_v0 = vpack.i.bf16 %v15949_v28, %v15949_v28  ;;  %v5778_v32 = vrot.slane %v5777_v1, 2  ;;  %v16083_v45 = vld [vmem:[#allocation2 + $0x10] sm:$0xff]   ;;  %v11688_v16 = vcombine.low %v5371_v55, %v5371_v55 }
 0x45d   : > { %v5142_v9 = vsel %vm15851_vm2, %v5141_v62, 0  ;;  %v11689_v44 = vcombine.high %v5371_v55, %v5371_v55  ;;  %v5575_v60 = vpack.c.b16 %v5568_v26, %v5574_v3  ;;  %v5887_v30 = vor.u32 %v5885_v49, %v5883_v46 }
 0x45e   : > { %12958 = vmatpush3.bf16.msra.mxu1 %v13790_v21  ;;  %v11686_v13 = vcombine.low %v5142_v9, %v5142_v9  ;;  %v11687_v51 = vcombine.high %v5142_v9, %v5142_v9  ;;  %v5792_v23 = vunpack.c.l.b16 %v5704_v61  ;;  %v5889_v28 = vshll.u32 %v16083_v45, 16 }
 0x45f   : > { %v5377_v50 = vrot.slane %v11688_v16, 6  ;;  %12959 = vmatprep.subr.bf16.mxu1 %v17815_v53  ;;  %v5755_v12 = vmax.f32 %v15938_v52, %v5754_v20  ;;  %v5768_v8 = vmax.f32 %v15964_v35, %v5767_v25  ;;  %v5379_v7 = vrot.slane %v11689_v44, 6  ;;  %v16139_v16 = vld [vmem:[#allocation2 + $0x8] sm:$0xf] }
 0x460   : > { %v5148_v22 = vrot.slane %v11686_v13, 7  ;;  %v5577_v46 = vsel %vm15841_vm11, 0, %v5575_v60  ;;  %v5779_v57 = vmax.f32 %v5777_v1, %v5778_v32  ;;  %v5891_v56 = vrot.slane %v5889_v28, 1 }
 0x461   : > { %v5150_v15 = vrot.slane %v11687_v51, 7  ;;  %v5378_v48 = vrot.slane %v5377_v50, 4  ;;  %vm17817_vm1 = vcmask 519170   ;;  %v5578_v54 = vsel %vm15851_vm2, %v5577_v46, 0 }
 0x462   : > { %5383 = vst.msk [vmem:[#allocation2 + $0x1c] sm:$0xc] %vm17817_vm1, %v5377_v50  ;;  %v5149_v6 = vrot.slane %v5148_v22, 4  ;;  %12960 = vmatpush3.bf16.msra.mxu1 %v13792_v11  ;;  %v11690_v52 = vcombine.low %v5578_v54, %v5578_v54  ;;  %v11691_v35 = vcombine.high %v5578_v54, %v5578_v54  ;;  %v5780_v63 = vrot.slane %v5779_v57, 1 }
 0x463   : > { %5154 = vst.msk [vmem:[#allocation2 + $0x18] sm:$0xe] %vm4060_vm4, %v5148_v22  ;;  %vm17818_vm8 = vsmask.f32 7424  ;;  %v5380_v41 = vsel %vm15931_vm10, %v5378_v48, %v5379_v7  ;;  %12961 = vmatprep.subr.bf16.mxu1 %v17815_v53  ;;  %v5756_v14 = vpack.i.bf16 %v5755_v12, %v5755_v12  ;;  %v5795_v5 = vunpack.c.l.b16 %v5743_v0  ;;  %v16154_v22 = vld [vmem:[#allocation2 + $0xc] sm:$0xff]  }
 0x464   : > { %v5892_v59 = vsel %vm17818_vm8, %v5887_v30, %v5891_v56  ;;  %vm17819_vm1 = vcmask 523264   ;;  %v5151_v10 = vsel %vm15942_vm9, %v5149_v6, %v5150_v15  ;;  %5384 = vst.msk [vmem:[#allocation2 + $0x20] sm:$0x7] %vm4063_vm5, %v5380_v41  ;;  %v5584_v39 = vrot.slane %v11690_v52, 5 }
 0x465   : > { %12940 = vmatmul.mubr.msk.bf16.gmra.mrb[12].mxu1 %vm17819_vm1, %v5892_v59  ;;  %v5769_v34 = vpack.i.bf16 %v5768_v8, %v5768_v8  ;;  %v5781_v61 = vmax.f32 %v5779_v57, %v5780_v63  ;;  %5155 = vst.msk [vmem:[#allocation2 + $0x1c] sm:$0x3] %vm4281_vm7, %v5151_v10  ;;  %vm17820_vm4 = vcmask 1042434   ;;  %v11718_v24 = vcombine.low %v6136_v31, %v15992_v33 }
 0x466   : > { %12943 = vmatprep.mubr.msk.bf16.mxu1 %vm17816_vm6, %v17815_v53  ;;  %v5799_v19 = vsel %vm17820_vm4, %v5792_v23, %v16058_v58  ;;  %v6149_v38 = vrot.slane %v16016_v2, 1  ;;  %v6151_v49 = vrot.slane %v16083_v45, 1  ;;  %v5585_v21 = vrot.slane %v5584_v39, 4  ;;  %5590 = vst.msk [vmem:[#allocation2 + $0x20] sm:$0x8] %vm4724_vm3, %v5584_v39  ;;  %12962 = vmatpush3.bf16.msra.mxu1 %v13794_v29 }
 0x467   : > { %v5586_v37 = vrot.slane %v11691_v35, 5  ;;  %v5782_v3 = vpack.i.bf16 %v5781_v61, %v5781_v61  ;;  %vm17821_vm5 = vcmask 1043459   ;;  %v5796_v17 = vunpack.c.l.b16 %v5756_v14  ;;  %12983 = vmatprep.subr.bf16.mxu1 %v17815_v53  ;;  %v6648_v23 = vld [vmem:[#allocation2 + $0x4] sm:$0xc] }
 0x468   : > { %v5800_v1 = vsel %vm17821_vm5, %v15957_v40, %v5799_v19  ;;  %v6148_v33 = vrot.slane %v11718_v24, 1  ;;  %vm17822_vm7 = vcmask 1046528   ;;  %v5797_v25 = vunpack.c.l.b16 %v5769_v34 }
 0x469   : > { %v5801_v26 = vsel %vm4250_vm12, %v15990_v36, %v5800_v1  ;;  %v16126_v58 = vsel %vm17822_vm7, %v6149_v38, %v6151_v49  ;;  %v5587_v20 = vsel %vm15969_vm0, %v5585_v21, %v5586_v37  ;;  %vm17823_vm3 = vcmask 519168   ;;  %vm17824_vm10 = vmmov %vm17822_vm7  ;;  %v16202_v1 = vld [vmem:[#allocation2 + $0xc] sm:$0xf] }
 0x46a   : > { %v5802_v62 = vsel %vm4252_vm13, %v5795_v5, %v5801_v26  ;;  %5591 = vst.msk [vmem:[#allocation2 + $0x24] sm:$0xf] %vm17823_vm3, %v5587_v20  ;;  %v5798_v55 = vunpack.c.l.b16 %v5782_v3  ;;  %v16134_v0 = vsel %vm17824_vm10, %v6148_v33, %v6149_v38  ;;  %v5893_v44 = vshrl.u32 %v16083_v45, 16  ;;  %vm17825_vm0 = vmmov %vm17822_vm7  ;;  %v16206_v26 = vld [vmem:[#allocation2 + $0x10] sm:$0xff]  }
 0x46b   : > { %v5803_v40 = vsel %vm4254_vm14, %v5796_v17, %v5802_v62  ;;  %vm17826_vm13 = vmmov %vm17823_vm3  ;;  %vm17827_vm14 = vcmask 516096   ;;  %v11753_v42 = vcombine.low %v6648_v23, %v16139_v16  ;;  %v6661_v35 = vrot.slane %v16154_v22, 2  ;;  %v7160_v17 = vld [vmem:[#allocation2 + $0x8] sm:$0x8]  ;;  %v13799_v23 = vld [vmem:[%s17713_s4 + $0x58] sm:$0xff]  }
 0x46c   : > { %v5804_v36 = vsel %vm4256_vm15, %v5797_v25, %v5803_v40  ;;  %v16137_v9 = vld [vmem:[#allocation2 + $0x18] sm:$0xff]   ;;  %v5895_v28 = vor.u32 %v5893_v44, %v5891_v56  ;;  %vm17828_vm15 = vmmov %vm17818_vm8  ;;  %v11788_v33 = vcombine.low %v7160_v17, %v16202_v1  ;;  %v13796_v25 = vld [vmem:[%s17713_s4 + $0x40] sm:$0xff]  }
 0x46d   : > { %v5805_v32 = vpack.c.b16 %v5798_v55, %v5804_v36  ;;  %v5897_v60 = vshll.u32 %v16137_v9, 16  ;;  %v6153_v13 = vrot.slane %v16137_v9, 1  ;;  %v16162_v56 = vld [vmem:[#allocation2 + $0x14] sm:$0xff]   ;;  %v16164_v15 = vld [vmem:[#allocation2 + $0x1c] sm:$0xff]   ;;  %v5901_v48 = vshrl.u32 %v16137_v9, 16  ;;  %vm17830_vm8 = vmmov %vm17825_vm0 }
 0x46e   : > { %v6660_v52 = vrot.slane %v11753_v42, 2  ;;  %v6663_v31 = vrot.slane %v16162_v56, 2  ;;  %v6665_v59 = vrot.slane %v16164_v15, 2  ;;  %vm17832_vm4 = vmmov %vm17828_vm15  ;;  %v16209_v20 = vld [vmem:[#allocation2 + $0x18] sm:$0xff]   ;;  %v7172_v40 = vrot.slane %v11788_v33, 3 }
 0x46f   : > { %v5807_v43 = vsel %vm15841_vm11, 0, %v5805_v32  ;;  %v5899_v50 = vrot.slane %v5897_v60, 1  ;;  %v16151_v8 = vsel %vm17825_vm0, %v6151_v49, %v6153_v13  ;;  %vm17836_vm10 = vmmov %vm17825_vm0  ;;  %v7173_v36 = vrot.slane %v16206_v26, 3 }
 0x470   : > { %v5808_v30 = vsel %vm15851_vm2, %v5807_v43, 0  ;;  %vm17829_vm2 = vmmov %vm17819_vm1  ;;  %vm17831_vm1 = vcmask 1045504   ;;  %v7175_v32 = vrot.slane %v16209_v20, 3  ;;  %v13797_v43 = vld [vmem:[%s17713_s4 + $0x48] sm:$0xff]   ;;  %v6491_v17 = vshrl.u32 %v16162_v56, 16 }
 0x471   : > { %v11692_v51 = vcombine.low %v5808_v30, %v5808_v30  ;;  %v11693_v11 = vcombine.high %v5808_v30, %v5808_v30  ;;  %v16148_v12 = vld [vmem:[#allocation2 + $0x20] sm:$0xff]   ;;  %v5900_v7 = vsel %vm17828_vm15, %v5895_v28, %v5899_v50  ;;  %v5903_v29 = vor.u32 %v5901_v48, %v5899_v50  ;;  %vm17833_vm5 = vmmov %vm17831_vm1  ;;  %v13812_v48 = vld [vmem:[%s17713_s4 + $0x98] sm:$0xff]  }
 0x472   : > { %v5905_v46 = vshll.u32 %v16148_v12, 16  ;;  %12944 = vmatmul.mubr.msk.bf16.gmra.mrb[16].mxu1 %vm17829_vm2, %v5900_v7  ;;  %v6155_v57 = vrot.slane %v16148_v12, 1  ;;  %v16174_v63 = vsel %vm17831_vm1, %v6660_v52, %v6661_v35  ;;  %v16182_v10 = vsel %vm17833_vm5, %v6661_v35, %v6663_v31  ;;  %vm17834_vm7 = vmmov %vm17831_vm1  ;;  %v16214_v62 = vld [vmem:[#allocation2 + $0x20] sm:$0xff]   ;;  %v13808_v7 = vld [vmem:[%s17713_s4 + $0x88] sm:$0xff]  }
 0x473   : > { %5816 = vst.msk [vmem:[#allocation2 + $0x28] sm:$0xf] %vm17826_vm13, %v11692_v51  ;;  %12947 = vmatprep.mubr.msk.bf16.mxu1 %vm17816_vm6, %v17815_v53  ;;  %v16185_v39 = vsel %vm17834_vm7, %v6663_v31, %v6665_v59  ;;  %vm17835_vm3 = vmmov %vm17829_vm2  ;;  %v5909_v38 = vshrl.u32 %v16148_v12, 16  ;;  %v7177_v60 = vrot.slane %v16214_v62, 3  ;;  %v6329_v50 = vrot.slane %v16154_v22, 1 }
 0x474   : > { %5817 = vst.msk [vmem:[#allocation2 + $0x2c] sm:$0x1] %vm17827_vm14, %v11693_v11  ;;  %v5907_v54 = vrot.slane %v5905_v46, 1  ;;  %v16170_v6 = vsel %vm17830_vm8, %v6153_v13, %v6155_v57  ;;  %vm17837_vm0 = vmmov %vm17831_vm1  ;;  %v13798_v11 = vld [vmem:[%s17713_s4 + $0x50] sm:$0xff]   ;;  %v6494_v33 = vshll.u32 %v16162_v56, 16 }
 0x475   : > { %vm17838_vm13 = vmmov %vm17832_vm4  ;;  %v13810_v46 = vld [vmem:[%s17713_s4 + $0x90] sm:$0xff]  }
 0x476   : > { %v5908_v41 = vsel %vm17832_vm4, %v5903_v29, %v5907_v54  ;;  %v5911_v37 = vor.u32 %v5909_v38, %v5907_v54  ;;  %vm17839_vm14 = vmmov %vm17829_vm2  ;;  %v6333_v54 = vrot.slane %v16164_v15, 1 }
 0x477   : > { %vm17840_vm15 = vmmov %vm17829_vm2  ;;  %vm17841_vm2 = vcmask 1044480  }
 0x478   : > { %v16228_v44 = vsel %vm17841_vm2, %v7172_v40, %v7173_v36  ;;  %vm17842_vm8 = vmmov %vm17841_vm2 }
 0x479   : > { %vm17843_vm1 = vmmov %vm17841_vm2 }
 0x47a   : > { %v13795_v14 = vld [vmem:[#allocation2 + $0x28] ss:$0 sps:$4 sm:$0x11]   ;;  %12948 = vmatmul.mubr.msk.bf16.gmra.mrb[20].mxu1 %vm17835_vm3, %v5908_v41  ;;  %v16237_v13 = vsel %vm17843_vm1, %v7175_v32, %v7177_v60  ;;  %vm17844_vm4 = vmmov %vm17843_vm1  ;;  %v6485_v41 = vshll.u32 %v16154_v22, 16 }
 0x47b   : > { %v16179_v5 = vld [vmem:[#allocation2 + $0x24] sm:$0xff]   ;;  %v5913_v34 = vshll.u32 %v13795_v14, 16  ;;  %v6157_v61 = vrot.slane %v13795_v14, 1  ;;  %12951 = vmatprep.mubr.msk.bf16.mxu1 %vm17816_vm6, %v17815_v53  ;;  %vm17845_vm5 = vmmov %vm17835_vm3  ;;  %v13813_v29 = vld [vmem:[#allocation2 + $0x2c] ss:$0 sps:$4 sm:$0x11]  }
 0x47c   : > { %v6667_v19 = vrot.slane %v16179_v5, 2  ;;  %v16216_v55 = vld [vmem:[#allocation2 + $0x28] sm:$0xff]   ;;  %vm17846_vm7 = vmmov %vm17835_vm3  ;;  %v6335_v52 = vrot.slane %v16179_v5, 1  ;;  %v6337_v31 = vrot.slane %v13813_v29, 1  ;;  %v6487_v38 = vrot.slane %v6485_v41, 2 }
 0x47d   : > { %v16192_v24 = vsel %vm17836_vm10, %v6155_v57, %v6157_v61  ;;  %v5915_v49 = vrot.slane %v5913_v34, 1  ;;  %v7179_v30 = vrot.slane %v16216_v55, 3  ;;  %vm17847_vm10 = vmmov %vm17835_vm3  ;;  %v13820_v29 = vld [vmem:[%s17713_s4 + $0xc8] sm:$0xff]  }
 0x47e   : > { %v16198_v21 = vsel %vm17837_vm0, %v6665_v59, %v6667_v19  ;;  %vm17848_vm0 = vmmov %vm17835_vm3  ;;  %v6482_v59 = vshrl.u32 %v16154_v22, 16  ;;  %v13814_v22 = vld [vmem:[%s17713_s4 + $0xa0] sm:$0xff]   ;;  %v6793_v41 = vld [vmem:[#allocation2 + $0x8] sm:$0xc] }
 0x47f   : > { %v5916_v3 = vsel %vm17838_vm13, %v5911_v37, %v5915_v49  ;;  %v16242_v51 = vsel %vm17844_vm4, %v7177_v60, %v7179_v30  ;;  %vm17849_vm13 = vmmov %vm17848_vm0  ;;  %v6500_v60 = vshrl.u32 %v16164_v15, 16 }
 0x480   : > { %vm17852_vm2 = vmmov %vm17848_vm0 }
 0x481   : > { %vm17854_vm1 = vmmov %vm17848_vm0 }
 0x482   : > { %12952 = vmatmul.mubr.msk.bf16.gmra.mrb[24].mxu1 %vm17839_vm14, %v5916_v3  ;;  %vm17850_vm14 = vmmov %vm17848_vm0 }
 0x483   : > { %12963 = vmatprep.mubr.msk.bf16.mxu1 %vm17816_vm6, %v17815_v53 }
 0x48a   : > { %12964 = vmatmul.mubr.msk.bf16.vlgmr.msra.gmra.mrb[8].mxu1 %vm17840_vm15, %v16006_v4  ;;  %v16234_v4 = vsel %vm17842_vm8, %v7173_v36, %v7175_v32  ;;  %vm17851_vm15 = vmmov %vm17848_vm0  ;;  %vm17853_vm8 = vcmask 1046528   ;;  %v6493_v36 = vrot.slane %v6491_v17, 1  ;;  %v6496_v32 = vrot.slane %v6494_v33, 2  ;;  %v13832_v33 = vld [vmem:[#allocation2 + $0x30] ss:$0 sps:$4 sm:$0x33]  }
 0x48b   : > { %12984 = vmatpush3.bf16.msra.mxu1 %v13796_v25  ;;  %12967 = vmatprep.mubr.msk.bf16.mxu1 %vm17816_vm6, %v17815_v53  ;;  %vm17855_vm4 = vmmov %vm17853_vm8 }
 0x48c   : > { %12985 = vmatprep.subr.bf16.mxu1 %v17815_v53 }
 0x48f   : > { %12986 = vmatpush3.bf16.msra.mxu1 %v13797_v43  ;;  %v13815_v43 = vld [vmem:[%s17713_s4 + $0xa8] sm:$0xff]  }
 0x490   : > { %12987 = vmatprep.subr.bf16.mxu1 %v17815_v53 }
 0x492   : > { %12968 = vmatmul.mubr.msk.bf16.gmra.mrb[12].mxu1 %vm17845_vm5, %v16016_v2  ;;  %v13800_v2 = vld [vmem:[%s17713_s4 + $0x60] sm:$0xff]   ;;  %vm17856_vm5 = vmmov %vm17848_vm0 }
 0x493   : > { %12971 = vmatprep.mubr.msk.bf16.mxu1 %vm17816_vm6, %v17815_v53  ;;  %12988 = vmatpush3.bf16.msra.mxu1 %v13798_v11  ;;  %v6503_v11 = vshll.u32 %v16164_v15, 16  ;;  %v13817_v15 = vld [vmem:[%s17713_s4 + $0xb8] sm:$0xff]  }
 0x494   : > { %12989 = vmatprep.subr.bf16.mxu1 %v17815_v53 }
 0x497   : > { %12990 = vmatpush3.bf16.msra.mxu1 %v13799_v23  ;;  %v13816_v23 = vld [vmem:[%s17713_s4 + $0xb0] sm:$0xff]  }
 0x498   : > { %13011 = vmatprep.subr.bf16.mxu1 %v17815_v53 }
 0x49a   : > { %12972 = vmatmul.mubr.msk.bf16.gmra.mrb[16].mxu1 %vm17846_vm7, %v16083_v45  ;;  %v13801_v45 = vld [vmem:[%s17713_s4 + $0x68] sm:$0xff]   ;;  %vm17857_vm7 = vmmov %vm17855_vm4 }
 0x49b   : > { %12975 = vmatprep.mubr.msk.bf16.mxu1 %vm17816_vm6, %v17815_v53 }
 0x4a2   : > { %12976 = vmatmul.mubr.msk.bf16.gmra.mrb[20].mxu1 %vm17835_vm3, %v16137_v9  ;;  %v13802_v9 = vld [vmem:[%s17713_s4 + $0x70] sm:$0xff]   ;;  %vm17858_vm3 = vmmov %vm17848_vm0 }
 0x4a3   : > { %12979 = vmatprep.mubr.msk.bf16.mxu1 %vm17816_vm6, %v17815_v53 }
 0x4aa   : > { %12980 = vmatmul.mubr.msk.bf16.gmra.mrb[24].mxu1 %vm17847_vm10, %v16148_v12  ;;  %vm17859_vm10 = vmmov %vm17855_vm4 }
 0x4ab   : > { %12991 = vmatprep.mubr.msk.bf16.mxu1 %vm17816_vm6, %v17815_v53  ;;  %v6336_v35 = vsel %vm17859_vm10, %v6333_v54, %v6335_v52 }
 0x4b2   : > { %12992 = vmatmul.mubr.msk.bf16.vlgmr.msra.gmra.mrb[8].mxu1 %vm17848_vm0, %v16134_v0  ;;  %v13803_v0 = vld [vmem:[%s17713_s4 + $0x78] sm:$0xff]  }
 0x4b3   : > { %13012 = vmatpush3.bf16.msra.mxu1 %v13800_v2  ;;  %12995 = vmatprep.mubr.msk.bf16.mxu1 %vm17816_vm6, %v17815_v53 }
 0x4b4   : > { %13013 = vmatprep.subr.bf16.mxu1 %v17815_v53 }
 0x4b7   : > { %13014 = vmatpush3.bf16.msra.mxu1 %v13801_v45  ;;  %v6502_v45 = vrot.slane %v6500_v60, 1 }
 0x4b8   : > { %13015 = vmatprep.subr.bf16.mxu1 %v17815_v53 }
 0x4ba   : > { %12996 = vmatmul.mubr.msk.bf16.gmra.mrb[12].mxu1 %vm17849_vm13, %v16126_v58  ;;  %v6281_v58 = vld [vmem:[#allocation2 + $0x4] sm:$0xe]  ;;  %vm17860_vm13 = vmmov %vm17855_vm4 }
 0x4bb   : > { %12999 = vmatprep.mubr.msk.bf16.mxu1 %vm17816_vm6, %v17815_v53  ;;  %13016 = vmatpush3.bf16.msra.mxu1 %v13802_v9  ;;  %v11728_v28 = vcombine.low %v6281_v58, %v16139_v16  ;;  %v6331_v16 = vrot.slane %v16162_v56, 1  ;;  %v6338_v61 = vsel %vm17860_vm13, %v6335_v52, %v6337_v31  ;;  %v6497_v56 = vor.u32 %v6496_v32, %v6493_v36  ;;  %vm17871_vm13 = vmmov %vm17848_vm0  ;;  %v13821_v31 = vld [vmem:[%s17713_s4 + $0xd0] sm:$0xff]  }
 0x4bc   : > { %13017 = vmatprep.subr.bf16.mxu1 %v17815_v53  ;;  %v6505_v9 = vrot.slane %v6503_v11, 2  ;;  %v6509_v58 = vshrl.u32 %v16179_v5, 16 }
 0x4bd   : > { %v6328_v12 = vrot.slane %v11728_v28, 1  ;;  %v6332_v57 = vsel %vm17855_vm4, %v6329_v50, %v6331_v16  ;;  %v6474_v14 = vshrl.u32 %v11728_v28, 16  ;;  %v6477_v34 = vshll.u32 %v11728_v28, 16 }
 0x4be   : > { %v6512_v28 = vshll.u32 %v16179_v5, 16  ;;  %v13827_v5 = vld [vmem:[%s17713_s4 + $0xe8] sm:$0xff]  }
 0x4bf   : > { %13018 = vmatpush3.bf16.msra.mxu1 %v13803_v0  ;;  %v6330_v42 = vsel %vm17853_vm8, %v6328_v12, %v6329_v50  ;;  %v6476_v49 = vrot.slane %v6474_v14, 1  ;;  %v6479_v37 = vrot.slane %v6477_v34, 2  ;;  %v6506_v0 = vor.u32 %v6505_v9, %v6502_v45 }
 0x4c0   : > { %13039 = vmatprep.subr.bf16.mxu1 %v17815_v53  ;;  %v6511_v12 = vrot.slane %v6509_v58, 1  ;;  %v6841_v14 = vrot.slane %v16206_v26, 2  ;;  %v7003_v45 = vshrl.u32 %v16209_v20, 16  ;;  %v7006_v9 = vshll.u32 %v16209_v20, 16 }
 0x4c1   : > { %v6480_v25 = vor.u32 %v6479_v37, %v6476_v49  ;;  %v6845_v49 = vrot.slane %v16214_v62, 2 }
 0x4c2   : > { %13000 = vmatmul.mubr.msk.bf16.gmra.mrb[16].mxu1 %vm17850_vm14, %v16151_v8  ;;  %v13806_v8 = vld [vmem:[%s17713_s4 + $0x80] sm:$0xff]   ;;  %vm17861_vm14 = vmmov %vm17848_vm0  ;;  %v7005_v58 = vrot.slane %v7003_v45, 2 }
 0x4c3   : > { %13003 = vmatprep.mubr.msk.bf16.mxu1 %vm17816_vm6, %v17815_v53 }
 0x4ca   : > { %13004 = vmatmul.mubr.msk.bf16.gmra.mrb[20].mxu1 %vm17851_vm15, %v16170_v6  ;;  %v6334_v6 = vsel %vm17857_vm7, %v6331_v16, %v6333_v54  ;;  %vm17862_vm15 = vsmask.f32 6400 }
 0x4cb   : > { %13007 = vmatprep.mubr.msk.bf16.mxu1 %vm17816_vm6, %v17815_v53  ;;  %vm17864_vm8 = vmmov %vm17862_vm15 }
 0x4cc   : > { %vm17866_vm4 = vmmov %vm17864_vm8 }
 0x4cd   : > { %v6507_v50 = vsel %vm17866_vm4, %v6497_v56, %v6506_v0  ;;  %vm17868_vm7 = vmmov %vm17866_vm4 }
 0x4ce   : > { %vm17870_vm10 = vmmov %vm17866_vm4 }
 0x4d2   : > { %13008 = vmatmul.mubr.msk.bf16.gmra.mrb[24].mxu1 %vm17852_vm2, %v16192_v24  ;;  %v6484_v24 = vrot.slane %v6482_v59, 1  ;;  %vm17863_vm2 = vmmov %vm17848_vm0 }
 0x4d3   : > { %13019 = vmatprep.mubr.msk.bf16.mxu1 %vm17816_vm6, %v17815_v53 }
 0x4d4   : > { %v6488_v3 = vor.u32 %v6487_v38, %v6484_v24  ;;  %v13831_v38 = vld [vmem:[%s17713_s4 + $0xf8] sm:$0xff]  }
 0x4d6   : > { %v6489_v40 = vsel %vm17862_vm15, %v6480_v25, %v6488_v3  ;;  %v6498_v2 = vsel %vm17864_vm8, %v6488_v3, %v6497_v56  ;;  %vm17873_vm15 = vmmov %vm17848_vm0  ;;  %vm17875_vm8 = vcmask 1045504   ;;  %v6847_v3 = vrot.slane %v16216_v55, 2 }
 0x4d7   : > { %vm17877_vm4 = vmmov %vm17875_vm8  ;;  %v6849_v25 = vrot.slane %v13832_v33, 2  ;;  %v16580_v33 = vld [vmem:[%s17715_s6] ss:$0 sm:$0xff] }
 0x4da   : > { %13020 = vmatmul.mubr.msk.bf16.vlgmr.msra.gmra.mrb[8].mxu1 %vm17854_vm1, %v6330_v42  ;;  %vm17865_vm1 = vmmov %vm17848_vm0  ;;  %v13818_v42 = vld [vmem:[#allocation2 + $0x2c] ss:$0 sps:$4 sm:$0x33]  }
 0x4db   : > { %13040 = vmatpush3.bf16.msra.mxu1 %v13806_v8  ;;  %13023 = vmatprep.mubr.msk.bf16.mxu1 %vm17816_vm6, %v17815_v53  ;;  %v6514_v8 = vrot.slane %v6512_v28, 2  ;;  %v6518_v16 = vshrl.u32 %v13818_v42, 16  ;;  %v7008_v28 = vrot.slane %v7006_v9, 3 }
 0x4dc   : > { %13041 = vmatprep.subr.bf16.mxu1 %v17815_v53 }
 0x4df   : > { %13042 = vmatpush3.bf16.msra.mxu1 %v13808_v7  ;;  %v6515_v7 = vor.u32 %v6514_v8, %v6511_v12  ;;  %v7012_v12 = vshrl.u32 %v16214_v62, 16  ;;  %v7015_v8 = vshll.u32 %v16214_v62, 16  ;;  %v13836_v62 = vld [vmem:[%s17713_s4 + $0x118] sm:$0xff]  }
 0x4e0   : > { %13043 = vmatprep.subr.bf16.mxu1 %v17815_v53 }
 0x4e2   : > { %13024 = vmatmul.mubr.msk.bf16.gmra.mrb[12].mxu1 %vm17856_vm5, %v6332_v57  ;;  %vm17867_vm5 = vmmov %vm17848_vm0  ;;  %v6516_v57 = vsel %vm17868_vm7, %v6506_v0, %v6515_v7 }
 0x4e3   : > { %13027 = vmatprep.mubr.msk.bf16.mxu1 %vm17816_vm6, %v17815_v53  ;;  %13044 = vmatpush3.bf16.msra.mxu1 %v13810_v46  ;;  %v6521_v46 = vshll.u32 %v13818_v42, 16  ;;  %vm17879_vm7 = vmmov %vm17877_vm4 }
 0x4e4   : > { %13045 = vmatprep.subr.bf16.mxu1 %v17815_v53 }
 0x4e5   : > { %v6523_v54 = vrot.slane %v6521_v46, 2  ;;  %v7017_v46 = vrot.slane %v7015_v8, 3 }
 0x4e7   : > { %13046 = vmatpush3.bf16.msra.mxu1 %v13812_v48  ;;  %v6520_v48 = vrot.slane %v6518_v16, 1  ;;  %v7014_v16 = vrot.slane %v7012_v12, 2 }
 0x4e8   : > { %13067 = vmatprep.subr.bf16.mxu1 %v17815_v53 }
 0x4ea   : > { %13028 = vmatmul.mubr.msk.bf16.gmra.mrb[16].mxu1 %vm17858_vm3, %v6334_v6  ;;  %vm17869_vm3 = vmmov %vm17848_vm0  ;;  %v6524_v6 = vor.u32 %v6523_v54, %v6520_v48  ;;  %v7021_v48 = vshrl.u32 %v16216_v55, 16  ;;  %v7024_v54 = vshll.u32 %v16216_v55, 16  ;;  %v13842_v55 = vld [vmem:[%s17716_s7 + $0x90] ss:$8 sps:$4 sm:$0xff]  }
 0x4eb   : > { %13031 = vmatprep.mubr.msk.bf16.mxu1 %vm17816_vm6, %v17815_v53 }
 0x4ec   : > { %v6525_v52 = vsel %vm17870_vm10, %v6515_v7, %v6524_v6  ;;  %vm17881_vm10 = vmmov %vm17877_vm4 }
 0x4f2   : > { %13032 = vmatmul.mubr.msk.bf16.gmra.mrb[20].mxu1 %vm17848_vm0, %v6336_v35  ;;  %v13819_v35 = vld [vmem:[%s17713_s4 + $0xc0] sm:$0xff]  }
 0x4f3   : > { %13035 = vmatprep.mubr.msk.bf16.mxu1 %vm17816_vm6, %v17815_v53 }
 0x4fa   : > { %13036 = vmatmul.mubr.msk.bf16.gmra.mrb[24].mxu1 %vm17861_vm14, %v6338_v61  ;;  %vm17872_vm14 = vmmov %vm17848_vm0 }
 0x4fb   : > { %13047 = vmatprep.mubr.msk.bf16.mxu1 %vm17816_vm6, %v17815_v53 }
 0x502   : > { %13048 = vmatmul.mubr.msk.bf16.vlgmr.msra.gmra.mrb[8].mxu1 %vm17863_vm2, %v6489_v40  ;;  %vm17874_vm2 = vmmov %vm17848_vm0  ;;  %v6997_v40 = vshll.u32 %v16206_v26, 16 }
 0x503   : > { %13068 = vmatpush3.bf16.msra.mxu1 %v13814_v22  ;;  %13051 = vmatprep.mubr.msk.bf16.mxu1 %vm17816_vm6, %v17815_v53  ;;  %v6994_v22 = vshrl.u32 %v16206_v26, 16  ;;  %v13833_v26 = vld [vmem:[%s17713_s4 + $0x100] sm:$0xff]  }
 0x504   : > { %13069 = vmatprep.subr.bf16.mxu1 %v17815_v53  ;;  %v6999_v60 = vrot.slane %v6997_v40, 3 }
 0x505   : > { %v6996_v56 = vrot.slane %v6994_v22, 2 }
 0x507   : > { %13070 = vmatpush3.bf16.msra.mxu1 %v13815_v43 }
 0x508   : > { %13071 = vmatprep.subr.bf16.mxu1 %v17815_v53 }
 0x50a   : > { %13052 = vmatmul.mubr.msk.bf16.gmra.mrb[12].mxu1 %vm17865_vm1, %v6498_v2  ;;  %vm17876_vm1 = vmmov %vm17848_vm0  ;;  %v7000_v2 = vor.u32 %v6999_v60, %v6996_v56 }
 0x50b   : > { %13055 = vmatprep.mubr.msk.bf16.mxu1 %vm17816_vm6, %v17815_v53  ;;  %13072 = vmatpush3.bf16.msra.mxu1 %v13816_v23 }
 0x50c   : > { %13073 = vmatprep.subr.bf16.mxu1 %v17815_v53 }
 0x50f   : > { %13074 = vmatpush3.bf16.msra.mxu1 %v13817_v15 }
 0x510   : > { %13095 = vmatprep.subr.bf16.mxu1 %v17815_v53 }
 0x512   : > { %13056 = vmatmul.mubr.msk.bf16.gmra.mrb[16].mxu1 %vm17867_vm5, %v6507_v50  ;;  %vm17878_vm5 = vmmov %vm17848_vm0  ;;  %v13834_v50 = vld [vmem:[%s17713_s4 + $0x108] sm:$0xff]  }
 0x513   : > { %13059 = vmatprep.mubr.msk.bf16.mxu1 %vm17816_vm6, %v17815_v53 }
 0x51a   : > { %13060 = vmatmul.mubr.msk.bf16.gmra.mrb[20].mxu1 %vm17869_vm3, %v6516_v57  ;;  %vm17880_vm3 = vmmov %vm17848_vm0  ;;  %v7018_v57 = vor.u32 %v7017_v46, %v7014_v16 }
 0x51b   : > { %13063 = vmatprep.mubr.msk.bf16.mxu1 %vm17816_vm6, %v17815_v53 }
 0x522   : > { %13064 = vmatmul.mubr.msk.bf16.gmra.mrb[24].mxu1 %vm17848_vm0, %v6525_v52  ;;  %v7023_v52 = vrot.slane %v7021_v48, 2 }
 0x523   : > { %13075 = vmatprep.mubr.msk.bf16.mxu1 %vm17816_vm6, %v17815_v53 }
 0x52a   : > { %13076 = vmatmul.mubr.msk.bf16.vlgmr.msra.gmra.mrb[8].mxu1 %vm17871_vm13, %v16174_v63  ;;  %v13822_v63 = vld [vmem:[%s17713_s4 + $0xd8] sm:$0xff]   ;;  %vm17882_vm13 = vmmov %vm17877_vm4 }
 0x52b   : > { %13096 = vmatpush3.bf16.msra.mxu1 %v13819_v35  ;;  %13079 = vmatprep.mubr.msk.bf16.mxu1 %vm17816_vm6, %v17815_v53  ;;  %v6848_v17 = vsel %vm17882_vm13, %v6845_v49, %v6847_v3  ;;  %v7026_v35 = vrot.slane %v7024_v54, 3 }
 0x52c   : > { %13097 = vmatprep.subr.bf16.mxu1 %v17815_v53 }
 0x52f   : > { %13098 = vmatpush3.bf16.msra.mxu1 %v13820_v29  ;;  %v13837_v29 = vld [vmem:[#allocation2 + $0x30] ss:$0 sps:$4 sm:$0x77]  }
 0x530   : > { %13099 = vmatprep.subr.bf16.mxu1 %v17815_v53 }
 0x532   : > { %13080 = vmatmul.mubr.msk.bf16.gmra.mrb[12].mxu1 %vm17872_vm14, %v16182_v10  ;;  %v6669_v10 = vrot.slane %v13818_v42, 2  ;;  %vm17883_vm14 = vmmov %vm17848_vm0  ;;  %v13835_v42 = vld [vmem:[%s17713_s4 + $0x110] sm:$0xff]  }
 0x533   : > { %13083 = vmatprep.mubr.msk.bf16.mxu1 %vm17816_vm6, %v17815_v53  ;;  %13100 = vmatpush3.bf16.msra.mxu1 %v13821_v31  ;;  %v7027_v31 = vor.u32 %v7026_v35, %v7023_v52 }
 0x534   : > { %13101 = vmatprep.subr.bf16.mxu1 %v17815_v53  ;;  %v6670_v59 = vsel %vm17875_vm8, %v6667_v19, %v6669_v10  ;;  %v6843_v19 = vrot.slane %v16209_v20, 2  ;;  %vm17886_vm8 = vsmask.f32 5376  ;;  %v7009_v20 = vor.u32 %v7008_v28, %v7005_v58 }
 0x535   : > { %v7033_v10 = vshll.u32 %v13837_v29, 16 }
 0x536   : > { %v6844_v24 = vsel %vm17879_vm7, %v6841_v14, %v6843_v19  ;;  %v6846_v37 = vsel %vm17881_vm10, %v6843_v19, %v6845_v49  ;;  %v13848_v19 = vld [vmem:[%s17716_s7 + $0xb0] ss:$8 sps:$4 sm:$0xff]  }
 0x537   : > { %13102 = vmatpush3.bf16.msra.mxu1 %v13822_v63  ;;  %v7030_v63 = vshrl.u32 %v13837_v29, 16  ;;  %v13854_v49 = vld [vmem:[%s17716_s7 + $0xd0] ss:$8 sps:$4 sm:$0xff]  }
 0x538   : > { %13123 = vmatprep.subr.bf16.mxu1 %v17815_v53 }
 0x53a   : > { %13084 = vmatmul.mubr.msk.bf16.gmra.mrb[16].mxu1 %vm17873_vm15, %v16185_v39  ;;  %v11763_v39 = vcombine.low %v6793_v41, %v16202_v1  ;;  %v13829_v1 = vld [vmem:[%s17713_s4 + $0xf0] sm:$0xff]   ;;  %vm17884_vm15 = vmmov %vm17877_vm4  ;;  %v7032_v41 = vrot.slane %v7030_v63, 2 }
 0x53b   : > { %13087 = vmatprep.mubr.msk.bf16.mxu1 %vm17816_vm6, %v17815_v53  ;;  %v6850_v43 = vsel %vm17884_vm15, %v6847_v3, %v6849_v25  ;;  %vm17895_vm15 = vmmov %vm17848_vm0  ;;  %v16575_v3 = vld [vmem:[%s17714_s5] ss:$0 sm:$0xff] }
 0x53c   : > { %v6840_v34 = vrot.slane %v11763_v39, 2  ;;  %v6986_v36 = vshrl.u32 %v11763_v39, 16  ;;  %v6989_v32 = vshll.u32 %v11763_v39, 16  ;;  %v7035_v39 = vrot.slane %v7033_v10, 3  ;;  %v13857_v25 = vld [vmem:[%s17716_s7 + $0xe0] ss:$8 sps:$4 sm:$0xff]  }
 0x53e   : > { %v6842_v61 = vsel %vm17877_vm4, %v6840_v34, %v6841_v14  ;;  %v6988_v11 = vrot.slane %v6986_v36, 2  ;;  %v6991_v23 = vrot.slane %v6989_v32, 3  ;;  %vm17888_vm4 = vmmov %vm17886_vm8  ;;  %v7036_v14 = vor.u32 %v7035_v39, %v7032_v41  ;;  %v13862_v36 = vld [vmem:[%s17716_s7 + $0xf4] ss:$8 sps:$4 sm:$0xff]  }
 0x53f   : > { %v7010_v7 = vsel %vm17888_vm4, %v7000_v2, %v7009_v20  ;;  %vm17890_vm7 = vmmov %vm17888_vm4 }
 0x540   : > { %v6992_v15 = vor.u32 %v6991_v23, %v6988_v11  ;;  %v7019_v6 = vsel %vm17890_vm7, %v7009_v20, %v7018_v57  ;;  %vm17892_vm10 = vmmov %vm17888_vm4  ;;  %v13860_v11 = vld [vmem:[%s17716_s7 + $0xf0] ss:$8 sps:$4 sm:$0xff]   ;;  %vm17903_vm7 = vcmask 1040384  }
 0x541   : > { %vm17893_vm13 = vmmov %vm17888_vm4  ;;  %vm17899_vm4 = vcmask 1044480  }
 0x542   : > { %13088 = vmatmul.mubr.msk.bf16.gmra.mrb[20].mxu1 %vm17874_vm2, %v16198_v21  ;;  %v13825_v21 = vld [vmem:[%s17713_s4 + $0xe0] sm:$0xff]   ;;  %vm17885_vm2 = vmmov %vm17848_vm0  ;;  %v7001_v0 = vsel %vm17886_vm8, %v6992_v15, %v7000_v2  ;;  %v7037_v34 = vsel %vm17893_vm13, %v7027_v31, %v7036_v14 }
 0x543   : > { %13091 = vmatprep.mubr.msk.bf16.mxu1 %vm17816_vm6, %v17815_v53  ;;  %vm17897_vm8 = vmmov %vm17848_vm0  ;;  %v13865_v2 = vld [vmem:[%s17716_s7 + $0x4] ss:$8 sps:$4 sm:$0xff]  }
 0x54a   : > { %13092 = vmatmul.mubr.msk.bf16.gmra.mrb[24].mxu1 %vm17876_vm1, %v6670_v59  ;;  %vm17887_vm1 = vmmov %vm17848_vm0  ;;  %v7028_v59 = vsel %vm17892_vm10, %v7018_v57, %v7027_v31 }
 0x54b   : > { %13103 = vmatprep.mubr.msk.bf16.mxu1 %vm17816_vm6, %v17815_v53  ;;  %vm17905_vm10 = vmmov %vm17903_vm7 }
 0x552   : > { %13104 = vmatmul.mubr.msk.bf16.vlgmr.msra.gmra.mrb[8].mxu1 %vm17878_vm5, %v6842_v61  ;;  %vm17889_vm5 = vmmov %vm17848_vm0  ;;  %v13845_v61 = vld [vmem:[%s17716_s7 + $0xa0] ss:$8 sps:$4 sm:$0xff]  }
 0x553   : > { %13124 = vmatpush3.bf16.msra.mxu1 %v13825_v21  ;;  %13107 = vmatprep.mubr.msk.bf16.mxu1 %vm17816_vm6, %v17815_v53  ;;  %v17901_v21 = vmov 0  }
 0x554   : > { %13125 = vmatprep.subr.bf16.mxu1 %v17815_v53 }
 0x557   : > { %13126 = vmatpush3.bf16.msra.mxu1 %v13827_v5  ;;  %v13850_v5 = vld [vmem:[%s17716_s7 + $0xb4] ss:$8 sps:$4 sm:$0xff]  }
 0x558   : > { %13127 = vmatprep.subr.bf16.mxu1 %v17815_v53 }
 0x55a   : > { %13108 = vmatmul.mubr.msk.bf16.gmra.mrb[12].mxu1 %vm17880_vm3, %v6844_v24  ;;  %vm17891_vm3 = vmmov %vm17848_vm0  ;;  %v13851_v24 = vld [vmem:[%s17716_s7 + $0xc0] ss:$8 sps:$4 sm:$0xff]  }
 0x55b   : > { %13111 = vmatprep.mubr.msk.bf16.mxu1 %vm17816_vm6, %v17815_v53  ;;  %13128 = vmatpush3.bf16.msra.mxu1 %v13829_v1  ;;  %v13853_v1 = vld [vmem:[%s17716_s7 + $0xc4] ss:$8 sps:$4 sm:$0xff]  }
 0x55c   : > { %13129 = vmatprep.subr.bf16.mxu1 %v17815_v53 }
 0x55f   : > { %13130 = vmatpush3.bf16.msra.mxu1 %v13831_v38  ;;  %v13856_v38 = vld [vmem:[%s17716_s7 + $0xd4] ss:$8 sps:$4 sm:$0xff]  }
 0x560   : > { %13151 = vmatprep.subr.bf16.mxu1 %v17815_v53 }
 0x562   : > { %13112 = vmatmul.mubr.msk.bf16.gmra.mrb[16].mxu1 %vm17848_vm0, %v6846_v37  ;;  %v13859_v37 = vld [vmem:[%s17716_s7 + $0xe4] ss:$8 sps:$4 sm:$0xff]  }
 0x563   : > { %13115 = vmatprep.mubr.msk.bf16.mxu1 %vm17816_vm6, %v17815_v53 }
 0x56a   : > { %13116 = vmatmul.mubr.msk.bf16.gmra.mrb[20].mxu1 %vm17883_vm14, %v6848_v17  ;;  %vm17894_vm14 = vmmov %vm17848_vm0 }
 0x56b   : > { %13119 = vmatprep.mubr.msk.bf16.mxu1 %vm17816_vm6, %v17815_v53 }
 0x572   : > { %13120 = vmatmul.mubr.msk.bf16.gmra.mrb[24].mxu1 %vm17885_vm2, %v6850_v43  ;;  %vm17896_vm2 = vmmov %vm17848_vm0 }
 0x573   : > { %13131 = vmatprep.mubr.msk.bf16.mxu1 %vm17816_vm6, %v17815_v53 }
 0x57a   : > { %13132 = vmatmul.mubr.msk.bf16.vlgmr.msra.gmra.mrb[8].mxu1 %vm17887_vm1, %v7001_v0  ;;  %vm17898_vm1 = vmmov %vm17848_vm0 }
 0x57b   : > { %13152 = vmatpush3.bf16.msra.mxu1 %v13833_v26  ;;  %13135 = vmatprep.mubr.msk.bf16.mxu1 %vm17816_vm6, %v17815_v53 }
 0x57c   : > { %13153 = vmatprep.subr.bf16.mxu1 %v17815_v53 }
 0x57f   : > { %13154 = vmatpush3.bf16.msra.mxu1 %v13834_v50 }
 0x580   : > { %13155 = vmatprep.subr.bf16.mxu1 %v17815_v53 }
 0x582   : > { %13136 = vmatmul.mubr.msk.bf16.gmra.mrb[12].mxu1 %vm17889_vm5, %v7010_v7  ;;  %vm17900_vm5 = vmmov %vm17848_vm0 }
 0x583   : > { %13139 = vmatprep.mubr.msk.bf16.mxu1 %vm17816_vm6, %v17815_v53  ;;  %13156 = vmatpush3.bf16.msra.mxu1 %v13835_v42 }
 0x584   : > { %13157 = vmatprep.subr.bf16.mxu1 %v17815_v53 }
 0x587   : > { %13158 = vmatpush3.bf16.msra.mxu1 %v13836_v62 }
 0x58a   : > { %13140 = vmatmul.mubr.msk.bf16.gmra.mrb[16].mxu1 %vm17891_vm3, %v7019_v6 }
 0x58b   : > { %13143 = vmatprep.mubr.msk.bf16.mxu1 %vm17816_vm6, %v17815_v53 }
 0x592   : > { %13144 = vmatmul.mubr.msk.bf16.gmra.mrb[20].mxu1 %vm17848_vm0, %v7028_v59  ;;  %vm17906_vm0 = vmmov %vm17903_vm7 }
 0x593   : > { %13147 = vmatprep.mubr.msk.bf16.mxu1 %vm17816_vm6, %v17815_v53  ;;  %vm17907_vm13 = vmmov %vm17906_vm0 }
 0x59a   : > { %13148 = vmatmul.mubr.msk.bf16.gmra.mrb[24].mxu1 %vm17894_vm14, %v7037_v34  ;;  %vm17908_vm14 = vmmov %vm17906_vm0 }
 0x59b   : > { %13159 = vmatprep.mubr.msk.bf16.mxu1 %vm17816_vm6, %v17815_v53 }
 0x5a2   : > { %13160 = vmatmul.mubr.msk.bf16.vlgmr.msra.gmra.mrb[8].mxu1 %vm17895_vm15, %v16228_v44  ;;  %v7181_v44 = vrot.slane %v13837_v29, 3  ;;  %vm17909_vm15 = vmmov %vm17906_vm0 }
 0x5a3   : > { %13163 = vmatprep.mubr.msk.bf16.mxu1 %vm17816_vm6, %v17815_v53 }
 0x5aa   : > { %13164 = vmatmul.mubr.msk.bf16.gmra.mrb[12].mxu1 %vm17896_vm2, %v16234_v4  ;;  %v7182_v4 = vsel %vm17899_vm4, %v7179_v30, %v7181_v44  ;;  %v13847_v30 = vld [vmem:[%s17716_s7 + $0xa4] ss:$8 sps:$4 sm:$0xff]   ;;  %vm17910_vm2 = vmmov %vm17906_vm0  ;;  %vm17913_vm4 = vcmask 1043459  }
 0x5ab   : > { %13167 = vmatprep.mubr.msk.bf16.mxu1 %vm17816_vm6, %v17815_v53 }
 0x5b2   : > { %13168 = vmatmul.mubr.msk.bf16.gmra.mrb[16].mxu1 %vm17897_vm8, %v16237_v13  ;;  %v13839_v13 = vld [vmem:[%s17716_s7 + $0x80] ss:$8 sps:$4 sm:$0xff]   ;;  %vm17911_vm8 = vmmov %vm17906_vm0 }
 0x5b3   : > { %13171 = vmatprep.mubr.msk.bf16.mxu1 %vm17816_vm6, %v17815_v53 }
 0x5ba   : > { %13172 = vmatmul.mubr.msk.bf16.gmra.mrb[20].mxu1 %vm17898_vm1, %v16242_v51  ;;  %v13841_v51 = vld [vmem:[%s17716_s7 + $0x84] ss:$8 sps:$4 sm:$0xff]   ;;  %vm17912_vm1 = vcmask 1042434  }
 0x5bb   : > { %13175 = vmatprep.mubr.msk.bf16.mxu1 %vm17816_vm6, %v17815_v53  ;;  %v13844_v53 = vld [vmem:[%s17716_s7 + $0x94] ss:$8 sps:$4 sm:$0xff]   ;;  %7984 = vmatprep.subr.bf16.mxu1 %v13841_v51  ;;  %vm17902_vm6 = vcmask 1042432  }
 0x5bc   : > { %7985 = vmatpush1.bf16.msra.mxu1 %v13839_v13  ;;  %vm17904_vm3 = vmmov %vm17902_vm6 }
 0x5bd   : > { %7986 = vmatprep.subr.bf16.mxu1 %v13844_v53 }
 0x5c0   : > { %7987 = vmatpush1.bf16.msra.mxu1 %v13842_v55 }
 0x5c1   : > { %7988 = vmatprep.subr.bf16.mxu1 %v13847_v30 }
 0x5c2   : > { %13176 = vmatmul.mubr.msk.bf16.gmra.mrb[24].mxu1 %vm17900_vm5, %v7182_v4  ;;  %vm7465_vm5 = vsmask.f32 2304 }
 0x5c3   : > { %8016 = vmatprep.mubr.bf16.mxu1 %v17901_v21 }
 0x5c4   : > { %7989 = vmatpush1.bf16.msra.mxu1 %v13845_v61 }
 0x5c5   : > { %7990 = vmatprep.subr.bf16.mxu1 %v13850_v5 }
 0x5c8   : > { %7991 = vmatpush1.bf16.msra.mxu1 %v13848_v19 }
 0x5c9   : > { %7992 = vmatprep.subr.bf16.mxu1 %v13853_v1 }
 0x5cc   : > { %7993 = vmatpush1.bf16.msra.mxu1 %v13851_v24 }
 0x5cd   : > { %7994 = vmatprep.subr.bf16.mxu1 %v13856_v38 }
 0x5d0   : > { %7995 = vmatpush1.bf16.msra.mxu1 %v13854_v49 }
 0x5d1   : > { %7996 = vmatprep.subr.bf16.mxu1 %v13859_v37 }
 0x5d4   : > { %7997 = vmatpush1.bf16.msra.mxu1 %v13857_v25 }
 0x5d5   : > { %7998 = vmatprep.subr.bf16.mxu1 %v13862_v36 }
 0x5d8   : > { %7999 = vmatpush1.bf16.msra.mxu1 %v13860_v11 }
 0x5d9   : > { %8118 = vmatprep.subr.bf16.mxu1 %v13865_v2 }
 0x675   : > { %v7256_v17 = vpop.f32.mrb[8].mxu1 }
 0x676   : > { %v7312_v22 = vmul.f32 %v16575_v3, %v7256_v17  ;;  %v13161_v40 = vpop.f32.mrb[9].mxu1 }
 0x677   : > { %v7259_v32 = vpop.f32.mrb[10].mxu1 }
 0x678   : > { %v7329_v43 = vadd.f32 %v16580_v33, %v7312_v22  ;;  %v7313_v56 = vmul.f32 %v16575_v3, %v7259_v32  ;;  %v13162_v60 = vpop.f32.mrb[11].mxu1 }
 0x67a   : > { %v7330_v23 = vadd.f32 %v16580_v33, %v7313_v56  ;;  %v7339_v45 = vmax.f32 %v7329_v43, 0.0 }
 0x67c   : > { %v7340_v9 = vmax.f32 %v7330_v23, 0.0 }
 0x67d   : > { %v7264_v15 = vpop.f32.mrb[12].mxu1 }
 0x67e   : > { %v7349_v26 = vpack.c.bf16 %v7340_v9, %v7339_v45  ;;  %v7314_v0 = vmul.f32 %v16575_v3, %v7264_v15  ;;  %v13165_v58 = vpop.f32.mrb[13].mxu1 }
 0x67f   : > { %v7267_v28 = vpop.f32.mrb[14].mxu1 }
 0x680   : > { %7354 = vst [vmem:[#allocation6] sm:$0xff] %v7349_v26  ;;  %v7331_v50 = vadd.f32 %v16580_v33, %v7314_v0  ;;  %v7315_v20 = vmul.f32 %v16575_v3, %v7267_v28  ;;  %v13166_v12 = vpop.f32.mrb[15].mxu1 }
 0x682   : > { %v7332_v8 = vadd.f32 %v16580_v33, %v7315_v20  ;;  %v7341_v42 = vmax.f32 %v7331_v50, 0.0 }
 0x684   : > { %v7342_v7 = vmax.f32 %v7332_v8, 0.0 }
 0x685   : > { %v7272_v16 = vpop.f32.mrb[16].mxu1 }
 0x686   : > { %v7350_v46 = vpack.c.bf16 %v7342_v7, %v7341_v42  ;;  %v7316_v62 = vmul.f32 %v16575_v3, %v7272_v16  ;;  %v13169_v57 = vpop.f32.mrb[17].mxu1 }
 0x687   : > { %v7275_v48 = vpop.f32.mrb[18].mxu1  ;;  %v7364_v63 = vld [vmem:[#allocation6] sm:$0xe0]  ;;  %v7363_v55 = vld [vmem:[#allocation6] sm:$0xf] }
 0x688   : > { %7355 = vst [vmem:[#allocation6 + $0x8] sm:$0xff] %v7350_v46  ;;  %v7333_v54 = vadd.f32 %v16580_v33, %v7316_v62  ;;  %v7317_v6 = vmul.f32 %v16575_v3, %v7275_v48  ;;  %v13170_v52 = vpop.f32.mrb[19].mxu1  ;;  %v7368_v34 = vrot.slane %v7364_v63, 5 }
 0x68a   : > { %v7334_v35 = vadd.f32 %v16580_v33, %v7317_v6  ;;  %v7343_v29 = vmax.f32 %v7333_v54, 0.0 }
 0x68c   : > { %v7344_v31 = vmax.f32 %v7334_v35, 0.0 }
 0x68d   : > { %v7280_v10 = vpop.f32.mrb[20].mxu1 }
 0x68e   : > { %v7351_v59 = vpack.c.bf16 %v7344_v31, %v7343_v29  ;;  %v7318_v41 = vmul.f32 %v16575_v3, %v7280_v10  ;;  %v13173_v39 = vpop.f32.mrb[21].mxu1 }
 0x68f   : > { %v7365_v14 = vld [vmem:[#allocation6 + $0x8] sm:$0x1]  ;;  %v7283_v4 = vpop.f32.mrb[22].mxu1  ;;  %v7478_v1 = vld [vmem:[#allocation6 + $0x8] sm:$0x80] }
 0x690   : > { %v7369_v44 = vrot.slane %v7365_v14, 5  ;;  %7356 = vst [vmem:[#allocation6 + $0x10] sm:$0xff] %v7351_v59  ;;  %v7335_v13 = vadd.f32 %v16580_v33, %v7318_v41  ;;  %v7319_v51 = vmul.f32 %v16575_v3, %v7283_v4  ;;  %v13174_v53 = vpop.f32.mrb[23].mxu1  ;;  %v7482_v43 = vrot.slane %v7478_v1, 5  ;;  %v7477_v0 = vld [vmem:[#allocation6 + $0x8] sm:$0x3c] }
 0x692   : > { %v7370_v30 = vsel %vm17902_vm6, %v7368_v34, %v7369_v44  ;;  %v7336_v5 = vadd.f32 %v16580_v33, %v7319_v51  ;;  %v7345_v24 = vmax.f32 %v7335_v13, 0.0  ;;  %vm17914_vm6 = vmmov %vm17906_vm0 }
 0x693   : > { %v7372_v61 = vmax.bf16 %v7370_v30, %v7363_v55 }
 0x694   : > { %v7346_v38 = vmax.f32 %v7336_v5, 0.0 }
 0x695   : > { %v7380_v19 = vrot.slane %v7372_v61, %v17780_v18  ;;  %v7288_v49 = vpop.f32.mrb[24].mxu1 }
 0x696   : > { %v7320_v37 = vmul.f32 %v16575_v3, %v7288_v49  ;;  %v13177_v17 = vpop.f32.mrb[25].mxu1  ;;  %v7352_v36 = vpack.c.bf16 %v7346_v38, %v7345_v24 }
 0x697   : > { %v7381_v25 = vcombine.high %v7380_v19, %v7380_v19  ;;  %v7388_v22 = vrot.slane %v7380_v19, %v17780_v18  ;;  %v7479_v40 = vld [vmem:[#allocation6 + $0x10] sm:$0x7]  ;;  %v7291_v32 = vpop.f32.mrb[26].mxu1 }
 0x698   : > { %v7483_v56 = vrot.slane %v7479_v40, 5  ;;  %v16615_v60 = vadd.f32 %v16580_v33, %v7320_v37  ;;  %v13178_v11 = vpop.f32.mrb[27].mxu1  ;;  %7357 = vst [vmem:[#allocation6 + $0x18] sm:$0xff] %v7352_v36  ;;  %v7321_v9 = vmul.f32 %v16575_v3, %v7291_v32 }
 0x699   : > { %v7395_v23 = vrot.slane %v7381_v25, %v17780_v18  ;;  %v7396_v2 = vcombine.high %v7388_v22, %v7388_v22  ;;  %v7400_v45 = vsel %vm17903_vm7, %v7388_v22, 4286644096  ;;  %vm17915_vm7 = vmmov %vm17906_vm0 }
 0x69a   : > { %v7402_v15 = vunpack.i.l.bf16 %v7400_v45  ;;  %v7403_v26 = vunpack.i.h.bf16 %v7400_v45  ;;  %v7484_v58 = vsel %vm17904_vm3, %v7482_v43, %v7483_v56  ;;  %v7347_v28 = vmax.f32 %v16615_v60, 0.0  ;;  %vm17916_vm3 = vmmov %vm17906_vm0 }
 0x69b   : > { %v7397_v50 = vcombine.high %v7395_v23, %v7395_v23  ;;  %v7413_v20 = vsel %vm17905_vm10, %v7395_v23, 4286644096  ;;  %v7426_v12 = vsel %vm17906_vm0, %v7396_v2, 4286644096  ;;  %v7486_v8 = vmax.bf16 %v7484_v58, %v7477_v0  ;;  %vm17917_vm10 = vmmov %vm17906_vm0 }
 0x69c   : > { %v7404_v42 = vmax.f32 %v7402_v15, %v7403_v26  ;;  %v7415_v7 = vunpack.i.l.bf16 %v7413_v20  ;;  %v7416_v16 = vunpack.i.h.bf16 %v7413_v20  ;;  %v7428_v46 = vunpack.i.l.bf16 %v7426_v12 }
 0x69d   : > { %v7429_v62 = vunpack.i.h.bf16 %v7426_v12  ;;  %v7439_v3 = vsel %vm17907_vm13, %v7397_v50, 4286644096  ;;  %v7488_v57 = vcombine.high %v7486_v8, %v7486_v8  ;;  %v7495_v48 = vrot.slane %v7486_v8, %v17780_v18 }
 0x69e   : > { %v7405_v54 = vrot.slane %v7404_v42, 4  ;;  %v7417_v6 = vmax.f32 %v7415_v7, %v7416_v16  ;;  %v7441_v52 = vunpack.i.l.bf16 %v7439_v3  ;;  %v7442_v35 = vunpack.i.h.bf16 %v7439_v3 }
 0x69f   : > { %v7430_v29 = vmax.f32 %v7428_v46, %v7429_v62  ;;  %v7502_v31 = vrot.slane %v7488_v57, %v17780_v18  ;;  %v7503_v63 = vcombine.high %v7495_v48, %v7495_v48  ;;  %v7511_v10 = vrot.slane %v7495_v48, %v17780_v18  ;;  %v7612_v16 = vld [vmem:[#allocation6 + $0x18] sm:$0x1e] }
 0x6a0   : > { %v7406_v59 = vmax.f32 %v7404_v42, %v7405_v54  ;;  %v7418_v41 = vrot.slane %v7417_v6, 4  ;;  %v7443_v39 = vmax.f32 %v7441_v52, %v7442_v35  ;;  %v16629_v14 = vadd.f32 %v16580_v33, %v7321_v9 }
 0x6a1   : > { %v7431_v34 = vrot.slane %v7430_v29, 4  ;;  %v7504_v44 = vcombine.high %v7502_v31, %v7502_v31  ;;  %v7518_v4 = vrot.slane %v7502_v31, %v17780_v18  ;;  %v7525_v13 = vrot.slane %v7503_v63, %v17780_v18 }
 0x6a2   : > { %v7407_v51 = vrot.slane %v7406_v59, 2  ;;  %v7419_v53 = vmax.f32 %v7417_v6, %v7418_v41  ;;  %v7444_v55 = vrot.slane %v7443_v39, 4  ;;  %v7533_v30 = vcombine.high %v7511_v10, %v7511_v10 }
 0x6a3   : > { %v7432_v61 = vmax.f32 %v7430_v29, %v7431_v34  ;;  %v7532_v5 = vrot.slane %v7504_v44, %v17780_v18  ;;  %v7534_v19 = vcombine.high %v7525_v13, %v7525_v13  ;;  %v7562_v1 = vsel %vm17908_vm14, %v7518_v4, 4286644096  ;;  %vm17921_vm14 = vmmov %vm17910_vm2 }
 0x6a4   : > { %v7408_v24 = vmax.f32 %v7406_v59, %v7407_v51  ;;  %v7420_v38 = vrot.slane %v7419_v53, 2  ;;  %v7445_v33 = vmax.f32 %v7443_v39, %v7444_v55  ;;  %v7536_v49 = vsel %vm17909_vm15, %v7533_v30, 4286644096  ;;  %v7611_v39 = vld [vmem:[#allocation6 + $0x10] sm:$0xf0]  ;;  %vm17922_vm15 = vmmov %vm17910_vm2 }
 0x6a5   : > { %v7433_v37 = vrot.slane %v7432_v61, 2  ;;  %v7538_v17 = vunpack.i.l.bf16 %v7536_v49  ;;  %v7539_v25 = vunpack.i.h.bf16 %v7536_v49  ;;  %v7549_v22 = vsel %vm17910_vm2, %v7534_v19, 4286644096 }
 0x6a6   : > { %v7409_v40 = vrot.slane %v7408_v24, 1  ;;  %v7421_v36 = vmax.f32 %v7419_v53, %v7420_v38  ;;  %v7446_v32 = vrot.slane %v7445_v33, 2  ;;  %v7551_v43 = vunpack.i.l.bf16 %v7549_v22 }
 0x6a7   : > { %v7434_v56 = vmax.f32 %v7432_v61, %v7433_v37  ;;  %v7540_v11 = vmax.f32 %v7538_v17, %v7539_v25  ;;  %v7552_v23 = vunpack.i.h.bf16 %v7549_v22  ;;  %v7564_v2 = vunpack.i.l.bf16 %v7562_v1 }
 0x6a8   : > { %v7410_v45 = vmax.f32 %v7408_v24, %v7409_v40  ;;  %v7422_v9 = vrot.slane %v7421_v36, 1  ;;  %v7447_v15 = vmax.f32 %v7445_v33, %v7446_v32  ;;  %v7565_v26 = vunpack.i.h.bf16 %v7562_v1 }
 0x6a9   : > { %v7435_v0 = vrot.slane %v7434_v56, 1  ;;  %v7541_v58 = vrot.slane %v7540_v11, 4  ;;  %v7553_v50 = vmax.f32 %v7551_v43, %v7552_v23  ;;  %v7575_v20 = vsel %vm17911_vm8, %v7532_v5, 4286644096  ;;  %vm17923_vm8 = vmmov %vm17910_vm2 }
 0x6aa   : > { %v7411_v12 = vpack.i.bf16 %v7410_v45, %v7410_v45  ;;  %v7423_v8 = vmax.f32 %v7421_v36, %v7422_v9  ;;  %v7448_v42 = vrot.slane %v7447_v15, 1  ;;  %v7566_v7 = vmax.f32 %v7564_v2, %v7565_v26 }
 0x6ab   : > { %v7436_v46 = vmax.f32 %v7434_v56, %v7435_v0  ;;  %v7542_v62 = vmax.f32 %v7540_v11, %v7541_v58  ;;  %v7554_v3 = vrot.slane %v7553_v50, 4  ;;  %v7577_v57 = vunpack.i.l.bf16 %v7575_v20 }
 0x6ac   : > { %v7424_v48 = vpack.i.bf16 %v7423_v8, %v7423_v8  ;;  %v7455_v54 = vunpack.c.l.b16 %v7411_v12  ;;  %v7567_v6 = vrot.slane %v7566_v7, 4  ;;  %v7578_v52 = vunpack.i.h.bf16 %v7575_v20 }
 0x6ad   : > { %v7437_v35 = vpack.i.bf16 %v7436_v46, %v7436_v46  ;;  %v7543_v29 = vrot.slane %v7542_v62, 2  ;;  %v7555_v31 = vmax.f32 %v7553_v50, %v7554_v3  ;;  %v7614_v63 = vrot.slane %v7612_v16, 5 }
 0x6ae   : > { %v7456_v10 = vunpack.c.l.b16 %v7424_v48  ;;  %v7568_v59 = vmax.f32 %v7566_v7, %v7567_v6  ;;  %v7579_v41 = vmax.f32 %v7577_v57, %v7578_v52  ;;  %v7348_v34 = vmax.f32 %v16629_v14, 0.0 }
 0x6af   : > { %v7457_v44 = vunpack.c.l.b16 %v7437_v35  ;;  %v7544_v4 = vmax.f32 %v7542_v62, %v7543_v29  ;;  %v7556_v13 = vrot.slane %v7555_v31, 2  ;;  %v7616_v51 = vmax.bf16 %v7614_v63, %v7611_v39 }
 0x6b0   : > { %v7569_v53 = vrot.slane %v7568_v59, 2  ;;  %v7580_v55 = vrot.slane %v7579_v41, 4  ;;  %v7353_v30 = vpack.c.bf16 %v7348_v34, %v7347_v28  ;;  %v7449_v61 = vmax.f32 %v7447_v15, %v7448_v42  ;;  %v7716_v34 = vld [vmem:[#allocation6 + $0x18] sm:$0xc0] }
 0x6b1   : > { %v7545_v5 = vrot.slane %v7544_v4, 1  ;;  %v7557_v19 = vmax.f32 %v7555_v31, %v7556_v13  ;;  %v7618_v1 = vcombine.high %v7616_v51, %v7616_v51  ;;  %v7459_v24 = vsel %vm17912_vm1, %v7456_v10, %v7455_v54 }
 0x6b2   : > { %v7570_v38 = vmax.f32 %v7568_v59, %v7569_v53  ;;  %v7581_v33 = vmax.f32 %v7579_v41, %v7580_v55  ;;  %7358 = vst [vmem:[#allocation6 + $0x20] sm:$0xff] %v7353_v30  ;;  %v7450_v49 = vpack.i.bf16 %v7449_v61, %v7449_v61  ;;  %v7460_v25 = vsel %vm17913_vm4, %v7457_v44, %v7459_v24  ;;  %vm17924_vm4 = vmmov %vm17912_vm1 }
 0x6b3   : > { %v7546_v14 = vmax.f32 %v7544_v4, %v7545_v5  ;;  %v7558_v37 = vrot.slane %v7557_v19, 1  ;;  %v7625_v17 = vrot.slane %v7618_v1, %v17780_v18  ;;  %vm17918_vm0 = vcmask 1042432  }
 0x6b4   : > { %v7571_v22 = vrot.slane %v7570_v38, 1  ;;  %v7582_v40 = vrot.slane %v7581_v33, 2  ;;  %v7458_v60 = vunpack.c.l.b16 %v7450_v49  ;;  %vm16659_vm13 = vmand %vm17918_vm0, %vm7465_vm5  ;;  %vm17925_vm5 = vcmask 1043459  }
 0x6b5   : > { %v7547_v28 = vpack.i.bf16 %v7546_v14, %v7546_v14  ;;  %v7559_v36 = vmax.f32 %v7557_v19, %v7558_v37  ;;  %v7626_v32 = vcombine.high %v7625_v17, %v7625_v17  ;;  %v7633_v43 = vrot.slane %v7625_v17, %v17780_v18 }
 0x6b6   : > { %v7572_v56 = vmax.f32 %v7570_v38, %v7571_v22  ;;  %v7583_v11 = vmax.f32 %v7581_v33, %v7582_v40  ;;  %v7461_v23 = vsel %vm4250_vm12, %v7458_v60, %v7460_v25  ;;  %vm17931_vm0 = vsmask.f32 7424 }
 0x6b7   : > { %v7560_v2 = vpack.i.bf16 %v7559_v36, %v7559_v36  ;;  %v16646_v45 = vunpack.c.l.b16 %v7547_v28  ;;  %v7640_v9 = vrot.slane %v7626_v32, %v17780_v18  ;;  %v7641_v15 = vcombine.high %v7633_v43, %v7633_v43 }
 0x6b8   : > { %v7573_v26 = vpack.i.bf16 %v7572_v56, %v7572_v56  ;;  %v7584_v0 = vrot.slane %v7583_v11, 1  ;;  %v7644_v58 = vsel %vm17914_vm6, %v7633_v43, 4286644096  ;;  %v7462_v50 = vpack.c.b16 %v7461_v23, %v7461_v23  ;;  %vm17926_vm6 = vmmov %vm17925_vm5 }
 0x6b9   : > { %v16650_v20 = vunpack.c.l.b16 %v7560_v2  ;;  %v7642_v12 = vcombine.high %v7640_v9, %v7640_v9  ;;  %v7646_v8 = vunpack.i.l.bf16 %v7644_v58  ;;  %v7647_v42 = vunpack.i.h.bf16 %v7644_v58  ;;  %v7718_v7 = vld [vmem:[#allocation6 + $0x20] sm:$0x78]  ;;  %v7717_v44 = vld [vmem:[#allocation6 + $0x20] sm:$0x3] }
 0x6ba   : > { %v7585_v16 = vmax.f32 %v7583_v11, %v7584_v0  ;;  %v16652_v46 = vunpack.c.l.b16 %v7573_v26  ;;  %v7657_v62 = vsel %vm17915_vm7, %v7640_v9, 4286644096  ;;  %v7670_v3 = vsel %vm17916_vm3, %v7641_v15, 4286644096  ;;  %vm17927_vm7 = vmmov %vm17912_vm1 }
 0x6bb   : > { %v7648_v57 = vmax.f32 %v7646_v8, %v7647_v42  ;;  %v7659_v48 = vunpack.i.l.bf16 %v7657_v62  ;;  %v7660_v54 = vunpack.i.h.bf16 %v7657_v62  ;;  %v7672_v6 = vunpack.i.l.bf16 %v7670_v3  ;;  %vm17928_vm3 = vmmov %vm17925_vm5 }
 0x6bc   : > { %v7586_v52 = vpack.i.bf16 %v7585_v16, %v7585_v16  ;;  %v7673_v35 = vunpack.i.h.bf16 %v7670_v3  ;;  %v7683_v29 = vsel %vm17917_vm10, %v7642_v12, 4286644096  ;;  %v7720_v31 = vrot.slane %v7718_v7, 5 }
 0x6bd   : > { %v7649_v10 = vrot.slane %v7648_v57, 4  ;;  %v7661_v59 = vmax.f32 %v7659_v48, %v7660_v54  ;;  %v7685_v41 = vunpack.i.l.bf16 %v7683_v29  ;;  %v7686_v39 = vunpack.i.h.bf16 %v7683_v29 }
 0x6be   : > { %v7674_v4 = vmax.f32 %v7672_v6, %v7673_v35  ;;  %v7722_v13 = vmax.bf16 %v7720_v31, %v7716_v34  ;;  %v7723_v51 = vmax.bf16 %v7720_v31, %v7717_v44  ;;  %v7464_v53 = vsel %vm15841_vm11, 0, %v7462_v50 }
 0x6bf   : > { %v7650_v55 = vmax.f32 %v7648_v57, %v7649_v10  ;;  %v7662_v30 = vrot.slane %v7661_v59, 4  ;;  %v7687_v61 = vmax.f32 %v7685_v41, %v7686_v39  ;;  %v7467_v5 = vsel %vm16659_vm13, %v7464_v53, 0 }
 0x6c0   : > { %v7675_v19 = vrot.slane %v7674_v4, 4  ;;  %v7726_v1 = vcombine.high %v7722_v13, %v7722_v13  ;;  %v7757_v24 = vrot.slane %v7723_v51, %v17780_v18  ;;  %v11800_v38 = vcombine.low %v7467_v5, %v7467_v5 }
 0x6c1   : > { %v7651_v33 = vrot.slane %v7650_v55, 2  ;;  %v7663_v49 = vmax.f32 %v7661_v59, %v7662_v30  ;;  %v7688_v14 = vrot.slane %v7687_v61, 4  ;;  %v16668_v37 = vunpack.c.l.b16 %v7586_v52 }
 0x6c2   : > { %v7676_v17 = vmax.f32 %v7674_v4, %v7675_v19  ;;  %v7733_v25 = vrot.slane %v7726_v1, %v17780_v18  ;;  %v7758_v22 = vcombine.high %v7757_v24, %v7757_v24  ;;  %v7765_v40 = vrot.slane %v7757_v24, %v17780_v18 }
 0x6c3   : > { %v7652_v60 = vmax.f32 %v7650_v55, %v7651_v33  ;;  %v7664_v28 = vrot.slane %v7663_v49, 2  ;;  %v7689_v36 = vmax.f32 %v7687_v61, %v7688_v14  ;;  %v7471_v32 = vrot.slane %v11800_v38, 5 }
 0x6c4   : > { %v7677_v43 = vrot.slane %v7676_v17, 2  ;;  %v7734_v56 = vcombine.high %v7733_v25, %v7733_v25  ;;  %v7741_v11 = vrot.slane %v7733_v25, %v17780_v18  ;;  %v7772_v23 = vrot.slane %v7758_v22, %v17780_v18 }
 0x6c5   : > { %v7653_v2 = vrot.slane %v7652_v60, 1  ;;  %v7665_v9 = vmax.f32 %v7663_v49, %v7664_v28  ;;  %v7690_v15 = vrot.slane %v7689_v36, 2  ;;  %v7800_v26 = vsel %vm17921_vm14, %v7765_v40, 4286644096  ;;  %7475 = vst [vmem:[#allocation3] sm:$0x8] %v7471_v32 }
 0x6c6   : > { %v7678_v0 = vmax.f32 %v7676_v17, %v7677_v43  ;;  %v7748_v58 = vrot.slane %v7734_v56, %v17780_v18  ;;  %v7749_v50 = vcombine.high %v7741_v11, %v7741_v11  ;;  %v7802_v12 = vunpack.i.l.bf16 %v7800_v26 }
 0x6c7   : > { %v7654_v8 = vmax.f32 %v7652_v60, %v7653_v2  ;;  %v7666_v42 = vrot.slane %v7665_v9, 1  ;;  %v7691_v7 = vmax.f32 %v7689_v36, %v7690_v15  ;;  %v7803_v16 = vunpack.i.h.bf16 %v7800_v26 }
 0x6c8   : > { %v7679_v62 = vrot.slane %v7678_v0, 1  ;;  %v7750_v3 = vcombine.high %v7748_v58, %v7748_v58  ;;  %v7774_v57 = vsel %vm17922_vm15, %v7749_v50, 4286644096  ;;  %v7813_v48 = vsel %vm17910_vm2, %v7772_v23, 4286644096 }
 0x6c9   : > { %v7655_v54 = vpack.i.bf16 %v7654_v8, %v7654_v8  ;;  %v7667_v6 = vmax.f32 %v7665_v9, %v7666_v42  ;;  %v7692_v52 = vrot.slane %v7691_v7, 1  ;;  %v7776_v35 = vunpack.i.l.bf16 %v7774_v57 }
 0x6ca   : > { %v7680_v29 = vmax.f32 %v7678_v0, %v7679_v62  ;;  %v7777_v31 = vunpack.i.h.bf16 %v7774_v57  ;;  %v7787_v10 = vsel %vm17923_vm8, %v7750_v3, 4286644096  ;;  %v7804_v59 = vmax.f32 %v7802_v12, %v7803_v16 }
 0x6cb   : > { %v7668_v41 = vpack.i.bf16 %v7667_v6, %v7667_v6  ;;  %v7693_v39 = vmax.f32 %v7691_v7, %v7692_v52  ;;  %v7699_v34 = vunpack.c.l.b16 %v7655_v54  ;;  %v7789_v44 = vunpack.i.l.bf16 %v7787_v10 }
 0x6cc   : > { %v7681_v4 = vpack.i.bf16 %v7680_v29, %v7680_v29  ;;  %v7778_v13 = vmax.f32 %v7776_v35, %v7777_v31  ;;  %v7790_v51 = vunpack.i.h.bf16 %v7787_v10  ;;  %v7805_v53 = vrot.slane %v7804_v59, 4 }
 0x6cd   : > { %v7694_v55 = vpack.i.bf16 %v7693_v39, %v7693_v39  ;;  %v7700_v30 = vunpack.c.l.b16 %v7668_v41  ;;  %v7815_v61 = vunpack.i.l.bf16 %v7813_v48  ;;  %v7816_v5 = vunpack.i.h.bf16 %v7813_v48 }
 0x6ce   : > { %v7701_v19 = vunpack.c.l.b16 %v7681_v4  ;;  %v7779_v1 = vrot.slane %v7778_v13, 4  ;;  %v7791_v24 = vmax.f32 %v7789_v44, %v7790_v51  ;;  %v7806_v38 = vmax.f32 %v7804_v59, %v7805_v53 }
 0x6cf   : > { %v7702_v33 = vunpack.c.l.b16 %v7694_v55  ;;  %v7703_v49 = vsel %vm17912_vm1, %v7700_v30, %v7699_v34  ;;  %v7817_v14 = vmax.f32 %v7815_v61, %v7816_v5  ;;  %v7472_v17 = vrot.slane %v7471_v32, 4  ;;  %vm17938_vm1 = vmmov %vm17923_vm8 }
 0x6d0   : > { %v7780_v25 = vmax.f32 %v7778_v13, %v7779_v1  ;;  %v7792_v22 = vrot.slane %v7791_v24, 4  ;;  %v7807_v40 = vrot.slane %v7806_v38, 2  ;;  %v7595_v60 = vsel %vm17924_vm4, %v16650_v20, %v16646_v45  ;;  %vm17939_vm4 = vmmov %vm17938_vm1 }
 0x6d1   : > { %v7818_v28 = vrot.slane %v7817_v14, 4  ;;  %7476 = vst [vmem:[#allocation3 + $0x4] sm:$0x3] %v7472_v17  ;;  %v7596_v36 = vsel %vm17925_vm5, %v16652_v46, %v7595_v60  ;;  %v7704_v43 = vsel %vm17926_vm6, %v7701_v19, %v7703_v49  ;;  %v8331_v49 = vld [vmem:[#allocation3] sm:$0x8]  ;;  %vm17930_vm10 = vcmask 1044480   ;;  %vm17940_vm5 = vmmov %vm17938_vm1 }
 0x6d2   : > { %v7781_v56 = vrot.slane %v7780_v25, 2  ;;  %v7793_v11 = vmax.f32 %v7791_v24, %v7792_v22  ;;  %v7808_v23 = vmax.f32 %v7806_v38, %v7807_v40  ;;  %v7597_v32 = vsel %vm4250_vm12, %v16668_v37, %v7596_v36  ;;  %v7841_v24 = vld [vmem:[#allocation3] sm:$0xf]  ;;  %vm17935_vm2 = vmmov %vm17930_vm10 }
 0x6d3   : > { %v7819_v2 = vmax.f32 %v7817_v14, %v7818_v28  ;;  %v7598_v9 = vpack.c.b16 %v7597_v32, %v7597_v32  ;;  %v7705_v15 = vsel %vm4250_vm12, %v7702_v33, %v7704_v43  ;;  %vm17933_vm14 = vcmask 1045504   ;;  %vm17941_vm6 = vmmov %vm17938_vm1 }
 0x6d4   : > { %v7782_v26 = vmax.f32 %v7780_v25, %v7781_v56  ;;  %v7794_v0 = vrot.slane %v7793_v11, 2  ;;  %v7809_v45 = vrot.slane %v7808_v23, 1  ;;  %v7706_v20 = vpack.c.b16 %v7705_v15, %v7705_v15  ;;  %v8169_v25 = vld [vmem:[#allocation3] sm:$0xe] }
 0x6d5   : > { %v7820_v58 = vrot.slane %v7819_v2, 2  ;;  %v7600_v46 = vsel %vm15841_vm11, 0, %v7598_v9  ;;  %vm17934_vm15 = vsmask.f32 5376 }
 0x6d6   : > { %v7783_v50 = vrot.slane %v7782_v26, 1  ;;  %v7795_v12 = vmax.f32 %v7793_v11, %v7794_v0  ;;  %v7601_v8 = vsel %vm16659_vm13, %v7600_v46, 0  ;;  %v7810_v42 = vmax.f32 %v7808_v23, %v7809_v45 }
 0x6d7   : > { %v7821_v7 = vmax.f32 %v7819_v2, %v7820_v58  ;;  %v11801_v37 = vcombine.low %v7601_v8, %v7601_v8  ;;  %v7708_v16 = vsel %vm15841_vm11, 0, %v7706_v20 }
 0x6d8   : > { %v7784_v62 = vmax.f32 %v7782_v26, %v7783_v50  ;;  %v7796_v3 = vrot.slane %v7795_v12, 1  ;;  %v7709_v57 = vsel %vm16659_vm13, %v7708_v16, 0  ;;  %v7811_v29 = vpack.i.bf16 %v7810_v42, %v7810_v42  ;;  %v13863_v50 = vld [vmem:[%s17716_s7] ss:$8 sps:$4 sm:$0xff]  }
 0x6d9   : > { %v7822_v48 = vrot.slane %v7821_v7, 1  ;;  %v7605_v54 = vrot.slane %v11801_v37, 6  ;;  %v11802_v6 = vcombine.low %v7709_v57, %v7709_v57  ;;  %v13870_v37 = vld [vmem:[%s17716_s7 + $0x14] ss:$8 sps:$4 sm:$0xff]  }
 0x6da   : > { %v7785_v52 = vpack.i.bf16 %v7784_v62, %v7784_v62  ;;  %v7797_v35 = vmax.f32 %v7795_v12, %v7796_v3  ;;  %v7831_v4 = vunpack.c.l.b16 %v7811_v29  ;;  %v13871_v29 = vld [vmem:[%s17716_s7 + $0x20] ss:$8 sps:$4 sm:$0xff]  }
 0x6db   : > { %v7823_v31 = vmax.f32 %v7821_v7, %v7822_v48  ;;  %v7606_v10 = vrot.slane %v7605_v54, 4  ;;  %7609 = vst [vmem:[#allocation3 + $0x4] sm:$0xc] %v7605_v54  ;;  %v7713_v59 = vrot.slane %v11802_v6, 7  ;;  %v13868_v54 = vld [vmem:[%s17716_s7 + $0x10] ss:$8 sps:$4 sm:$0xff]  }
 0x6dc   : > { %v7798_v41 = vpack.i.bf16 %v7797_v35, %v7797_v35  ;;  %v7829_v34 = vunpack.c.l.b16 %v7785_v52  ;;  %v13873_v6 = vld [vmem:[%s17716_s7 + $0x24] ss:$8 sps:$4 sm:$0xff]  }
 0x6dd   : > { %v7824_v39 = vpack.i.bf16 %v7823_v31, %v7823_v31  ;;  %7610 = vst [vmem:[#allocation3 + $0x8] sm:$0x1] %v7606_v10  ;;  %7715 = vst [vmem:[#allocation3 + $0x8] sm:$0xe] %v7713_v59  ;;  %v13876_v10 = vld [vmem:[%s17716_s7 + $0x34] ss:$8 sps:$4 sm:$0xff]  }
 0x6de   : > { %v7830_v44 = vunpack.c.l.b16 %v7798_v41  ;;  %v13874_v59 = vld [vmem:[%s17716_s7 + $0x30] ss:$8 sps:$4 sm:$0xff]   ;;  %v13879_v41 = vld [vmem:[%s17716_s7 + $0x44] ss:$8 sps:$4 sm:$0xff]  }
 0x6df   : > { %v7832_v13 = vunpack.c.l.b16 %v7824_v39  ;;  %v13877_v39 = vld [vmem:[%s17716_s7 + $0x40] ss:$8 sps:$4 sm:$0xff]  }
 0x6e0   : > { %v7833_v51 = vsel %vm17927_vm7, %v7830_v44, %v7829_v34  ;;  %v13882_v34 = vld [vmem:[%s17716_s7 + $0x54] ss:$8 sps:$4 sm:$0xff]   ;;  %v13880_v44 = vld [vmem:[%s17716_s7 + $0x50] ss:$8 sps:$4 sm:$0xff]   ;;  %vm17942_vm7 = vmmov %vm17938_vm1 }
 0x6e1   : > { %v7834_v53 = vsel %vm17928_vm3, %v7831_v4, %v7833_v51  ;;  %v13885_v4 = vld [vmem:[%s17716_s7 + $0x64] ss:$8 sps:$4 sm:$0xff]   ;;  %v13888_v51 = vld [vmem:[%s17716_s7 + $0x74] ss:$8 sps:$4 sm:$0xff]   ;;  %vm17943_vm3 = vmmov %vm17938_vm1 }
 0x6e2   : > { %v7835_v55 = vsel %vm4250_vm12, %v7832_v13, %v7834_v53  ;;  %v16700_v61 = vld [vmem:[#allocation3 + $0x4] sm:$0xf]  ;;  %vm17929_vm12 = vcmask 1046528   ;;  %v13883_v13 = vld [vmem:[%s17716_s7 + $0x60] ss:$8 sps:$4 sm:$0xff]  }
 0x6e3   : > { %v7836_v30 = vpack.c.b16 %v7835_v55, %v7835_v55  ;;  %v16709_v38 = vcombine.low %v7841_v24, %v16700_v61  ;;  %v11855_v14 = vcombine.low %v8331_v49, %v16700_v61  ;;  %v11838_v22 = vcombine.low %v8169_v25, %v16700_v61  ;;  %v13886_v53 = vld [vmem:[%s17716_s7 + $0x70] ss:$8 sps:$4 sm:$0xff]   ;;  %v13891_v55 = vld [vmem:[%s17716_s7 + $0x104] ss:$8 sps:$4 sm:$0xff]   ;;  %v13896_v49 = vld [vmem:[%s17716_s7 + $0x120] ss:$8 sps:$4 sm:$0xff]  }
 0x6e4   : > { %v16702_v5 = vld [vmem:[#allocation3 + $0x8] sm:$0xf]  ;;  %v13898_v24 = vld [vmem:[%s17716_s7 + $0x124] ss:$8 sps:$4 sm:$0xff]  }
 0x6e5   : > { %v7838_v19 = vsel %vm15841_vm11, 0, %v7836_v30  ;;  %v11890_v33 = vcombine.low %v16700_v61, %v16702_v5  ;;  %v7890_v17 = vshll.u32 %v16709_v38, 16  ;;  %v8518_v40 = vshrl.u32 %v11855_v14, 16  ;;  %v13889_v30 = vld [vmem:[%s17716_s7 + $0x100] ss:$8 sps:$4 sm:$0xff]  }
 0x6e6   : > { %v7839_v1 = vsel %vm16659_vm13, %v7838_v19, 0  ;;  %v8521_v60 = vshll.u32 %v11855_v14, 16  ;;  %v7888_v32 = vshrl.u32 %v16709_v38, 16  ;;  %v8189_v2 = vrot.slane %v11838_v22, 1  ;;  %v13894_v19 = vld [vmem:[%s17716_s7 + $0x114] ss:$8 sps:$4 sm:$0xff]  }
 0x6e7   : > { %7840 = vst [vmem:[#allocation3 + $0xc] sm:$0x7] %v7839_v1  ;;  %v7892_v56 = vrot.slane %v7890_v17, 1  ;;  %v8355_v26 = vrot.slane %v11855_v14, 3  ;;  %v8520_v45 = vrot.slane %v8518_v40, 3 }
 0x6e8   : > { %v8523_v20 = vrot.slane %v8521_v60, 4  ;;  %vm17932_vm13 = vsmask.f32 4352  ;;  %v13892_v1 = vld [vmem:[%s17716_s7 + $0x110] ss:$8 sps:$4 sm:$0xff]  }
 0x6e9   : > { %v7893_v12 = vor.u32 %v7892_v56, %v7888_v32  ;;  %v13901_v14 = vld [vmem:[%s17716_s7 + $0x134] ss:$8 sps:$4 sm:$0xff]   ;;  %v13899_v17 = vld [vmem:[%s17716_s7 + $0x130] ss:$8 sps:$4 sm:$0xff]   ;;  %v13904_v25 = vld [vmem:[%s17716_s7 + $0x144] ss:$8 sps:$4 sm:$0xff]  }
 0x6ea   : > { %v8524_v57 = vor.u32 %v8523_v20, %v8520_v45  ;;  %v13902_v22 = vld [vmem:[%s17716_s7 + $0x140] ss:$8 sps:$4 sm:$0xff]   ;;  %v13907_v40 = vld [vmem:[%s17716_s7 + $0x154] ss:$8 sps:$4 sm:$0xff]   ;;  %v13905_v60 = vld [vmem:[%s17716_s7 + $0x150] ss:$8 sps:$4 sm:$0xff]  }
 0x6eb   : > { %v13913_v56 = vld [vmem:[%s17716_s7 + $0x174] ss:$8 sps:$4 sm:$0xff]   ;;  %v13915_v32 = vld [vmem:[%s17716_s7 + $0x180] ss:$8 sps:$4 sm:$0xff]  }
 0x6ec   : > { %v13921_v45 = vld [vmem:[%s17716_s7 + $0x1a0] ss:$8 sps:$4 sm:$0xff]   ;;  %v13926_v20 = vld [vmem:[%s17716_s7 + $0x1b4] ss:$8 sps:$4 sm:$0xff]  }
 0x6ee   : > { %v7860_v63 = vld [vmem:[#allocation3 + $0xc] sm:$0x1] }
 0x6ef   : > { %v8332_v28 = vld [vmem:[#allocation3 + $0xc] sm:$0x7]  ;;  %v16719_v43 = vcombine.low %v16702_v5, %v7860_v63 }
 0x6f0   : > { %v16716_v36 = vld [vmem:[#allocation3 + $0xc] sm:$0xf]  ;;  %v11856_v11 = vcombine.low %v16702_v5, %v8332_v28  ;;  %v13908_v28 = vld [vmem:[%s17716_s7 + $0x160] ss:$8 sps:$4 sm:$0xff]  }
 0x6f1   : > { %v11873_v23 = vcombine.low %v16702_v5, %v16716_v36  ;;  %v7895_v9 = vshll.u32 %v16719_v43, 16  ;;  %v8190_v15 = vrot.slane %v16719_v43, 1  ;;  %v7899_v35 = vshrl.u32 %v16719_v43, 16  ;;  %v13910_v63 = vld [vmem:[%s17716_s7 + $0x164] ss:$8 sps:$4 sm:$0xff]  }
 0x6f2   : > { %v16727_v0 = vrot.slane %v11856_v11, 3  ;;  %v13911_v11 = vld [vmem:[%s17716_s7 + $0x170] ss:$8 sps:$4 sm:$0xff]   ;;  %v13932_v43 = vld [vmem:[%s17716_s7 + $0x1d4] ss:$8 sps:$4 sm:$0xff]   ;;  %v11891_v61 = vcombine.low %v16716_v36, %v16716_v36 }
 0x6f3   : > { %v8526_v58 = vshrl.u32 %v11873_v23, 16  ;;  %v8529_v46 = vshll.u32 %v11873_v23, 16  ;;  %v7897_v8 = vrot.slane %v7895_v9, 1  ;;  %v16735_v42 = vsel %vm17929_vm12, %v8189_v2, %v8190_v15  ;;  %v13917_v23 = vld [vmem:[%s17716_s7 + $0x184] ss:$8 sps:$4 sm:$0xff]  }
 0x6f4   : > { %v16739_v7 = vsel %vm17930_vm10, %v8355_v26, %v16727_v0  ;;  %v13920_v2 = vld [vmem:[%s17716_s7 + $0x194] ss:$8 sps:$4 sm:$0xff]   ;;  %v13918_v9 = vld [vmem:[%s17716_s7 + $0x190] ss:$8 sps:$4 sm:$0xff]   ;;  %v13923_v26 = vld [vmem:[%s17716_s7 + $0x1a4] ss:$8 sps:$4 sm:$0xff]  }
 0x6f5   : > { %v8528_v16 = vrot.slane %v8526_v58, 3  ;;  %v8531_v62 = vrot.slane %v8529_v46, 4  ;;  %v7898_v3 = vsel %vm17931_vm0, %v7893_v12, %v7897_v8  ;;  %v7901_v31 = vor.u32 %v7899_v35, %v7897_v8  ;;  %v13924_v58 = vld [vmem:[%s17716_s7 + $0x1b0] ss:$8 sps:$4 sm:$0xff]   ;;  %v13929_v46 = vld [vmem:[%s17716_s7 + $0x1c4] ss:$8 sps:$4 sm:$0xff]  }
 0x6f6   : > { %8017 = vmatmul.mubr.bf16.vlgmr.msra.gmra.mrb[28].mxu1 %v7898_v3  ;;  %v13935_v12 = vld [vmem:[%s17716_s7 + $0x1e4] ss:$8 sps:$4 sm:$0xff]   ;;  %v13933_v8 = vld [vmem:[%s17716_s7 + $0x1e0] ss:$8 sps:$4 sm:$0xff]   ;;  %v13946_v3 = vld [vmem:[%s17716_s7 + $0x214] ss:$8 sps:$4 sm:$0xff]  }
 0x6f7   : > { %v16745_v48 = vor.u32 %v8531_v62, %v8528_v16  ;;  %8119 = vmatpush1.bf16.msra.mxu1 %v13863_v50  ;;  %8026 = vmatprep.mubr.bf16.mxu1 %v17901_v21  ;;  %v13927_v50 = vld [vmem:[%s17716_s7 + $0x1c0] ss:$8 sps:$4 sm:$0xff]   ;;  %v13943_v16 = vld [vmem:[%s17716_s7 + $0x204] ss:$8 sps:$4 sm:$0xff]   ;;  %v13950_v35 = vld [vmem:[%s17716_s7 + $0x230] ss:$8 sps:$4 sm:$0xff]  }
 0x6f8   : > { %8120 = vmatprep.subr.bf16.mxu1 %v13870_v37  ;;  %v13936_v37 = vld [vmem:[%s17716_s7 + $0x1f0] ss:$8 sps:$4 sm:$0xff]   ;;  %v13941_v62 = vld [vmem:[%s17716_s7 + $0x200] ss:$8 sps:$4 sm:$0xff]   ;;  %vm17944_vm12 = vcmask 1042434  }
 0x6f9   : > { %v16756_v52 = vsel %vm17932_vm13, %v8524_v57, %v16745_v48  ;;  %v13944_v57 = vld [vmem:[%s17716_s7 + $0x210] ss:$8 sps:$4 sm:$0xff]   ;;  %v14004_v36 = vld [vmem:[%s17716_s7 + $0x340] ss:$8 sps:$4 sm:$0xff]   ;;  %vm9554_vm10 = vsmask.f32 1280  ;;  %vm17945_vm0 = vmmov %vm17944_vm12 }
 0x6fa   : > { %vm17946_vm13 = vcmask 1041408  }
 0x6fb   : > { %8121 = vmatpush1.bf16.msra.mxu1 %v13868_v54  ;;  %v13949_v54 = vld [vmem:[%s17716_s7 + $0x224] ss:$8 sps:$4 sm:$0xff]  }
 0x6fc   : > { %8122 = vmatprep.subr.bf16.mxu1 %v13873_v6  ;;  %v13947_v6 = vld [vmem:[%s17716_s7 + $0x220] ss:$8 sps:$4 sm:$0xff]  }
 0x6fe   : > { %8027 = vmatmul.mubr.bf16.gmra.mrb[32].mxu1 %v7901_v31  ;;  %v13953_v31 = vld [vmem:[%s17716_s7 + $0x240] ss:$8 sps:$4 sm:$0xff]  }
 0x6ff   : > { %8123 = vmatpush1.bf16.msra.mxu1 %v13871_v29  ;;  %8150 = vmatprep.mubr.bf16.mxu1 %v17901_v21  ;;  %v13955_v29 = vld [vmem:[%s17716_s7 + $0x244] ss:$8 sps:$4 sm:$0xff]  }
 0x700   : > { %8124 = vmatprep.subr.bf16.mxu1 %v13876_v10  ;;  %v13956_v10 = vld [vmem:[%s17716_s7 + $0x250] ss:$8 sps:$4 sm:$0xff]  }
 0x703   : > { %8125 = vmatpush1.bf16.msra.mxu1 %v13874_v59  ;;  %v13961_v59 = vld [vmem:[%s17716_s7 + $0x264] ss:$8 sps:$4 sm:$0xff]  }
 0x704   : > { %8126 = vmatprep.subr.bf16.mxu1 %v13879_v41  ;;  %v13959_v41 = vld [vmem:[%s17716_s7 + $0x260] ss:$8 sps:$4 sm:$0xff]  }
 0x707   : > { %8127 = vmatpush1.bf16.msra.mxu1 %v13877_v39  ;;  %v13964_v39 = vld [vmem:[%s17716_s7 + $0x274] ss:$8 sps:$4 sm:$0xff]  }
 0x708   : > { %8128 = vmatprep.subr.bf16.mxu1 %v13882_v34  ;;  %v13962_v34 = vld [vmem:[%s17716_s7 + $0x270] ss:$8 sps:$4 sm:$0xff]  }
 0x70b   : > { %8129 = vmatpush1.bf16.msra.mxu1 %v13880_v44  ;;  %v13968_v44 = vld [vmem:[%s17716_s7 + $0x284] ss:$8 sps:$4 sm:$0xff]  }
 0x70c   : > { %8130 = vmatprep.subr.bf16.mxu1 %v13885_v4  ;;  %v13966_v4 = vld [vmem:[%s17716_s7 + $0x280] ss:$8 sps:$4 sm:$0xff]  }
 0x70f   : > { %8131 = vmatpush1.bf16.msra.mxu1 %v13883_v13  ;;  %v13971_v13 = vld [vmem:[%s17716_s7 + $0x294] ss:$8 sps:$4 sm:$0xff]  }
 0x710   : > { %8132 = vmatprep.subr.bf16.mxu1 %v13888_v51  ;;  %v13969_v51 = vld [vmem:[%s17716_s7 + $0x290] ss:$8 sps:$4 sm:$0xff]  }
 0x713   : > { %8133 = vmatpush1.bf16.msra.mxu1 %v13886_v53  ;;  %v13974_v53 = vld [vmem:[%s17716_s7 + $0x2a4] ss:$8 sps:$4 sm:$0xff]  }
 0x714   : > { %8274 = vmatprep.subr.bf16.mxu1 %v13891_v55  ;;  %v13972_v55 = vld [vmem:[%s17716_s7 + $0x2a0] ss:$8 sps:$4 sm:$0xff]  }
 0x716   : > { %8151 = vmatmul.mubr.bf16.vlgmr.msra.gmra.mrb[28].mxu1 %v16709_v38  ;;  %v11821_v38 = vcombine.low %v16702_v5, %v16702_v5  ;;  %v14003_v5 = vld [vmem:[%s17716_s7 + $0x334] ss:$8 sps:$4 sm:$0xff]  }
 0x717   : > { %8275 = vmatpush1.bf16.msra.mxu1 %v13889_v30  ;;  %8160 = vmatprep.mubr.bf16.mxu1 %v17901_v21  ;;  %v13975_v30 = vld [vmem:[%s17716_s7 + $0x2b0] ss:$8 sps:$4 sm:$0xff]  }
 0x718   : > { %8276 = vmatprep.subr.bf16.mxu1 %v13894_v19  ;;  %v13980_v19 = vld [vmem:[%s17716_s7 + $0x2c4] ss:$8 sps:$4 sm:$0xff]  }
 0x71b   : > { %8277 = vmatpush1.bf16.msra.mxu1 %v13892_v1  ;;  %v13978_v1 = vld [vmem:[%s17716_s7 + $0x2c0] ss:$8 sps:$4 sm:$0xff]  }
 0x71c   : > { %8278 = vmatprep.subr.bf16.mxu1 %v13898_v24  ;;  %v13981_v24 = vld [vmem:[%s17716_s7 + $0x2d0] ss:$8 sps:$4 sm:$0xff]  }
 0x71e   : > { %8161 = vmatmul.mubr.bf16.gmra.mrb[32].mxu1 %v11821_v38  ;;  %v13984_v38 = vld [vmem:[%s17716_s7 + $0x2e0] ss:$8 sps:$4 sm:$0xff]  }
 0x71f   : > { %8279 = vmatpush1.bf16.msra.mxu1 %v13896_v49  ;;  %8306 = vmatprep.mubr.bf16.mxu1 %v17901_v21  ;;  %v13986_v49 = vld [vmem:[%s17716_s7 + $0x2e4] ss:$8 sps:$4 sm:$0xff]  }
 0x720   : > { %8280 = vmatprep.subr.bf16.mxu1 %v13901_v14  ;;  %v13989_v14 = vld [vmem:[%s17716_s7 + $0x2f4] ss:$8 sps:$4 sm:$0xff]  }
 0x723   : > { %8281 = vmatpush1.bf16.msra.mxu1 %v13899_v17  ;;  %v13987_v17 = vld [vmem:[%s17716_s7 + $0x2f0] ss:$8 sps:$4 sm:$0xff]  }
 0x724   : > { %8282 = vmatprep.subr.bf16.mxu1 %v13904_v25  ;;  %v13993_v25 = vld [vmem:[%s17716_s7 + $0x304] ss:$8 sps:$4 sm:$0xff]  }
 0x727   : > { %8283 = vmatpush1.bf16.msra.mxu1 %v13902_v22  ;;  %v13991_v22 = vld [vmem:[%s17716_s7 + $0x300] ss:$8 sps:$4 sm:$0xff]  }
 0x728   : > { %8284 = vmatprep.subr.bf16.mxu1 %v13907_v40  ;;  %v13996_v40 = vld [vmem:[%s17716_s7 + $0x314] ss:$8 sps:$4 sm:$0xff]  }
 0x72b   : > { %8285 = vmatpush1.bf16.msra.mxu1 %v13905_v60  ;;  %v13994_v60 = vld [vmem:[%s17716_s7 + $0x310] ss:$8 sps:$4 sm:$0xff]  }
 0x72c   : > { %8286 = vmatprep.subr.bf16.mxu1 %v13910_v63  ;;  %v14000_v63 = vld [vmem:[%s17716_s7 + $0x324] ss:$8 sps:$4 sm:$0xff]  }
 0x72f   : > { %8287 = vmatpush1.bf16.msra.mxu1 %v13908_v28  ;;  %v13998_v28 = vld [vmem:[%s17716_s7 + $0x320] ss:$8 sps:$4 sm:$0xff]  }
 0x730   : > { %8288 = vmatprep.subr.bf16.mxu1 %v13913_v56  ;;  %v14006_v56 = vld [vmem:[%s17716_s7 + $0x344] ss:$8 sps:$4 sm:$0xff]  }
 0x733   : > { %8289 = vmatpush1.bf16.msra.mxu1 %v13911_v11  ;;  %v14009_v11 = vld [vmem:[%s17716_s7 + $0x354] ss:$8 sps:$4 sm:$0xff]  }
 0x734   : > { %8440 = vmatprep.subr.bf16.mxu1 %v13917_v23  ;;  %v14007_v23 = vld [vmem:[%s17716_s7 + $0x350] ss:$8 sps:$4 sm:$0xff]  }
 0x736   : > { %8307 = vmatmul.mubr.bf16.vlgmr.msra.gmra.mrb[28].mxu1 %v16735_v42  ;;  %v13938_v42 = vld [vmem:[%s17716_s7 + $0x1f4] ss:$8 sps:$4 sm:$0xff]  }
 0x737   : > { %8441 = vmatpush1.bf16.msra.mxu1 %v13915_v32  ;;  %8316 = vmatprep.mubr.bf16.mxu1 %v17901_v21  ;;  %v14012_v32 = vld [vmem:[%s17716_s7 + $0x364] ss:$8 sps:$4 sm:$0xff]  }
 0x738   : > { %8442 = vmatprep.subr.bf16.mxu1 %v13920_v2  ;;  %v8832_v2 = vld [vmem:[#allocation3 + $0xc] sm:$0xf] }
 0x73b   : > { %8443 = vmatpush1.bf16.msra.mxu1 %v13918_v9  ;;  %v8833_v9 = vld [vmem:[#allocation3 + $0x10] sm:$0x3] }
 0x73c   : > { %8444 = vmatprep.subr.bf16.mxu1 %v13923_v26  ;;  %v14010_v26 = vld [vmem:[%s17716_s7 + $0x360] ss:$8 sps:$4 sm:$0xff]  }
 0x73e   : > { %8317 = vmatmul.mubr.bf16.gmra.mrb[32].mxu1 %v8190_v15  ;;  %v13930_v15 = vld [vmem:[%s17716_s7 + $0x1d0] ss:$8 sps:$4 sm:$0xff]  }
 0x73f   : > { %8445 = vmatpush1.bf16.msra.mxu1 %v13921_v45  ;;  %8472 = vmatprep.mubr.bf16.mxu1 %v17901_v21  ;;  %v14015_v45 = vld [vmem:[%s17716_s7 + $0x374] ss:$8 sps:$4 sm:$0xff]  }
 0x740   : > { %8446 = vmatprep.subr.bf16.mxu1 %v13926_v20  ;;  %v17055_v20 = vld [vmem:[#allocation3 + $0x8] sm:$0xf] }
 0x743   : > { %8447 = vmatpush1.bf16.msra.mxu1 %v13924_v58  ;;  %v11909_v58 = vcombine.low %v8832_v2, %v8833_v9 }
 0x744   : > { %8448 = vmatprep.subr.bf16.mxu1 %v13929_v46  ;;  %v8830_v46 = vld [vmem:[#allocation3 + $0x4] sm:$0xc] }
 0x747   : > { %8449 = vmatpush1.bf16.msra.mxu1 %v13927_v50  ;;  %v14013_v50 = vld [vmem:[%s17716_s7 + $0x370] ss:$8 sps:$4 sm:$0xff]  }
 0x748   : > { %8450 = vmatprep.subr.bf16.mxu1 %v13932_v43  ;;  %v11908_v43 = vcombine.low %v8830_v46, %v17055_v20  ;;  %v14077_v46 = vld [vmem:[%s17719_s10] sm:$0xff]  }
 0x74b   : > { %8451 = vmatpush1.bf16.msra.mxu1 %v13930_v15  ;;  %v14021_v15 = vld [vmem:[%s17716_s7 + $0x384] ss:$8 sps:$4 sm:$0xff]  }
 0x74c   : > { %8452 = vmatprep.subr.bf16.mxu1 %v13935_v12  ;;  %v8861_v12 = vrot.slane %v11909_v58, 2  ;;  %v14076_v58 = vld [vmem:[%s17719_s10 + $0x40] sm:$0xff]  }
 0x74f   : > { %8453 = vmatpush1.bf16.msra.mxu1 %v13933_v8  ;;  %v8860_v8 = vrot.slane %v11908_v43, 2 }
 0x750   : > { %8454 = vmatprep.subr.bf16.mxu1 %v13938_v42  ;;  %v14019_v42 = vld [vmem:[%s17716_s7 + $0x380] ss:$8 sps:$4 sm:$0xff]  }
 0x753   : > { %8455 = vmatpush1.bf16.msra.mxu1 %v13936_v37  ;;  %v14024_v37 = vld [vmem:[%s17716_s7 + $0x394] ss:$8 sps:$4 sm:$0xff]  }
 0x754   : > { %8616 = vmatprep.subr.bf16.mxu1 %v13943_v16  ;;  %v8862_v16 = vsel %vm17933_vm14, %v8860_v8, %v8861_v12  ;;  %v14073_v8 = vld [vmem:[%s17719_s10 + $0x90] sm:$0xff]   ;;  %vm9555_vm14 = vmand %vm17946_vm13, %vm9554_vm10 }
 0x756   : > { %8473 = vmatmul.mubr.bf16.vlgmr.msra.gmra.mrb[28].mxu1 %v16739_v7  ;;  %v13952_v7 = vld [vmem:[%s17716_s7 + $0x234] ss:$8 sps:$4 sm:$0xff]  }
 0x757   : > { %8617 = vmatpush1.bf16.msra.mxu1 %v13941_v62  ;;  %8482 = vmatprep.mubr.bf16.mxu1 %v17901_v21  ;;  %v14022_v62 = vld [vmem:[%s17716_s7 + $0x390] ss:$8 sps:$4 sm:$0xff]  }
 0x758   : > { %8618 = vmatprep.subr.bf16.mxu1 %v13946_v3  ;;  %v14027_v3 = vld [vmem:[%s17716_s7 + $0x3a4] ss:$8 sps:$4 sm:$0xff]  }
 0x75b   : > { %8619 = vmatpush1.bf16.msra.mxu1 %v13944_v57  ;;  %v14025_v57 = vld [vmem:[%s17716_s7 + $0x3a0] ss:$8 sps:$4 sm:$0xff]  }
 0x75c   : > { %8620 = vmatprep.subr.bf16.mxu1 %v13949_v54  ;;  %v14030_v54 = vld [vmem:[%s17716_s7 + $0x3b4] ss:$8 sps:$4 sm:$0xff]  }
 0x75e   : > { %8483 = vmatmul.mubr.bf16.gmra.mrb[32].mxu1 %v16727_v0  ;;  %v13958_v0 = vld [vmem:[%s17716_s7 + $0x254] ss:$8 sps:$4 sm:$0xff]  }
 0x75f   : > { %8621 = vmatpush1.bf16.msra.mxu1 %v13947_v6  ;;  %8648 = vmatprep.mubr.bf16.mxu1 %v17901_v21  ;;  %v14028_v6 = vld [vmem:[%s17716_s7 + $0x3b0] ss:$8 sps:$4 sm:$0xff]  }
 0x760   : > { %8622 = vmatprep.subr.bf16.mxu1 %v13952_v7  ;;  %v14033_v7 = vld [vmem:[%s17716_s7 + $0x3c4] ss:$8 sps:$4 sm:$0xff]  }
 0x763   : > { %8623 = vmatpush1.bf16.msra.mxu1 %v13950_v35  ;;  %v9002_v35 = vld [vmem:[#allocation3 + $0x10] sm:$0x7] }
 0x764   : > { %8624 = vmatprep.subr.bf16.mxu1 %v13955_v29  ;;  %v14031_v29 = vld [vmem:[%s17716_s7 + $0x3c0] ss:$8 sps:$4 sm:$0xff]  }
 0x767   : > { %8625 = vmatpush1.bf16.msra.mxu1 %v13953_v31  ;;  %v14036_v31 = vld [vmem:[%s17716_s7 + $0x3d4] ss:$8 sps:$4 sm:$0xff]  }
 0x768   : > { %8626 = vmatprep.subr.bf16.mxu1 %v13958_v0  ;;  %v17097_v0 = vcombine.low %v8832_v2, %v9002_v35  ;;  %v14089_v35 = vld [vmem:[%s17719_s10 + $0x20] sm:$0xff]  }
 0x76b   : > { %8627 = vmatpush1.bf16.msra.mxu1 %v13956_v10  ;;  %v14034_v10 = vld [vmem:[%s17716_s7 + $0x3d0] ss:$8 sps:$4 sm:$0xff]  }
 0x76c   : > { %8628 = vmatprep.subr.bf16.mxu1 %v13961_v59  ;;  %v14039_v59 = vld [vmem:[%s17716_s7 + $0x3e4] ss:$8 sps:$4 sm:$0xff]  }
 0x76f   : > { %8629 = vmatpush1.bf16.msra.mxu1 %v13959_v41  ;;  %v9031_v41 = vshrl.u32 %v17097_v0, 16 }
 0x770   : > { %8630 = vmatprep.subr.bf16.mxu1 %v13964_v39  ;;  %v9034_v39 = vshll.u32 %v17097_v0, 16 }
 0x773   : > { %8631 = vmatpush1.bf16.msra.mxu1 %v13962_v34  ;;  %v14037_v34 = vld [vmem:[%s17716_s7 + $0x3e0] ss:$8 sps:$4 sm:$0xff]  }
 0x774   : > { %8773 = vmatprep.subr.bf16.mxu1 %v13968_v44  ;;  %v9023_v44 = vshrl.u32 %v11908_v43, 16 }
 0x776   : > { %8649 = vmatmul.mubr.bf16.vlgmr.msra.gmra.mrb[28].mxu1 %v16756_v52  ;;  %v13977_v52 = vld [vmem:[%s17716_s7 + $0x2b4] ss:$8 sps:$4 sm:$0xff]  }
 0x777   : > { %8774 = vmatpush1.bf16.msra.mxu1 %v13966_v4  ;;  %8658 = vmatprep.mubr.bf16.mxu1 %v17901_v21  ;;  %v9026_v4 = vshll.u32 %v11908_v43, 16  ;;  %v14072_v43 = vld [vmem:[%s17719_s10 + $0xd0] sm:$0xff]  }
 0x778   : > { %8775 = vmatprep.subr.bf16.mxu1 %v13971_v13  ;;  %v14042_v13 = vld [vmem:[%s17716_s7 + $0x3f4] ss:$8 sps:$4 sm:$0xff]  }
 0x77b   : > { %8776 = vmatpush1.bf16.msra.mxu1 %v13969_v51  ;;  %v9033_v51 = vrot.slane %v9031_v41, 2  ;;  %v14095_v41 = vld [vmem:[%s17719_s10 + $0xb0] sm:$0xff]  }
 0x77c   : > { %8777 = vmatprep.subr.bf16.mxu1 %v13974_v53  ;;  %v9036_v53 = vrot.slane %v9034_v39, 3  ;;  %v14094_v39 = vld [vmem:[%s17719_s10 + $0x30] sm:$0xff]  }
 0x77e   : > { %8659 = vmatmul.mubr.bf16.gmra.mrb[32].mxu1 %v16745_v48  ;;  %v13983_v48 = vld [vmem:[%s17716_s7 + $0x2d4] ss:$8 sps:$4 sm:$0xff]  }
 0x77f   : > { %8778 = vmatpush1.bf16.msra.mxu1 %v13972_v55  ;;  %8805 = vmatprep.mubr.bf16.mxu1 %v17901_v21  ;;  %v14040_v55 = vld [vmem:[%s17716_s7 + $0x3f0] ss:$8 sps:$4 sm:$0xff]  }
 0x780   : > { %8779 = vmatprep.subr.bf16.mxu1 %v13977_v52  ;;  %v9025_v52 = vrot.slane %v9023_v44, 2  ;;  %v14097_v44 = vld [vmem:[%s17719_s10 + $0x38] sm:$0xff]  }
 0x783   : > { %8780 = vmatpush1.bf16.msra.mxu1 %v13975_v30  ;;  %v9028_v30 = vrot.slane %v9026_v4, 3  ;;  %v14100_v4 = vld [vmem:[%s17719_s10 + $0x1c0] sm:$0xff]  }
 0x784   : > { %8781 = vmatprep.subr.bf16.mxu1 %v13980_v19  ;;  %v14045_v19 = vld [vmem:[%s17716_s7 + $0x404] ss:$8 sps:$4 sm:$0xff]  }
 0x787   : > { %8782 = vmatpush1.bf16.msra.mxu1 %v13978_v1  ;;  %v9037_v1 = vor.u32 %v9036_v53, %v9033_v51  ;;  %v14104_v51 = vld [vmem:[%s17719_s10 + $0xb8] sm:$0xff]   ;;  %v14112_v53 = vld [vmem:[%s17719_s10 + $0x140] sm:$0xff]  }
 0x788   : > { %8783 = vmatprep.subr.bf16.mxu1 %v13983_v48  ;;  %v9029_v48 = vor.u32 %v9028_v30, %v9025_v52  ;;  %v9340_v30 = vld [vmem:[%s17717_s8] sm:$0x3] }
 0x78b   : > { %8784 = vmatpush1.bf16.msra.mxu1 %v13981_v24  ;;  %v14043_v24 = vld [vmem:[%s17716_s7 + $0x400] ss:$8 sps:$4 sm:$0xff]  }
 0x78c   : > { %8785 = vmatprep.subr.bf16.mxu1 %v13986_v49  ;;  %v14048_v49 = vld [vmem:[%s17716_s7 + $0x414] ss:$8 sps:$4 sm:$0xff]  }
 0x78f   : > { %8786 = vmatpush1.bf16.msra.mxu1 %v13984_v38  ;;  %v9038_v38 = vsel %vm17934_vm15, %v9029_v48, %v9037_v1  ;;  %vm17947_vm15 = vmmov %vm17945_vm0 }
 0x790   : > { %8787 = vmatprep.subr.bf16.mxu1 %v13989_v14  ;;  %v14046_v14 = vld [vmem:[%s17716_s7 + $0x410] ss:$8 sps:$4 sm:$0xff]  }
 0x793   : > { %8788 = vmatpush1.bf16.msra.mxu1 %v13987_v17  ;;  %v14051_v17 = vld [vmem:[%s17716_s7 + $0x424] ss:$8 sps:$4 sm:$0xff]  }
 0x794   : > { %8945 = vmatprep.subr.bf16.mxu1 %v13993_v25  ;;  %v14049_v25 = vld [vmem:[%s17716_s7 + $0x420] ss:$8 sps:$4 sm:$0xff]  }
 0x796   : > { %8806 = vmatmul.mubr.bf16.vlgmr.msra.gmra.mrb[28].mxu1 %v11890_v33  ;;  %v14001_v33 = vld [vmem:[%s17716_s7 + $0x330] ss:$8 sps:$4 sm:$0xff]  }
 0x797   : > { %8946 = vmatpush1.bf16.msra.mxu1 %v13991_v22  ;;  %8815 = vmatprep.mubr.bf16.mxu1 %v17901_v21  ;;  %v14054_v22 = vld [vmem:[%s17716_s7 + $0x434] ss:$8 sps:$4 sm:$0xff]  }
 0x798   : > { %8947 = vmatprep.subr.bf16.mxu1 %v13996_v40  ;;  %v14052_v40 = vld [vmem:[%s17716_s7 + $0x430] ss:$8 sps:$4 sm:$0xff]  }
 0x79b   : > { %8948 = vmatpush1.bf16.msra.mxu1 %v13994_v60  ;;  %v14057_v60 = vld [vmem:[%s17716_s7 + $0x444] ss:$8 sps:$4 sm:$0xff]  }
 0x79c   : > { %8949 = vmatprep.subr.bf16.mxu1 %v14000_v63  ;;  %v14055_v63 = vld [vmem:[%s17716_s7 + $0x440] ss:$8 sps:$4 sm:$0xff]  }
 0x79e   : > { %8816 = vmatmul.mubr.bf16.gmra.mrb[32].mxu1 %v11891_v61  ;;  %v14058_v61 = vld [vmem:[%s17716_s7 + $0x450] ss:$8 sps:$4 sm:$0xff]  }
 0x79f   : > { %8950 = vmatpush1.bf16.msra.mxu1 %v13998_v28  ;;  %8977 = vmatprep.mubr.bf16.mxu1 %v17901_v21  ;;  %v14060_v28 = vld [vmem:[%s17716_s7 + $0x454] ss:$8 sps:$4 sm:$0xff]  }
 0x7a0   : > { %8951 = vmatprep.subr.bf16.mxu1 %v14003_v5  ;;  %v14063_v5 = vld [vmem:[%s17716_s7 + $0x464] ss:$8 sps:$4 sm:$0xff]  }
 0x7a3   : > { %8952 = vmatpush1.bf16.msra.mxu1 %v14001_v33  ;;  %v14061_v33 = vld [vmem:[%s17716_s7 + $0x460] ss:$8 sps:$4 sm:$0xff]  }
 0x7a4   : > { %8953 = vmatprep.subr.bf16.mxu1 %v14006_v56  ;;  %v14066_v56 = vld [vmem:[%s17716_s7 + $0x474] ss:$8 sps:$4 sm:$0xff]  }
 0x7a7   : > { %8954 = vmatpush1.bf16.msra.mxu1 %v14004_v36  ;;  %v9178_v36 = vld [vmem:[#allocation3 + $0x4] sm:$0x8] }
 0x7a8   : > { %8955 = vmatprep.subr.bf16.mxu1 %v14009_v11  ;;  %v14064_v11 = vld [vmem:[%s17716_s7 + $0x470] ss:$8 sps:$4 sm:$0xff]  }
 0x7ab   : > { %8956 = vmatpush1.bf16.msra.mxu1 %v14007_v23  ;;  %v11943_v23 = vcombine.low %v9178_v36, %v17055_v20  ;;  %v14070_v20 = vld [vmem:[%s17719_s10 + $0xc8] sm:$0xff]  }
 0x7ac   : > { %8957 = vmatprep.subr.bf16.mxu1 %v14012_v32  ;;  %v9199_v32 = vrot.slane %v17097_v0, 3  ;;  %v14093_v0 = vld [vmem:[%s17719_s10 + $0xf0] sm:$0xff]  }
 0x7ad   : > { %v9198_v2 = vrot.slane %v11943_v23, 3 }
 0x7af   : > { %8958 = vmatpush1.bf16.msra.mxu1 %v14010_v26  ;;  %v9200_v9 = vsel %vm17935_vm2, %v9198_v2, %v9199_v32  ;;  %v14068_v26 = vld [vmem:[%s17719_s10 + $0xc0] sm:$0xff]   ;;  %vm17948_vm2 = vmmov %vm17945_vm0 }
 0x7b0   : > { %8959 = vmatprep.subr.bf16.mxu1 %v14015_v45  ;;  %v14069_v45 = vld [vmem:[%s17719_s10 + $0x80] sm:$0xff]   ;;  %12387 = vmatprep.subr.bf16.mxu0 %v14068_v26 }
 0x7b1   : > { %12388 = vmatpush3.bf16.msra.mxu0 %v14069_v45 }
 0x7b2   : > { %12389 = vmatprep.subr.bf16.mxu0 %v14070_v20 }
 0x7b3   : > { %8960 = vmatpush1.bf16.msra.mxu1 %v14013_v50  ;;  %v14078_v50 = vld [vmem:[%s17719_s10 + $0x48] sm:$0xff]  }
 0x7b4   : > { %9121 = vmatprep.subr.bf16.mxu1 %v14021_v15  ;;  %v14079_v15 = vld [vmem:[%s17719_s10 + $0x8] sm:$0xff]  }
 0x7b6   : > { %8978 = vmatmul.mubr.bf16.vlgmr.msra.gmra.mrb[28].mxu1 %v8862_v16  ;;  %v14084_v16 = vld [vmem:[%s17719_s10 + $0x58] sm:$0xff]  }
 0x7b7   : > { %9122 = vmatpush1.bf16.msra.mxu1 %v14019_v42  ;;  %8987 = vmatprep.mubr.bf16.mxu1 %v17901_v21  ;;  %v14074_v42 = vld [vmem:[%s17719_s10 + $0xd8] sm:$0xff]  }
 0x7b8   : > { %9123 = vmatprep.subr.bf16.mxu1 %v14024_v37  ;;  %v14083_v37 = vld [vmem:[%s17719_s10 + $0x10] sm:$0xff]  }
 0x7bb   : > { %9124 = vmatpush1.bf16.msra.mxu1 %v14022_v62  ;;  %v14075_v62 = vld [vmem:[%s17719_s10 + $0x98] sm:$0xff]  }
 0x7bc   : > { %9125 = vmatprep.subr.bf16.mxu1 %v14027_v3  ;;  %v14080_v3 = vld [vmem:[%s17719_s10 + $0xe0] sm:$0xff]  }
 0x7be   : > { %8988 = vmatmul.mubr.bf16.gmra.mrb[32].mxu1 %v8861_v12  ;;  %v14082_v12 = vld [vmem:[%s17719_s10 + $0x50] sm:$0xff]  }
 0x7bf   : > { %9126 = vmatpush1.bf16.msra.mxu1 %v14025_v57  ;;  %9153 = vmatprep.mubr.bf16.mxu1 %v17901_v21  ;;  %v14085_v57 = vld [vmem:[%s17719_s10 + $0x18] sm:$0xff]  }
 0x7c0   : > { %9127 = vmatprep.subr.bf16.mxu1 %v14030_v54  ;;  %v14087_v54 = vld [vmem:[%s17719_s10 + $0x60] sm:$0xff]  }
 0x7c3   : > { %9128 = vmatpush1.bf16.msra.mxu1 %v14028_v6  ;;  %v14081_v6 = vld [vmem:[%s17719_s10 + $0xa0] sm:$0xff]  }
 0x7c4   : > { %9129 = vmatprep.subr.bf16.mxu1 %v14033_v7  ;;  %v14086_v7 = vld [vmem:[%s17719_s10 + $0xe8] sm:$0xff]  }
 0x7c7   : > { %9130 = vmatpush1.bf16.msra.mxu1 %v14031_v29  ;;  %v14090_v29 = vld [vmem:[%s17719_s10 + $0x68] sm:$0xff]  }
 0x7c8   : > { %9131 = vmatprep.subr.bf16.mxu1 %v14036_v31  ;;  %v14088_v31 = vld [vmem:[%s17719_s10 + $0xa8] sm:$0xff]  }
 0x7cb   : > { %9132 = vmatpush1.bf16.msra.mxu1 %v14034_v10  ;;  %v14091_v10 = vld [vmem:[%s17719_s10 + $0x28] sm:$0xff]  }
 0x7cc   : > { %9133 = vmatprep.subr.bf16.mxu1 %v14039_v59  ;;  %v14092_v59 = vld [vmem:[%s17719_s10 + $0x70] sm:$0xff]  }
 0x7cf   : > { %9134 = vmatpush1.bf16.msra.mxu1 %v14037_v34  ;;  %v14096_v34 = vld [vmem:[%s17719_s10 + $0x78] sm:$0xff]  }
 0x7d0   : > { %9135 = vmatprep.subr.bf16.mxu1 %v14042_v13  ;;  %v14103_v13 = vld [vmem:[%s17719_s10 + $0xf8] sm:$0xff]  }
 0x7d3   : > { %9136 = vmatpush1.bf16.msra.mxu1 %v14040_v55  ;;  %v17936_v55 = vld [vmem:[#allocation8_spill] sm:$0xff] }
 0x7d4   : > { %9283 = vmatprep.subr.bf16.mxu1 %v14045_v19  ;;  %v9344_v52 = vsub.s32 0, %v17936_v55  ;;  %v9348_v19 = vsub.s32 1, %v17936_v55 }
 0x7d6   : > { %9154 = vmatmul.mubr.bf16.vlgmr.msra.gmra.mrb[28].mxu1 %v9038_v38  ;;  %v9345_v48 = vrot.slane %v9340_v30, %v9344_v52 }
 0x7d7   : > { %9284 = vmatpush1.bf16.msra.mxu1 %v14043_v24  ;;  %9163 = vmatprep.mubr.bf16.mxu1 %v17901_v21  ;;  %v9349_v24 = vrot.slane %v9340_v30, %v9348_v19 }
 0x7d8   : > { %9285 = vmatprep.subr.bf16.mxu1 %v14048_v49 }
 0x7db   : > { %9286 = vmatpush1.bf16.msra.mxu1 %v14046_v14 }
 0x7dc   : > { %9287 = vmatprep.subr.bf16.mxu1 %v14051_v17 }
 0x7de   : > { %9164 = vmatmul.mubr.bf16.gmra.mrb[32].mxu1 %v9037_v1  ;;  %v9358_v1 = vld [vmem:[%s17718_s9] sm:$0x3] }
 0x7df   : > { %9288 = vmatpush1.bf16.msra.mxu1 %v14049_v25  ;;  %9315 = vmatprep.mubr.bf16.mxu1 %v17901_v21  ;;  %v9363_v49 = vrot.slane %v9358_v1, %v9344_v52  ;;  %v9367_v14 = vrot.slane %v9358_v1, %v9348_v19 }
 0x7e0   : > { %9289 = vmatprep.subr.bf16.mxu1 %v14054_v22 }
 0x7e3   : > { %9290 = vmatpush1.bf16.msra.mxu1 %v14052_v40 }
 0x7e4   : > { %9291 = vmatprep.subr.bf16.mxu1 %v14057_v60 }
 0x7e7   : > { %9292 = vmatpush1.bf16.msra.mxu1 %v14055_v63 }
 0x7e8   : > { %9293 = vmatprep.subr.bf16.mxu1 %v14060_v28 }
 0x7eb   : > { %9294 = vmatpush1.bf16.msra.mxu1 %v14058_v61 }
 0x7ec   : > { %9295 = vmatprep.subr.bf16.mxu1 %v14063_v5 }
 0x7ef   : > { %9296 = vmatpush1.bf16.msra.mxu1 %v14061_v33 }
 0x7f0   : > { %9297 = vmatprep.subr.bf16.mxu1 %v14066_v56 }
 0x7f3   : > { %9298 = vmatpush1.bf16.msra.mxu1 %v14064_v11 }
 0x7f4   : > { %12409 = vmatprep.subr.bf16.mxu1 %v14076_v58 }
 0x7f6   : > { %9316 = vmatmul.mubr.bf16.vlgmr.msra.gmra.mrb[28].mxu1 %v9200_v9 }
 0x7f7   : > { %9325 = vmatprep.mubr.bf16.mxu1 %v17901_v21  ;;  %v14071_v21 = vld [vmem:[%s17719_s10 + $0x88] sm:$0xff]   ;;  %12410 = vmatpush3.bf16.msra.mxu1 %v14077_v46 }
 0x7f8   : > { %12411 = vmatprep.subr.bf16.mxu1 %v14078_v50  ;;  %12390 = vmatpush3.bf16.msra.mxu0 %v14071_v21 }
 0x7f9   : > { %12391 = vmatprep.subr.bf16.mxu0 %v14072_v43 }
 0x7fb   : > { %12412 = vmatpush3.bf16.msra.mxu1 %v14079_v15 }
 0x7fc   : > { %12413 = vmatprep.subr.bf16.mxu1 %v14082_v12  ;;  %12392 = vmatpush3.bf16.msra.mxu0 %v14073_v8 }
 0x7fd   : > { %12393 = vmatprep.subr.bf16.mxu0 %v14074_v42 }
 0x7fe   : > { %9326 = vmatmul.mubr.bf16.gmra.mrb[32].mxu1 %v9199_v32 }
 0x7ff   : > { %12414 = vmatpush3.bf16.msra.mxu1 %v14083_v37 }
 0x800   : > { %12415 = vmatprep.subr.bf16.mxu1 %v14084_v16  ;;  %12394 = vmatpush3.bf16.msra.mxu0 %v14075_v62 }
 0x801   : > { %12395 = vmatprep.subr.bf16.mxu0 %v14080_v3 }
 0x803   : > { %12416 = vmatpush3.bf16.msra.mxu1 %v14085_v57 }
 0x804   : > { %12417 = vmatprep.subr.bf16.mxu1 %v14087_v54  ;;  %12396 = vmatpush3.bf16.msra.mxu0 %v14081_v6 }
 0x805   : > { %12397 = vmatprep.subr.bf16.mxu0 %v14086_v7 }
 0x807   : > { %12418 = vmatpush3.bf16.msra.mxu1 %v14089_v35 }
 0x808   : > { %12419 = vmatprep.subr.bf16.mxu1 %v14090_v29  ;;  %12398 = vmatpush3.bf16.msra.mxu0 %v14088_v31 }
 0x809   : > { %12399 = vmatprep.subr.bf16.mxu0 %v14093_v0 }
 0x80b   : > { %12420 = vmatpush3.bf16.msra.mxu1 %v14091_v10 }
 0x80c   : > { %12421 = vmatprep.subr.bf16.mxu1 %v14092_v59  ;;  %12400 = vmatpush3.bf16.msra.mxu0 %v14095_v41 }
 0x80d   : > { %12401 = vmatprep.subr.bf16.mxu0 %v14103_v13 }
 0x80f   : > { %12422 = vmatpush3.bf16.msra.mxu1 %v14094_v39 }
 0x810   : > { %12423 = vmatprep.subr.bf16.mxu1 %v14096_v34  ;;  %12402 = vmatpush3.bf16.msra.mxu0 %v14104_v51 }
 0x811   : > { %12431 = vmatprep.subr.bf16.mxu0 %v14112_v53 }
 0x813   : > { %12424 = vmatpush3.bf16.msra.mxu1 %v14097_v44 }
 0x814   : > { %12453 = vmatprep.subr.bf16.mxu1 %v14100_v4 }
 0x8c9   : > { %v9317_v38 = vpop.f32.mrb[28].mxu1 }
 0x8ca   : > { %v9352_v17 = vmul.f32 %v9345_v48, %v9317_v38  ;;  %v9319_v25 = vpop.f32.mrb[29].mxu1 }
 0x8cb   : > { %v9353_v22 = vmul.f32 %v9349_v24, %v9319_v25  ;;  %v9321_v40 = vpop.f32.mrb[30].mxu1 }
 0x8cc   : > { %v9370_v60 = vadd.f32 %v9363_v49, %v9352_v17  ;;  %v9354_v63 = vmul.f32 %v9345_v48, %v9321_v40  ;;  %v9323_v28 = vpop.f32.mrb[31].mxu1 }
 0x8cd   : > { %v9371_v61 = vadd.f32 %v9367_v14, %v9353_v22  ;;  %v9355_v5 = vmul.f32 %v9349_v24, %v9323_v28 }
 0x8ce   : > { %v9376_v33 = vmax.f32 %v9370_v60, 0.0  ;;  %v9372_v56 = vadd.f32 %v9363_v49, %v9354_v63 }
 0x8cf   : > { %v9377_v36 = vmax.f32 %v9371_v61, 0.0  ;;  %v9373_v11 = vadd.f32 %v9367_v14, %v9355_v5 }
 0x8d0   : > { %v9378_v23 = vmax.f32 %v9372_v56, 0.0 }
 0x8d1   : > { %v12132_v32 = vpack.c.bf16 %v9377_v36, %v9376_v33  ;;  %v9379_v2 = vmax.f32 %v9373_v11, 0.0  ;;  %v9327_v9 = vpop.f32.mrb[32].mxu1 }
 0x8d2   : > { %v9356_v26 = vmul.f32 %v9345_v48, %v9327_v9  ;;  %v9329_v45 = vpop.f32.mrb[33].mxu1 }
 0x8d3   : > { %9402 = vst [vmem:[#allocation7] sm:$0xff] %v12132_v32  ;;  %v12133_v20 = vpack.c.bf16 %v9379_v2, %v9378_v23  ;;  %v9357_v58 = vmul.f32 %v9349_v24, %v9329_v45  ;;  %v9331_v21 = vpop.f32.mrb[34].mxu1 }
 0x8d4   : > { %v9374_v46 = vadd.f32 %v9363_v49, %v9356_v26  ;;  %v9332_v50 = vpop.f32.mrb[35].mxu1 }
 0x8d5   : > { %9403 = vst [vmem:[#allocation7 + $0x8] sm:$0xff] %v12133_v20  ;;  %v9375_v43 = vadd.f32 %v9367_v14, %v9357_v58 }
 0x8d6   : > { %v9380_v15 = vmax.f32 %v9374_v46, 0.0 }
 0x8d7   : > { %v9381_v12 = vmax.f32 %v9375_v43, 0.0 }
 0x8d9   : > { %v12134_v8 = vpack.c.bf16 %v9381_v12, %v9380_v15 }
 0x8da   : > { %v9409_v42 = vld [vmem:[#allocation7] sm:$0x88]  ;;  %v9408_v3 = vld [vmem:[#allocation7] sm:$0x33] }
 0x8db   : > { %9404 = vst [vmem:[#allocation7 + $0x10] sm:$0xff] %v12134_v8  ;;  %v11963_v16 = vrot.slane %v9409_v42, 11 }
 0x8dc   : > { %v9410_v37 = vld [vmem:[#allocation7 + $0x8] sm:$0x11]  ;;  %v9566_v0 = vld [vmem:[#allocation7 + $0x8] sm:$0xcc] }
 0x8dd   : > { %v9415_v62 = vrot.slane %v9410_v37, 7 }
 0x8df   : > { %v9416_v57 = vsel %vm15942_vm9, %v11963_v16, %v9415_v62  ;;  %vm17937_vm9 = vmmov %vm17923_vm8 }
 0x8e0   : > { %v9418_v54 = vmax.bf16 %v9416_v57, %v9408_v3 }
 0x8e2   : > { %v9426_v6 = vrot.slane %v9418_v54, %v17780_v18  ;;  %v9567_v7 = vld [vmem:[#allocation7 + $0x10] sm:$0x66] }
 0x8e3   : > { %v9569_v35 = vrot.slane %v9567_v7, 7 }
 0x8e4   : > { %v9427_v29 = vcombine.high %v9426_v6, %v9426_v6  ;;  %v9434_v31 = vrot.slane %v9426_v6, %v17780_v18 }
 0x8e5   : > { %v9571_v10 = vmax.bf16 %v9569_v35, %v9566_v0 }
 0x8e6   : > { %v9441_v59 = vrot.slane %v9427_v29, %v17780_v18  ;;  %v9448_v41 = vrot.slane %v9434_v31, %v17780_v18 }
 0x8e7   : > { %v9579_v39 = vrot.slane %v9571_v10, %v17780_v18 }
 0x8e8   : > { %v9449_v34 = vcombine.high %v9448_v41, %v9448_v41  ;;  %v9456_v27 = vrot.slane %v9448_v41, %v17780_v18  ;;  %v9470_v44 = vrot.slane %v9441_v59, %v17780_v18 }
 0x8e9   : > { %v9580_v4 = vcombine.high %v9579_v39, %v9579_v39  ;;  %v9587_v13 = vrot.slane %v9579_v39, %v17780_v18 }
 0x8ea   : > { %v9463_v51 = vrot.slane %v9449_v34, %v17780_v18  ;;  %v9471_v53 = vcombine.high %v9470_v44, %v9470_v44  ;;  %v9478_v55 = vrot.slane %v9470_v44, %v17780_v18  ;;  %v9487_v52 = vsel %vm17937_vm9, %v9456_v27, 4286644096 }
 0x8eb   : > { %v9489_v30 = vunpack.i.l.bf16 %v9487_v52  ;;  %v9490_v19 = vunpack.i.h.bf16 %v9487_v52  ;;  %v9594_v1 = vrot.slane %v9580_v4, %v17780_v18  ;;  %v9595_v48 = vcombine.high %v9587_v13, %v9587_v13 }
 0x8ec   : > { %v9485_v24 = vrot.slane %v9471_v53, %v17780_v18  ;;  %v9500_v49 = vsel %vm17923_vm8, %v9463_v51, 4286644096  ;;  %v9513_v38 = vsel %vm17938_vm1, %v9478_v55, 4286644096 }
 0x8ed   : > { %v9491_v14 = vmax.f32 %v9489_v30, %v9490_v19  ;;  %v9502_v17 = vunpack.i.l.bf16 %v9500_v49  ;;  %v9503_v25 = vunpack.i.h.bf16 %v9500_v49  ;;  %v9515_v22 = vunpack.i.l.bf16 %v9513_v38 }
 0x8ee   : > { %v9516_v40 = vunpack.i.h.bf16 %v9513_v38  ;;  %v9526_v60 = vsel %vm17939_vm4, %v9485_v24, 4286644096  ;;  %v9596_v63 = vcombine.high %v9594_v1, %v9594_v1  ;;  %v9603_v28 = vrot.slane %v9595_v48, %v17780_v18 }
 0x8ef   : > { %v9528_v61 = vunpack.i.l.bf16 %v9526_v60  ;;  %v9529_v5 = vunpack.i.h.bf16 %v9526_v60  ;;  %v9492_v33 = vrot.slane %v9491_v14, 4  ;;  %v9504_v56 = vmax.f32 %v9502_v17, %v9503_v25 }
 0x8f0   : > { %v9604_v36 = vcombine.high %v9603_v28, %v9603_v28  ;;  %v9611_v11 = vrot.slane %v9603_v28, %v17780_v18  ;;  %v9625_v23 = vrot.slane %v9596_v63, %v17780_v18  ;;  %v9517_v32 = vmax.f32 %v9515_v22, %v9516_v40 }
 0x8f1   : > { %v9493_v2 = vmax.f32 %v9491_v14, %v9492_v33  ;;  %v9505_v9 = vrot.slane %v9504_v56, 4  ;;  %v9530_v26 = vmax.f32 %v9528_v61, %v9529_v5 }
 0x8f2   : > { %v9618_v45 = vrot.slane %v9604_v36, %v17780_v18  ;;  %v9626_v20 = vcombine.high %v9625_v23, %v9625_v23  ;;  %v9633_v58 = vrot.slane %v9625_v23, %v17780_v18  ;;  %v9642_v21 = vsel %vm17940_vm5, %v9611_v11, 4286644096 }
 0x8f3   : > { %v9644_v46 = vunpack.i.l.bf16 %v9642_v21  ;;  %v9645_v50 = vunpack.i.h.bf16 %v9642_v21  ;;  %v9494_v43 = vrot.slane %v9493_v2, 2  ;;  %v9506_v15 = vmax.f32 %v9504_v56, %v9505_v9 }
 0x8f4   : > { %v9640_v12 = vrot.slane %v9626_v20, %v17780_v18  ;;  %v9655_v8 = vsel %vm17941_vm6, %v9618_v45, 4286644096  ;;  %v9668_v42 = vsel %vm17942_vm7, %v9633_v58, 4286644096  ;;  %v9518_v37 = vrot.slane %v9517_v32, 4 }
 0x8f5   : > { %v9646_v16 = vmax.f32 %v9644_v46, %v9645_v50  ;;  %v9657_v62 = vunpack.i.l.bf16 %v9655_v8  ;;  %v9658_v3 = vunpack.i.h.bf16 %v9655_v8  ;;  %v9670_v57 = vunpack.i.l.bf16 %v9668_v42 }
 0x8f6   : > { %v9671_v54 = vunpack.i.h.bf16 %v9668_v42  ;;  %v9681_v6 = vsel %vm17943_vm3, %v9640_v12, 4286644096  ;;  %v9495_v7 = vmax.f32 %v9493_v2, %v9494_v43  ;;  %v9507_v35 = vrot.slane %v9506_v15, 2 }
 0x8f7   : > { %v9647_v29 = vrot.slane %v9646_v16, 4  ;;  %v9659_v31 = vmax.f32 %v9657_v62, %v9658_v3  ;;  %v9683_v0 = vunpack.i.l.bf16 %v9681_v6  ;;  %v9684_v10 = vunpack.i.h.bf16 %v9681_v6 }
 0x8f8   : > { %v9672_v59 = vmax.f32 %v9670_v57, %v9671_v54  ;;  %v9496_v18 = vrot.slane %v9495_v7, 1  ;;  %v9508_v41 = vmax.f32 %v9506_v15, %v9507_v35  ;;  %v9519_v39 = vmax.f32 %v9517_v32, %v9518_v37 }
 0x8f9   : > { %v9648_v34 = vmax.f32 %v9646_v16, %v9647_v29  ;;  %v9660_v27 = vrot.slane %v9659_v31, 4  ;;  %v9685_v44 = vmax.f32 %v9683_v0, %v9684_v10  ;;  %v9531_v4 = vrot.slane %v9530_v26, 4 }
 0x8fa   : > { %v9673_v13 = vrot.slane %v9672_v59, 4  ;;  %v9509_v51 = vrot.slane %v9508_v41, 1  ;;  %v9520_v53 = vrot.slane %v9519_v39, 2  ;;  %v9497_v48 = vmax.f32 %v9495_v7, %v9496_v18 }
 0x8fb   : > { %v9649_v55 = vrot.slane %v9648_v34, 2  ;;  %v9661_v52 = vmax.f32 %v9659_v31, %v9660_v27  ;;  %v9686_v30 = vrot.slane %v9685_v44, 4  ;;  %v9532_v19 = vmax.f32 %v9530_v26, %v9531_v4 }
 0x8fc   : > { %v9674_v1 = vmax.f32 %v9672_v59, %v9673_v13  ;;  %v9521_v24 = vmax.f32 %v9519_v39, %v9520_v53  ;;  %v9510_v22 = vmax.f32 %v9508_v41, %v9509_v51  ;;  %v9498_v33 = vpack.i.bf16 %v9497_v48, %v9497_v48 }
 0x8fd   : > { %v9650_v49 = vmax.f32 %v9648_v34, %v9649_v55  ;;  %v9662_v38 = vrot.slane %v9661_v52, 2  ;;  %v9687_v14 = vmax.f32 %v9685_v44, %v9686_v30  ;;  %v9533_v17 = vrot.slane %v9532_v19, 2 }
 0x8fe   : > { %v9675_v25 = vrot.slane %v9674_v1, 2  ;;  %v9522_v40 = vrot.slane %v9521_v24, 1  ;;  %v9511_v26 = vpack.i.bf16 %v9510_v22, %v9510_v22  ;;  %v9542_v21 = vunpack.c.l.b16 %v9498_v33 }
 0x8ff   : > { %v9651_v60 = vrot.slane %v9650_v49, 1  ;;  %v9663_v63 = vmax.f32 %v9661_v52, %v9662_v38  ;;  %v9688_v28 = vrot.slane %v9687_v14, 2  ;;  %v9534_v61 = vmax.f32 %v9532_v19, %v9533_v17  ;;  %v14105_v17 = vld [vmem:[%s17719_s10 + $0x1c8] sm:$0xff]  }
 0x900   : > { %v9676_v5 = vmax.f32 %v9674_v1, %v9675_v25  ;;  %v9523_v56 = vmax.f32 %v9521_v24, %v9522_v40  ;;  %v9543_v16 = vunpack.c.l.b16 %v9511_v26  ;;  %v14110_v26 = vld [vmem:[%s17719_s10 + $0x190] sm:$0xff]  }
 0x901   : > { %v9535_v36 = vrot.slane %v9534_v61, 1  ;;  %v9652_v11 = vmax.f32 %v9650_v49, %v9651_v60  ;;  %v9664_v23 = vrot.slane %v9663_v63, 1  ;;  %v9689_v32 = vmax.f32 %v9687_v14, %v9688_v28  ;;  %v14102_v49 = vld [vmem:[%s17719_s10 + $0x180] sm:$0xff]  }
 0x902   : > { %v9524_v2 = vpack.i.bf16 %v9523_v56, %v9523_v56  ;;  %v9677_v9 = vrot.slane %v9676_v5, 1 }
 0x903   : > { %v9536_v45 = vmax.f32 %v9534_v61, %v9535_v36  ;;  %v9665_v20 = vmax.f32 %v9663_v63, %v9664_v23  ;;  %v9690_v58 = vrot.slane %v9689_v32, 1  ;;  %v9653_v50 = vpack.i.bf16 %v9652_v11, %v9652_v11  ;;  %v14106_v61 = vld [vmem:[%s17719_s10 + $0x188] sm:$0xff]   ;;  %v14109_v11 = vld [vmem:[%s17719_s10 + $0x1d0] sm:$0xff]  }
 0x904   : > { %v9544_v46 = vunpack.c.l.b16 %v9524_v2  ;;  %v9678_v43 = vmax.f32 %v9676_v5, %v9677_v9  ;;  %v14113_v2 = vld [vmem:[%s17719_s10 + $0x100] sm:$0xff]   ;;  %v14118_v9 = vld [vmem:[%s17719_s10 + $0x148] sm:$0xff]  }
 0x905   : > { %v9537_v15 = vpack.i.bf16 %v9536_v45, %v9536_v45  ;;  %v9666_v12 = vpack.i.bf16 %v9665_v20, %v9665_v20  ;;  %v9691_v8 = vmax.f32 %v9689_v32, %v9690_v58  ;;  %v9697_v54 = vunpack.c.l.b16 %v9653_v50  ;;  %v14114_v20 = vld [vmem:[%s17719_s10 + $0x1d8] sm:$0xff]   ;;  %v14119_v58 = vld [vmem:[%s17719_s10 + $0x108] sm:$0xff]   ;;  %v14120_v50 = vld [vmem:[%s17719_s10 + $0x1e0] sm:$0xff]  }
 0x906   : > { %v9546_v42 = vsel %vm17944_vm12, %v9544_v46, %v9542_v21  ;;  %v9679_v37 = vpack.i.bf16 %v9678_v43, %v9678_v43  ;;  %v14122_v21 = vld [vmem:[%s17719_s10 + $0x150] sm:$0xff]   ;;  %v14117_v46 = vld [vmem:[%s17719_s10 + $0x198] sm:$0xff]  }
 0x907   : > { %v9545_v62 = vunpack.c.l.b16 %v9537_v15  ;;  %v9548_v3 = vpack.c.b16 %v9546_v42, %v9546_v42  ;;  %v9692_v57 = vpack.i.bf16 %v9691_v8, %v9691_v8  ;;  %v9698_v35 = vunpack.c.l.b16 %v9666_v12  ;;  %v14123_v43 = vld [vmem:[%s17719_s10 + $0x110] sm:$0xff]   ;;  %v14126_v15 = vld [vmem:[%s17719_s10 + $0x158] sm:$0xff]   ;;  %v14121_v12 = vld [vmem:[%s17719_s10 + $0x1a0] sm:$0xff]  }
 0x908   : > { %v9699_v6 = vunpack.c.l.b16 %v9679_v37  ;;  %v14124_v8 = vld [vmem:[%s17719_s10 + $0x1e8] sm:$0xff]   ;;  %v14127_v42 = vld [vmem:[%s17719_s10 + $0x118] sm:$0xff]   ;;  %v14130_v37 = vld [vmem:[%s17719_s10 + $0x160] sm:$0xff]  }
 0x909   : > { %v9547_v7 = vsel %vm17945_vm0, %v9545_v62, %v9543_v16  ;;  %v9700_v29 = vunpack.c.l.b16 %v9692_v57  ;;  %v9552_v0 = vsel %vm15841_vm11, 0, %v9548_v3  ;;  %v14125_v16 = vld [vmem:[%s17719_s10 + $0x1a8] sm:$0xff]   ;;  %v14128_v62 = vld [vmem:[%s17719_s10 + $0x1f0] sm:$0xff]   ;;  %v14131_v3 = vld [vmem:[%s17719_s10 + $0x120] sm:$0xff]  }
 0x90a   : > { %v9549_v31 = vpack.c.b16 %v9547_v7, %v9547_v7  ;;  %v9701_v10 = vsel %vm17947_vm15, %v9699_v6, %v9697_v54  ;;  %v9556_v34 = vsel %vm9555_vm14, %v9552_v0, 0  ;;  %v14134_v57 = vld [vmem:[%s17719_s10 + $0x168] sm:$0xff]   ;;  %v14129_v54 = vld [vmem:[%s17719_s10 + $0x1b0] sm:$0xff]   ;;  %v14132_v6 = vld [vmem:[%s17719_s10 + $0x1f8] sm:$0xff]  }
 0x90b   : > { %v9702_v59 = vsel %vm17948_vm2, %v9700_v29, %v9698_v35  ;;  %v9703_v18 = vpack.c.b16 %v9701_v10, %v9701_v10  ;;  %v14135_v35 = vld [vmem:[%s17719_s10 + $0x128] sm:$0xff]   ;;  %v14140_v29 = vld [vmem:[%s17719_s10 + $0x170] sm:$0xff]  }
 0x90c   : > { %v9553_v41 = vsel %vm15841_vm11, 0, %v9549_v31  ;;  %v9704_v39 = vpack.c.b16 %v9702_v59, %v9702_v59  ;;  %v14133_v31 = vld [vmem:[%s17719_s10 + $0x1b8] sm:$0xff]   ;;  %v14136_v59 = vld [vmem:[%s17719_s10 + $0x2c0] sm:$0xff]  }
 0x90d   : > { %v9557_v27 = vsel %vm9555_vm14, %v9553_v41, 0  ;;  %v9707_v44 = vsel %vm15841_vm11, 0, %v9703_v18 }
 0x90e   : > { %v11964_v4 = vcombine.low %v9556_v34, %v9557_v27  ;;  %v9708_v13 = vsel %vm15841_vm11, 0, %v9704_v39  ;;  %v9709_v51 = vsel %vm9555_vm14, %v9707_v44, 0  ;;  %v14141_v39 = vld [vmem:[%s17719_s10 + $0x130] sm:$0xff]   ;;  %v14144_v34 = vld [vmem:[%s17719_s10 + $0x178] sm:$0xff]   ;;  %v14137_v27 = vld [vmem:[%s17719_s10 + $0x280] sm:$0xff]   ;;  %vm11386_vm11 = vcmask 261120  }
 0x90f   : > { %v9710_v53 = vsel %vm9555_vm14, %v9708_v13, 0 }
 0x910   : > { %v9563_v55 = vrot.slane %v11964_v4, 6  ;;  %v11965_v52 = vcombine.low %v9709_v51, %v9710_v53  ;;  %v14142_v51 = vld [vmem:[%s17719_s10 + $0x2c8] sm:$0xff]  }
 0x912   : > { %9565 = vst [vmem:[#allocation4] sm:$0xcc] %v9563_v55  ;;  %9717 = vst [vmem:[#allocation4 + $0x8] sm:$0x33] %v11965_v52  ;;  %v14145_v55 = vld [vmem:[%s17719_s10 + $0x138] sm:$0xff]  }
 0x919   : > { %v9718_v30 = vld [vmem:[#allocation4] sm:$0xff]  ;;  %v17322_v19 = vld [vmem:[#allocation4 + $0x8] sm:$0x11] }
 0x91a   : > { %v11966_v1 = vcombine.low %v9718_v30, %v17322_v19  ;;  %v11985_v48 = vcombine.high %v9718_v30, %v9718_v30  ;;  %v11984_v24 = vcombine.low %v9718_v30, %v9718_v30  ;;  %v17328_v38 = vld [vmem:[#allocation4] sm:$0xcc]  ;;  %v17330_v47 = vld [vmem:[#allocation4 + $0x8] sm:$0x33]  ;;  %v11967_v14 = vcombine.high %v9718_v30, %v17322_v19  ;;  %v14148_v30 = vld [vmem:[%s17719_s10 + $0x240] sm:$0xff]  }
 0x91b   : > { %v12021_v25 = vcombine.high %v17328_v38, %v17330_v47  ;;  %v17338_v60 = vld [vmem:[#allocation4] sm:$0xee]  ;;  %v17408_v7 = vld [vmem:[#allocation4 + $0x8] sm:$0x77]  ;;  %v12020_v10 = vcombine.low %v17328_v38, %v17330_v47 }
 0x91c   : > { %v9795_v22 = vshll.u32 %v11966_v1, 16  ;;  %10076 = vmatprep.mubr.bf16.mxu1 %v11985_v48  ;;  %v9802_v40 = vshll.u32 %v11967_v14, 16  ;;  %v12003_v28 = vcombine.high %v17338_v60, %v17322_v19  ;;  %v9800_v5 = vshrl.u32 %v11967_v14, 16  ;;  %v17426_v18 = vld [vmem:[#allocation4] sm:$0x88]  ;;  %v14153_v14 = vld [vmem:[%s17719_s10 + $0x248] sm:$0xff]  }
 0x91d   : > { %10077 = vmatmul.mubr.bf16.vlgmr.msra.gmra.mrb[36].mxu1 %v11984_v24  ;;  %v10306_v63 = vrot.slane %v12021_v25, 2  ;;  %v9793_v56 = vshrl.u32 %v11966_v1, 16  ;;  %v12039_v0 = vcombine.high %v17328_v38, %v17408_v7  ;;  %v12057_v41 = vcombine.high %v17426_v18, %v17408_v7  ;;  %v14143_v1 = vld [vmem:[%s17719_s10 + $0x288] sm:$0xff]  }
 0x91e   : > { %12454 = vmatpush3.bf16.msra.mxu1 %v14102_v49  ;;  %v9804_v33 = vrot.slane %v9802_v40, 1  ;;  %v9797_v36 = vrot.slane %v9795_v22, 1  ;;  %v10123_v45 = vrot.slane %v12003_v28, 1  ;;  %v10305_v13 = vrot.slane %v12020_v10, 2  ;;  %v14146_v49 = vld [vmem:[%s17719_s10 + $0x2d0] sm:$0xff]   ;;  %v14151_v22 = vld [vmem:[%s17719_s10 + $0x2d8] sm:$0xff]  }
 0x91f   : > { %12455 = vmatprep.subr.bf16.mxu1 %v14105_v17  ;;  %10437 = vmatprep.mubr.bf16.mxu1 %v10306_v63  ;;  %v10493_v44 = vshrl.u32 %v12039_v0, 16  ;;  %v10496_v4 = vshll.u32 %v12039_v0, 16  ;;  %v10678_v53 = vrot.slane %v12057_v41, 3  ;;  %v12002_v52 = vcombine.low %v17338_v60, %v17322_v19  ;;  %v14149_v19 = vld [vmem:[%s17719_s10 + $0x200] sm:$0xff]   ;;  %v14147_v17 = vld [vmem:[%s17719_s10 + $0x290] sm:$0xff]   ;;  %v14154_v40 = vld [vmem:[%s17719_s10 + $0x208] sm:$0xff]  }
 0x920   : > { %v9805_v23 = vor.u32 %v9804_v33, %v9800_v5  ;;  %v9798_v32 = vor.u32 %v9797_v36, %v9793_v56  ;;  %v14157_v60 = vld [vmem:[%s17719_s10 + $0x250] sm:$0xff]   ;;  %v14152_v63 = vld [vmem:[%s17719_s10 + $0x298] sm:$0xff]   ;;  %v14155_v28 = vld [vmem:[%s17719_s10 + $0x2e0] sm:$0xff]  }
 0x921   : > { %v10495_v48 = vrot.slane %v10493_v44, 2  ;;  %v10498_v24 = vrot.slane %v10496_v4, 3  ;;  %v10122_v47 = vrot.slane %v12002_v52, 1  ;;  %v14161_v5 = vld [vmem:[%s17719_s10 + $0x258] sm:$0xff]   ;;  %v14156_v33 = vld [vmem:[%s17719_s10 + $0x2a0] sm:$0xff]   ;;  %v14159_v56 = vld [vmem:[%s17719_s10 + $0x2e8] sm:$0xff]  }
 0x922   : > { %12456 = vmatpush3.bf16.msra.mxu1 %v14106_v61  ;;  %9936 = vmatprep.mubr.bf16.mxu0 %v9805_v23  ;;  %v14158_v61 = vld [vmem:[%s17719_s10 + $0x210] sm:$0xff]   ;;  %v14162_v36 = vld [vmem:[%s17719_s10 + $0x218] sm:$0xff]   ;;  %v14184_v10 = vld [vmem:[%s17719_s10 + $0x340] sm:$0xff]  }
 0x923   : > { %12457 = vmatprep.subr.bf16.mxu1 %v14109_v11  ;;  %9937 = vmatmul.mubr.bf16.vlgmr.msra.gmra.mrb[36].mxu0 %v9798_v32  ;;  %v10499_v25 = vor.u32 %v10498_v24, %v10495_v48  ;;  %v14165_v11 = vld [vmem:[%s17719_s10 + $0x260] sm:$0xff]   ;;  %v17498_v23 = vld [vmem:[#allocation4 + $0x8] sm:$0xff]  ;;  %v14195_v52 = vld [vmem:[%s17719_s10 + $0x310] sm:$0xff]  }
 0x924   : > { %12432 = vmatpush3.bf16.msra.mxu0 %v14113_v2  ;;  %10254 = vmatprep.mubr.bf16.mxu0 %v10123_v45  ;;  %v17500_v32 = vld [vmem:[#allocation4 + $0x10] sm:$0x11]  ;;  %v14160_v2 = vld [vmem:[%s17719_s10 + $0x2a8] sm:$0xff]   ;;  %v12075_v44 = vcombine.high %v17498_v23, %v17498_v23  ;;  %v14188_v4 = vld [vmem:[%s17719_s10 + $0x3d8] sm:$0xff]  }
 0x925   : > { %12433 = vmatprep.subr.bf16.mxu0 %v14118_v9  ;;  %v14163_v9 = vld [vmem:[%s17719_s10 + $0x2f0] sm:$0xff]   ;;  %v12093_v45 = vcombine.high %v17498_v23, %v17500_v32  ;;  %v14185_v41 = vld [vmem:[%s17719_s10 + $0x300] sm:$0xff]   ;;  %v14196_v48 = vld [vmem:[%s17719_s10 + $0x3e8] sm:$0xff]  }
 0x926   : > { %12458 = vmatpush3.bf16.msra.mxu1 %v14110_v26  ;;  %v14166_v26 = vld [vmem:[%s17719_s10 + $0x220] sm:$0xff]   ;;  %v14199_v24 = vld [vmem:[%s17719_s10 + $0x318] sm:$0xff]  }
 0x927   : > { %12459 = vmatprep.subr.bf16.mxu1 %v14114_v20  ;;  %v14169_v20 = vld [vmem:[%s17719_s10 + $0x268] sm:$0xff]  }
 0x928   : > { %12434 = vmatpush3.bf16.msra.mxu0 %v14119_v58  ;;  %v14164_v58 = vld [vmem:[%s17719_s10 + $0x2b0] sm:$0xff]  }
 0x929   : > { %12435 = vmatprep.subr.bf16.mxu0 %v14122_v21  ;;  %v14167_v21 = vld [vmem:[%s17719_s10 + $0x2f8] sm:$0xff]  }
 0x92a   : > { %12460 = vmatpush3.bf16.msra.mxu1 %v14117_v46  ;;  %v14170_v46 = vld [vmem:[%s17719_s10 + $0x228] sm:$0xff]  }
 0x92b   : > { %12461 = vmatprep.subr.bf16.mxu1 %v14120_v50  ;;  %v11047_v50 = vshll.u32 %v12093_v45, 16 }
 0x92c   : > { %12436 = vmatpush3.bf16.msra.mxu0 %v14123_v43  ;;  %v14175_v43 = vld [vmem:[%s17719_s10 + $0x270] sm:$0xff]  }
 0x92d   : > { %12437 = vmatprep.subr.bf16.mxu0 %v14126_v15  ;;  %v12038_v15 = vcombine.low %v17328_v38, %v17408_v7  ;;  %v14179_v38 = vld [vmem:[%s17719_s10 + $0x278] sm:$0xff]  }
 0x92e   : > { %12462 = vmatpush3.bf16.msra.mxu1 %v14121_v12  ;;  %v14168_v12 = vld [vmem:[%s17719_s10 + $0x2b8] sm:$0xff]  }
 0x92f   : > { %12463 = vmatprep.subr.bf16.mxu1 %v14124_v8  ;;  %v12056_v8 = vcombine.low %v17426_v18, %v17408_v7  ;;  %v14177_v7 = vld [vmem:[%s17719_s10 + $0x3c8] sm:$0xff]   ;;  %v14181_v18 = vld [vmem:[%s17719_s10 + $0x3d0] sm:$0xff]  }
 0x930   : > { %12438 = vmatpush3.bf16.msra.mxu0 %v14127_v42  ;;  %v14171_v42 = vld [vmem:[%s17719_s10 + $0x3c0] sm:$0xff]  }
 0x931   : > { %12439 = vmatprep.subr.bf16.mxu0 %v14130_v37  ;;  %v11049_v37 = vrot.slane %v11047_v50, 1  ;;  %v14217_v50 = vld [vmem:[%s17719_s10 + $0x408] sm:$0xff]  }
 0x932   : > { %12464 = vmatpush3.bf16.msra.mxu1 %v14125_v16  ;;  %v14176_v16 = vld [vmem:[%s17719_s10 + $0x230] sm:$0xff]  }
 0x933   : > { %12465 = vmatprep.subr.bf16.mxu1 %v14128_v62  ;;  %v10485_v62 = vshrl.u32 %v12038_v15, 16 }
 0x934   : > { %12440 = vmatpush3.bf16.msra.mxu0 %v14131_v3  ;;  %v10488_v3 = vshll.u32 %v12038_v15, 16  ;;  %v14220_v15 = vld [vmem:[%s17719_s10 + $0x458] sm:$0xff]  }
 0x935   : > { %12441 = vmatprep.subr.bf16.mxu0 %v14134_v57  ;;  %v14172_v57 = vld [vmem:[%s17719_s10 + $0x380] sm:$0xff]  }
 0x936   : > { %12466 = vmatpush3.bf16.msra.mxu1 %v14129_v54  ;;  %v11045_v54 = vshrl.u32 %v12093_v45, 16  ;;  %v10490_v0 = vrot.slane %v10488_v3, 3  ;;  %v14228_v3 = vld [vmem:[%s17719_s10 + $0x478] sm:$0xff]  }
 0x937   : > { %12467 = vmatprep.subr.bf16.mxu1 %v14132_v6  ;;  %v10677_v6 = vrot.slane %v12056_v8, 3  ;;  %v14222_v8 = vld [vmem:[%s17719_s10 + $0x460] sm:$0xff]  }
 0x938   : > { %12442 = vmatpush3.bf16.msra.mxu0 %v14135_v35  ;;  %v11050_v35 = vor.u32 %v11049_v37, %v11045_v54  ;;  %v14224_v37 = vld [vmem:[%s17719_s10 + $0x468] sm:$0xff]  }
 0x939   : > { %12443 = vmatprep.subr.bf16.mxu0 %v14140_v29  ;;  %v14180_v29 = vld [vmem:[%s17719_s10 + $0x238] sm:$0xff]  }
 0x93a   : > { %12468 = vmatpush3.bf16.msra.mxu1 %v14133_v31  ;;  %v10487_v31 = vrot.slane %v10485_v62, 2  ;;  %v14227_v62 = vld [vmem:[%s17719_s10 + $0x430] sm:$0xff]  }
 0x93b   : > { %12497 = vmatprep.subr.bf16.mxu1 %v14136_v59  ;;  %v14178_v59 = vld [vmem:[%s17719_s10 + $0x388] sm:$0xff]  }
 0x93c   : > { %12444 = vmatpush3.bf16.msra.mxu0 %v14141_v39  ;;  %v10491_v39 = vor.u32 %v10490_v0, %v10487_v31 }
 0x93d   : > { %10438 = vmatmul.mubr.bf16.vlgmr.msra.gmra.mrb[40].mxu1 %v10305_v13  ;;  %12445 = vmatprep.subr.bf16.mxu0 %v14144_v34  ;;  %v14190_v34 = vld [vmem:[%s17719_s10 + $0x348] sm:$0xff]  }
 0x93e   : > { %12498 = vmatpush3.bf16.msra.mxu1 %v14137_v27  ;;  %10809 = vmatprep.mubr.bf16.mxu1 %v10678_v53  ;;  %v14182_v27 = vld [vmem:[%s17719_s10 + $0x390] sm:$0xff]   ;;  %v14191_v13 = vld [vmem:[%s17719_s10 + $0x308] sm:$0xff]   ;;  %v14189_v53 = vld [vmem:[%s17719_s10 + $0x398] sm:$0xff]  }
 0x93f   : > { %12499 = vmatprep.subr.bf16.mxu1 %v14142_v51  ;;  %v14194_v51 = vld [vmem:[%s17719_s10 + $0x350] sm:$0xff]  }
 0x940   : > { %12446 = vmatpush3.bf16.msra.mxu0 %v14145_v55  ;;  %v14192_v55 = vld [vmem:[%s17719_s10 + $0x3e0] sm:$0xff]  }
 0x941   : > { %12475 = vmatprep.subr.bf16.mxu0 %v14148_v30  ;;  %v14198_v30 = vld [vmem:[%s17719_s10 + $0x358] sm:$0xff]  }
 0x942   : > { %12500 = vmatpush3.bf16.msra.mxu1 %v14143_v1  ;;  %v14193_v1 = vld [vmem:[%s17719_s10 + $0x3a0] sm:$0xff]  }
 0x943   : > { %12501 = vmatprep.subr.bf16.mxu1 %v14146_v49  ;;  %10255 = vmatmul.mubr.bf16.vlgmr.msra.gmra.mrb[40].mxu0 %v10122_v47  ;;  %v14202_v49 = vld [vmem:[%s17719_s10 + $0x360] sm:$0xff]   ;;  %v12092_v47 = vcombine.low %v17498_v23, %v17500_v32 }
 0x944   : > { %12476 = vmatpush3.bf16.msra.mxu0 %v14149_v19  ;;  %10630 = vmatprep.mubr.bf16.mxu0 %v10499_v25  ;;  %v14197_v19 = vld [vmem:[%s17719_s10 + $0x3a8] sm:$0xff]  }
 0x945   : > { %12477 = vmatprep.subr.bf16.mxu0 %v14153_v14  ;;  %v14200_v14 = vld [vmem:[%s17719_s10 + $0x3f0] sm:$0xff]   ;;  %v14206_v25 = vld [vmem:[%s17719_s10 + $0x368] sm:$0xff]  }
 0x946   : > { %12502 = vmatpush3.bf16.msra.mxu1 %v14147_v17  ;;  %v14203_v17 = vld [vmem:[%s17719_s10 + $0x320] sm:$0xff]  }
 0x947   : > { %12503 = vmatprep.subr.bf16.mxu1 %v14151_v22  ;;  %v14201_v22 = vld [vmem:[%s17719_s10 + $0x3b0] sm:$0xff]  }
 0x948   : > { %12478 = vmatpush3.bf16.msra.mxu0 %v14154_v40  ;;  %v14204_v40 = vld [vmem:[%s17719_s10 + $0x3f8] sm:$0xff]  }
 0x949   : > { %12479 = vmatprep.subr.bf16.mxu0 %v14157_v60  ;;  %v11040_v60 = vshll.u32 %v12092_v47, 16 }
 0x94a   : > { %12504 = vmatpush3.bf16.msra.mxu1 %v14152_v63  ;;  %v14207_v63 = vld [vmem:[%s17719_s10 + $0x328] sm:$0xff]  }
 0x94b   : > { %12505 = vmatprep.subr.bf16.mxu1 %v14155_v28  ;;  %v14208_v28 = vld [vmem:[%s17719_s10 + $0x370] sm:$0xff]  }
 0x94c   : > { %12480 = vmatpush3.bf16.msra.mxu0 %v14158_v61  ;;  %v14205_v61 = vld [vmem:[%s17719_s10 + $0x3b8] sm:$0xff]  }
 0x94d   : > { %12481 = vmatprep.subr.bf16.mxu0 %v14161_v5  ;;  %v11042_v5 = vrot.slane %v11040_v60, 1 }
 0x94e   : > { %12506 = vmatpush3.bf16.msra.mxu1 %v14156_v33  ;;  %v14209_v33 = vld [vmem:[%s17719_s10 + $0x330] sm:$0xff]  }
 0x94f   : > { %12507 = vmatprep.subr.bf16.mxu1 %v14159_v56  ;;  %v11038_v56 = vshrl.u32 %v12092_v47, 16 }
 0x950   : > { %12482 = vmatpush3.bf16.msra.mxu0 %v14162_v36  ;;  %v14210_v36 = vld [vmem:[%s17719_s10 + $0x378] sm:$0xff]  }
 0x951   : > { %12483 = vmatprep.subr.bf16.mxu0 %v14165_v11  ;;  %v11043_v11 = vor.u32 %v11042_v5, %v11038_v56 }
 0x952   : > { %12508 = vmatpush3.bf16.msra.mxu1 %v14160_v2  ;;  %v11190_v2 = vld [vmem:[#allocation4 + $0x8] sm:$0xee] }
 0x953   : > { %12509 = vmatprep.subr.bf16.mxu1 %v14163_v9  ;;  %v14211_v9 = vld [vmem:[%s17719_s10 + $0x338] sm:$0xff]   ;;  %v12111_v45 = vcombine.high %v11190_v2, %v17500_v32  ;;  %v12110_v54 = vcombine.low %v11190_v2, %v17500_v32 }
 0x954   : > { %12484 = vmatpush3.bf16.msra.mxu0 %v14166_v26  ;;  %v14212_v26 = vld [vmem:[%s17719_s10 + $0x440] sm:$0xff]  }
 0x955   : > { %12485 = vmatprep.subr.bf16.mxu0 %v14169_v20  ;;  %v14213_v20 = vld [vmem:[%s17719_s10 + $0x400] sm:$0xff]  }
 0x956   : > { %12510 = vmatpush3.bf16.msra.mxu1 %v14164_v58  ;;  %v12074_v58 = vcombine.low %v17498_v23, %v17498_v23  ;;  %v14219_v23 = vld [vmem:[%s17719_s10 + $0x410] sm:$0xff]  }
 0x957   : > { %12511 = vmatprep.subr.bf16.mxu1 %v14167_v21  ;;  %v14216_v21 = vld [vmem:[%s17719_s10 + $0x448] sm:$0xff]  }
 0x958   : > { %12486 = vmatpush3.bf16.msra.mxu0 %v14170_v46  ;;  %v11229_v46 = vrot.slane %v12111_v45, 1 }
 0x959   : > { %12487 = vmatprep.subr.bf16.mxu0 %v14175_v43  ;;  %v14218_v43 = vld [vmem:[%s17719_s10 + $0x450] sm:$0xff]  }
 0x95a   : > { %12512 = vmatpush3.bf16.msra.mxu1 %v14168_v12  ;;  %v14221_v12 = vld [vmem:[%s17719_s10 + $0x418] sm:$0xff]  }
 0x95b   : > { %12541 = vmatprep.subr.bf16.mxu1 %v14171_v42  ;;  %v14223_v42 = vld [vmem:[%s17719_s10 + $0x420] sm:$0xff]  }
 0x95c   : > { %12488 = vmatpush3.bf16.msra.mxu0 %v14176_v16  ;;  %v14225_v16 = vld [vmem:[%s17719_s10 + $0x428] sm:$0xff]  }
 0x95d   : > { %10810 = vmatmul.mubr.bf16.vlgmr.msra.gmra.mrb[44].mxu1 %v10677_v6  ;;  %12489 = vmatprep.subr.bf16.mxu0 %v14179_v38  ;;  %v14226_v38 = vld [vmem:[%s17719_s10 + $0x470] sm:$0xff]   ;;  %v11228_v6 = vrot.slane %v12110_v54, 1 }
 0x95e   : > { %12542 = vmatpush3.bf16.msra.mxu1 %v14172_v57  ;;  %11181 = vmatprep.mubr.bf16.mxu1 %v11050_v35  ;;  %v14229_v57 = vld [vmem:[%s17719_s10 + $0x438] sm:$0xff]  }
 0x95f   : > { %12543 = vmatprep.subr.bf16.mxu1 %v14177_v7 }
 0x960   : > { %12490 = vmatpush3.bf16.msra.mxu0 %v14180_v29 }
 0x961   : > { %12519 = vmatprep.subr.bf16.mxu0 %v14184_v10 }
 0x962   : > { %12544 = vmatpush3.bf16.msra.mxu1 %v14178_v59 }
 0x963   : > { %12545 = vmatprep.subr.bf16.mxu1 %v14181_v18  ;;  %10631 = vmatmul.mubr.bf16.vlgmr.msra.gmra.mrb[44].mxu0 %v10491_v39 }
 0x964   : > { %12520 = vmatpush3.bf16.msra.mxu0 %v14185_v41  ;;  %10986 = vmatprep.mubr.bf16.mxu0 %v12075_v44 }
 0x965   : > { %12521 = vmatprep.subr.bf16.mxu0 %v14190_v34 }
 0x966   : > { %12546 = vmatpush3.bf16.msra.mxu1 %v14182_v27 }
 0x967   : > { %12547 = vmatprep.subr.bf16.mxu1 %v14188_v4 }
 0x968   : > { %12522 = vmatpush3.bf16.msra.mxu0 %v14191_v13 }
 0x969   : > { %12523 = vmatprep.subr.bf16.mxu0 %v14194_v51 }
 0x96a   : > { %12548 = vmatpush3.bf16.msra.mxu1 %v14189_v53 }
 0x96b   : > { %12549 = vmatprep.subr.bf16.mxu1 %v14192_v55 }
 0x96c   : > { %12524 = vmatpush3.bf16.msra.mxu0 %v14195_v52 }
 0x96d   : > { %12525 = vmatprep.subr.bf16.mxu0 %v14198_v30 }
 0x96e   : > { %12550 = vmatpush3.bf16.msra.mxu1 %v14193_v1 }
 0x96f   : > { %12551 = vmatprep.subr.bf16.mxu1 %v14196_v48 }
 0x970   : > { %12526 = vmatpush3.bf16.msra.mxu0 %v14199_v24 }
 0x971   : > { %12527 = vmatprep.subr.bf16.mxu0 %v14202_v49 }
 0x972   : > { %12552 = vmatpush3.bf16.msra.mxu1 %v14197_v19 }
 0x973   : > { %12553 = vmatprep.subr.bf16.mxu1 %v14200_v14 }
 0x974   : > { %12528 = vmatpush3.bf16.msra.mxu0 %v14203_v17 }
 0x975   : > { %12529 = vmatprep.subr.bf16.mxu0 %v14206_v25 }
 0x976   : > { %12554 = vmatpush3.bf16.msra.mxu1 %v14201_v22 }
 0x977   : > { %12555 = vmatprep.subr.bf16.mxu1 %v14204_v40 }
 0x978   : > { %12530 = vmatpush3.bf16.msra.mxu0 %v14207_v63 }
 0x979   : > { %12531 = vmatprep.subr.bf16.mxu0 %v14208_v28 }
 0x97a   : > { %12556 = vmatpush3.bf16.msra.mxu1 %v14205_v61 }
 0x97c   : > { %12532 = vmatpush3.bf16.msra.mxu0 %v14209_v33 }
 0x97d   : > { %11182 = vmatmul.mubr.bf16.vlgmr.msra.gmra.mrb[48].mxu1 %v11043_v11  ;;  %12533 = vmatprep.subr.bf16.mxu0 %v14210_v36 }
 0x980   : > { %12534 = vmatpush3.bf16.msra.mxu0 %v14211_v9 }
 0x981   : > { %12563 = vmatprep.subr.bf16.mxu0 %v14212_v26 }
 0x983   : > { %10987 = vmatmul.mubr.bf16.vlgmr.msra.gmra.mrb[48].mxu0 %v12074_v58 }
 0x984   : > { %12564 = vmatpush3.bf16.msra.mxu0 %v14213_v20  ;;  %11360 = vmatprep.mubr.bf16.mxu0 %v11229_v46 }
 0x985   : > { %12565 = vmatprep.subr.bf16.mxu0 %v14216_v21 }
 0x988   : > { %12566 = vmatpush3.bf16.msra.mxu0 %v14217_v50 }
 0x989   : > { %12567 = vmatprep.subr.bf16.mxu0 %v14218_v43 }
 0x98c   : > { %12568 = vmatpush3.bf16.msra.mxu0 %v14219_v23  ;;  %v12128_v23 = vld [vmem:[%s17720_s11] ss:$0 sm:$0xff] }
 0x98d   : > { %12569 = vmatprep.subr.bf16.mxu0 %v14220_v15 }
 0x990   : > { %12570 = vmatpush3.bf16.msra.mxu0 %v14221_v12 }
 0x991   : > { %12571 = vmatprep.subr.bf16.mxu0 %v14222_v8  ;;  %v12129_v8 = vld [vmem:[%s17721_s12] ss:$0 sm:$0xff] }
 0x994   : > { %12572 = vmatpush3.bf16.msra.mxu0 %v14223_v42 }
 0x995   : > { %12573 = vmatprep.subr.bf16.mxu0 %v14224_v37 }
 0x998   : > { %12574 = vmatpush3.bf16.msra.mxu0 %v14225_v16 }
 0x999   : > { %12575 = vmatprep.subr.bf16.mxu0 %v14226_v38 }
 0x99c   : > { %12576 = vmatpush3.bf16.msra.mxu0 %v14227_v62 }
 0x99d   : > { %12577 = vmatprep.subr.bf16.mxu0 %v14228_v3 }
 0x9a0   : > { %12578 = vmatpush3.bf16.msra.mxu0 %v14229_v57 }
 0x9a3   : > { %11361 = vmatmul.mubr.bf16.vlgmr.msra.gmra.mrb[52].mxu0 %v11228_v6 }
 0x9f0   : > { %v12425_v7 = vpop.f32.mrb[36].mxu1 }
 0x9f1   : > { %v12426_v35 = vpop.f32.mrb[37].mxu1 }
 0x9f2   : > { %v12427_v29 = vadd.f32 %v12426_v35, %v12425_v7  ;;  %v12428_v31 = vpop.f32.mrb[38].mxu1 }
 0x9f3   : > { %v12429_v0 = vpop.f32.mrb[39].mxu1 }
 0x9f6   : > { %v12403_v10 = vpop.f32.mrb[36].mxu0 }
 0x9f7   : > { %v12404_v59 = vpop.f32.mrb[37].mxu0 }
 0x9f8   : > { %v12405_v18 = vadd.f32 %v12404_v59, %v12403_v10  ;;  %v12406_v41 = vpop.f32.mrb[38].mxu0 }
 0x9f9   : > { %v12407_v39 = vpop.f32.mrb[39].mxu0 }
 0x9fa   : > { %v10079_v34 = vadd.f32 %v12427_v29, %v12405_v18 }
 0xa10   : > { %v12469_v27 = vpop.f32.mrb[40].mxu1 }
 0xa11   : > { %v12470_v44 = vpop.f32.mrb[41].mxu1 }
 0xa12   : > { %v12471_v4 = vadd.f32 %v12470_v44, %v12469_v27  ;;  %v12472_v13 = vpop.f32.mrb[42].mxu1 }
 0xa13   : > { %v12473_v32 = vpop.f32.mrb[43].mxu1 }
 0xa16   : > { %v12447_v51 = vpop.f32.mrb[40].mxu0 }
 0xa17   : > { %v12448_v53 = vpop.f32.mrb[41].mxu0 }
 0xa18   : > { %v12449_v55 = vadd.f32 %v12448_v53, %v12447_v51  ;;  %v12450_v52 = vpop.f32.mrb[42].mxu0 }
 0xa19   : > { %v12451_v30 = vpop.f32.mrb[43].mxu0 }
 0xa1a   : > { %v10262_v1 = vadd.f32 %v12449_v55, %v10079_v34 }
 0xa1c   : > { %v10445_v48 = vadd.f32 %v12471_v4, %v10262_v1 }
 0xa30   : > { %v12513_v24 = vpop.f32.mrb[44].mxu1 }
 0xa31   : > { %v12514_v49 = vpop.f32.mrb[45].mxu1 }
 0xa32   : > { %v12515_v19 = vadd.f32 %v12514_v49, %v12513_v24  ;;  %v12516_v47 = vpop.f32.mrb[46].mxu1 }
 0xa33   : > { %v12517_v14 = vpop.f32.mrb[47].mxu1 }
 0xa36   : > { %v12491_v17 = vpop.f32.mrb[44].mxu0 }
 0xa37   : > { %v12492_v25 = vpop.f32.mrb[45].mxu0 }
 0xa38   : > { %v12493_v22 = vadd.f32 %v12492_v25, %v12491_v17  ;;  %v12494_v40 = vpop.f32.mrb[46].mxu0 }
 0xa39   : > { %v12495_v60 = vpop.f32.mrb[47].mxu0 }
 0xa3a   : > { %v10638_v63 = vadd.f32 %v12493_v22, %v10445_v48 }
 0xa3c   : > { %v10817_v28 = vadd.f32 %v12515_v19, %v10638_v63 }
 0xa50   : > { %v12557_v61 = vpop.f32.mrb[48].mxu1 }
 0xa51   : > { %v12558_v5 = vpop.f32.mrb[49].mxu1 }
 0xa52   : > { %v12559_v33 = vadd.f32 %v12558_v5, %v12557_v61  ;;  %v12560_v56 = vpop.f32.mrb[50].mxu1 }
 0xa53   : > { %v12561_v36 = vpop.f32.mrb[51].mxu1 }
 0xa56   : > { %v12535_v11 = vpop.f32.mrb[48].mxu0 }
 0xa57   : > { %v12536_v2 = vpop.f32.mrb[49].mxu0 }
 0xa58   : > { %v12537_v9 = vadd.f32 %v12536_v2, %v12535_v11  ;;  %v12538_v26 = vpop.f32.mrb[50].mxu0 }
 0xa59   : > { %v12539_v45 = vpop.f32.mrb[51].mxu0 }
 0xa5a   : > { %v10994_v20 = vadd.f32 %v12537_v9, %v10817_v28 }
 0xa5c   : > { %v11189_v58 = vadd.f32 %v12559_v33, %v10994_v20 }
 0xa76   : > { %v12579_v21 = vpop.f32.mrb[52].mxu0 }
 0xa77   : > { %v12580_v46 = vpop.f32.mrb[53].mxu0 }
 0xa78   : > { %v12581_v50 = vadd.f32 %v12580_v46, %v12579_v21  ;;  %v12582_v43 = vpop.f32.mrb[54].mxu0 }
 0xa79   : > { %v12583_v15 = vpop.f32.mrb[55].mxu0 }
 0xa7a   : > { %v11368_v12 = vadd.f32 %v12581_v50, %v11189_v58 }
 0xa7c   : > { %v11376_v42 = vmul.f32 %v12128_v23, %v11368_v12 }
 0xa7e   : > { %v11384_v37 = vadd.f32 %v12129_v8, %v11376_v42 }
 0xa80   : > { %v11385_v16 = vmax.f32 %v11384_v37, 0.0 }
 0xa82   : > { %11387 = vst.msk [vmem:[%s438_s30] sm:$0xff] %vm11386_vm11, %v11385_v16 }
 0xa83 PF: > { %s23_s25 = sadd.s32 1, %s14243_s25  }
 0xa84   : > { %p20_p4 = scmp.ge.s32.totalorder %s23_s25, 4  }
 0xa86   :  { %22 = sbr.rel (!%p20_p4) target bundleno = 1 (0x1), region = 102 }

</bundles_post_ra>
